<compile_context>
chip_gen: v6e
topology: v6e:2x2x1
jax: 0.10.0
libtpu: 0.0.40
codegen_flags: <defaults>
</compile_context>

<pallas_src>
import jax
import jax.numpy as jnp
from jax import lax
from jax.experimental import pallas as pl
from jax.experimental.pallas import tpu as pltpu

EPS = 1e-8

# --- SkiM hyperparameters (module defaults at small sizes) ---
INPUT_SIZE = 16      # D
HIDDEN_SIZE = 32     # H
OUTPUT_SIZE = 16
NUM_BLOCKS = 2
SEGMENT_SIZE = 8     # K

B_CHUNK = 8                    # sublane-aligned batch rows per grid step

_H = HIDDEN_SIZE
_H2 = 2 * HIDDEN_SIZE          # 64: [h_fwd | h_bwd] concatenated hidden
_G = 4 * _H2                   # 256: gates, gate-major [i|f|g|o], dir-inner [fwd|bwd]


# ----------------------------------------------------------------------------
# In-kernel fused BiLSTM + Linear + gLN + residual block (operates on values)
# ----------------------------------------------------------------------------

def _bilstm_block(xs, h0, c0, wx, whh, b, wpf, wpb, bp, gamma, beta, fwd_mask):
    """One SegLSTM / MemLSTM block on register/VMEM-resident values.

    xs:      list of T arrays (N, Din), position (time) order.  N is a multiple
             of 8, so every axis-0 slice / concat below is sublane-tile aligned.
    h0/c0:   (N, 2H) initial states, lane layout [fwd H | bwd H].
    wx:      (Din, 8H) input->gates for both directions (gate-major, dir-inner).
    whh:     (2H, 8H) block-diagonal recurrent weights.
    b:       (1, 8H) combined LSTM biases (b_ih + b_hh, both directions).
    wpf/wpb: (2H, Din) direction-masked projection weights, bp: (1, Din).
    gamma/beta: (1, Din) gLN affine parameters.
    Returns (list of T (N, Din) outputs, hT (N, 2H), cT (N, 2H)).
    """
    T = len(xs)
    N = xs[0].shape[0]
    H2 = h0.shape[-1]
    dout = wpf.shape[-1]

    # Input-to-gate projection for every timestep and both directions in one
    # MXU matmul.  The fwd/bwd time selection and the bias add are hoisted out
    # of the serial recurrence into one wide, fully vectorized pass.
    xcat = jnp.concatenate(xs, axis=0)                                  # (T*N, Din)
    gx = jnp.dot(xcat, wx, preferred_element_type=jnp.float32)          # (T*N, 8H)
    gx_rev = jnp.concatenate([gx[(T - 1 - s) * N:(T - s) * N, :]
                              for s in range(T)], axis=0)               # time-reversed
    gsel = jnp.where(fwd_mask, gx, gx_rev) + b                          # (T*N, 8H)

    # Serial recurrence: only h @ Whh + gate nonlinearities on the critical path.
    # TODO(synk): keep Whh staged in MXU weight registers across the unrolled
    #             steps (pltpu.matmul_push_rhs / matmul_acc_lhs / matmul_pop)
    #             once the low-level API semantics are validated on all chips.
    h, c = h0, c0
    hs = [None] * T
    for s in range(T):            # static unroll: full scheduler visibility
        gates = gsel[s * N:(s + 1) * N, :] + jnp.dot(
            h, whh, preferred_element_type=jnp.float32)
        i = jax.nn.sigmoid(gates[:, 0 * H2:1 * H2])
        f = jax.nn.sigmoid(gates[:, 1 * H2:2 * H2])
        g = jnp.tanh(gates[:, 2 * H2:3 * H2])
        o = jax.nn.sigmoid(gates[:, 3 * H2:4 * H2])
        c = f * c + i * g
        h = o * jnp.tanh(c)
        hs[s] = h

    # BiLSTM output at position t: fwd half from step t, bwd half from step
    # T-1-t, realized via two direction-masked projection matmuls (the fwd/bwd
    # halves of h never need lane slicing or re-concatenation).
    yf = jnp.concatenate(hs, axis=0)                                    # (T*N, 2H)
    yb = jnp.concatenate(hs[::-1], axis=0)
    p = (jnp.dot(yf, wpf, preferred_element_type=jnp.float32)
         + jnp.dot(yb, wpb, preferred_element_type=jnp.float32) + bp)   # (T*N, Din)

    # gLN per batch row over (T, Din): one-pass mean / E[x^2] from lane
    # reductions of the flat projection output, then residual.
    inv = 1.0 / float(T * dout)
    row_sum = jnp.sum(p, axis=-1, keepdims=True)                        # (T*N, 1)
    row_sq = jnp.sum(p * p, axis=-1, keepdims=True)
    mean = sum(row_sum[t * N:(t + 1) * N] for t in range(T)) * inv      # (N, 1)
    ex2 = sum(row_sq[t * N:(t + 1) * N] for t in range(T)) * inv
    var = jnp.maximum(ex2 - mean * mean, 0.0)
    scale = gamma * lax.rsqrt(var + EPS)                                # (N, Din)
    shift = beta - scale * mean
    outs = [xs[t] + scale * p[t * N:(t + 1) * N, :] + shift for t in range(T)]
    return outs, h, c


# ----------------------------------------------------------------------------
# Whole-forward fused kernel (one grid step per 8-row batch chunk)
# ----------------------------------------------------------------------------

def _make_skim_kernel(S, num_blocks):
    K = SEGMENT_SIZE
    NP = S * B_CHUNK       # rows per grid step: segment-major, 8-row batch inner

    def kernel(*refs):
        x_ref = refs[0]
        idx = 1
        seg_p = []
        for _ in range(num_blocks):
            seg_p.append(refs[idx:idx + 8])
            idx += 8
        mem_p = []
        for _ in range(num_blocks - 1):
            mem_p.append((refs[idx:idx + 8], refs[idx + 8:idx + 16]))
            idx += 16
        a_ref, wc_ref, bc_ref = refs[idx:idx + 3]
        out_ref = refs[idx + 3]

        def load(prs):
            return tuple(r[...] for r in prs)

        # fwd/bwd lane selector over the gate-major, direction-inner 8H axis.
        lane = lax.broadcasted_iota(jnp.int32, (1, _G), 1)
        fwd_mask = (lane % _H2) < _H

        xs = [x_ref[k] for k in range(K)]                    # K x (NP, D)
        h = jnp.zeros((NP, _H2), jnp.float32)
        c = jnp.zeros((NP, _H2), jnp.float32)

        for i in range(num_blocks):
            xs, h, c = _bilstm_block(xs, h, c, *load(seg_p[i]), fwd_mask)
            if i < num_blocks - 1:
                # MemLSTM ('hc'): BiLSTM over the segment axis per batch row,
                # applied to the segment-final hidden / cell states.  Slices at
                # multiples of B_CHUNK=8 are sublane-tile aligned.
                h_seq = [h[s * B_CHUNK:(s + 1) * B_CHUNK, :] for s in range(S)]
                c_seq = [c[s * B_CHUNK:(s + 1) * B_CHUNK, :] for s in range(S)]
                zb = jnp.zeros((B_CHUNK, _H2), jnp.float32)
                h_seq, _, _ = _bilstm_block(h_seq, zb, zb,
                                            *load(mem_p[i][0]), fwd_mask)
                c_seq, _, _ = _bilstm_block(c_seq, zb, zb,
                                            *load(mem_p[i][1]), fwd_mask)
                h = jnp.concatenate(h_seq, axis=0)
                c = jnp.concatenate(c_seq, axis=0)

        # output_fc: PReLU + Conv1d(kernel=1).  The K timesteps are folded into
        # the lane axis ((NP, K*D) = (NP, 128)) and the conv weight is packed
        # block-diagonally, so a single matmul produces the lane-dense
        # (NP, K*O) = (NP, 128) output slab -> full-width unmasked stores.
        z = jnp.concatenate(xs, axis=1)                      # (NP, K*D)
        a = a_ref[0, 0]
        z = jnp.where(z >= 0.0, z, a * z)
        out_ref[...] = (jnp.dot(z, wc_ref[...], preferred_element_type=jnp.float32)
                        + bc_ref[...]).astype(out_ref.dtype)

    return kernel


def skim_forward(x, params):
    """SkiM forward: x (B, T, D) -> (B, T, OUTPUT_SIZE)."""
    B, T, D = x.shape
    K = SEGMENT_SIZE
    O = OUTPUT_SIZE

    # PyTorch _padfeature always pads (a full extra segment when T % K == 0).
    rest = K - T % K
    if rest > 0:
        x = jnp.pad(x, ((0, 0), (0, rest), (0, 0)))
    S = x.shape[1] // K

    # Pad batch to a multiple of the 8-row sublane tile; one grid step per
    # 8-row batch chunk (batch is the only fully independent axis).
    G = -(-B // B_CHUNK)
    Bp = G * B_CHUNK
    if Bp > B:
        x = jnp.pad(x, ((0, Bp - B), (0, 0), (0, 0)))
    NP = S * B_CHUNK

    # (Bp, S*K, D) -> (K, G*S*B_CHUNK, D): per grid chunk, rows are segment-major
    # with an 8-row batch inner dim, so every axis-0 slice / concat inside the
    # kernel lands on (8,128)-tile boundaries.
    x_tm = (x.reshape(G, B_CHUNK, S, K, D)
             .transpose(3, 0, 2, 1, 4)
             .reshape(K, G * NP, D))

    # Fold the K timesteps of the 1x1 conv into one block-diagonal weight so the
    # kernel's final matmul directly yields the lane-dense (NP, K*O) slab.
    conv_blk_w = jnp.kron(jnp.eye(K, dtype=jnp.float32), params['conv_w'])  # (K*D, K*O)
    conv_blk_b = jnp.tile(params['conv_b'], (1, K))                         # (1, K*O)

    weights = []
    for blk in params['seg']:
        weights.extend(blk)
    for mh, mc in params['mem']:
        weights.extend(mh)
        weights.extend(mc)
    weights.extend([params['prelu_a'], conv_blk_w, conv_blk_b])

    def const_spec(w):
        nd = w.ndim
        return pl.BlockSpec(w.shape, lambda g, _nd=nd: (0,) * _nd)  # VMEM-resident

    in_specs = [pl.BlockSpec((K, NP, D), lambda g: (0, g, 0))]
    in_specs += [const_spec(w) for w in weights]
    out_spec = pl.BlockSpec((NP, K * O), lambda g: (g, 0))

    # VMEM budget derived from actual buffer sizes (weights pinned + double-
    # buffered x/out blocks + headroom for in-kernel temporaries).
    param_bytes = sum(int(w.size) * 4 for w in weights)
    io_bytes = 2 * (K * NP * D * 4 + NP * K * O * 4)
    vmem_limit = min(48 << 20, param_bytes + io_bytes + (8 << 20))

    out_flat = pl.pallas_call(
        _make_skim_kernel(S, NUM_BLOCKS),
        out_shape=jax.ShapeDtypeStruct((G * NP, K * O), jnp.float32),
        grid_spec=pltpu.PrefetchScalarGridSpec(
            num_scalar_prefetch=0,
            grid=(G,),
            in_specs=in_specs,
            out_specs=out_spec),
        compiler_params=pltpu.CompilerParams(
            dimension_semantics=("parallel",),
            vmem_limit_bytes=vmem_limit),
    )(x_tm, *weights)

    out = (out_flat.reshape(G, S, B_CHUNK, K, O)
           .transpose(0, 2, 1, 3, 4)
           .reshape(Bp, S * K, O)[:B, :T, :])
    return out


# ----------------------------------------------------------------------------
# Deterministic synthetic parameters (PyTorch layout -> kernel layout)
# ----------------------------------------------------------------------------

def _uniform(key, shape, scale):
    return jax.random.uniform(key, shape, jnp.float32, minval=-scale, maxval=scale)


def _init_bilstm_block(key, in_size, hidden):
    """Raw PyTorch-layout params: BiLSTM(in,hidden) + Linear(2*hidden,in) + gLN."""
    ks = jax.random.split(key, 10)
    s = 1.0 / (hidden ** 0.5)
    raw = {}
    for d, off in (('f', 0), ('b', 4)):
        raw['w_ih_' + d] = _uniform(ks[off + 0], (4 * hidden, in_size), s)
        raw['w_hh_' + d] = _uniform(ks[off + 1], (4 * hidden, hidden), s)
        raw['b_ih_' + d] = _uniform(ks[off + 2], (4 * hidden,), s)
        raw['b_hh_' + d] = _uniform(ks[off + 3], (4 * hidden,), s)
    sp = 1.0 / ((2 * hidden) ** 0.5)
    raw['proj_w'] = _uniform(ks[8], (in_size, 2 * hidden), sp)   # (out, 2H)
    raw['proj_b'] = _uniform(ks[9], (in_size,), sp)
    raw['gamma'] = jnp.ones((in_size,), jnp.float32)             # gLN init
    raw['beta'] = jnp.zeros((in_size,), jnp.float32)
    return raw


def _pack_bilstm_block(raw, in_size, hidden):
    """PyTorch layout -> fused-kernel layout (gate-major, direction-inner)."""
    Hh = hidden

    def per_gate(w):                       # split the 4H axis: [i, f, g, o]
        return [w[k * Hh:(k + 1) * Hh] for k in range(4)]

    wf = per_gate(raw['w_ih_f']); wb = per_gate(raw['w_ih_b'])
    hf = per_gate(raw['w_hh_f']); hb = per_gate(raw['w_hh_b'])
    bf = per_gate((raw['b_ih_f'] + raw['b_hh_f']).reshape(4 * Hh, 1))
    bb = per_gate((raw['b_ih_b'] + raw['b_hh_b']).reshape(4 * Hh, 1))
    z = jnp.zeros((Hh, Hh), jnp.float32)

    wx_cols, whh_cols, b_cols = [], [], []
    for k in range(4):
        wx_cols.append(jnp.concatenate([wf[k].T, wb[k].T], axis=1))     # (in, 2H)
        top = jnp.concatenate([hf[k].T, z], axis=1)                     # (H, 2H)
        bot = jnp.concatenate([z, hb[k].T], axis=1)                     # (H, 2H)
        whh_cols.append(jnp.concatenate([top, bot], axis=0))            # (2H, 2H)
        b_cols.append(jnp.concatenate([bf[k], bb[k]], axis=0).T)        # (1, 2H)
    wx = jnp.concatenate(wx_cols, axis=1)      # (in, 8H)
    whh = jnp.concatenate(whh_cols, axis=1)    # (2H, 8H), block-diag per gate
    b = jnp.concatenate(b_cols, axis=1)        # (1, 8H)

    wp_t = raw['proj_w'].T                                              # (2H, in)
    zp = jnp.zeros((Hh, in_size), jnp.float32)
    wpf = jnp.concatenate([wp_t[:Hh], zp], axis=0)    # uses only fwd half of h
    wpb = jnp.concatenate([zp, wp_t[Hh:]], axis=0)    # uses only bwd half of h
    bp = raw['proj_b'].reshape(1, in_size)
    gamma = raw['gamma'].reshape(1, in_size)
    beta = raw['beta'].reshape(1, in_size)
    return (wx, whh, b, wpf, wpb, bp, gamma, beta)


def init_params(key):
    n_mem = NUM_BLOCKS - 1
    keys = jax.random.split(key, NUM_BLOCKS + 2 * n_mem + 1)
    seg = [_pack_bilstm_block(
               _init_bilstm_block(keys[i], INPUT_SIZE, HIDDEN_SIZE),
               INPUT_SIZE, HIDDEN_SIZE)
           for i in range(NUM_BLOCKS)]
    mem = []
    for i in range(n_mem):
        kh = keys[NUM_BLOCKS + 2 * i]
        kc = keys[NUM_BLOCKS + 2 * i + 1]
        mem.append((
            _pack_bilstm_block(_init_bilstm_block(kh, 2 * HIDDEN_SIZE, HIDDEN_SIZE),
                               2 * HIDDEN_SIZE, HIDDEN_SIZE),
            _pack_bilstm_block(_init_bilstm_block(kc, 2 * HIDDEN_SIZE, HIDDEN_SIZE),
                               2 * HIDDEN_SIZE, HIDDEN_SIZE),
        ))
    k1, k2 = jax.random.split(keys[-1])
    s = 1.0 / (INPUT_SIZE ** 0.5)
    return {
        'seg': seg,
        'mem': mem,
        'prelu_a': jnp.full((1, 1), 0.25, jnp.float32),             # PReLU default
        'conv_w': _uniform(k1, (OUTPUT_SIZE, INPUT_SIZE), s).T,     # (D, O)
        'conv_b': _uniform(k2, (1, OUTPUT_SIZE), s),
    }


if __name__ == "__main__":
    key = jax.random.PRNGKey(0)
    kx, kp = jax.random.split(key)
    B, T = 2, 12
    x = jax.random.normal(kx, (B, T, INPUT_SIZE), jnp.float32)
    params = init_params(kp)

    out = jax.jit(skim_forward)(x, params)
    out = jax.block_until_ready(out)
    assert out.shape == (B, T, OUTPUT_SIZE), out.shape
    assert bool(jnp.all(jnp.isfinite(out)))
    print("KERNEL_OK")
</pallas_src>

<mosaic_0001>
module attributes {stable_mosaic.version = 11 : i64} {
  func.func @kernel(%arg0: i32, %arg1: memref<8x16x16xf32, #tpu.memory_space<vmem>>, %arg2: memref<16x256xf32, #tpu.memory_space<vmem>>, %arg3: memref<64x256xf32, #tpu.memory_space<vmem>>, %arg4: memref<1x256xf32, #tpu.memory_space<vmem>>, %arg5: memref<64x16xf32, #tpu.memory_space<vmem>>, %arg6: memref<64x16xf32, #tpu.memory_space<vmem>>, %arg7: memref<1x16xf32, #tpu.memory_space<vmem>>, %arg8: memref<1x16xf32, #tpu.memory_space<vmem>>, %arg9: memref<1x16xf32, #tpu.memory_space<vmem>>, %arg10: memref<16x256xf32, #tpu.memory_space<vmem>>, %arg11: memref<64x256xf32, #tpu.memory_space<vmem>>, %arg12: memref<1x256xf32, #tpu.memory_space<vmem>>, %arg13: memref<64x16xf32, #tpu.memory_space<vmem>>, %arg14: memref<64x16xf32, #tpu.memory_space<vmem>>, %arg15: memref<1x16xf32, #tpu.memory_space<vmem>>, %arg16: memref<1x16xf32, #tpu.memory_space<vmem>>, %arg17: memref<1x16xf32, #tpu.memory_space<vmem>>, %arg18: memref<64x256xf32, #tpu.memory_space<vmem>>, %arg19: memref<64x256xf32, #tpu.memory_space<vmem>>, %arg20: memref<1x256xf32, #tpu.memory_space<vmem>>, %arg21: memref<64x64xf32, #tpu.memory_space<vmem>>, %arg22: memref<64x64xf32, #tpu.memory_space<vmem>>, %arg23: memref<1x64xf32, #tpu.memory_space<vmem>>, %arg24: memref<1x64xf32, #tpu.memory_space<vmem>>, %arg25: memref<1x64xf32, #tpu.memory_space<vmem>>, %arg26: memref<64x256xf32, #tpu.memory_space<vmem>>, %arg27: memref<64x256xf32, #tpu.memory_space<vmem>>, %arg28: memref<1x256xf32, #tpu.memory_space<vmem>>, %arg29: memref<64x64xf32, #tpu.memory_space<vmem>>, %arg30: memref<64x64xf32, #tpu.memory_space<vmem>>, %arg31: memref<1x64xf32, #tpu.memory_space<vmem>>, %arg32: memref<1x64xf32, #tpu.memory_space<vmem>>, %arg33: memref<1x64xf32, #tpu.memory_space<vmem>>, %arg34: memref<1x1xf32, #tpu.memory_space<vmem>>, %arg35: memref<128x128xf32, #tpu.memory_space<vmem>>, %arg36: memref<1x128xf32, #tpu.memory_space<vmem>>, %arg37: memref<16x128xf32, #tpu.memory_space<vmem>>) attributes {dimension_semantics = [#tpu.dimension_semantics<parallel>], iteration_bounds = array<i64: 1>, scalar_prefetch = 0 : i64, scratch_operands = 0 : i64, tpu.core_type = #tpu.core_type<tc>, window_params = [{transform_indices = @transform_0, window_bounds = array<i64: 8, 16, 16>}, {pipeline_mode = #tpu.pipeline_mode<synchronous>, transform_indices = @transform_1, window_bounds = array<i64: 16, 256>}, {pipeline_mode = #tpu.pipeline_mode<synchronous>, transform_indices = @transform_2, window_bounds = array<i64: 64, 256>}, {pipeline_mode = #tpu.pipeline_mode<synchronous>, transform_indices = @transform_3, window_bounds = array<i64: 1, 256>}, {pipeline_mode = #tpu.pipeline_mode<synchronous>, transform_indices = @transform_4, window_bounds = array<i64: 64, 16>}, {pipeline_mode = #tpu.pipeline_mode<synchronous>, transform_indices = @transform_5, window_bounds = array<i64: 64, 16>}, {pipeline_mode = #tpu.pipeline_mode<synchronous>, transform_indices = @transform_6, window_bounds = array<i64: 1, 16>}, {pipeline_mode = #tpu.pipeline_mode<synchronous>, transform_indices = @transform_7, window_bounds = array<i64: 1, 16>}, {pipeline_mode = #tpu.pipeline_mode<synchronous>, transform_indices = @transform_8, window_bounds = array<i64: 1, 16>}, {pipeline_mode = #tpu.pipeline_mode<synchronous>, transform_indices = @transform_9, window_bounds = array<i64: 16, 256>}, {pipeline_mode = #tpu.pipeline_mode<synchronous>, transform_indices = @transform_10, window_bounds = array<i64: 64, 256>}, {pipeline_mode = #tpu.pipeline_mode<synchronous>, transform_indices = @transform_11, window_bounds = array<i64: 1, 256>}, {pipeline_mode = #tpu.pipeline_mode<synchronous>, transform_indices = @transform_12, window_bounds = array<i64: 64, 16>}, {pipeline_mode = #tpu.pipeline_mode<synchronous>, transform_indices = @transform_13, window_bounds = array<i64: 64, 16>}, {pipeline_mode = #tpu.pipeline_mode<synchronous>, transform_indices = @transform_14, window_bounds = array<i64: 1, 16>}, {pipeline_mode = #tpu.pipeline_mode<synchronous>, transform_indices = @transform_15, window_bounds = array<i64: 1, 16>}, {pipeline_mode = #tpu.pipeline_mode<synchronous>, transform_indices = @transform_16, window_bounds = array<i64: 1, 16>}, {pipeline_mode = #tpu.pipeline_mode<synchronous>, transform_indices = @transform_17, window_bounds = array<i64: 64, 256>}, {pipeline_mode = #tpu.pipeline_mode<synchronous>, transform_indices = @transform_18, window_bounds = array<i64: 64, 256>}, {pipeline_mode = #tpu.pipeline_mode<synchronous>, transform_indices = @transform_19, window_bounds = array<i64: 1, 256>}, {pipeline_mode = #tpu.pipeline_mode<synchronous>, transform_indices = @transform_20, window_bounds = array<i64: 64, 64>}, {pipeline_mode = #tpu.pipeline_mode<synchronous>, transform_indices = @transform_21, window_bounds = array<i64: 64, 64>}, {pipeline_mode = #tpu.pipeline_mode<synchronous>, transform_indices = @transform_22, window_bounds = array<i64: 1, 64>}, {pipeline_mode = #tpu.pipeline_mode<synchronous>, transform_indices = @transform_23, window_bounds = array<i64: 1, 64>}, {pipeline_mode = #tpu.pipeline_mode<synchronous>, transform_indices = @transform_24, window_bounds = array<i64: 1, 64>}, {pipeline_mode = #tpu.pipeline_mode<synchronous>, transform_indices = @transform_25, window_bounds = array<i64: 64, 256>}, {pipeline_mode = #tpu.pipeline_mode<synchronous>, transform_indices = @transform_26, window_bounds = array<i64: 64, 256>}, {pipeline_mode = #tpu.pipeline_mode<synchronous>, transform_indices = @transform_27, window_bounds = array<i64: 1, 256>}, {pipeline_mode = #tpu.pipeline_mode<synchronous>, transform_indices = @transform_28, window_bounds = array<i64: 64, 64>}, {pipeline_mode = #tpu.pipeline_mode<synchronous>, transform_indices = @transform_29, window_bounds = array<i64: 64, 64>}, {pipeline_mode = #tpu.pipeline_mode<synchronous>, transform_indices = @transform_30, window_bounds = array<i64: 1, 64>}, {pipeline_mode = #tpu.pipeline_mode<synchronous>, transform_indices = @transform_31, window_bounds = array<i64: 1, 64>}, {pipeline_mode = #tpu.pipeline_mode<synchronous>, transform_indices = @transform_32, window_bounds = array<i64: 1, 64>}, {pipeline_mode = #tpu.pipeline_mode<synchronous>, transform_indices = @transform_33, window_bounds = array<i64: 1, 1>}, {pipeline_mode = #tpu.pipeline_mode<synchronous>, transform_indices = @transform_34, window_bounds = array<i64: 128, 128>}, {pipeline_mode = #tpu.pipeline_mode<synchronous>, transform_indices = @transform_35, window_bounds = array<i64: 1, 128>}, {transform_indices = @transform_36, window_bounds = array<i64: 16, 128>}]} {
    %0 = tpu.iota {dimensions = array<i32: 1>} : vector<1x256xi32>
    %c64_i32 = arith.constant 64 : i32
    %c0_i32 = arith.constant 0 : i32
    %1 = arith.cmpi eq, %c64_i32, %c0_i32 : i32
    %c1_i32 = arith.constant 1 : i32
    %2 = arith.select %1, %c1_i32, %c64_i32 : i32
    %3 = vector.broadcast %2 : i32 to vector<1x256xi32>
    %4 = arith.remsi %0, %3 : vector<1x256xi32>
    %c0_i32_0 = arith.constant 0 : i32
    %5 = vector.broadcast %c0_i32_0 : i32 to vector<1x256xi32>
    %6 = arith.cmpi ne, %4, %5 : vector<1x256xi32>
    %c0_i32_1 = arith.constant 0 : i32
    %7 = vector.broadcast %c0_i32_1 : i32 to vector<1x256xi32>
    %8 = arith.cmpi slt, %4, %7 : vector<1x256xi32>
    %c0_i32_2 = arith.constant 0 : i32
    %9 = arith.cmpi slt, %2, %c0_i32_2 : i32
    %10 = vector.broadcast %9 : i1 to vector<1x256xi1>
    %11 = vector.broadcast %10 : vector<1x256xi1> to vector<1x256xi1>
    %12 = arith.xori %8, %11 : vector<1x256xi1>
    %13 = arith.andi %12, %6 : vector<1x256xi1>
    %14 = vector.broadcast %2 : i32 to vector<1x256xi32>
    %15 = arith.addi %4, %14 : vector<1x256xi32>
    %16 = arith.select %13, %15, %4 : vector<1x256xi1>, vector<1x256xi32>
    %c32_i32 = arith.constant 32 : i32
    %17 = vector.broadcast %c32_i32 : i32 to vector<1x256xi32>
    %18 = arith.cmpi slt, %16, %17 : vector<1x256xi32>
    %c0 = arith.constant 0 : index
    %c0_3 = arith.constant 0 : index
    %c0_4 = arith.constant 0 : index
    %19 = vector.load %arg1[%c0, %c0_3, %c0_4] : memref<8x16x16xf32, #tpu.memory_space<vmem>>, vector<1x16x16xf32>
    %20 = vector.shape_cast %19 : vector<1x16x16xf32> to vector<16x16xf32>
    %c1 = arith.constant 1 : index
    %c0_5 = arith.constant 0 : index
    %c0_6 = arith.constant 0 : index
    %21 = vector.load %arg1[%c1, %c0_5, %c0_6] : memref<8x16x16xf32, #tpu.memory_space<vmem>>, vector<1x16x16xf32>
    %22 = vector.shape_cast %21 : vector<1x16x16xf32> to vector<16x16xf32>
    %c2 = arith.constant 2 : index
    %c0_7 = arith.constant 0 : index
    %c0_8 = arith.constant 0 : index
    %23 = vector.load %arg1[%c2, %c0_7, %c0_8] : memref<8x16x16xf32, #tpu.memory_space<vmem>>, vector<1x16x16xf32>
    %24 = vector.shape_cast %23 : vector<1x16x16xf32> to vector<16x16xf32>
    %c3 = arith.constant 3 : index
    %c0_9 = arith.constant 0 : index
    %c0_10 = arith.constant 0 : index
    %25 = vector.load %arg1[%c3, %c0_9, %c0_10] : memref<8x16x16xf32, #tpu.memory_space<vmem>>, vector<1x16x16xf32>
    %26 = vector.shape_cast %25 : vector<1x16x16xf32> to vector<16x16xf32>
    %c4 = arith.constant 4 : index
    %c0_11 = arith.constant 0 : index
    %c0_12 = arith.constant 0 : index
    %27 = vector.load %arg1[%c4, %c0_11, %c0_12] : memref<8x16x16xf32, #tpu.memory_space<vmem>>, vector<1x16x16xf32>
    %28 = vector.shape_cast %27 : vector<1x16x16xf32> to vector<16x16xf32>
    %c5 = arith.constant 5 : index
    %c0_13 = arith.constant 0 : index
    %c0_14 = arith.constant 0 : index
    %29 = vector.load %arg1[%c5, %c0_13, %c0_14] : memref<8x16x16xf32, #tpu.memory_space<vmem>>, vector<1x16x16xf32>
    %30 = vector.shape_cast %29 : vector<1x16x16xf32> to vector<16x16xf32>
    %c6 = arith.constant 6 : index
    %c0_15 = arith.constant 0 : index
    %c0_16 = arith.constant 0 : index
    %31 = vector.load %arg1[%c6, %c0_15, %c0_16] : memref<8x16x16xf32, #tpu.memory_space<vmem>>, vector<1x16x16xf32>
    %32 = vector.shape_cast %31 : vector<1x16x16xf32> to vector<16x16xf32>
    %c7 = arith.constant 7 : index
    %c0_17 = arith.constant 0 : index
    %c0_18 = arith.constant 0 : index
    %33 = vector.load %arg1[%c7, %c0_17, %c0_18] : memref<8x16x16xf32, #tpu.memory_space<vmem>>, vector<1x16x16xf32>
    %34 = vector.shape_cast %33 : vector<1x16x16xf32> to vector<16x16xf32>
    %cst = arith.constant 0.000000e+00 : f32
    %35 = vector.broadcast %cst : f32 to vector<16x64xf32>
    %cst_19 = arith.constant 0.000000e+00 : f32
    %36 = vector.broadcast %cst_19 : f32 to vector<16x64xf32>
    %c0_20 = arith.constant 0 : index
    %c0_21 = arith.constant 0 : index
    %37 = vector.load %arg2[%c0_20, %c0_21] : memref<16x256xf32, #tpu.memory_space<vmem>>, vector<16x256xf32>
    %c0_22 = arith.constant 0 : index
    %c0_23 = arith.constant 0 : index
    %38 = vector.load %arg3[%c0_22, %c0_23] : memref<64x256xf32, #tpu.memory_space<vmem>>, vector<64x256xf32>
    %c0_24 = arith.constant 0 : index
    %c0_25 = arith.constant 0 : index
    %39 = vector.load %arg4[%c0_24, %c0_25] : memref<1x256xf32, #tpu.memory_space<vmem>>, vector<1x256xf32>
    %c0_26 = arith.constant 0 : index
    %c0_27 = arith.constant 0 : index
    %40 = vector.load %arg5[%c0_26, %c0_27] : memref<64x16xf32, #tpu.memory_space<vmem>>, vector<64x16xf32>
    %c0_28 = arith.constant 0 : index
    %c0_29 = arith.constant 0 : index
    %41 = vector.load %arg6[%c0_28, %c0_29] : memref<64x16xf32, #tpu.memory_space<vmem>>, vector<64x16xf32>
    %c0_30 = arith.constant 0 : index
    %c0_31 = arith.constant 0 : index
    %42 = vector.load %arg7[%c0_30, %c0_31] : memref<1x16xf32, #tpu.memory_space<vmem>>, vector<1x16xf32>
    %c0_32 = arith.constant 0 : index
    %c0_33 = arith.constant 0 : index
    %43 = vector.load %arg8[%c0_32, %c0_33] : memref<1x16xf32, #tpu.memory_space<vmem>>, vector<1x16xf32>
    %c0_34 = arith.constant 0 : index
    %c0_35 = arith.constant 0 : index
    %44 = vector.load %arg9[%c0_34, %c0_35] : memref<1x16xf32, #tpu.memory_space<vmem>>, vector<1x16xf32>
    %45 = tpu.concatenate %20, %22, %24, %26, %28, %30, %32, %34 in 0 : vector<16x16xf32>, vector<16x16xf32>, vector<16x16xf32>, vector<16x16xf32>, vector<16x16xf32>, vector<16x16xf32>, vector<16x16xf32>, vector<16x16xf32> -> vector<128x16xf32>
    %cst_36 = arith.constant dense<0.000000e+00> : vector<128x256xf32>
    %46 = tpu.matmul %45, %37, %cst_36 {dimension_numbers = #tpu.dot_dimension_numbers<[1], [0], [0], [1], [0, 0, 1, 1], [], []>} : vector<128x16xf32>, vector<16x256xf32>, vector<128x256xf32> -> vector<128x256xf32>
    %47 = vector.extract_strided_slice %46 {offsets = [112, 0], sizes = [16, 256], strides = [1, 1]} : vector<128x256xf32> to vector<16x256xf32>
    %48 = vector.extract_strided_slice %46 {offsets = [96, 0], sizes = [16, 256], strides = [1, 1]} : vector<128x256xf32> to vector<16x256xf32>
    %49 = vector.extract_strided_slice %46 {offsets = [80, 0], sizes = [16, 256], strides = [1, 1]} : vector<128x256xf32> to vector<16x256xf32>
    %50 = vector.extract_strided_slice %46 {offsets = [64, 0], sizes = [16, 256], strides = [1, 1]} : vector<128x256xf32> to vector<16x256xf32>
    %51 = vector.extract_strided_slice %46 {offsets = [48, 0], sizes = [16, 256], strides = [1, 1]} : vector<128x256xf32> to vector<16x256xf32>
    %52 = vector.extract_strided_slice %46 {offsets = [32, 0], sizes = [16, 256], strides = [1, 1]} : vector<128x256xf32> to vector<16x256xf32>
    %53 = vector.extract_strided_slice %46 {offsets = [16, 0], sizes = [16, 256], strides = [1, 1]} : vector<128x256xf32> to vector<16x256xf32>
    %54 = vector.extract_strided_slice %46 {offsets = [0, 0], sizes = [16, 256], strides = [1, 1]} : vector<128x256xf32> to vector<16x256xf32>
    %55 = tpu.concatenate %47, %48, %49, %50, %51, %52, %53, %54 in 0 : vector<16x256xf32>, vector<16x256xf32>, vector<16x256xf32>, vector<16x256xf32>, vector<16x256xf32>, vector<16x256xf32>, vector<16x256xf32>, vector<16x256xf32> -> vector<128x256xf32>
    %56 = vector.shape_cast %18 : vector<1x256xi1> to vector<1x256xi1>
    %57 = vector.broadcast %56 : vector<1x256xi1> to vector<128x256xi1>
    %58 = arith.select %57, %46, %55 : vector<128x256xi1>, vector<128x256xf32>
    %59 = vector.broadcast %39 : vector<1x256xf32> to vector<128x256xf32>
    %60 = arith.addf %58, %59 : vector<128x256xf32>
    %61 = vector.extract_strided_slice %60 {offsets = [0, 0], sizes = [16, 256], strides = [1, 1]} : vector<128x256xf32> to vector<16x256xf32>
    %cst_37 = arith.constant dense<0.000000e+00> : vector<16x256xf32>
    %62 = tpu.matmul %35, %38, %cst_37 {dimension_numbers = #tpu.dot_dimension_numbers<[1], [0], [0], [1], [0, 0, 1, 1], [], []>} : vector<16x64xf32>, vector<64x256xf32>, vector<16x256xf32> -> vector<16x256xf32>
    %63 = arith.addf %61, %62 : vector<16x256xf32>
    %64 = vector.extract_strided_slice %63 {offsets = [0, 0], sizes = [16, 64], strides = [1, 1]} : vector<16x256xf32> to vector<16x64xf32>
    %65 = arith.negf %64 : vector<16x64xf32>
    %66 = math.exp %65 : vector<16x64xf32>
    %cst_38 = arith.constant 1.000000e+00 : f32
    %67 = vector.broadcast %cst_38 : f32 to vector<16x64xf32>
    %68 = arith.addf %67, %66 : vector<16x64xf32>
    %69 = arith.divf %67, %68 : vector<16x64xf32>
    %70 = vector.extract_strided_slice %63 {offsets = [0, 64], sizes = [16, 64], strides = [1, 1]} : vector<16x256xf32> to vector<16x64xf32>
    %71 = arith.negf %70 : vector<16x64xf32>
    %72 = math.exp %71 : vector<16x64xf32>
    %cst_39 = arith.constant 1.000000e+00 : f32
    %73 = vector.broadcast %cst_39 : f32 to vector<16x64xf32>
    %74 = arith.addf %73, %72 : vector<16x64xf32>
    %75 = arith.divf %73, %74 : vector<16x64xf32>
    %76 = vector.extract_strided_slice %63 {offsets = [0, 128], sizes = [16, 64], strides = [1, 1]} : vector<16x256xf32> to vector<16x64xf32>
    %77 = math.tanh %76 : vector<16x64xf32>
    %78 = vector.extract_strided_slice %63 {offsets = [0, 192], sizes = [16, 64], strides = [1, 1]} : vector<16x256xf32> to vector<16x64xf32>
    %79 = arith.negf %78 : vector<16x64xf32>
    %80 = math.exp %79 : vector<16x64xf32>
    %cst_40 = arith.constant 1.000000e+00 : f32
    %81 = vector.broadcast %cst_40 : f32 to vector<16x64xf32>
    %82 = arith.addf %81, %80 : vector<16x64xf32>
    %83 = arith.divf %81, %82 : vector<16x64xf32>
    %84 = arith.mulf %75, %36 : vector<16x64xf32>
    %85 = arith.mulf %69, %77 : vector<16x64xf32>
    %86 = arith.addf %84, %85 : vector<16x64xf32>
    %87 = math.tanh %86 : vector<16x64xf32>
    %88 = arith.mulf %83, %87 : vector<16x64xf32>
    %89 = vector.extract_strided_slice %60 {offsets = [16, 0], sizes = [16, 256], strides = [1, 1]} : vector<128x256xf32> to vector<16x256xf32>
    %cst_41 = arith.constant dense<0.000000e+00> : vector<16x256xf32>
    %90 = tpu.matmul %88, %38, %cst_41 {dimension_numbers = #tpu.dot_dimension_numbers<[1], [0], [0], [1], [0, 0, 1, 1], [], []>} : vector<16x64xf32>, vector<64x256xf32>, vector<16x256xf32> -> vector<16x256xf32>
    %91 = arith.addf %89, %90 : vector<16x256xf32>
    %92 = vector.extract_strided_slice %91 {offsets = [0, 0], sizes = [16, 64], strides = [1, 1]} : vector<16x256xf32> to vector<16x64xf32>
    %93 = arith.negf %92 : vector<16x64xf32>
    %94 = math.exp %93 : vector<16x64xf32>
    %cst_42 = arith.constant 1.000000e+00 : f32
    %95 = vector.broadcast %cst_42 : f32 to vector<16x64xf32>
    %96 = arith.addf %95, %94 : vector<16x64xf32>
    %97 = arith.divf %95, %96 : vector<16x64xf32>
    %98 = vector.extract_strided_slice %91 {offsets = [0, 64], sizes = [16, 64], strides = [1, 1]} : vector<16x256xf32> to vector<16x64xf32>
    %99 = arith.negf %98 : vector<16x64xf32>
    %100 = math.exp %99 : vector<16x64xf32>
    %cst_43 = arith.constant 1.000000e+00 : f32
    %101 = vector.broadcast %cst_43 : f32 to vector<16x64xf32>
    %102 = arith.addf %101, %100 : vector<16x64xf32>
    %103 = arith.divf %101, %102 : vector<16x64xf32>
    %104 = vector.extract_strided_slice %91 {offsets = [0, 128], sizes = [16, 64], strides = [1, 1]} : vector<16x256xf32> to vector<16x64xf32>
    %105 = math.tanh %104 : vector<16x64xf32>
    %106 = vector.extract_strided_slice %91 {offsets = [0, 192], sizes = [16, 64], strides = [1, 1]} : vector<16x256xf32> to vector<16x64xf32>
    %107 = arith.negf %106 : vector<16x64xf32>
    %108 = math.exp %107 : vector<16x64xf32>
    %cst_44 = arith.constant 1.000000e+00 : f32
    %109 = vector.broadcast %cst_44 : f32 to vector<16x64xf32>
    %110 = arith.addf %109, %108 : vector<16x64xf32>
    %111 = arith.divf %109, %110 : vector<16x64xf32>
    %112 = arith.mulf %103, %86 : vector<16x64xf32>
    %113 = arith.mulf %97, %105 : vector<16x64xf32>
    %114 = arith.addf %112, %113 : vector<16x64xf32>
    %115 = math.tanh %114 : vector<16x64xf32>
    %116 = arith.mulf %111, %115 : vector<16x64xf32>
    %117 = vector.extract_strided_slice %60 {offsets = [32, 0], sizes = [16, 256], strides = [1, 1]} : vector<128x256xf32> to vector<16x256xf32>
    %cst_45 = arith.constant dense<0.000000e+00> : vector<16x256xf32>
    %118 = tpu.matmul %116, %38, %cst_45 {dimension_numbers = #tpu.dot_dimension_numbers<[1], [0], [0], [1], [0, 0, 1, 1], [], []>} : vector<16x64xf32>, vector<64x256xf32>, vector<16x256xf32> -> vector<16x256xf32>
    %119 = arith.addf %117, %118 : vector<16x256xf32>
    %120 = vector.extract_strided_slice %119 {offsets = [0, 0], sizes = [16, 64], strides = [1, 1]} : vector<16x256xf32> to vector<16x64xf32>
    %121 = arith.negf %120 : vector<16x64xf32>
    %122 = math.exp %121 : vector<16x64xf32>
    %cst_46 = arith.constant 1.000000e+00 : f32
    %123 = vector.broadcast %cst_46 : f32 to vector<16x64xf32>
    %124 = arith.addf %123, %122 : vector<16x64xf32>
    %125 = arith.divf %123, %124 : vector<16x64xf32>
    %126 = vector.extract_strided_slice %119 {offsets = [0, 64], sizes = [16, 64], strides = [1, 1]} : vector<16x256xf32> to vector<16x64xf32>
    %127 = arith.negf %126 : vector<16x64xf32>
    %128 = math.exp %127 : vector<16x64xf32>
    %cst_47 = arith.constant 1.000000e+00 : f32
    %129 = vector.broadcast %cst_47 : f32 to vector<16x64xf32>
    %130 = arith.addf %129, %128 : vector<16x64xf32>
    %131 = arith.divf %129, %130 : vector<16x64xf32>
    %132 = vector.extract_strided_slice %119 {offsets = [0, 128], sizes = [16, 64], strides = [1, 1]} : vector<16x256xf32> to vector<16x64xf32>
    %133 = math.tanh %132 : vector<16x64xf32>
    %134 = vector.extract_strided_slice %119 {offsets = [0, 192], sizes = [16, 64], strides = [1, 1]} : vector<16x256xf32> to vector<16x64xf32>
    %135 = arith.negf %134 : vector<16x64xf32>
    %136 = math.exp %135 : vector<16x64xf32>
    %cst_48 = arith.constant 1.000000e+00 : f32
    %137 = vector.broadcast %cst_48 : f32 to vector<16x64xf32>
    %138 = arith.addf %137, %136 : vector<16x64xf32>
    %139 = arith.divf %137, %138 : vector<16x64xf32>
    %140 = arith.mulf %131, %114 : vector<16x64xf32>
    %141 = arith.mulf %125, %133 : vector<16x64xf32>
    %142 = arith.addf %140, %141 : vector<16x64xf32>
    %143 = math.tanh %142 : vector<16x64xf32>
    %144 = arith.mulf %139, %143 : vector<16x64xf32>
    %145 = vector.extract_strided_slice %60 {offsets = [48, 0], sizes = [16, 256], strides = [1, 1]} : vector<128x256xf32> to vector<16x256xf32>
    %cst_49 = arith.constant dense<0.000000e+00> : vector<16x256xf32>
    %146 = tpu.matmul %144, %38, %cst_49 {dimension_numbers = #tpu.dot_dimension_numbers<[1], [0], [0], [1], [0, 0, 1, 1], [], []>} : vector<16x64xf32>, vector<64x256xf32>, vector<16x256xf32> -> vector<16x256xf32>
    %147 = arith.addf %145, %146 : vector<16x256xf32>
    %148 = vector.extract_strided_slice %147 {offsets = [0, 0], sizes = [16, 64], strides = [1, 1]} : vector<16x256xf32> to vector<16x64xf32>
    %149 = arith.negf %148 : vector<16x64xf32>
    %150 = math.exp %149 : vector<16x64xf32>
    %cst_50 = arith.constant 1.000000e+00 : f32
    %151 = vector.broadcast %cst_50 : f32 to vector<16x64xf32>
    %152 = arith.addf %151, %150 : vector<16x64xf32>
    %153 = arith.divf %151, %152 : vector<16x64xf32>
    %154 = vector.extract_strided_slice %147 {offsets = [0, 64], sizes = [16, 64], strides = [1, 1]} : vector<16x256xf32> to vector<16x64xf32>
    %155 = arith.negf %154 : vector<16x64xf32>
    %156 = math.exp %155 : vector<16x64xf32>
    %cst_51 = arith.constant 1.000000e+00 : f32
    %157 = vector.broadcast %cst_51 : f32 to vector<16x64xf32>
    %158 = arith.addf %157, %156 : vector<16x64xf32>
    %159 = arith.divf %157, %158 : vector<16x64xf32>
    %160 = vector.extract_strided_slice %147 {offsets = [0, 128], sizes = [16, 64], strides = [1, 1]} : vector<16x256xf32> to vector<16x64xf32>
    %161 = math.tanh %160 : vector<16x64xf32>
    %162 = vector.extract_strided_slice %147 {offsets = [0, 192], sizes = [16, 64], strides = [1, 1]} : vector<16x256xf32> to vector<16x64xf32>
    %163 = arith.negf %162 : vector<16x64xf32>
    %164 = math.exp %163 : vector<16x64xf32>
    %cst_52 = arith.constant 1.000000e+00 : f32
    %165 = vector.broadcast %cst_52 : f32 to vector<16x64xf32>
    %166 = arith.addf %165, %164 : vector<16x64xf32>
    %167 = arith.divf %165, %166 : vector<16x64xf32>
    %168 = arith.mulf %159, %142 : vector<16x64xf32>
    %169 = arith.mulf %153, %161 : vector<16x64xf32>
    %170 = arith.addf %168, %169 : vector<16x64xf32>
    %171 = math.tanh %170 : vector<16x64xf32>
    %172 = arith.mulf %167, %171 : vector<16x64xf32>
    %173 = vector.extract_strided_slice %60 {offsets = [64, 0], sizes = [16, 256], strides = [1, 1]} : vector<128x256xf32> to vector<16x256xf32>
    %cst_53 = arith.constant dense<0.000000e+00> : vector<16x256xf32>
    %174 = tpu.matmul %172, %38, %cst_53 {dimension_numbers = #tpu.dot_dimension_numbers<[1], [0], [0], [1], [0, 0, 1, 1], [], []>} : vector<16x64xf32>, vector<64x256xf32>, vector<16x256xf32> -> vector<16x256xf32>
    %175 = arith.addf %173, %174 : vector<16x256xf32>
    %176 = vector.extract_strided_slice %175 {offsets = [0, 0], sizes = [16, 64], strides = [1, 1]} : vector<16x256xf32> to vector<16x64xf32>
    %177 = arith.negf %176 : vector<16x64xf32>
    %178 = math.exp %177 : vector<16x64xf32>
    %cst_54 = arith.constant 1.000000e+00 : f32
    %179 = vector.broadcast %cst_54 : f32 to vector<16x64xf32>
    %180 = arith.addf %179, %178 : vector<16x64xf32>
    %181 = arith.divf %179, %180 : vector<16x64xf32>
    %182 = vector.extract_strided_slice %175 {offsets = [0, 64], sizes = [16, 64], strides = [1, 1]} : vector<16x256xf32> to vector<16x64xf32>
    %183 = arith.negf %182 : vector<16x64xf32>
    %184 = math.exp %183 : vector<16x64xf32>
    %cst_55 = arith.constant 1.000000e+00 : f32
    %185 = vector.broadcast %cst_55 : f32 to vector<16x64xf32>
    %186 = arith.addf %185, %184 : vector<16x64xf32>
    %187 = arith.divf %185, %186 : vector<16x64xf32>
    %188 = vector.extract_strided_slice %175 {offsets = [0, 128], sizes = [16, 64], strides = [1, 1]} : vector<16x256xf32> to vector<16x64xf32>
    %189 = math.tanh %188 : vector<16x64xf32>
    %190 = vector.extract_strided_slice %175 {offsets = [0, 192], sizes = [16, 64], strides = [1, 1]} : vector<16x256xf32> to vector<16x64xf32>
    %191 = arith.negf %190 : vector<16x64xf32>
    %192 = math.exp %191 : vector<16x64xf32>
    %cst_56 = arith.constant 1.000000e+00 : f32
    %193 = vector.broadcast %cst_56 : f32 to vector<16x64xf32>
    %194 = arith.addf %193, %192 : vector<16x64xf32>
    %195 = arith.divf %193, %194 : vector<16x64xf32>
    %196 = arith.mulf %187, %170 : vector<16x64xf32>
    %197 = arith.mulf %181, %189 : vector<16x64xf32>
    %198 = arith.addf %196, %197 : vector<16x64xf32>
    %199 = math.tanh %198 : vector<16x64xf32>
    %200 = arith.mulf %195, %199 : vector<16x64xf32>
    %201 = vector.extract_strided_slice %60 {offsets = [80, 0], sizes = [16, 256], strides = [1, 1]} : vector<128x256xf32> to vector<16x256xf32>
    %cst_57 = arith.constant dense<0.000000e+00> : vector<16x256xf32>
    %202 = tpu.matmul %200, %38, %cst_57 {dimension_numbers = #tpu.dot_dimension_numbers<[1], [0], [0], [1], [0, 0, 1, 1], [], []>} : vector<16x64xf32>, vector<64x256xf32>, vector<16x256xf32> -> vector<16x256xf32>
    %203 = arith.addf %201, %202 : vector<16x256xf32>
    %204 = vector.extract_strided_slice %203 {offsets = [0, 0], sizes = [16, 64], strides = [1, 1]} : vector<16x256xf32> to vector<16x64xf32>
    %205 = arith.negf %204 : vector<16x64xf32>
    %206 = math.exp %205 : vector<16x64xf32>
    %cst_58 = arith.constant 1.000000e+00 : f32
    %207 = vector.broadcast %cst_58 : f32 to vector<16x64xf32>
    %208 = arith.addf %207, %206 : vector<16x64xf32>
    %209 = arith.divf %207, %208 : vector<16x64xf32>
    %210 = vector.extract_strided_slice %203 {offsets = [0, 64], sizes = [16, 64], strides = [1, 1]} : vector<16x256xf32> to vector<16x64xf32>
    %211 = arith.negf %210 : vector<16x64xf32>
    %212 = math.exp %211 : vector<16x64xf32>
    %cst_59 = arith.constant 1.000000e+00 : f32
    %213 = vector.broadcast %cst_59 : f32 to vector<16x64xf32>
    %214 = arith.addf %213, %212 : vector<16x64xf32>
    %215 = arith.divf %213, %214 : vector<16x64xf32>
    %216 = vector.extract_strided_slice %203 {offsets = [0, 128], sizes = [16, 64], strides = [1, 1]} : vector<16x256xf32> to vector<16x64xf32>
    %217 = math.tanh %216 : vector<16x64xf32>
    %218 = vector.extract_strided_slice %203 {offsets = [0, 192], sizes = [16, 64], strides = [1, 1]} : vector<16x256xf32> to vector<16x64xf32>
    %219 = arith.negf %218 : vector<16x64xf32>
    %220 = math.exp %219 : vector<16x64xf32>
    %cst_60 = arith.constant 1.000000e+00 : f32
    %221 = vector.broadcast %cst_60 : f32 to vector<16x64xf32>
    %222 = arith.addf %221, %220 : vector<16x64xf32>
    %223 = arith.divf %221, %222 : vector<16x64xf32>
    %224 = arith.mulf %215, %198 : vector<16x64xf32>
    %225 = arith.mulf %209, %217 : vector<16x64xf32>
    %226 = arith.addf %224, %225 : vector<16x64xf32>
    %227 = math.tanh %226 : vector<16x64xf32>
    %228 = arith.mulf %223, %227 : vector<16x64xf32>
    %229 = vector.extract_strided_slice %60 {offsets = [96, 0], sizes = [16, 256], strides = [1, 1]} : vector<128x256xf32> to vector<16x256xf32>
    %cst_61 = arith.constant dense<0.000000e+00> : vector<16x256xf32>
    %230 = tpu.matmul %228, %38, %cst_61 {dimension_numbers = #tpu.dot_dimension_numbers<[1], [0], [0], [1], [0, 0, 1, 1], [], []>} : vector<16x64xf32>, vector<64x256xf32>, vector<16x256xf32> -> vector<16x256xf32>
    %231 = arith.addf %229, %230 : vector<16x256xf32>
    %232 = vector.extract_strided_slice %231 {offsets = [0, 0], sizes = [16, 64], strides = [1, 1]} : vector<16x256xf32> to vector<16x64xf32>
    %233 = arith.negf %232 : vector<16x64xf32>
    %234 = math.exp %233 : vector<16x64xf32>
    %cst_62 = arith.constant 1.000000e+00 : f32
    %235 = vector.broadcast %cst_62 : f32 to vector<16x64xf32>
    %236 = arith.addf %235, %234 : vector<16x64xf32>
    %237 = arith.divf %235, %236 : vector<16x64xf32>
    %238 = vector.extract_strided_slice %231 {offsets = [0, 64], sizes = [16, 64], strides = [1, 1]} : vector<16x256xf32> to vector<16x64xf32>
    %239 = arith.negf %238 : vector<16x64xf32>
    %240 = math.exp %239 : vector<16x64xf32>
    %cst_63 = arith.constant 1.000000e+00 : f32
    %241 = vector.broadcast %cst_63 : f32 to vector<16x64xf32>
    %242 = arith.addf %241, %240 : vector<16x64xf32>
    %243 = arith.divf %241, %242 : vector<16x64xf32>
    %244 = vector.extract_strided_slice %231 {offsets = [0, 128], sizes = [16, 64], strides = [1, 1]} : vector<16x256xf32> to vector<16x64xf32>
    %245 = math.tanh %244 : vector<16x64xf32>
    %246 = vector.extract_strided_slice %231 {offsets = [0, 192], sizes = [16, 64], strides = [1, 1]} : vector<16x256xf32> to vector<16x64xf32>
    %247 = arith.negf %246 : vector<16x64xf32>
    %248 = math.exp %247 : vector<16x64xf32>
    %cst_64 = arith.constant 1.000000e+00 : f32
    %249 = vector.broadcast %cst_64 : f32 to vector<16x64xf32>
    %250 = arith.addf %249, %248 : vector<16x64xf32>
    %251 = arith.divf %249, %250 : vector<16x64xf32>
    %252 = arith.mulf %243, %226 : vector<16x64xf32>
    %253 = arith.mulf %237, %245 : vector<16x64xf32>
    %254 = arith.addf %252, %253 : vector<16x64xf32>
    %255 = math.tanh %254 : vector<16x64xf32>
    %256 = arith.mulf %251, %255 : vector<16x64xf32>
    %257 = vector.extract_strided_slice %60 {offsets = [112, 0], sizes = [16, 256], strides = [1, 1]} : vector<128x256xf32> to vector<16x256xf32>
    %cst_65 = arith.constant dense<0.000000e+00> : vector<16x256xf32>
    %258 = tpu.matmul %256, %38, %cst_65 {dimension_numbers = #tpu.dot_dimension_numbers<[1], [0], [0], [1], [0, 0, 1, 1], [], []>} : vector<16x64xf32>, vector<64x256xf32>, vector<16x256xf32> -> vector<16x256xf32>
    %259 = arith.addf %257, %258 : vector<16x256xf32>
    %260 = vector.extract_strided_slice %259 {offsets = [0, 0], sizes = [16, 64], strides = [1, 1]} : vector<16x256xf32> to vector<16x64xf32>
    %261 = arith.negf %260 : vector<16x64xf32>
    %262 = math.exp %261 : vector<16x64xf32>
    %cst_66 = arith.constant 1.000000e+00 : f32
    %263 = vector.broadcast %cst_66 : f32 to vector<16x64xf32>
    %264 = arith.addf %263, %262 : vector<16x64xf32>
    %265 = arith.divf %263, %264 : vector<16x64xf32>
    %266 = vector.extract_strided_slice %259 {offsets = [0, 64], sizes = [16, 64], strides = [1, 1]} : vector<16x256xf32> to vector<16x64xf32>
    %267 = arith.negf %266 : vector<16x64xf32>
    %268 = math.exp %267 : vector<16x64xf32>
    %cst_67 = arith.constant 1.000000e+00 : f32
    %269 = vector.broadcast %cst_67 : f32 to vector<16x64xf32>
    %270 = arith.addf %269, %268 : vector<16x64xf32>
    %271 = arith.divf %269, %270 : vector<16x64xf32>
    %272 = vector.extract_strided_slice %259 {offsets = [0, 128], sizes = [16, 64], strides = [1, 1]} : vector<16x256xf32> to vector<16x64xf32>
    %273 = math.tanh %272 : vector<16x64xf32>
    %274 = vector.extract_strided_slice %259 {offsets = [0, 192], sizes = [16, 64], strides = [1, 1]} : vector<16x256xf32> to vector<16x64xf32>
    %275 = arith.negf %274 : vector<16x64xf32>
    %276 = math.exp %275 : vector<16x64xf32>
    %cst_68 = arith.constant 1.000000e+00 : f32
    %277 = vector.broadcast %cst_68 : f32 to vector<16x64xf32>
    %278 = arith.addf %277, %276 : vector<16x64xf32>
    %279 = arith.divf %277, %278 : vector<16x64xf32>
    %280 = arith.mulf %271, %254 : vector<16x64xf32>
    %281 = arith.mulf %265, %273 : vector<16x64xf32>
    %282 = arith.addf %280, %281 : vector<16x64xf32>
    %283 = math.tanh %282 : vector<16x64xf32>
    %284 = arith.mulf %279, %283 : vector<16x64xf32>
    %285 = tpu.concatenate %88, %116, %144, %172, %200, %228, %256, %284 in 0 : vector<16x64xf32>, vector<16x64xf32>, vector<16x64xf32>, vector<16x64xf32>, vector<16x64xf32>, vector<16x64xf32>, vector<16x64xf32>, vector<16x64xf32> -> vector<128x64xf32>
    %286 = tpu.concatenate %284, %256, %228, %200, %172, %144, %116, %88 in 0 : vector<16x64xf32>, vector<16x64xf32>, vector<16x64xf32>, vector<16x64xf32>, vector<16x64xf32>, vector<16x64xf32>, vector<16x64xf32>, vector<16x64xf32> -> vector<128x64xf32>
    %cst_69 = arith.constant dense<0.000000e+00> : vector<128x16xf32>
    %287 = tpu.matmul %285, %40, %cst_69 {dimension_numbers = #tpu.dot_dimension_numbers<[1], [0], [0], [1], [0, 0, 1, 1], [], []>} : vector<128x64xf32>, vector<64x16xf32>, vector<128x16xf32> -> vector<128x16xf32>
    %cst_70 = arith.constant dense<0.000000e+00> : vector<128x16xf32>
    %288 = tpu.matmul %286, %41, %cst_70 {dimension_numbers = #tpu.dot_dimension_numbers<[1], [0], [0], [1], [0, 0, 1, 1], [], []>} : vector<128x64xf32>, vector<64x16xf32>, vector<128x16xf32> -> vector<128x16xf32>
    %289 = arith.addf %287, %288 : vector<128x16xf32>
    %290 = vector.broadcast %42 : vector<1x16xf32> to vector<128x16xf32>
    %291 = arith.addf %289, %290 : vector<128x16xf32>
    %cst_71 = arith.constant dense<0.000000e+00> : vector<128xf32>
    %292 = vector.multi_reduction <add>, %291, %cst_71 [1] : vector<128x16xf32> to vector<128xf32>
    %293 = vector.shape_cast %292 : vector<128xf32> to vector<128x1xf32>
    %294 = arith.mulf %291, %291 : vector<128x16xf32>
    %cst_72 = arith.constant dense<0.000000e+00> : vector<128xf32>
    %295 = vector.multi_reduction <add>, %294, %cst_72 [1] : vector<128x16xf32> to vector<128xf32>
    %296 = vector.shape_cast %295 : vector<128xf32> to vector<128x1xf32>
    %297 = vector.extract_strided_slice %293 {offsets = [0, 0], sizes = [16, 1], strides = [1, 1]} : vector<128x1xf32> to vector<16x1xf32>
    %cst_73 = arith.constant 0.000000e+00 : f32
    %298 = vector.broadcast %cst_73 : f32 to vector<16x1xf32>
    %299 = arith.addf %298, %297 : vector<16x1xf32>
    %300 = vector.extract_strided_slice %293 {offsets = [16, 0], sizes = [16, 1], strides = [1, 1]} : vector<128x1xf32> to vector<16x1xf32>
    %301 = arith.addf %299, %300 : vector<16x1xf32>
    %302 = vector.extract_strided_slice %293 {offsets = [32, 0], sizes = [16, 1], strides = [1, 1]} : vector<128x1xf32> to vector<16x1xf32>
    %303 = arith.addf %301, %302 : vector<16x1xf32>
    %304 = vector.extract_strided_slice %293 {offsets = [48, 0], sizes = [16, 1], strides = [1, 1]} : vector<128x1xf32> to vector<16x1xf32>
    %305 = arith.addf %303, %304 : vector<16x1xf32>
    %306 = vector.extract_strided_slice %293 {offsets = [64, 0], sizes = [16, 1], strides = [1, 1]} : vector<128x1xf32> to vector<16x1xf32>
    %307 = arith.addf %305, %306 : vector<16x1xf32>
    %308 = vector.extract_strided_slice %293 {offsets = [80, 0], sizes = [16, 1], strides = [1, 1]} : vector<128x1xf32> to vector<16x1xf32>
    %309 = arith.addf %307, %308 : vector<16x1xf32>
    %310 = vector.extract_strided_slice %293 {offsets = [96, 0], sizes = [16, 1], strides = [1, 1]} : vector<128x1xf32> to vector<16x1xf32>
    %311 = arith.addf %309, %310 : vector<16x1xf32>
    %312 = vector.extract_strided_slice %293 {offsets = [112, 0], sizes = [16, 1], strides = [1, 1]} : vector<128x1xf32> to vector<16x1xf32>
    %313 = arith.addf %311, %312 : vector<16x1xf32>
    %cst_74 = arith.constant 7.812500e-03 : f32
    %314 = vector.broadcast %cst_74 : f32 to vector<16x1xf32>
    %315 = arith.mulf %313, %314 : vector<16x1xf32>
    %316 = vector.extract_strided_slice %296 {offsets = [0, 0], sizes = [16, 1], strides = [1, 1]} : vector<128x1xf32> to vector<16x1xf32>
    %cst_75 = arith.constant 0.000000e+00 : f32
    %317 = vector.broadcast %cst_75 : f32 to vector<16x1xf32>
    %318 = arith.addf %317, %316 : vector<16x1xf32>
    %319 = vector.extract_strided_slice %296 {offsets = [16, 0], sizes = [16, 1], strides = [1, 1]} : vector<128x1xf32> to vector<16x1xf32>
    %320 = arith.addf %318, %319 : vector<16x1xf32>
    %321 = vector.extract_strided_slice %296 {offsets = [32, 0], sizes = [16, 1], strides = [1, 1]} : vector<128x1xf32> to vector<16x1xf32>
    %322 = arith.addf %320, %321 : vector<16x1xf32>
    %323 = vector.extract_strided_slice %296 {offsets = [48, 0], sizes = [16, 1], strides = [1, 1]} : vector<128x1xf32> to vector<16x1xf32>
    %324 = arith.addf %322, %323 : vector<16x1xf32>
    %325 = vector.extract_strided_slice %296 {offsets = [64, 0], sizes = [16, 1], strides = [1, 1]} : vector<128x1xf32> to vector<16x1xf32>
    %326 = arith.addf %324, %325 : vector<16x1xf32>
    %327 = vector.extract_strided_slice %296 {offsets = [80, 0], sizes = [16, 1], strides = [1, 1]} : vector<128x1xf32> to vector<16x1xf32>
    %328 = arith.addf %326, %327 : vector<16x1xf32>
    %329 = vector.extract_strided_slice %296 {offsets = [96, 0], sizes = [16, 1], strides = [1, 1]} : vector<128x1xf32> to vector<16x1xf32>
    %330 = arith.addf %328, %329 : vector<16x1xf32>
    %331 = vector.extract_strided_slice %296 {offsets = [112, 0], sizes = [16, 1], strides = [1, 1]} : vector<128x1xf32> to vector<16x1xf32>
    %332 = arith.addf %330, %331 : vector<16x1xf32>
    %cst_76 = arith.constant 7.812500e-03 : f32
    %333 = vector.broadcast %cst_76 : f32 to vector<16x1xf32>
    %334 = arith.mulf %332, %333 : vector<16x1xf32>
    %335 = arith.mulf %315, %315 : vector<16x1xf32>
    %336 = arith.subf %334, %335 : vector<16x1xf32>
    %cst_77 = arith.constant 0.000000e+00 : f32
    %337 = vector.broadcast %cst_77 : f32 to vector<16x1xf32>
    %338 = arith.maximumf %336, %337 : vector<16x1xf32>
    %cst_78 = arith.constant 9.99999993E-9 : f32
    %339 = vector.broadcast %cst_78 : f32 to vector<16x1xf32>
    %340 = arith.addf %338, %339 : vector<16x1xf32>
    %341 = math.rsqrt %340 : vector<16x1xf32>
    %342 = vector.broadcast %43 : vector<1x16xf32> to vector<16x16xf32>
    %343 = vector.broadcast %341 : vector<16x1xf32> to vector<16x16xf32>
    %344 = arith.mulf %342, %343 : vector<16x16xf32>
    %345 = vector.broadcast %315 : vector<16x1xf32> to vector<16x16xf32>
    %346 = arith.mulf %344, %345 : vector<16x16xf32>
    %347 = vector.broadcast %44 : vector<1x16xf32> to vector<16x16xf32>
    %348 = arith.subf %347, %346 : vector<16x16xf32>
    %349 = vector.extract_strided_slice %291 {offsets = [0, 0], sizes = [16, 16], strides = [1, 1]} : vector<128x16xf32> to vector<16x16xf32>
    %350 = arith.mulf %344, %349 : vector<16x16xf32>
    %351 = arith.addf %20, %350 : vector<16x16xf32>
    %352 = arith.addf %351, %348 : vector<16x16xf32>
    %353 = vector.extract_strided_slice %291 {offsets = [16, 0], sizes = [16, 16], strides = [1, 1]} : vector<128x16xf32> to vector<16x16xf32>
    %354 = arith.mulf %344, %353 : vector<16x16xf32>
    %355 = arith.addf %22, %354 : vector<16x16xf32>
    %356 = arith.addf %355, %348 : vector<16x16xf32>
    %357 = vector.extract_strided_slice %291 {offsets = [32, 0], sizes = [16, 16], strides = [1, 1]} : vector<128x16xf32> to vector<16x16xf32>
    %358 = arith.mulf %344, %357 : vector<16x16xf32>
    %359 = arith.addf %24, %358 : vector<16x16xf32>
    %360 = arith.addf %359, %348 : vector<16x16xf32>
    %361 = vector.extract_strided_slice %291 {offsets = [48, 0], sizes = [16, 16], strides = [1, 1]} : vector<128x16xf32> to vector<16x16xf32>
    %362 = arith.mulf %344, %361 : vector<16x16xf32>
    %363 = arith.addf %26, %362 : vector<16x16xf32>
    %364 = arith.addf %363, %348 : vector<16x16xf32>
    %365 = vector.extract_strided_slice %291 {offsets = [64, 0], sizes = [16, 16], strides = [1, 1]} : vector<128x16xf32> to vector<16x16xf32>
    %366 = arith.mulf %344, %365 : vector<16x16xf32>
    %367 = arith.addf %28, %366 : vector<16x16xf32>
    %368 = arith.addf %367, %348 : vector<16x16xf32>
    %369 = vector.extract_strided_slice %291 {offsets = [80, 0], sizes = [16, 16], strides = [1, 1]} : vector<128x16xf32> to vector<16x16xf32>
    %370 = arith.mulf %344, %369 : vector<16x16xf32>
    %371 = arith.addf %30, %370 : vector<16x16xf32>
    %372 = arith.addf %371, %348 : vector<16x16xf32>
    %373 = vector.extract_strided_slice %291 {offsets = [96, 0], sizes = [16, 16], strides = [1, 1]} : vector<128x16xf32> to vector<16x16xf32>
    %374 = arith.mulf %344, %373 : vector<16x16xf32>
    %375 = arith.addf %32, %374 : vector<16x16xf32>
    %376 = arith.addf %375, %348 : vector<16x16xf32>
    %377 = vector.extract_strided_slice %291 {offsets = [112, 0], sizes = [16, 16], strides = [1, 1]} : vector<128x16xf32> to vector<16x16xf32>
    %378 = arith.mulf %344, %377 : vector<16x16xf32>
    %379 = arith.addf %34, %378 : vector<16x16xf32>
    %380 = arith.addf %379, %348 : vector<16x16xf32>
    %381 = vector.extract_strided_slice %284 {offsets = [0, 0], sizes = [8, 64], strides = [1, 1]} : vector<16x64xf32> to vector<8x64xf32>
    %382 = vector.extract_strided_slice %284 {offsets = [8, 0], sizes = [8, 64], strides = [1, 1]} : vector<16x64xf32> to vector<8x64xf32>
    %383 = vector.extract_strided_slice %282 {offsets = [0, 0], sizes = [8, 64], strides = [1, 1]} : vector<16x64xf32> to vector<8x64xf32>
    %384 = vector.extract_strided_slice %282 {offsets = [8, 0], sizes = [8, 64], strides = [1, 1]} : vector<16x64xf32> to vector<8x64xf32>
    %cst_79 = arith.constant 0.000000e+00 : f32
    %385 = vector.broadcast %cst_79 : f32 to vector<8x64xf32>
    %c0_80 = arith.constant 0 : index
    %c0_81 = arith.constant 0 : index
    %386 = vector.load %arg18[%c0_80, %c0_81] : memref<64x256xf32, #tpu.memory_space<vmem>>, vector<64x256xf32>
    %c0_82 = arith.constant 0 : index
    %c0_83 = arith.constant 0 : index
    %387 = vector.load %arg19[%c0_82, %c0_83] : memref<64x256xf32, #tpu.memory_space<vmem>>, vector<64x256xf32>
    %c0_84 = arith.constant 0 : index
    %c0_85 = arith.constant 0 : index
    %388 = vector.load %arg20[%c0_84, %c0_85] : memref<1x256xf32, #tpu.memory_space<vmem>>, vector<1x256xf32>
    %c0_86 = arith.constant 0 : index
    %c0_87 = arith.constant 0 : index
    %389 = vector.load %arg21[%c0_86, %c0_87] : memref<64x64xf32, #tpu.memory_space<vmem>>, vector<64x64xf32>
    %c0_88 = arith.constant 0 : index
    %c0_89 = arith.constant 0 : index
    %390 = vector.load %arg22[%c0_88, %c0_89] : memref<64x64xf32, #tpu.memory_space<vmem>>, vector<64x64xf32>
    %c0_90 = arith.constant 0 : index
    %c0_91 = arith.constant 0 : index
    %391 = vector.load %arg23[%c0_90, %c0_91] : memref<1x64xf32, #tpu.memory_space<vmem>>, vector<1x64xf32>
    %c0_92 = arith.constant 0 : index
    %c0_93 = arith.constant 0 : index
    %392 = vector.load %arg24[%c0_92, %c0_93] : memref<1x64xf32, #tpu.memory_space<vmem>>, vector<1x64xf32>
    %c0_94 = arith.constant 0 : index
    %c0_95 = arith.constant 0 : index
    %393 = vector.load %arg25[%c0_94, %c0_95] : memref<1x64xf32, #tpu.memory_space<vmem>>, vector<1x64xf32>
    %394 = tpu.concatenate %381, %382 in 0 : vector<8x64xf32>, vector<8x64xf32> -> vector<16x64xf32>
    %cst_96 = arith.constant dense<0.000000e+00> : vector<16x256xf32>
    %395 = tpu.matmul %394, %386, %cst_96 {dimension_numbers = #tpu.dot_dimension_numbers<[1], [0], [0], [1], [0, 0, 1, 1], [], []>} : vector<16x64xf32>, vector<64x256xf32>, vector<16x256xf32> -> vector<16x256xf32>
    %396 = vector.extract_strided_slice %395 {offsets = [8, 0], sizes = [8, 256], strides = [1, 1]} : vector<16x256xf32> to vector<8x256xf32>
    %397 = vector.extract_strided_slice %395 {offsets = [0, 0], sizes = [8, 256], strides = [1, 1]} : vector<16x256xf32> to vector<8x256xf32>
    %398 = tpu.concatenate %396, %397 in 0 : vector<8x256xf32>, vector<8x256xf32> -> vector<16x256xf32>
    %399 = vector.shape_cast %18 : vector<1x256xi1> to vector<1x256xi1>
    %400 = vector.broadcast %399 : vector<1x256xi1> to vector<16x256xi1>
    %401 = arith.select %400, %395, %398 : vector<16x256xi1>, vector<16x256xf32>
    %402 = vector.broadcast %388 : vector<1x256xf32> to vector<16x256xf32>
    %403 = arith.addf %401, %402 : vector<16x256xf32>
    %404 = vector.extract_strided_slice %403 {offsets = [0, 0], sizes = [8, 256], strides = [1, 1]} : vector<16x256xf32> to vector<8x256xf32>
    %cst_97 = arith.constant dense<0.000000e+00> : vector<8x256xf32>
    %405 = tpu.matmul %385, %387, %cst_97 {dimension_numbers = #tpu.dot_dimension_numbers<[1], [0], [0], [1], [0, 0, 1, 1], [], []>} : vector<8x64xf32>, vector<64x256xf32>, vector<8x256xf32> -> vector<8x256xf32>
    %406 = arith.addf %404, %405 : vector<8x256xf32>
    %407 = vector.extract_strided_slice %406 {offsets = [0, 0], sizes = [8, 64], strides = [1, 1]} : vector<8x256xf32> to vector<8x64xf32>
    %408 = arith.negf %407 : vector<8x64xf32>
    %409 = math.exp %408 : vector<8x64xf32>
    %cst_98 = arith.constant 1.000000e+00 : f32
    %410 = vector.broadcast %cst_98 : f32 to vector<8x64xf32>
    %411 = arith.addf %410, %409 : vector<8x64xf32>
    %412 = arith.divf %410, %411 : vector<8x64xf32>
    %413 = vector.extract_strided_slice %406 {offsets = [0, 64], sizes = [8, 64], strides = [1, 1]} : vector<8x256xf32> to vector<8x64xf32>
    %414 = arith.negf %413 : vector<8x64xf32>
    %415 = math.exp %414 : vector<8x64xf32>
    %cst_99 = arith.constant 1.000000e+00 : f32
    %416 = vector.broadcast %cst_99 : f32 to vector<8x64xf32>
    %417 = arith.addf %416, %415 : vector<8x64xf32>
    %418 = arith.divf %416, %417 : vector<8x64xf32>
    %419 = vector.extract_strided_slice %406 {offsets = [0, 128], sizes = [8, 64], strides = [1, 1]} : vector<8x256xf32> to vector<8x64xf32>
    %420 = math.tanh %419 : vector<8x64xf32>
    %421 = vector.extract_strided_slice %406 {offsets = [0, 192], sizes = [8, 64], strides = [1, 1]} : vector<8x256xf32> to vector<8x64xf32>
    %422 = arith.negf %421 : vector<8x64xf32>
    %423 = math.exp %422 : vector<8x64xf32>
    %cst_100 = arith.constant 1.000000e+00 : f32
    %424 = vector.broadcast %cst_100 : f32 to vector<8x64xf32>
    %425 = arith.addf %424, %423 : vector<8x64xf32>
    %426 = arith.divf %424, %425 : vector<8x64xf32>
    %427 = arith.mulf %418, %385 : vector<8x64xf32>
    %428 = arith.mulf %412, %420 : vector<8x64xf32>
    %429 = arith.addf %427, %428 : vector<8x64xf32>
    %430 = math.tanh %429 : vector<8x64xf32>
    %431 = arith.mulf %426, %430 : vector<8x64xf32>
    %432 = vector.extract_strided_slice %403 {offsets = [8, 0], sizes = [8, 256], strides = [1, 1]} : vector<16x256xf32> to vector<8x256xf32>
    %cst_101 = arith.constant dense<0.000000e+00> : vector<8x256xf32>
    %433 = tpu.matmul %431, %387, %cst_101 {dimension_numbers = #tpu.dot_dimension_numbers<[1], [0], [0], [1], [0, 0, 1, 1], [], []>} : vector<8x64xf32>, vector<64x256xf32>, vector<8x256xf32> -> vector<8x256xf32>
    %434 = arith.addf %432, %433 : vector<8x256xf32>
    %435 = vector.extract_strided_slice %434 {offsets = [0, 0], sizes = [8, 64], strides = [1, 1]} : vector<8x256xf32> to vector<8x64xf32>
    %436 = arith.negf %435 : vector<8x64xf32>
    %437 = math.exp %436 : vector<8x64xf32>
    %cst_102 = arith.constant 1.000000e+00 : f32
    %438 = vector.broadcast %cst_102 : f32 to vector<8x64xf32>
    %439 = arith.addf %438, %437 : vector<8x64xf32>
    %440 = arith.divf %438, %439 : vector<8x64xf32>
    %441 = vector.extract_strided_slice %434 {offsets = [0, 64], sizes = [8, 64], strides = [1, 1]} : vector<8x256xf32> to vector<8x64xf32>
    %442 = arith.negf %441 : vector<8x64xf32>
    %443 = math.exp %442 : vector<8x64xf32>
    %cst_103 = arith.constant 1.000000e+00 : f32
    %444 = vector.broadcast %cst_103 : f32 to vector<8x64xf32>
    %445 = arith.addf %444, %443 : vector<8x64xf32>
    %446 = arith.divf %444, %445 : vector<8x64xf32>
    %447 = vector.extract_strided_slice %434 {offsets = [0, 128], sizes = [8, 64], strides = [1, 1]} : vector<8x256xf32> to vector<8x64xf32>
    %448 = math.tanh %447 : vector<8x64xf32>
    %449 = vector.extract_strided_slice %434 {offsets = [0, 192], sizes = [8, 64], strides = [1, 1]} : vector<8x256xf32> to vector<8x64xf32>
    %450 = arith.negf %449 : vector<8x64xf32>
    %451 = math.exp %450 : vector<8x64xf32>
    %cst_104 = arith.constant 1.000000e+00 : f32
    %452 = vector.broadcast %cst_104 : f32 to vector<8x64xf32>
    %453 = arith.addf %452, %451 : vector<8x64xf32>
    %454 = arith.divf %452, %453 : vector<8x64xf32>
    %455 = arith.mulf %446, %429 : vector<8x64xf32>
    %456 = arith.mulf %440, %448 : vector<8x64xf32>
    %457 = arith.addf %455, %456 : vector<8x64xf32>
    %458 = math.tanh %457 : vector<8x64xf32>
    %459 = arith.mulf %454, %458 : vector<8x64xf32>
    %460 = tpu.concatenate %431, %459 in 0 : vector<8x64xf32>, vector<8x64xf32> -> vector<16x64xf32>
    %461 = tpu.concatenate %459, %431 in 0 : vector<8x64xf32>, vector<8x64xf32> -> vector<16x64xf32>
    %cst_105 = arith.constant dense<0.000000e+00> : vector<16x64xf32>
    %462 = tpu.matmul %460, %389, %cst_105 {dimension_numbers = #tpu.dot_dimension_numbers<[1], [0], [0], [1], [0, 0, 1, 1], [], []>} : vector<16x64xf32>, vector<64x64xf32>, vector<16x64xf32> -> vector<16x64xf32>
    %cst_106 = arith.constant dense<0.000000e+00> : vector<16x64xf32>
    %463 = tpu.matmul %461, %390, %cst_106 {dimension_numbers = #tpu.dot_dimension_numbers<[1], [0], [0], [1], [0, 0, 1, 1], [], []>} : vector<16x64xf32>, vector<64x64xf32>, vector<16x64xf32> -> vector<16x64xf32>
    %464 = arith.addf %462, %463 : vector<16x64xf32>
    %465 = vector.broadcast %391 : vector<1x64xf32> to vector<16x64xf32>
    %466 = arith.addf %464, %465 : vector<16x64xf32>
    %cst_107 = arith.constant dense<0.000000e+00> : vector<16xf32>
    %467 = vector.multi_reduction <add>, %466, %cst_107 [1] : vector<16x64xf32> to vector<16xf32>
    %468 = vector.shape_cast %467 : vector<16xf32> to vector<16x1xf32>
    %469 = arith.mulf %466, %466 : vector<16x64xf32>
    %cst_108 = arith.constant dense<0.000000e+00> : vector<16xf32>
    %470 = vector.multi_reduction <add>, %469, %cst_108 [1] : vector<16x64xf32> to vector<16xf32>
    %471 = vector.shape_cast %470 : vector<16xf32> to vector<16x1xf32>
    %472 = vector.extract_strided_slice %468 {offsets = [0, 0], sizes = [8, 1], strides = [1, 1]} : vector<16x1xf32> to vector<8x1xf32>
    %cst_109 = arith.constant 0.000000e+00 : f32
    %473 = vector.broadcast %cst_109 : f32 to vector<8x1xf32>
    %474 = arith.addf %473, %472 : vector<8x1xf32>
    %475 = vector.extract_strided_slice %468 {offsets = [8, 0], sizes = [8, 1], strides = [1, 1]} : vector<16x1xf32> to vector<8x1xf32>
    %476 = arith.addf %474, %475 : vector<8x1xf32>
    %cst_110 = arith.constant 7.812500e-03 : f32
    %477 = vector.broadcast %cst_110 : f32 to vector<8x1xf32>
    %478 = arith.mulf %476, %477 : vector<8x1xf32>
    %479 = vector.extract_strided_slice %471 {offsets = [0, 0], sizes = [8, 1], strides = [1, 1]} : vector<16x1xf32> to vector<8x1xf32>
    %cst_111 = arith.constant 0.000000e+00 : f32
    %480 = vector.broadcast %cst_111 : f32 to vector<8x1xf32>
    %481 = arith.addf %480, %479 : vector<8x1xf32>
    %482 = vector.extract_strided_slice %471 {offsets = [8, 0], sizes = [8, 1], strides = [1, 1]} : vector<16x1xf32> to vector<8x1xf32>
    %483 = arith.addf %481, %482 : vector<8x1xf32>
    %cst_112 = arith.constant 7.812500e-03 : f32
    %484 = vector.broadcast %cst_112 : f32 to vector<8x1xf32>
    %485 = arith.mulf %483, %484 : vector<8x1xf32>
    %486 = arith.mulf %478, %478 : vector<8x1xf32>
    %487 = arith.subf %485, %486 : vector<8x1xf32>
    %cst_113 = arith.constant 0.000000e+00 : f32
    %488 = vector.broadcast %cst_113 : f32 to vector<8x1xf32>
    %489 = arith.maximumf %487, %488 : vector<8x1xf32>
    %cst_114 = arith.constant 9.99999993E-9 : f32
    %490 = vector.broadcast %cst_114 : f32 to vector<8x1xf32>
    %491 = arith.addf %489, %490 : vector<8x1xf32>
    %492 = math.rsqrt %491 : vector<8x1xf32>
    %493 = vector.broadcast %392 : vector<1x64xf32> to vector<8x64xf32>
    %494 = vector.broadcast %492 : vector<8x1xf32> to vector<8x64xf32>
    %495 = arith.mulf %493, %494 : vector<8x64xf32>
    %496 = vector.broadcast %478 : vector<8x1xf32> to vector<8x64xf32>
    %497 = arith.mulf %495, %496 : vector<8x64xf32>
    %498 = vector.broadcast %393 : vector<1x64xf32> to vector<8x64xf32>
    %499 = arith.subf %498, %497 : vector<8x64xf32>
    %500 = vector.extract_strided_slice %466 {offsets = [0, 0], sizes = [8, 64], strides = [1, 1]} : vector<16x64xf32> to vector<8x64xf32>
    %501 = arith.mulf %495, %500 : vector<8x64xf32>
    %502 = arith.addf %381, %501 : vector<8x64xf32>
    %503 = arith.addf %502, %499 : vector<8x64xf32>
    %504 = vector.extract_strided_slice %466 {offsets = [8, 0], sizes = [8, 64], strides = [1, 1]} : vector<16x64xf32> to vector<8x64xf32>
    %505 = arith.mulf %495, %504 : vector<8x64xf32>
    %506 = arith.addf %382, %505 : vector<8x64xf32>
    %507 = arith.addf %506, %499 : vector<8x64xf32>
    %c0_115 = arith.constant 0 : index
    %c0_116 = arith.constant 0 : index
    %508 = vector.load %arg26[%c0_115, %c0_116] : memref<64x256xf32, #tpu.memory_space<vmem>>, vector<64x256xf32>
    %c0_117 = arith.constant 0 : index
    %c0_118 = arith.constant 0 : index
    %509 = vector.load %arg27[%c0_117, %c0_118] : memref<64x256xf32, #tpu.memory_space<vmem>>, vector<64x256xf32>
    %c0_119 = arith.constant 0 : index
    %c0_120 = arith.constant 0 : index
    %510 = vector.load %arg28[%c0_119, %c0_120] : memref<1x256xf32, #tpu.memory_space<vmem>>, vector<1x256xf32>
    %c0_121 = arith.constant 0 : index
    %c0_122 = arith.constant 0 : index
    %511 = vector.load %arg29[%c0_121, %c0_122] : memref<64x64xf32, #tpu.memory_space<vmem>>, vector<64x64xf32>
    %c0_123 = arith.constant 0 : index
    %c0_124 = arith.constant 0 : index
    %512 = vector.load %arg30[%c0_123, %c0_124] : memref<64x64xf32, #tpu.memory_space<vmem>>, vector<64x64xf32>
    %c0_125 = arith.constant 0 : index
    %c0_126 = arith.constant 0 : index
    %513 = vector.load %arg31[%c0_125, %c0_126] : memref<1x64xf32, #tpu.memory_space<vmem>>, vector<1x64xf32>
    %c0_127 = arith.constant 0 : index
    %c0_128 = arith.constant 0 : index
    %514 = vector.load %arg32[%c0_127, %c0_128] : memref<1x64xf32, #tpu.memory_space<vmem>>, vector<1x64xf32>
    %c0_129 = arith.constant 0 : index
    %c0_130 = arith.constant 0 : index
    %515 = vector.load %arg33[%c0_129, %c0_130] : memref<1x64xf32, #tpu.memory_space<vmem>>, vector<1x64xf32>
    %516 = tpu.concatenate %383, %384 in 0 : vector<8x64xf32>, vector<8x64xf32> -> vector<16x64xf32>
    %cst_131 = arith.constant dense<0.000000e+00> : vector<16x256xf32>
    %517 = tpu.matmul %516, %508, %cst_131 {dimension_numbers = #tpu.dot_dimension_numbers<[1], [0], [0], [1], [0, 0, 1, 1], [], []>} : vector<16x64xf32>, vector<64x256xf32>, vector<16x256xf32> -> vector<16x256xf32>
    %518 = vector.extract_strided_slice %517 {offsets = [8, 0], sizes = [8, 256], strides = [1, 1]} : vector<16x256xf32> to vector<8x256xf32>
    %519 = vector.extract_strided_slice %517 {offsets = [0, 0], sizes = [8, 256], strides = [1, 1]} : vector<16x256xf32> to vector<8x256xf32>
    %520 = tpu.concatenate %518, %519 in 0 : vector<8x256xf32>, vector<8x256xf32> -> vector<16x256xf32>
    %521 = vector.shape_cast %18 : vector<1x256xi1> to vector<1x256xi1>
    %522 = vector.broadcast %521 : vector<1x256xi1> to vector<16x256xi1>
    %523 = arith.select %522, %517, %520 : vector<16x256xi1>, vector<16x256xf32>
    %524 = vector.broadcast %510 : vector<1x256xf32> to vector<16x256xf32>
    %525 = arith.addf %523, %524 : vector<16x256xf32>
    %526 = vector.extract_strided_slice %525 {offsets = [0, 0], sizes = [8, 256], strides = [1, 1]} : vector<16x256xf32> to vector<8x256xf32>
    %cst_132 = arith.constant dense<0.000000e+00> : vector<8x256xf32>
    %527 = tpu.matmul %385, %509, %cst_132 {dimension_numbers = #tpu.dot_dimension_numbers<[1], [0], [0], [1], [0, 0, 1, 1], [], []>} : vector<8x64xf32>, vector<64x256xf32>, vector<8x256xf32> -> vector<8x256xf32>
    %528 = arith.addf %526, %527 : vector<8x256xf32>
    %529 = vector.extract_strided_slice %528 {offsets = [0, 0], sizes = [8, 64], strides = [1, 1]} : vector<8x256xf32> to vector<8x64xf32>
    %530 = arith.negf %529 : vector<8x64xf32>
    %531 = math.exp %530 : vector<8x64xf32>
    %cst_133 = arith.constant 1.000000e+00 : f32
    %532 = vector.broadcast %cst_133 : f32 to vector<8x64xf32>
    %533 = arith.addf %532, %531 : vector<8x64xf32>
    %534 = arith.divf %532, %533 : vector<8x64xf32>
    %535 = vector.extract_strided_slice %528 {offsets = [0, 64], sizes = [8, 64], strides = [1, 1]} : vector<8x256xf32> to vector<8x64xf32>
    %536 = arith.negf %535 : vector<8x64xf32>
    %537 = math.exp %536 : vector<8x64xf32>
    %cst_134 = arith.constant 1.000000e+00 : f32
    %538 = vector.broadcast %cst_134 : f32 to vector<8x64xf32>
    %539 = arith.addf %538, %537 : vector<8x64xf32>
    %540 = arith.divf %538, %539 : vector<8x64xf32>
    %541 = vector.extract_strided_slice %528 {offsets = [0, 128], sizes = [8, 64], strides = [1, 1]} : vector<8x256xf32> to vector<8x64xf32>
    %542 = math.tanh %541 : vector<8x64xf32>
    %543 = vector.extract_strided_slice %528 {offsets = [0, 192], sizes = [8, 64], strides = [1, 1]} : vector<8x256xf32> to vector<8x64xf32>
    %544 = arith.negf %543 : vector<8x64xf32>
    %545 = math.exp %544 : vector<8x64xf32>
    %cst_135 = arith.constant 1.000000e+00 : f32
    %546 = vector.broadcast %cst_135 : f32 to vector<8x64xf32>
    %547 = arith.addf %546, %545 : vector<8x64xf32>
    %548 = arith.divf %546, %547 : vector<8x64xf32>
    %549 = arith.mulf %540, %385 : vector<8x64xf32>
    %550 = arith.mulf %534, %542 : vector<8x64xf32>
    %551 = arith.addf %549, %550 : vector<8x64xf32>
    %552 = math.tanh %551 : vector<8x64xf32>
    %553 = arith.mulf %548, %552 : vector<8x64xf32>
    %554 = vector.extract_strided_slice %525 {offsets = [8, 0], sizes = [8, 256], strides = [1, 1]} : vector<16x256xf32> to vector<8x256xf32>
    %cst_136 = arith.constant dense<0.000000e+00> : vector<8x256xf32>
    %555 = tpu.matmul %553, %509, %cst_136 {dimension_numbers = #tpu.dot_dimension_numbers<[1], [0], [0], [1], [0, 0, 1, 1], [], []>} : vector<8x64xf32>, vector<64x256xf32>, vector<8x256xf32> -> vector<8x256xf32>
    %556 = arith.addf %554, %555 : vector<8x256xf32>
    %557 = vector.extract_strided_slice %556 {offsets = [0, 0], sizes = [8, 64], strides = [1, 1]} : vector<8x256xf32> to vector<8x64xf32>
    %558 = arith.negf %557 : vector<8x64xf32>
    %559 = math.exp %558 : vector<8x64xf32>
    %cst_137 = arith.constant 1.000000e+00 : f32
    %560 = vector.broadcast %cst_137 : f32 to vector<8x64xf32>
    %561 = arith.addf %560, %559 : vector<8x64xf32>
    %562 = arith.divf %560, %561 : vector<8x64xf32>
    %563 = vector.extract_strided_slice %556 {offsets = [0, 64], sizes = [8, 64], strides = [1, 1]} : vector<8x256xf32> to vector<8x64xf32>
    %564 = arith.negf %563 : vector<8x64xf32>
    %565 = math.exp %564 : vector<8x64xf32>
    %cst_138 = arith.constant 1.000000e+00 : f32
    %566 = vector.broadcast %cst_138 : f32 to vector<8x64xf32>
    %567 = arith.addf %566, %565 : vector<8x64xf32>
    %568 = arith.divf %566, %567 : vector<8x64xf32>
    %569 = vector.extract_strided_slice %556 {offsets = [0, 128], sizes = [8, 64], strides = [1, 1]} : vector<8x256xf32> to vector<8x64xf32>
    %570 = math.tanh %569 : vector<8x64xf32>
    %571 = vector.extract_strided_slice %556 {offsets = [0, 192], sizes = [8, 64], strides = [1, 1]} : vector<8x256xf32> to vector<8x64xf32>
    %572 = arith.negf %571 : vector<8x64xf32>
    %573 = math.exp %572 : vector<8x64xf32>
    %cst_139 = arith.constant 1.000000e+00 : f32
    %574 = vector.broadcast %cst_139 : f32 to vector<8x64xf32>
    %575 = arith.addf %574, %573 : vector<8x64xf32>
    %576 = arith.divf %574, %575 : vector<8x64xf32>
    %577 = arith.mulf %568, %551 : vector<8x64xf32>
    %578 = arith.mulf %562, %570 : vector<8x64xf32>
    %579 = arith.addf %577, %578 : vector<8x64xf32>
    %580 = math.tanh %579 : vector<8x64xf32>
    %581 = arith.mulf %576, %580 : vector<8x64xf32>
    %582 = tpu.concatenate %553, %581 in 0 : vector<8x64xf32>, vector<8x64xf32> -> vector<16x64xf32>
    %583 = tpu.concatenate %581, %553 in 0 : vector<8x64xf32>, vector<8x64xf32> -> vector<16x64xf32>
    %cst_140 = arith.constant dense<0.000000e+00> : vector<16x64xf32>
    %584 = tpu.matmul %582, %511, %cst_140 {dimension_numbers = #tpu.dot_dimension_numbers<[1], [0], [0], [1], [0, 0, 1, 1], [], []>} : vector<16x64xf32>, vector<64x64xf32>, vector<16x64xf32> -> vector<16x64xf32>
    %cst_141 = arith.constant dense<0.000000e+00> : vector<16x64xf32>
    %585 = tpu.matmul %583, %512, %cst_141 {dimension_numbers = #tpu.dot_dimension_numbers<[1], [0], [0], [1], [0, 0, 1, 1], [], []>} : vector<16x64xf32>, vector<64x64xf32>, vector<16x64xf32> -> vector<16x64xf32>
    %586 = arith.addf %584, %585 : vector<16x64xf32>
    %587 = vector.broadcast %513 : vector<1x64xf32> to vector<16x64xf32>
    %588 = arith.addf %586, %587 : vector<16x64xf32>
    %cst_142 = arith.constant dense<0.000000e+00> : vector<16xf32>
    %589 = vector.multi_reduction <add>, %588, %cst_142 [1] : vector<16x64xf32> to vector<16xf32>
    %590 = vector.shape_cast %589 : vector<16xf32> to vector<16x1xf32>
    %591 = arith.mulf %588, %588 : vector<16x64xf32>
    %cst_143 = arith.constant dense<0.000000e+00> : vector<16xf32>
    %592 = vector.multi_reduction <add>, %591, %cst_143 [1] : vector<16x64xf32> to vector<16xf32>
    %593 = vector.shape_cast %592 : vector<16xf32> to vector<16x1xf32>
    %594 = vector.extract_strided_slice %590 {offsets = [0, 0], sizes = [8, 1], strides = [1, 1]} : vector<16x1xf32> to vector<8x1xf32>
    %cst_144 = arith.constant 0.000000e+00 : f32
    %595 = vector.broadcast %cst_144 : f32 to vector<8x1xf32>
    %596 = arith.addf %595, %594 : vector<8x1xf32>
    %597 = vector.extract_strided_slice %590 {offsets = [8, 0], sizes = [8, 1], strides = [1, 1]} : vector<16x1xf32> to vector<8x1xf32>
    %598 = arith.addf %596, %597 : vector<8x1xf32>
    %cst_145 = arith.constant 7.812500e-03 : f32
    %599 = vector.broadcast %cst_145 : f32 to vector<8x1xf32>
    %600 = arith.mulf %598, %599 : vector<8x1xf32>
    %601 = vector.extract_strided_slice %593 {offsets = [0, 0], sizes = [8, 1], strides = [1, 1]} : vector<16x1xf32> to vector<8x1xf32>
    %cst_146 = arith.constant 0.000000e+00 : f32
    %602 = vector.broadcast %cst_146 : f32 to vector<8x1xf32>
    %603 = arith.addf %602, %601 : vector<8x1xf32>
    %604 = vector.extract_strided_slice %593 {offsets = [8, 0], sizes = [8, 1], strides = [1, 1]} : vector<16x1xf32> to vector<8x1xf32>
    %605 = arith.addf %603, %604 : vector<8x1xf32>
    %cst_147 = arith.constant 7.812500e-03 : f32
    %606 = vector.broadcast %cst_147 : f32 to vector<8x1xf32>
    %607 = arith.mulf %605, %606 : vector<8x1xf32>
    %608 = arith.mulf %600, %600 : vector<8x1xf32>
    %609 = arith.subf %607, %608 : vector<8x1xf32>
    %cst_148 = arith.constant 0.000000e+00 : f32
    %610 = vector.broadcast %cst_148 : f32 to vector<8x1xf32>
    %611 = arith.maximumf %609, %610 : vector<8x1xf32>
    %cst_149 = arith.constant 9.99999993E-9 : f32
    %612 = vector.broadcast %cst_149 : f32 to vector<8x1xf32>
    %613 = arith.addf %611, %612 : vector<8x1xf32>
    %614 = math.rsqrt %613 : vector<8x1xf32>
    %615 = vector.broadcast %514 : vector<1x64xf32> to vector<8x64xf32>
    %616 = vector.broadcast %614 : vector<8x1xf32> to vector<8x64xf32>
    %617 = arith.mulf %615, %616 : vector<8x64xf32>
    %618 = vector.broadcast %600 : vector<8x1xf32> to vector<8x64xf32>
    %619 = arith.mulf %617, %618 : vector<8x64xf32>
    %620 = vector.broadcast %515 : vector<1x64xf32> to vector<8x64xf32>
    %621 = arith.subf %620, %619 : vector<8x64xf32>
    %622 = vector.extract_strided_slice %588 {offsets = [0, 0], sizes = [8, 64], strides = [1, 1]} : vector<16x64xf32> to vector<8x64xf32>
    %623 = arith.mulf %617, %622 : vector<8x64xf32>
    %624 = arith.addf %383, %623 : vector<8x64xf32>
    %625 = arith.addf %624, %621 : vector<8x64xf32>
    %626 = vector.extract_strided_slice %588 {offsets = [8, 0], sizes = [8, 64], strides = [1, 1]} : vector<16x64xf32> to vector<8x64xf32>
    %627 = arith.mulf %617, %626 : vector<8x64xf32>
    %628 = arith.addf %384, %627 : vector<8x64xf32>
    %629 = arith.addf %628, %621 : vector<8x64xf32>
    %630 = tpu.concatenate %503, %507 in 0 : vector<8x64xf32>, vector<8x64xf32> -> vector<16x64xf32>
    %631 = tpu.concatenate %625, %629 in 0 : vector<8x64xf32>, vector<8x64xf32> -> vector<16x64xf32>
    %c0_150 = arith.constant 0 : index
    %c0_151 = arith.constant 0 : index
    %632 = vector.load %arg10[%c0_150, %c0_151] : memref<16x256xf32, #tpu.memory_space<vmem>>, vector<16x256xf32>
    %c0_152 = arith.constant 0 : index
    %c0_153 = arith.constant 0 : index
    %633 = vector.load %arg11[%c0_152, %c0_153] : memref<64x256xf32, #tpu.memory_space<vmem>>, vector<64x256xf32>
    %c0_154 = arith.constant 0 : index
    %c0_155 = arith.constant 0 : index
    %634 = vector.load %arg12[%c0_154, %c0_155] : memref<1x256xf32, #tpu.memory_space<vmem>>, vector<1x256xf32>
    %c0_156 = arith.constant 0 : index
    %c0_157 = arith.constant 0 : index
    %635 = vector.load %arg13[%c0_156, %c0_157] : memref<64x16xf32, #tpu.memory_space<vmem>>, vector<64x16xf32>
    %c0_158 = arith.constant 0 : index
    %c0_159 = arith.constant 0 : index
    %636 = vector.load %arg14[%c0_158, %c0_159] : memref<64x16xf32, #tpu.memory_space<vmem>>, vector<64x16xf32>
    %c0_160 = arith.constant 0 : index
    %c0_161 = arith.constant 0 : index
    %637 = vector.load %arg15[%c0_160, %c0_161] : memref<1x16xf32, #tpu.memory_space<vmem>>, vector<1x16xf32>
    %c0_162 = arith.constant 0 : index
    %c0_163 = arith.constant 0 : index
    %638 = vector.load %arg16[%c0_162, %c0_163] : memref<1x16xf32, #tpu.memory_space<vmem>>, vector<1x16xf32>
    %c0_164 = arith.constant 0 : index
    %c0_165 = arith.constant 0 : index
    %639 = vector.load %arg17[%c0_164, %c0_165] : memref<1x16xf32, #tpu.memory_space<vmem>>, vector<1x16xf32>
    %640 = tpu.concatenate %352, %356, %360, %364, %368, %372, %376, %380 in 0 : vector<16x16xf32>, vector<16x16xf32>, vector<16x16xf32>, vector<16x16xf32>, vector<16x16xf32>, vector<16x16xf32>, vector<16x16xf32>, vector<16x16xf32> -> vector<128x16xf32>
    %cst_166 = arith.constant dense<0.000000e+00> : vector<128x256xf32>
    %641 = tpu.matmul %640, %632, %cst_166 {dimension_numbers = #tpu.dot_dimension_numbers<[1], [0], [0], [1], [0, 0, 1, 1], [], []>} : vector<128x16xf32>, vector<16x256xf32>, vector<128x256xf32> -> vector<128x256xf32>
    %642 = vector.extract_strided_slice %641 {offsets = [112, 0], sizes = [16, 256], strides = [1, 1]} : vector<128x256xf32> to vector<16x256xf32>
    %643 = vector.extract_strided_slice %641 {offsets = [96, 0], sizes = [16, 256], strides = [1, 1]} : vector<128x256xf32> to vector<16x256xf32>
    %644 = vector.extract_strided_slice %641 {offsets = [80, 0], sizes = [16, 256], strides = [1, 1]} : vector<128x256xf32> to vector<16x256xf32>
    %645 = vector.extract_strided_slice %641 {offsets = [64, 0], sizes = [16, 256], strides = [1, 1]} : vector<128x256xf32> to vector<16x256xf32>
    %646 = vector.extract_strided_slice %641 {offsets = [48, 0], sizes = [16, 256], strides = [1, 1]} : vector<128x256xf32> to vector<16x256xf32>
    %647 = vector.extract_strided_slice %641 {offsets = [32, 0], sizes = [16, 256], strides = [1, 1]} : vector<128x256xf32> to vector<16x256xf32>
    %648 = vector.extract_strided_slice %641 {offsets = [16, 0], sizes = [16, 256], strides = [1, 1]} : vector<128x256xf32> to vector<16x256xf32>
    %649 = vector.extract_strided_slice %641 {offsets = [0, 0], sizes = [16, 256], strides = [1, 1]} : vector<128x256xf32> to vector<16x256xf32>
    %650 = tpu.concatenate %642, %643, %644, %645, %646, %647, %648, %649 in 0 : vector<16x256xf32>, vector<16x256xf32>, vector<16x256xf32>, vector<16x256xf32>, vector<16x256xf32>, vector<16x256xf32>, vector<16x256xf32>, vector<16x256xf32> -> vector<128x256xf32>
    %651 = vector.shape_cast %18 : vector<1x256xi1> to vector<1x256xi1>
    %652 = vector.broadcast %651 : vector<1x256xi1> to vector<128x256xi1>
    %653 = arith.select %652, %641, %650 : vector<128x256xi1>, vector<128x256xf32>
    %654 = vector.broadcast %634 : vector<1x256xf32> to vector<128x256xf32>
    %655 = arith.addf %653, %654 : vector<128x256xf32>
    %656 = vector.extract_strided_slice %655 {offsets = [0, 0], sizes = [16, 256], strides = [1, 1]} : vector<128x256xf32> to vector<16x256xf32>
    %cst_167 = arith.constant dense<0.000000e+00> : vector<16x256xf32>
    %657 = tpu.matmul %630, %633, %cst_167 {dimension_numbers = #tpu.dot_dimension_numbers<[1], [0], [0], [1], [0, 0, 1, 1], [], []>} : vector<16x64xf32>, vector<64x256xf32>, vector<16x256xf32> -> vector<16x256xf32>
    %658 = arith.addf %656, %657 : vector<16x256xf32>
    %659 = vector.extract_strided_slice %658 {offsets = [0, 0], sizes = [16, 64], strides = [1, 1]} : vector<16x256xf32> to vector<16x64xf32>
    %660 = arith.negf %659 : vector<16x64xf32>
    %661 = math.exp %660 : vector<16x64xf32>
    %cst_168 = arith.constant 1.000000e+00 : f32
    %662 = vector.broadcast %cst_168 : f32 to vector<16x64xf32>
    %663 = arith.addf %662, %661 : vector<16x64xf32>
    %664 = arith.divf %662, %663 : vector<16x64xf32>
    %665 = vector.extract_strided_slice %658 {offsets = [0, 64], sizes = [16, 64], strides = [1, 1]} : vector<16x256xf32> to vector<16x64xf32>
    %666 = arith.negf %665 : vector<16x64xf32>
    %667 = math.exp %666 : vector<16x64xf32>
    %cst_169 = arith.constant 1.000000e+00 : f32
    %668 = vector.broadcast %cst_169 : f32 to vector<16x64xf32>
    %669 = arith.addf %668, %667 : vector<16x64xf32>
    %670 = arith.divf %668, %669 : vector<16x64xf32>
    %671 = vector.extract_strided_slice %658 {offsets = [0, 128], sizes = [16, 64], strides = [1, 1]} : vector<16x256xf32> to vector<16x64xf32>
    %672 = math.tanh %671 : vector<16x64xf32>
    %673 = vector.extract_strided_slice %658 {offsets = [0, 192], sizes = [16, 64], strides = [1, 1]} : vector<16x256xf32> to vector<16x64xf32>
    %674 = arith.negf %673 : vector<16x64xf32>
    %675 = math.exp %674 : vector<16x64xf32>
    %cst_170 = arith.constant 1.000000e+00 : f32
    %676 = vector.broadcast %cst_170 : f32 to vector<16x64xf32>
    %677 = arith.addf %676, %675 : vector<16x64xf32>
    %678 = arith.divf %676, %677 : vector<16x64xf32>
    %679 = arith.mulf %670, %631 : vector<16x64xf32>
    %680 = arith.mulf %664, %672 : vector<16x64xf32>
    %681 = arith.addf %679, %680 : vector<16x64xf32>
    %682 = math.tanh %681 : vector<16x64xf32>
    %683 = arith.mulf %678, %682 : vector<16x64xf32>
    %684 = vector.extract_strided_slice %655 {offsets = [16, 0], sizes = [16, 256], strides = [1, 1]} : vector<128x256xf32> to vector<16x256xf32>
    %cst_171 = arith.constant dense<0.000000e+00> : vector<16x256xf32>
    %685 = tpu.matmul %683, %633, %cst_171 {dimension_numbers = #tpu.dot_dimension_numbers<[1], [0], [0], [1], [0, 0, 1, 1], [], []>} : vector<16x64xf32>, vector<64x256xf32>, vector<16x256xf32> -> vector<16x256xf32>
    %686 = arith.addf %684, %685 : vector<16x256xf32>
    %687 = vector.extract_strided_slice %686 {offsets = [0, 0], sizes = [16, 64], strides = [1, 1]} : vector<16x256xf32> to vector<16x64xf32>
    %688 = arith.negf %687 : vector<16x64xf32>
    %689 = math.exp %688 : vector<16x64xf32>
    %cst_172 = arith.constant 1.000000e+00 : f32
    %690 = vector.broadcast %cst_172 : f32 to vector<16x64xf32>
    %691 = arith.addf %690, %689 : vector<16x64xf32>
    %692 = arith.divf %690, %691 : vector<16x64xf32>
    %693 = vector.extract_strided_slice %686 {offsets = [0, 64], sizes = [16, 64], strides = [1, 1]} : vector<16x256xf32> to vector<16x64xf32>
    %694 = arith.negf %693 : vector<16x64xf32>
    %695 = math.exp %694 : vector<16x64xf32>
    %cst_173 = arith.constant 1.000000e+00 : f32
    %696 = vector.broadcast %cst_173 : f32 to vector<16x64xf32>
    %697 = arith.addf %696, %695 : vector<16x64xf32>
    %698 = arith.divf %696, %697 : vector<16x64xf32>
    %699 = vector.extract_strided_slice %686 {offsets = [0, 128], sizes = [16, 64], strides = [1, 1]} : vector<16x256xf32> to vector<16x64xf32>
    %700 = math.tanh %699 : vector<16x64xf32>
    %701 = vector.extract_strided_slice %686 {offsets = [0, 192], sizes = [16, 64], strides = [1, 1]} : vector<16x256xf32> to vector<16x64xf32>
    %702 = arith.negf %701 : vector<16x64xf32>
    %703 = math.exp %702 : vector<16x64xf32>
    %cst_174 = arith.constant 1.000000e+00 : f32
    %704 = vector.broadcast %cst_174 : f32 to vector<16x64xf32>
    %705 = arith.addf %704, %703 : vector<16x64xf32>
    %706 = arith.divf %704, %705 : vector<16x64xf32>
    %707 = arith.mulf %698, %681 : vector<16x64xf32>
    %708 = arith.mulf %692, %700 : vector<16x64xf32>
    %709 = arith.addf %707, %708 : vector<16x64xf32>
    %710 = math.tanh %709 : vector<16x64xf32>
    %711 = arith.mulf %706, %710 : vector<16x64xf32>
    %712 = vector.extract_strided_slice %655 {offsets = [32, 0], sizes = [16, 256], strides = [1, 1]} : vector<128x256xf32> to vector<16x256xf32>
    %cst_175 = arith.constant dense<0.000000e+00> : vector<16x256xf32>
    %713 = tpu.matmul %711, %633, %cst_175 {dimension_numbers = #tpu.dot_dimension_numbers<[1], [0], [0], [1], [0, 0, 1, 1], [], []>} : vector<16x64xf32>, vector<64x256xf32>, vector<16x256xf32> -> vector<16x256xf32>
    %714 = arith.addf %712, %713 : vector<16x256xf32>
    %715 = vector.extract_strided_slice %714 {offsets = [0, 0], sizes = [16, 64], strides = [1, 1]} : vector<16x256xf32> to vector<16x64xf32>
    %716 = arith.negf %715 : vector<16x64xf32>
    %717 = math.exp %716 : vector<16x64xf32>
    %cst_176 = arith.constant 1.000000e+00 : f32
    %718 = vector.broadcast %cst_176 : f32 to vector<16x64xf32>
    %719 = arith.addf %718, %717 : vector<16x64xf32>
    %720 = arith.divf %718, %719 : vector<16x64xf32>
    %721 = vector.extract_strided_slice %714 {offsets = [0, 64], sizes = [16, 64], strides = [1, 1]} : vector<16x256xf32> to vector<16x64xf32>
    %722 = arith.negf %721 : vector<16x64xf32>
    %723 = math.exp %722 : vector<16x64xf32>
    %cst_177 = arith.constant 1.000000e+00 : f32
    %724 = vector.broadcast %cst_177 : f32 to vector<16x64xf32>
    %725 = arith.addf %724, %723 : vector<16x64xf32>
    %726 = arith.divf %724, %725 : vector<16x64xf32>
    %727 = vector.extract_strided_slice %714 {offsets = [0, 128], sizes = [16, 64], strides = [1, 1]} : vector<16x256xf32> to vector<16x64xf32>
    %728 = math.tanh %727 : vector<16x64xf32>
    %729 = vector.extract_strided_slice %714 {offsets = [0, 192], sizes = [16, 64], strides = [1, 1]} : vector<16x256xf32> to vector<16x64xf32>
    %730 = arith.negf %729 : vector<16x64xf32>
    %731 = math.exp %730 : vector<16x64xf32>
    %cst_178 = arith.constant 1.000000e+00 : f32
    %732 = vector.broadcast %cst_178 : f32 to vector<16x64xf32>
    %733 = arith.addf %732, %731 : vector<16x64xf32>
    %734 = arith.divf %732, %733 : vector<16x64xf32>
    %735 = arith.mulf %726, %709 : vector<16x64xf32>
    %736 = arith.mulf %720, %728 : vector<16x64xf32>
    %737 = arith.addf %735, %736 : vector<16x64xf32>
    %738 = math.tanh %737 : vector<16x64xf32>
    %739 = arith.mulf %734, %738 : vector<16x64xf32>
    %740 = vector.extract_strided_slice %655 {offsets = [48, 0], sizes = [16, 256], strides = [1, 1]} : vector<128x256xf32> to vector<16x256xf32>
    %cst_179 = arith.constant dense<0.000000e+00> : vector<16x256xf32>
    %741 = tpu.matmul %739, %633, %cst_179 {dimension_numbers = #tpu.dot_dimension_numbers<[1], [0], [0], [1], [0, 0, 1, 1], [], []>} : vector<16x64xf32>, vector<64x256xf32>, vector<16x256xf32> -> vector<16x256xf32>
    %742 = arith.addf %740, %741 : vector<16x256xf32>
    %743 = vector.extract_strided_slice %742 {offsets = [0, 0], sizes = [16, 64], strides = [1, 1]} : vector<16x256xf32> to vector<16x64xf32>
    %744 = arith.negf %743 : vector<16x64xf32>
    %745 = math.exp %744 : vector<16x64xf32>
    %cst_180 = arith.constant 1.000000e+00 : f32
    %746 = vector.broadcast %cst_180 : f32 to vector<16x64xf32>
    %747 = arith.addf %746, %745 : vector<16x64xf32>
    %748 = arith.divf %746, %747 : vector<16x64xf32>
    %749 = vector.extract_strided_slice %742 {offsets = [0, 64], sizes = [16, 64], strides = [1, 1]} : vector<16x256xf32> to vector<16x64xf32>
    %750 = arith.negf %749 : vector<16x64xf32>
    %751 = math.exp %750 : vector<16x64xf32>
    %cst_181 = arith.constant 1.000000e+00 : f32
    %752 = vector.broadcast %cst_181 : f32 to vector<16x64xf32>
    %753 = arith.addf %752, %751 : vector<16x64xf32>
    %754 = arith.divf %752, %753 : vector<16x64xf32>
    %755 = vector.extract_strided_slice %742 {offsets = [0, 128], sizes = [16, 64], strides = [1, 1]} : vector<16x256xf32> to vector<16x64xf32>
    %756 = math.tanh %755 : vector<16x64xf32>
    %757 = vector.extract_strided_slice %742 {offsets = [0, 192], sizes = [16, 64], strides = [1, 1]} : vector<16x256xf32> to vector<16x64xf32>
    %758 = arith.negf %757 : vector<16x64xf32>
    %759 = math.exp %758 : vector<16x64xf32>
    %cst_182 = arith.constant 1.000000e+00 : f32
    %760 = vector.broadcast %cst_182 : f32 to vector<16x64xf32>
    %761 = arith.addf %760, %759 : vector<16x64xf32>
    %762 = arith.divf %760, %761 : vector<16x64xf32>
    %763 = arith.mulf %754, %737 : vector<16x64xf32>
    %764 = arith.mulf %748, %756 : vector<16x64xf32>
    %765 = arith.addf %763, %764 : vector<16x64xf32>
    %766 = math.tanh %765 : vector<16x64xf32>
    %767 = arith.mulf %762, %766 : vector<16x64xf32>
    %768 = vector.extract_strided_slice %655 {offsets = [64, 0], sizes = [16, 256], strides = [1, 1]} : vector<128x256xf32> to vector<16x256xf32>
    %cst_183 = arith.constant dense<0.000000e+00> : vector<16x256xf32>
    %769 = tpu.matmul %767, %633, %cst_183 {dimension_numbers = #tpu.dot_dimension_numbers<[1], [0], [0], [1], [0, 0, 1, 1], [], []>} : vector<16x64xf32>, vector<64x256xf32>, vector<16x256xf32> -> vector<16x256xf32>
    %770 = arith.addf %768, %769 : vector<16x256xf32>
    %771 = vector.extract_strided_slice %770 {offsets = [0, 0], sizes = [16, 64], strides = [1, 1]} : vector<16x256xf32> to vector<16x64xf32>
    %772 = arith.negf %771 : vector<16x64xf32>
    %773 = math.exp %772 : vector<16x64xf32>
    %cst_184 = arith.constant 1.000000e+00 : f32
    %774 = vector.broadcast %cst_184 : f32 to vector<16x64xf32>
    %775 = arith.addf %774, %773 : vector<16x64xf32>
    %776 = arith.divf %774, %775 : vector<16x64xf32>
    %777 = vector.extract_strided_slice %770 {offsets = [0, 64], sizes = [16, 64], strides = [1, 1]} : vector<16x256xf32> to vector<16x64xf32>
    %778 = arith.negf %777 : vector<16x64xf32>
    %779 = math.exp %778 : vector<16x64xf32>
    %cst_185 = arith.constant 1.000000e+00 : f32
    %780 = vector.broadcast %cst_185 : f32 to vector<16x64xf32>
    %781 = arith.addf %780, %779 : vector<16x64xf32>
    %782 = arith.divf %780, %781 : vector<16x64xf32>
    %783 = vector.extract_strided_slice %770 {offsets = [0, 128], sizes = [16, 64], strides = [1, 1]} : vector<16x256xf32> to vector<16x64xf32>
    %784 = math.tanh %783 : vector<16x64xf32>
    %785 = vector.extract_strided_slice %770 {offsets = [0, 192], sizes = [16, 64], strides = [1, 1]} : vector<16x256xf32> to vector<16x64xf32>
    %786 = arith.negf %785 : vector<16x64xf32>
    %787 = math.exp %786 : vector<16x64xf32>
    %cst_186 = arith.constant 1.000000e+00 : f32
    %788 = vector.broadcast %cst_186 : f32 to vector<16x64xf32>
    %789 = arith.addf %788, %787 : vector<16x64xf32>
    %790 = arith.divf %788, %789 : vector<16x64xf32>
    %791 = arith.mulf %782, %765 : vector<16x64xf32>
    %792 = arith.mulf %776, %784 : vector<16x64xf32>
    %793 = arith.addf %791, %792 : vector<16x64xf32>
    %794 = math.tanh %793 : vector<16x64xf32>
    %795 = arith.mulf %790, %794 : vector<16x64xf32>
    %796 = vector.extract_strided_slice %655 {offsets = [80, 0], sizes = [16, 256], strides = [1, 1]} : vector<128x256xf32> to vector<16x256xf32>
    %cst_187 = arith.constant dense<0.000000e+00> : vector<16x256xf32>
    %797 = tpu.matmul %795, %633, %cst_187 {dimension_numbers = #tpu.dot_dimension_numbers<[1], [0], [0], [1], [0, 0, 1, 1], [], []>} : vector<16x64xf32>, vector<64x256xf32>, vector<16x256xf32> -> vector<16x256xf32>
    %798 = arith.addf %796, %797 : vector<16x256xf32>
    %799 = vector.extract_strided_slice %798 {offsets = [0, 0], sizes = [16, 64], strides = [1, 1]} : vector<16x256xf32> to vector<16x64xf32>
    %800 = arith.negf %799 : vector<16x64xf32>
    %801 = math.exp %800 : vector<16x64xf32>
    %cst_188 = arith.constant 1.000000e+00 : f32
    %802 = vector.broadcast %cst_188 : f32 to vector<16x64xf32>
    %803 = arith.addf %802, %801 : vector<16x64xf32>
    %804 = arith.divf %802, %803 : vector<16x64xf32>
    %805 = vector.extract_strided_slice %798 {offsets = [0, 64], sizes = [16, 64], strides = [1, 1]} : vector<16x256xf32> to vector<16x64xf32>
    %806 = arith.negf %805 : vector<16x64xf32>
    %807 = math.exp %806 : vector<16x64xf32>
    %cst_189 = arith.constant 1.000000e+00 : f32
    %808 = vector.broadcast %cst_189 : f32 to vector<16x64xf32>
    %809 = arith.addf %808, %807 : vector<16x64xf32>
    %810 = arith.divf %808, %809 : vector<16x64xf32>
    %811 = vector.extract_strided_slice %798 {offsets = [0, 128], sizes = [16, 64], strides = [1, 1]} : vector<16x256xf32> to vector<16x64xf32>
    %812 = math.tanh %811 : vector<16x64xf32>
    %813 = vector.extract_strided_slice %798 {offsets = [0, 192], sizes = [16, 64], strides = [1, 1]} : vector<16x256xf32> to vector<16x64xf32>
    %814 = arith.negf %813 : vector<16x64xf32>
    %815 = math.exp %814 : vector<16x64xf32>
    %cst_190 = arith.constant 1.000000e+00 : f32
    %816 = vector.broadcast %cst_190 : f32 to vector<16x64xf32>
    %817 = arith.addf %816, %815 : vector<16x64xf32>
    %818 = arith.divf %816, %817 : vector<16x64xf32>
    %819 = arith.mulf %810, %793 : vector<16x64xf32>
    %820 = arith.mulf %804, %812 : vector<16x64xf32>
    %821 = arith.addf %819, %820 : vector<16x64xf32>
    %822 = math.tanh %821 : vector<16x64xf32>
    %823 = arith.mulf %818, %822 : vector<16x64xf32>
    %824 = vector.extract_strided_slice %655 {offsets = [96, 0], sizes = [16, 256], strides = [1, 1]} : vector<128x256xf32> to vector<16x256xf32>
    %cst_191 = arith.constant dense<0.000000e+00> : vector<16x256xf32>
    %825 = tpu.matmul %823, %633, %cst_191 {dimension_numbers = #tpu.dot_dimension_numbers<[1], [0], [0], [1], [0, 0, 1, 1], [], []>} : vector<16x64xf32>, vector<64x256xf32>, vector<16x256xf32> -> vector<16x256xf32>
    %826 = arith.addf %824, %825 : vector<16x256xf32>
    %827 = vector.extract_strided_slice %826 {offsets = [0, 0], sizes = [16, 64], strides = [1, 1]} : vector<16x256xf32> to vector<16x64xf32>
    %828 = arith.negf %827 : vector<16x64xf32>
    %829 = math.exp %828 : vector<16x64xf32>
    %cst_192 = arith.constant 1.000000e+00 : f32
    %830 = vector.broadcast %cst_192 : f32 to vector<16x64xf32>
    %831 = arith.addf %830, %829 : vector<16x64xf32>
    %832 = arith.divf %830, %831 : vector<16x64xf32>
    %833 = vector.extract_strided_slice %826 {offsets = [0, 64], sizes = [16, 64], strides = [1, 1]} : vector<16x256xf32> to vector<16x64xf32>
    %834 = arith.negf %833 : vector<16x64xf32>
    %835 = math.exp %834 : vector<16x64xf32>
    %cst_193 = arith.constant 1.000000e+00 : f32
    %836 = vector.broadcast %cst_193 : f32 to vector<16x64xf32>
    %837 = arith.addf %836, %835 : vector<16x64xf32>
    %838 = arith.divf %836, %837 : vector<16x64xf32>
    %839 = vector.extract_strided_slice %826 {offsets = [0, 128], sizes = [16, 64], strides = [1, 1]} : vector<16x256xf32> to vector<16x64xf32>
    %840 = math.tanh %839 : vector<16x64xf32>
    %841 = vector.extract_strided_slice %826 {offsets = [0, 192], sizes = [16, 64], strides = [1, 1]} : vector<16x256xf32> to vector<16x64xf32>
    %842 = arith.negf %841 : vector<16x64xf32>
    %843 = math.exp %842 : vector<16x64xf32>
    %cst_194 = arith.constant 1.000000e+00 : f32
    %844 = vector.broadcast %cst_194 : f32 to vector<16x64xf32>
    %845 = arith.addf %844, %843 : vector<16x64xf32>
    %846 = arith.divf %844, %845 : vector<16x64xf32>
    %847 = arith.mulf %838, %821 : vector<16x64xf32>
    %848 = arith.mulf %832, %840 : vector<16x64xf32>
    %849 = arith.addf %847, %848 : vector<16x64xf32>
    %850 = math.tanh %849 : vector<16x64xf32>
    %851 = arith.mulf %846, %850 : vector<16x64xf32>
    %852 = vector.extract_strided_slice %655 {offsets = [112, 0], sizes = [16, 256], strides = [1, 1]} : vector<128x256xf32> to vector<16x256xf32>
    %cst_195 = arith.constant dense<0.000000e+00> : vector<16x256xf32>
    %853 = tpu.matmul %851, %633, %cst_195 {dimension_numbers = #tpu.dot_dimension_numbers<[1], [0], [0], [1], [0, 0, 1, 1], [], []>} : vector<16x64xf32>, vector<64x256xf32>, vector<16x256xf32> -> vector<16x256xf32>
    %854 = arith.addf %852, %853 : vector<16x256xf32>
    %855 = vector.extract_strided_slice %854 {offsets = [0, 0], sizes = [16, 64], strides = [1, 1]} : vector<16x256xf32> to vector<16x64xf32>
    %856 = arith.negf %855 : vector<16x64xf32>
    %857 = math.exp %856 : vector<16x64xf32>
    %cst_196 = arith.constant 1.000000e+00 : f32
    %858 = vector.broadcast %cst_196 : f32 to vector<16x64xf32>
    %859 = arith.addf %858, %857 : vector<16x64xf32>
    %860 = arith.divf %858, %859 : vector<16x64xf32>
    %861 = vector.extract_strided_slice %854 {offsets = [0, 64], sizes = [16, 64], strides = [1, 1]} : vector<16x256xf32> to vector<16x64xf32>
    %862 = arith.negf %861 : vector<16x64xf32>
    %863 = math.exp %862 : vector<16x64xf32>
    %cst_197 = arith.constant 1.000000e+00 : f32
    %864 = vector.broadcast %cst_197 : f32 to vector<16x64xf32>
    %865 = arith.addf %864, %863 : vector<16x64xf32>
    %866 = arith.divf %864, %865 : vector<16x64xf32>
    %867 = vector.extract_strided_slice %854 {offsets = [0, 128], sizes = [16, 64], strides = [1, 1]} : vector<16x256xf32> to vector<16x64xf32>
    %868 = math.tanh %867 : vector<16x64xf32>
    %869 = vector.extract_strided_slice %854 {offsets = [0, 192], sizes = [16, 64], strides = [1, 1]} : vector<16x256xf32> to vector<16x64xf32>
    %870 = arith.negf %869 : vector<16x64xf32>
    %871 = math.exp %870 : vector<16x64xf32>
    %cst_198 = arith.constant 1.000000e+00 : f32
    %872 = vector.broadcast %cst_198 : f32 to vector<16x64xf32>
    %873 = arith.addf %872, %871 : vector<16x64xf32>
    %874 = arith.divf %872, %873 : vector<16x64xf32>
    %875 = arith.mulf %866, %849 : vector<16x64xf32>
    %876 = arith.mulf %860, %868 : vector<16x64xf32>
    %877 = arith.addf %875, %876 : vector<16x64xf32>
    %878 = math.tanh %877 : vector<16x64xf32>
    %879 = arith.mulf %874, %878 : vector<16x64xf32>
    %880 = tpu.concatenate %683, %711, %739, %767, %795, %823, %851, %879 in 0 : vector<16x64xf32>, vector<16x64xf32>, vector<16x64xf32>, vector<16x64xf32>, vector<16x64xf32>, vector<16x64xf32>, vector<16x64xf32>, vector<16x64xf32> -> vector<128x64xf32>
    %881 = tpu.concatenate %879, %851, %823, %795, %767, %739, %711, %683 in 0 : vector<16x64xf32>, vector<16x64xf32>, vector<16x64xf32>, vector<16x64xf32>, vector<16x64xf32>, vector<16x64xf32>, vector<16x64xf32>, vector<16x64xf32> -> vector<128x64xf32>
    %cst_199 = arith.constant dense<0.000000e+00> : vector<128x16xf32>
    %882 = tpu.matmul %880, %635, %cst_199 {dimension_numbers = #tpu.dot_dimension_numbers<[1], [0], [0], [1], [0, 0, 1, 1], [], []>} : vector<128x64xf32>, vector<64x16xf32>, vector<128x16xf32> -> vector<128x16xf32>
    %cst_200 = arith.constant dense<0.000000e+00> : vector<128x16xf32>
    %883 = tpu.matmul %881, %636, %cst_200 {dimension_numbers = #tpu.dot_dimension_numbers<[1], [0], [0], [1], [0, 0, 1, 1], [], []>} : vector<128x64xf32>, vector<64x16xf32>, vector<128x16xf32> -> vector<128x16xf32>
    %884 = arith.addf %882, %883 : vector<128x16xf32>
    %885 = vector.broadcast %637 : vector<1x16xf32> to vector<128x16xf32>
    %886 = arith.addf %884, %885 : vector<128x16xf32>
    %cst_201 = arith.constant dense<0.000000e+00> : vector<128xf32>
    %887 = vector.multi_reduction <add>, %886, %cst_201 [1] : vector<128x16xf32> to vector<128xf32>
    %888 = vector.shape_cast %887 : vector<128xf32> to vector<128x1xf32>
    %889 = arith.mulf %886, %886 : vector<128x16xf32>
    %cst_202 = arith.constant dense<0.000000e+00> : vector<128xf32>
    %890 = vector.multi_reduction <add>, %889, %cst_202 [1] : vector<128x16xf32> to vector<128xf32>
    %891 = vector.shape_cast %890 : vector<128xf32> to vector<128x1xf32>
    %892 = vector.extract_strided_slice %888 {offsets = [0, 0], sizes = [16, 1], strides = [1, 1]} : vector<128x1xf32> to vector<16x1xf32>
    %cst_203 = arith.constant 0.000000e+00 : f32
    %893 = vector.broadcast %cst_203 : f32 to vector<16x1xf32>
    %894 = arith.addf %893, %892 : vector<16x1xf32>
    %895 = vector.extract_strided_slice %888 {offsets = [16, 0], sizes = [16, 1], strides = [1, 1]} : vector<128x1xf32> to vector<16x1xf32>
    %896 = arith.addf %894, %895 : vector<16x1xf32>
    %897 = vector.extract_strided_slice %888 {offsets = [32, 0], sizes = [16, 1], strides = [1, 1]} : vector<128x1xf32> to vector<16x1xf32>
    %898 = arith.addf %896, %897 : vector<16x1xf32>
    %899 = vector.extract_strided_slice %888 {offsets = [48, 0], sizes = [16, 1], strides = [1, 1]} : vector<128x1xf32> to vector<16x1xf32>
    %900 = arith.addf %898, %899 : vector<16x1xf32>
    %901 = vector.extract_strided_slice %888 {offsets = [64, 0], sizes = [16, 1], strides = [1, 1]} : vector<128x1xf32> to vector<16x1xf32>
    %902 = arith.addf %900, %901 : vector<16x1xf32>
    %903 = vector.extract_strided_slice %888 {offsets = [80, 0], sizes = [16, 1], strides = [1, 1]} : vector<128x1xf32> to vector<16x1xf32>
    %904 = arith.addf %902, %903 : vector<16x1xf32>
    %905 = vector.extract_strided_slice %888 {offsets = [96, 0], sizes = [16, 1], strides = [1, 1]} : vector<128x1xf32> to vector<16x1xf32>
    %906 = arith.addf %904, %905 : vector<16x1xf32>
    %907 = vector.extract_strided_slice %888 {offsets = [112, 0], sizes = [16, 1], strides = [1, 1]} : vector<128x1xf32> to vector<16x1xf32>
    %908 = arith.addf %906, %907 : vector<16x1xf32>
    %cst_204 = arith.constant 7.812500e-03 : f32
    %909 = vector.broadcast %cst_204 : f32 to vector<16x1xf32>
    %910 = arith.mulf %908, %909 : vector<16x1xf32>
    %911 = vector.extract_strided_slice %891 {offsets = [0, 0], sizes = [16, 1], strides = [1, 1]} : vector<128x1xf32> to vector<16x1xf32>
    %cst_205 = arith.constant 0.000000e+00 : f32
    %912 = vector.broadcast %cst_205 : f32 to vector<16x1xf32>
    %913 = arith.addf %912, %911 : vector<16x1xf32>
    %914 = vector.extract_strided_slice %891 {offsets = [16, 0], sizes = [16, 1], strides = [1, 1]} : vector<128x1xf32> to vector<16x1xf32>
    %915 = arith.addf %913, %914 : vector<16x1xf32>
    %916 = vector.extract_strided_slice %891 {offsets = [32, 0], sizes = [16, 1], strides = [1, 1]} : vector<128x1xf32> to vector<16x1xf32>
    %917 = arith.addf %915, %916 : vector<16x1xf32>
    %918 = vector.extract_strided_slice %891 {offsets = [48, 0], sizes = [16, 1], strides = [1, 1]} : vector<128x1xf32> to vector<16x1xf32>
    %919 = arith.addf %917, %918 : vector<16x1xf32>
    %920 = vector.extract_strided_slice %891 {offsets = [64, 0], sizes = [16, 1], strides = [1, 1]} : vector<128x1xf32> to vector<16x1xf32>
    %921 = arith.addf %919, %920 : vector<16x1xf32>
    %922 = vector.extract_strided_slice %891 {offsets = [80, 0], sizes = [16, 1], strides = [1, 1]} : vector<128x1xf32> to vector<16x1xf32>
    %923 = arith.addf %921, %922 : vector<16x1xf32>
    %924 = vector.extract_strided_slice %891 {offsets = [96, 0], sizes = [16, 1], strides = [1, 1]} : vector<128x1xf32> to vector<16x1xf32>
    %925 = arith.addf %923, %924 : vector<16x1xf32>
    %926 = vector.extract_strided_slice %891 {offsets = [112, 0], sizes = [16, 1], strides = [1, 1]} : vector<128x1xf32> to vector<16x1xf32>
    %927 = arith.addf %925, %926 : vector<16x1xf32>
    %cst_206 = arith.constant 7.812500e-03 : f32
    %928 = vector.broadcast %cst_206 : f32 to vector<16x1xf32>
    %929 = arith.mulf %927, %928 : vector<16x1xf32>
    %930 = arith.mulf %910, %910 : vector<16x1xf32>
    %931 = arith.subf %929, %930 : vector<16x1xf32>
    %cst_207 = arith.constant 0.000000e+00 : f32
    %932 = vector.broadcast %cst_207 : f32 to vector<16x1xf32>
    %933 = arith.maximumf %931, %932 : vector<16x1xf32>
    %cst_208 = arith.constant 9.99999993E-9 : f32
    %934 = vector.broadcast %cst_208 : f32 to vector<16x1xf32>
    %935 = arith.addf %933, %934 : vector<16x1xf32>
    %936 = math.rsqrt %935 : vector<16x1xf32>
    %937 = vector.broadcast %638 : vector<1x16xf32> to vector<16x16xf32>
    %938 = vector.broadcast %936 : vector<16x1xf32> to vector<16x16xf32>
    %939 = arith.mulf %937, %938 : vector<16x16xf32>
    %940 = vector.broadcast %910 : vector<16x1xf32> to vector<16x16xf32>
    %941 = arith.mulf %939, %940 : vector<16x16xf32>
    %942 = vector.broadcast %639 : vector<1x16xf32> to vector<16x16xf32>
    %943 = arith.subf %942, %941 : vector<16x16xf32>
    %944 = vector.extract_strided_slice %886 {offsets = [0, 0], sizes = [16, 16], strides = [1, 1]} : vector<128x16xf32> to vector<16x16xf32>
    %945 = arith.mulf %939, %944 : vector<16x16xf32>
    %946 = arith.addf %352, %945 : vector<16x16xf32>
    %947 = arith.addf %946, %943 : vector<16x16xf32>
    %948 = vector.extract_strided_slice %886 {offsets = [16, 0], sizes = [16, 16], strides = [1, 1]} : vector<128x16xf32> to vector<16x16xf32>
    %949 = arith.mulf %939, %948 : vector<16x16xf32>
    %950 = arith.addf %356, %949 : vector<16x16xf32>
    %951 = arith.addf %950, %943 : vector<16x16xf32>
    %952 = vector.extract_strided_slice %886 {offsets = [32, 0], sizes = [16, 16], strides = [1, 1]} : vector<128x16xf32> to vector<16x16xf32>
    %953 = arith.mulf %939, %952 : vector<16x16xf32>
    %954 = arith.addf %360, %953 : vector<16x16xf32>
    %955 = arith.addf %954, %943 : vector<16x16xf32>
    %956 = vector.extract_strided_slice %886 {offsets = [48, 0], sizes = [16, 16], strides = [1, 1]} : vector<128x16xf32> to vector<16x16xf32>
    %957 = arith.mulf %939, %956 : vector<16x16xf32>
    %958 = arith.addf %364, %957 : vector<16x16xf32>
    %959 = arith.addf %958, %943 : vector<16x16xf32>
    %960 = vector.extract_strided_slice %886 {offsets = [64, 0], sizes = [16, 16], strides = [1, 1]} : vector<128x16xf32> to vector<16x16xf32>
    %961 = arith.mulf %939, %960 : vector<16x16xf32>
    %962 = arith.addf %368, %961 : vector<16x16xf32>
    %963 = arith.addf %962, %943 : vector<16x16xf32>
    %964 = vector.extract_strided_slice %886 {offsets = [80, 0], sizes = [16, 16], strides = [1, 1]} : vector<128x16xf32> to vector<16x16xf32>
    %965 = arith.mulf %939, %964 : vector<16x16xf32>
    %966 = arith.addf %372, %965 : vector<16x16xf32>
    %967 = arith.addf %966, %943 : vector<16x16xf32>
    %968 = vector.extract_strided_slice %886 {offsets = [96, 0], sizes = [16, 16], strides = [1, 1]} : vector<128x16xf32> to vector<16x16xf32>
    %969 = arith.mulf %939, %968 : vector<16x16xf32>
    %970 = arith.addf %376, %969 : vector<16x16xf32>
    %971 = arith.addf %970, %943 : vector<16x16xf32>
    %972 = vector.extract_strided_slice %886 {offsets = [112, 0], sizes = [16, 16], strides = [1, 1]} : vector<128x16xf32> to vector<16x16xf32>
    %973 = arith.mulf %939, %972 : vector<16x16xf32>
    %974 = arith.addf %380, %973 : vector<16x16xf32>
    %975 = arith.addf %974, %943 : vector<16x16xf32>
    %976 = tpu.concatenate %947, %951, %955, %959, %963, %967, %971, %975 in 1 : vector<16x16xf32>, vector<16x16xf32>, vector<16x16xf32>, vector<16x16xf32>, vector<16x16xf32>, vector<16x16xf32>, vector<16x16xf32>, vector<16x16xf32> -> vector<16x128xf32>
    %c0_209 = arith.constant 0 : index
    %c0_210 = arith.constant 0 : index
    %977 = vector.load %arg34[%c0_209, %c0_210] : memref<1x1xf32, #tpu.memory_space<vmem>>, vector<1x1xf32>
    %978 = vector.extract %977[0, 0] : f32 from vector<1x1xf32>
    %cst_211 = arith.constant 0.000000e+00 : f32
    %979 = vector.broadcast %cst_211 : f32 to vector<16x128xf32>
    %980 = arith.cmpf oge, %976, %979 : vector<16x128xf32>
    %981 = vector.broadcast %978 : f32 to vector<16x128xf32>
    %982 = arith.mulf %981, %976 : vector<16x128xf32>
    %983 = arith.select %980, %976, %982 : vector<16x128xi1>, vector<16x128xf32>
    %c0_212 = arith.constant 0 : index
    %c0_213 = arith.constant 0 : index
    %984 = vector.load %arg35[%c0_212, %c0_213] : memref<128x128xf32, #tpu.memory_space<vmem>>, vector<128x128xf32>
    %cst_214 = arith.constant dense<0.000000e+00> : vector<16x128xf32>
    %985 = tpu.matmul %983, %984, %cst_214 {dimension_numbers = #tpu.dot_dimension_numbers<[1], [0], [0], [1], [0, 0, 1, 1], [], []>} : vector<16x128xf32>, vector<128x128xf32>, vector<16x128xf32> -> vector<16x128xf32>
    %c0_215 = arith.constant 0 : index
    %c0_216 = arith.constant 0 : index
    %986 = vector.load %arg36[%c0_215, %c0_216] : memref<1x128xf32, #tpu.memory_space<vmem>>, vector<1x128xf32>
    %987 = vector.broadcast %986 : vector<1x128xf32> to vector<16x128xf32>
    %988 = arith.addf %985, %987 : vector<16x128xf32>
    %c0_217 = arith.constant 0 : index
    %c0_218 = arith.constant 0 : index
    %989 = vector.load %arg37[%c0_217, %c0_218] : memref<16x128xf32, #tpu.memory_space<vmem>>, vector<16x128xf32>
    tpu.vector_store %arg37[%c0_217, %c0_218], %988 {strides = array<i32>} : memref<16x128xf32, #tpu.memory_space<vmem>>, vector<16x128xf32>,
    return
  }
  func.func @transform_0(%arg0: i32) -> (i32, i32, i32) {
    %c0_i32 = arith.constant 0 : i32
    %c0_i32_0 = arith.constant 0 : i32
    %c0_i32_1 = arith.constant 0 : i32
    return %c0_i32, %arg0, %c0_i32_0 : i32, i32, i32
  }
  func.func @transform_1(%arg0: i32) -> (i32, i32) {
    %c0_i32 = arith.constant 0 : i32
    %c0_i32_0 = arith.constant 0 : i32
    %c0_i32_1 = arith.constant 0 : i32
    return %c0_i32, %c0_i32_0 : i32, i32
  }
  func.func @transform_2(%arg0: i32) -> (i32, i32) {
    %c0_i32 = arith.constant 0 : i32
    %c0_i32_0 = arith.constant 0 : i32
    %c0_i32_1 = arith.constant 0 : i32
    return %c0_i32, %c0_i32_0 : i32, i32
  }
  func.func @transform_3(%arg0: i32) -> (i32, i32) {
    %c0_i32 = arith.constant 0 : i32
    %c0_i32_0 = arith.constant 0 : i32
    %c0_i32_1 = arith.constant 0 : i32
    return %c0_i32, %c0_i32_0 : i32, i32
  }
  func.func @transform_4(%arg0: i32) -> (i32, i32) {
    %c0_i32 = arith.constant 0 : i32
    %c0_i32_0 = arith.constant 0 : i32
    %c0_i32_1 = arith.constant 0 : i32
    return %c0_i32, %c0_i32_0 : i32, i32
  }
  func.func @transform_5(%arg0: i32) -> (i32, i32) {
    %c0_i32 = arith.constant 0 : i32
    %c0_i32_0 = arith.constant 0 : i32
    %c0_i32_1 = arith.constant 0 : i32
    return %c0_i32, %c0_i32_0 : i32, i32
  }
  func.func @transform_6(%arg0: i32) -> (i32, i32) {
    %c0_i32 = arith.constant 0 : i32
    %c0_i32_0 = arith.constant 0 : i32
    %c0_i32_1 = arith.constant 0 : i32
    return %c0_i32, %c0_i32_0 : i32, i32
  }
  func.func @transform_7(%arg0: i32) -> (i32, i32) {
    %c0_i32 = arith.constant 0 : i32
    %c0_i32_0 = arith.constant 0 : i32
    %c0_i32_1 = arith.constant 0 : i32
    return %c0_i32, %c0_i32_0 : i32, i32
  }
  func.func @transform_8(%arg0: i32) -> (i32, i32) {
    %c0_i32 = arith.constant 0 : i32
    %c0_i32_0 = arith.constant 0 : i32
    %c0_i32_1 = arith.constant 0 : i32
    return %c0_i32, %c0_i32_0 : i32, i32
  }
  func.func @transform_9(%arg0: i32) -> (i32, i32) {
    %c0_i32 = arith.constant 0 : i32
    %c0_i32_0 = arith.constant 0 : i32
    %c0_i32_1 = arith.constant 0 : i32
    return %c0_i32, %c0_i32_0 : i32, i32
  }
  func.func @transform_10(%arg0: i32) -> (i32, i32) {
    %c0_i32 = arith.constant 0 : i32
    %c0_i32_0 = arith.constant 0 : i32
    %c0_i32_1 = arith.constant 0 : i32
    return %c0_i32, %c0_i32_0 : i32, i32
  }
  func.func @transform_11(%arg0: i32) -> (i32, i32) {
    %c0_i32 = arith.constant 0 : i32
    %c0_i32_0 = arith.constant 0 : i32
    %c0_i32_1 = arith.constant 0 : i32
    return %c0_i32, %c0_i32_0 : i32, i32
  }
  func.func @transform_12(%arg0: i32) -> (i32, i32) {
    %c0_i32 = arith.constant 0 : i32
    %c0_i32_0 = arith.constant 0 : i32
    %c0_i32_1 = arith.constant 0 : i32
    return %c0_i32, %c0_i32_0 : i32, i32
  }
  func.func @transform_13(%arg0: i32) -> (i32, i32) {
    %c0_i32 = arith.constant 0 : i32
    %c0_i32_0 = arith.constant 0 : i32
    %c0_i32_1 = arith.constant 0 : i32
    return %c0_i32, %c0_i32_0 : i32, i32
  }
  func.func @transform_14(%arg0: i32) -> (i32, i32) {
    %c0_i32 = arith.constant 0 : i32
    %c0_i32_0 = arith.constant 0 : i32
    %c0_i32_1 = arith.constant 0 : i32
    return %c0_i32, %c0_i32_0 : i32, i32
  }
  func.func @transform_15(%arg0: i32) -> (i32, i32) {
    %c0_i32 = arith.constant 0 : i32
    %c0_i32_0 = arith.constant 0 : i32
    %c0_i32_1 = arith.constant 0 : i32
    return %c0_i32, %c0_i32_0 : i32, i32
  }
  func.func @transform_16(%arg0: i32) -> (i32, i32) {
    %c0_i32 = arith.constant 0 : i32
    %c0_i32_0 = arith.constant 0 : i32
    %c0_i32_1 = arith.constant 0 : i32
    return %c0_i32, %c0_i32_0 : i32, i32
  }
  func.func @transform_17(%arg0: i32) -> (i32, i32) {
    %c0_i32 = arith.constant 0 : i32
    %c0_i32_0 = arith.constant 0 : i32
    %c0_i32_1 = arith.constant 0 : i32
    return %c0_i32, %c0_i32_0 : i32, i32
  }
  func.func @transform_18(%arg0: i32) -> (i32, i32) {
    %c0_i32 = arith.constant 0 : i32
    %c0_i32_0 = arith.constant 0 : i32
    %c0_i32_1 = arith.constant 0 : i32
    return %c0_i32, %c0_i32_0 : i32, i32
  }
  func.func @transform_19(%arg0: i32) -> (i32, i32) {
    %c0_i32 = arith.constant 0 : i32
    %c0_i32_0 = arith.constant 0 : i32
    %c0_i32_1 = arith.constant 0 : i32
    return %c0_i32, %c0_i32_0 : i32, i32
  }
  func.func @transform_20(%arg0: i32) -> (i32, i32) {
    %c0_i32 = arith.constant 0 : i32
    %c0_i32_0 = arith.constant 0 : i32
    %c0_i32_1 = arith.constant 0 : i32
    return %c0_i32, %c0_i32_0 : i32, i32
  }
  func.func @transform_21(%arg0: i32) -> (i32, i32) {
    %c0_i32 = arith.constant 0 : i32
    %c0_i32_0 = arith.constant 0 : i32
    %c0_i32_1 = arith.constant 0 : i32
    return %c0_i32, %c0_i32_0 : i32, i32
  }
  func.func @transform_22(%arg0: i32) -> (i32, i32) {
    %c0_i32 = arith.constant 0 : i32
    %c0_i32_0 = arith.constant 0 : i32
    %c0_i32_1 = arith.constant 0 : i32
    return %c0_i32, %c0_i32_0 : i32, i32
  }
  func.func @transform_23(%arg0: i32) -> (i32, i32) {
    %c0_i32 = arith.constant 0 : i32
    %c0_i32_0 = arith.constant 0 : i32
    %c0_i32_1 = arith.constant 0 : i32
    return %c0_i32, %c0_i32_0 : i32, i32
  }
  func.func @transform_24(%arg0: i32) -> (i32, i32) {
    %c0_i32 = arith.constant 0 : i32
    %c0_i32_0 = arith.constant 0 : i32
    %c0_i32_1 = arith.constant 0 : i32
    return %c0_i32, %c0_i32_0 : i32, i32
  }
  func.func @transform_25(%arg0: i32) -> (i32, i32) {
    %c0_i32 = arith.constant 0 : i32
    %c0_i32_0 = arith.constant 0 : i32
    %c0_i32_1 = arith.constant 0 : i32
    return %c0_i32, %c0_i32_0 : i32, i32
  }
  func.func @transform_26(%arg0: i32) -> (i32, i32) {
    %c0_i32 = arith.constant 0 : i32
    %c0_i32_0 = arith.constant 0 : i32
    %c0_i32_1 = arith.constant 0 : i32
    return %c0_i32, %c0_i32_0 : i32, i32
  }
  func.func @transform_27(%arg0: i32) -> (i32, i32) {
    %c0_i32 = arith.constant 0 : i32
    %c0_i32_0 = arith.constant 0 : i32
    %c0_i32_1 = arith.constant 0 : i32
    return %c0_i32, %c0_i32_0 : i32, i32
  }
  func.func @transform_28(%arg0: i32) -> (i32, i32) {
    %c0_i32 = arith.constant 0 : i32
    %c0_i32_0 = arith.constant 0 : i32
    %c0_i32_1 = arith.constant 0 : i32
    return %c0_i32, %c0_i32_0 : i32, i32
  }
  func.func @transform_29(%arg0: i32) -> (i32, i32) {
    %c0_i32 = arith.constant 0 : i32
    %c0_i32_0 = arith.constant 0 : i32
    %c0_i32_1 = arith.constant 0 : i32
    return %c0_i32, %c0_i32_0 : i32, i32
  }
  func.func @transform_30(%arg0: i32) -> (i32, i32) {
    %c0_i32 = arith.constant 0 : i32
    %c0_i32_0 = arith.constant 0 : i32
    %c0_i32_1 = arith.constant 0 : i32
    return %c0_i32, %c0_i32_0 : i32, i32
  }
  func.func @transform_31(%arg0: i32) -> (i32, i32) {
    %c0_i32 = arith.constant 0 : i32
    %c0_i32_0 = arith.constant 0 : i32
    %c0_i32_1 = arith.constant 0 : i32
    return %c0_i32, %c0_i32_0 : i32, i32
  }
  func.func @transform_32(%arg0: i32) -> (i32, i32) {
    %c0_i32 = arith.constant 0 : i32
    %c0_i32_0 = arith.constant 0 : i32
    %c0_i32_1 = arith.constant 0 : i32
    return %c0_i32, %c0_i32_0 : i32, i32
  }
  func.func @transform_33(%arg0: i32) -> (i32, i32) {
    %c0_i32 = arith.constant 0 : i32
    %c0_i32_0 = arith.constant 0 : i32
    %c0_i32_1 = arith.constant 0 : i32
    return %c0_i32, %c0_i32_0 : i32, i32
  }
  func.func @transform_34(%arg0: i32) -> (i32, i32) {
    %c0_i32 = arith.constant 0 : i32
    %c0_i32_0 = arith.constant 0 : i32
    %c0_i32_1 = arith.constant 0 : i32
    return %c0_i32, %c0_i32_0 : i32, i32
  }
  func.func @transform_35(%arg0: i32) -> (i32, i32) {
    %c0_i32 = arith.constant 0 : i32
    %c0_i32_0 = arith.constant 0 : i32
    %c0_i32_1 = arith.constant 0 : i32
    return %c0_i32, %c0_i32_0 : i32, i32
  }
  func.func @transform_36(%arg0: i32) -> (i32, i32) {
    %c0_i32 = arith.constant 0 : i32
    %c0_i32_0 = arith.constant 0 : i32
    return %arg0, %c0_i32 : i32, i32
  }
}

</mosaic_0001>

<bundles_post_ra>
// kernel: skim_forward.1
= control target key start
LH: loop header
LB: loop body
LE: loop exit
PB: predicated region body
PF: predicated region fallthrough
CT: control target
= control target key end

     0   :  { %s6664_s3 = smov 1   ;;  %v9154_v0 = vmov 0.0   ;;  %s6666_s10 = smov 2   ;;  %vm244_vm0 = vcmask 130048   ;;  %v152_v46 = vlaneseq  ;;  %v9181_v62 = vmov 0  ;;  %s9153_s0 = inlined_call_operand.smem [shape: u32[37], index: -1, kind: input, shape index: {}] }
   0x1   :  { %s5429_s6 = sld [smem:[%s9153_s0 + %s6664_s3]]   ;;  %357 = vmatprep.mubr.f32.mxu0 %v9154_v0  ;;  %601 = vmatprep.mubr.f32.mxu1 %v9154_v0  ;;  %s6667_s14 = smov 3   ;;  %vm533_vm3 = vcmask 523264   ;;  %vm5299_vm4 = vcmask 261120   ;;  %vm5302_vm5 = vcmask 392192   ;;  %vm5307_vm6 = vcmask 654336  }
   0x2   :  { %s6719_s9 = sld [smem:[%s9153_s0]]   ;;  %v153_v49 = vand.u32 127, %v152_v46  ;;  %v492_v51 = vshrl.u32 %v152_v46, 7  ;;  %s6668_s18 = smov 64   ;;  %vm5310_vm7 = vcmask 785408   ;;  %vm5313_vm8 = vcmask 916480  }
   0x3   :  { %s6724_s13 = sld [smem:[%s9153_s0 + %s6666_s10]]   ;;  %s6669_s19 = smov 4  }
   0x4   :  { %s5431_s17 = sld [smem:[%s9153_s0 + %s6667_s14]]   ;;  %v154_v53 = vadd.s32 128, %v153_v49  ;;  %v159_v55 = vand.u32 63, %v153_v49  ;;  %v6895_v56 = vsub.s32 0, %v492_v51  ;;  %v6897_v60 = vsub.s32 1, %v492_v51  ;;  %s6670_s23 = smov 5  }
   0x5   :  { %s7308_s22 = sld [smem:[%s9153_s0 + %s6669_s19]]   ;;  %s6671_s27 = smov 17  }
   0x6   :  { %9179 = vst [vmem:[#allocation3_spill] sm:$0xff] %v6895_v56  ;;  %v166_v59 = vand.u32 63, %v154_v53  ;;  %9180 = vst [vmem:[#allocation4_spill] sm:$0xff] %v6897_v60  ;;  %vm6899_vm1 = vcmp.lt.s32.totalorder %v159_v55, 32  ;;  %s7376_s26 = sld [smem:[%s9153_s0 + %s6670_s23]]   ;;  %s6672_s1 = smov 18  }
   0x7   :  { %v207_v1 = vld [vmem:[%s5429_s6 + $0x18] sm:$0xff]  ;;  %v206_v2 = vld [vmem:[%s5429_s6 + $0x10] sm:$0xff]  ;;  %v205_v3 = vld [vmem:[%s5429_s6 + $0x8] sm:$0xff]  ;;  %v9182_v62 = vsel %vm6899_vm1, 4294967295, %v9181_v62  ;;  %s7397_s30 = sld [smem:[%s9153_s0 + %s6671_s27]]   ;;  %s6673_s5 = smov 6  }
   0x8   :  { %321 = vmatprep.subr.mxu0 %v207_v1  ;;  %v204_v4 = vld [vmem:[%s5429_s6] sm:$0xff]  ;;  %v182_v9 = vld [vmem:[%s6719_s9 + $0x8] sm:$0xff]  ;;  %v5465_v14 = vld [vmem:[%s6719_s9 + $0x10] sm:$0xff]  ;;  %9183 = vst [vmem:[#allocation5_spill] sm:$0xff] %v9182_v62  ;;  %vm6906_vm2 = vcmp.lt.s32.totalorder %v166_v59, 32  ;;  %s7403_s4 = sld [smem:[%s9153_s0 + %s6672_s1]]   ;;  %s6674_s10 = smov 19  }
   0x9   :  { %322 = vmatpush1.msra.mxu0 %v206_v2  ;;  %v181_v5 = vld [vmem:[%s6719_s9] sm:$0xff]  ;;  %v6729_v6 = vld [vmem:[%s6724_s13 + $0x78] sm:$0xff]  ;;  %v6732_v7 = vld [vmem:[%s6724_s13 + $0x70] sm:$0xff]  ;;  %s5434_s8 = sld [smem:[%s9153_s0 + %s6673_s5]]   ;;  %s6675_s14 = smov 21  }
   0xa   :  { %323 = vmatprep.subr.mxu0 %v205_v3  ;;  %v6735_v8 = vld [vmem:[%s6724_s13 + $0x68] sm:$0xff]  ;;  %553 = vmatprep.subr.mxu1 %v6729_v6  ;;  %v6741_v10 = vld [vmem:[%s6724_s13 + $0x60] sm:$0xff]  ;;  %v6745_v11 = vld [vmem:[%s6724_s13 + $0x58] sm:$0xff]  ;;  %s6676_s19 = smov 20   ;;  %s6677_s23 = smov 25  }
   0xb   :  { %324 = vmatpush1.msra.mxu0 %v204_v4  ;;  %554 = vmatpush1.msra.mxu1 %v6732_v7  ;;  %v6750_v12 = vld [vmem:[%s6724_s13 + $0x50] sm:$0xff]  ;;  %v6756_v13 = vld [vmem:[%s6724_s13 + $0x48] sm:$0xff]  ;;  %v6762_v15 = vld [vmem:[%s6724_s13 + $0x40] sm:$0xff]  ;;  %s6678_s27 = smov 26   ;;  %s6679_s1 = smov 27  }
   0xc   :  { %5479 = vmatmul.mubr.msk.f32.vlgmr.msra.gmra.mxu0 %vm244_vm0, %v181_v5  ;;  %1093 = vmatprep.subr.mxu0 %v6729_v6  ;;  %v6766_v16 = vld [vmem:[%s6724_s13 + $0x38] sm:$0xff]  ;;  %v6771_v17 = vld [vmem:[%s6724_s13 + $0x30] sm:$0xff]  ;;  %v6777_v18 = vld [vmem:[%s6724_s13 + $0x28] sm:$0xff]  ;;  %s6680_s5 = smov 22  }
   0xd   :  { %363 = vmatprep.mubr.f32.mxu0 %v9154_v0  ;;  %555 = vmatprep.subr.mxu1 %v6735_v8  ;;  %v5466_v19 = vld [vmem:[%s6719_s9 + $0x18] sm:$0xff]  ;;  %v6783_v20 = vld [vmem:[%s6724_s13 + $0x20] sm:$0xff]  ;;  %v6792_v22 = vld [vmem:[%s6724_s13 + $0x10] sm:$0xff] }
   0xe   :  { %1094 = vmatpush1.msra.mxu0 %v6732_v7  ;;  %556 = vmatpush1.msra.mxu1 %v6741_v10  ;;  %v6787_v21 = vld [vmem:[%s6724_s13 + $0x18] sm:$0xff]  ;;  %v6798_v23 = vld [vmem:[%s6724_s13 + $0x8] sm:$0xff]  ;;  %v5467_v24 = vld [vmem:[%s6719_s9 + $0x20] sm:$0xff] }
   0xf   :  { %557 = vmatprep.subr.mxu1 %v6745_v11  ;;  %1095 = vmatprep.subr.mxu0 %v6735_v8  ;;  %v6804_v25 = vld [vmem:[%s6724_s13] sm:$0xff]  ;;  %v5468_v26 = vld [vmem:[%s6719_s9 + $0x28] sm:$0xff]  ;;  %v5469_v27 = vld [vmem:[%s6719_s9 + $0x30] sm:$0xff] }
  0x10   :  { %5480 = vmatmul.mubr.msk.f32.gmra.mxu0 %vm244_vm0, %v182_v9  ;;  %558 = vmatpush1.msra.mxu1 %v6750_v12  ;;  %v5470_v28 = vld [vmem:[%s6719_s9 + $0x38] sm:$0xff]  ;;  %v5471_v29 = vld [vmem:[%s6719_s9 + $0x40] sm:$0xff]  ;;  %v5472_v30 = vld [vmem:[%s6719_s9 + $0x48] sm:$0xff] }
  0x11   :  { %369 = vmatprep.mubr.f32.mxu0 %v9154_v0  ;;  %559 = vmatprep.subr.mxu1 %v6756_v13  ;;  %v5473_v31 = vld [vmem:[%s6719_s9 + $0x50] sm:$0xff]  ;;  %v5474_v32 = vld [vmem:[%s6719_s9 + $0x58] sm:$0xff]  ;;  %v5475_v33 = vld [vmem:[%s6719_s9 + $0x60] sm:$0xff] }
  0x12   :  { %1096 = vmatpush1.msra.mxu0 %v6741_v10  ;;  %560 = vmatpush1.msra.mxu1 %v6762_v15  ;;  %v5476_v34 = vld [vmem:[%s6719_s9 + $0x68] sm:$0xff]  ;;  %v5477_v35 = vld [vmem:[%s6719_s9 + $0x70] sm:$0xff]  ;;  %v5478_v36 = vld [vmem:[%s6719_s9 + $0x78] sm:$0xff] }
  0x13   :  { %561 = vmatprep.subr.mxu1 %v6766_v16  ;;  %1097 = vmatprep.subr.mxu0 %v6745_v11  ;;  %v224_v57 = vld [vmem:[%s5431_s17] sm:$0x3]  ;;  %s7638_s17 = sld [smem:[%s9153_s0 + %s6675_s14]]   ;;  %s6682_s14 = smov 28  }
  0x14   :  { %5481 = vmatmul.mubr.msk.f32.gmra.mxu0 %vm244_vm0, %v5465_v14  ;;  %562 = vmatpush1.msra.mxu1 %v6771_v17  ;;  %v6904_v63 = vrot.slane %v224_v57, %v6895_v56  ;;  %v6911_v3 = vrot.slane %v224_v57, %v6897_v60 }
  0x15   :  { %375 = vmatprep.mubr.f32.mxu0 %v9154_v0  ;;  %563 = vmatprep.subr.mxu1 %v6777_v18 }
  0x16   :  { %1098 = vmatpush1.msra.mxu0 %v6750_v12  ;;  %564 = vmatpush1.msra.mxu1 %v6783_v20  ;;  %9186 = vst [vmem:[#allocation6_spill] sm:$0xff] %v6911_v3 }
  0x17   :  { %565 = vmatprep.subr.mxu1 %v6787_v21  ;;  %1099 = vmatprep.subr.mxu0 %v6756_v13 }
  0x18   :  { %5482 = vmatmul.mubr.msk.f32.gmra.mxu0 %vm244_vm0, %v5466_v19  ;;  %566 = vmatpush1.msra.mxu1 %v6792_v22 }
  0x19   :  { %381 = vmatprep.mubr.f32.mxu0 %v9154_v0  ;;  %567 = vmatprep.subr.mxu1 %v6798_v23 }
  0x1a   :  { %1100 = vmatpush1.msra.mxu0 %v6762_v15  ;;  %568 = vmatpush1.msra.mxu1 %v6804_v25 }
  0x1b   :  { %602 = vmatmul.mubr.f32.vlgmr.msra.gmra.mxu1 %v9154_v0  ;;  %688 = vmatprep.subr.mxu1 %v6729_v6 }
  0x1c   :  { %5483 = vmatmul.mubr.msk.f32.gmra.mxu0 %vm244_vm0, %v5467_v24  ;;  %607 = vmatprep.mubr.f32.mxu1 %v9154_v0 }
  0x1d   :  { %387 = vmatprep.mubr.f32.mxu0 %v9154_v0  ;;  %689 = vmatpush1.msra.mxu1 %v6732_v7 }
  0x1e   :  { %1101 = vmatprep.subr.mxu0 %v6766_v16  ;;  %690 = vmatprep.subr.mxu1 %v6735_v8 }
  0x1f   :  { %608 = vmatmul.mubr.f32.gmra.mxu1 %v9154_v0  ;;  %1102 = vmatpush1.msra.mxu0 %v6771_v17 }
  0x20   :  { %5484 = vmatmul.mubr.msk.f32.gmra.mxu0 %vm244_vm0, %v5468_v26  ;;  %691 = vmatpush1.msra.mxu1 %v6741_v10 }
  0x21   :  { %393 = vmatprep.mubr.f32.mxu0 %v9154_v0  ;;  %736 = vmatprep.mubr.f32.mxu1 %v9154_v0 }
  0x22   :  { %692 = vmatprep.subr.mxu1 %v6745_v11  ;;  %1103 = vmatprep.subr.mxu0 %v6777_v18 }
  0x23   :  { %693 = vmatpush1.msra.mxu1 %v6750_v12  ;;  %1104 = vmatpush1.msra.mxu0 %v6783_v20 }
  0x24   :  { %5485 = vmatmul.mubr.msk.f32.gmra.mxu0 %vm244_vm0, %v5469_v27  ;;  %694 = vmatprep.subr.mxu1 %v6756_v13 }
  0x25   :  { %399 = vmatprep.mubr.f32.mxu0 %v9154_v0  ;;  %695 = vmatpush1.msra.mxu1 %v6762_v15 }
  0x26   :  { %696 = vmatprep.subr.mxu1 %v6766_v16  ;;  %1105 = vmatprep.subr.mxu0 %v6787_v21 }
  0x27   :  { %697 = vmatpush1.msra.mxu1 %v6771_v17  ;;  %1106 = vmatpush1.msra.mxu0 %v6792_v22 }
  0x28   :  { %5486 = vmatmul.mubr.msk.f32.gmra.mxu0 %vm244_vm0, %v5470_v28  ;;  %698 = vmatprep.subr.mxu1 %v6777_v18 }
  0x29   :  { %405 = vmatprep.mubr.f32.mxu0 %v9154_v0  ;;  %699 = vmatpush1.msra.mxu1 %v6783_v20 }
  0x2a   :  { %700 = vmatprep.subr.mxu1 %v6787_v21  ;;  %1107 = vmatprep.subr.mxu0 %v6798_v23 }
  0x2b   :  { %701 = vmatpush1.msra.mxu1 %v6792_v22  ;;  %1108 = vmatpush1.msra.mxu0 %v6804_v25 }
  0x2c   :  { %5487 = vmatmul.mubr.msk.f32.gmra.mxu0 %vm244_vm0, %v5471_v29  ;;  %702 = vmatprep.subr.mxu1 %v6798_v23 }
  0x2d   :  { %411 = vmatprep.mubr.f32.mxu0 %v9154_v0  ;;  %703 = vmatpush1.msra.mxu1 %v6804_v25 }
  0x2e   :  { %823 = vmatprep.subr.mxu1 %v6729_v6  ;;  %1363 = vmatprep.subr.mxu0 %v6729_v6 }
  0x30   :  { %5488 = vmatmul.mubr.msk.f32.gmra.mxu0 %vm244_vm0, %v5472_v30 }
  0x31   :  { %417 = vmatprep.mubr.f32.mxu0 %v9154_v0 }
  0x34   :  { %5489 = vmatmul.mubr.msk.f32.gmra.mxu0 %vm244_vm0, %v5473_v31 }
  0x35   :  { %423 = vmatprep.mubr.f32.mxu0 %v9154_v0 }
  0x38   :  { %5490 = vmatmul.mubr.msk.f32.gmra.mxu0 %vm244_vm0, %v5474_v32 }
  0x39   :  { %429 = vmatprep.mubr.f32.mxu0 %v9154_v0 }
  0x3c   :  { %5491 = vmatmul.mubr.msk.f32.gmra.mxu0 %vm244_vm0, %v5475_v33 }
  0x3d   :  { %435 = vmatprep.mubr.f32.mxu0 %v9154_v0 }
  0x40   :  { %5492 = vmatmul.mubr.msk.f32.gmra.mxu0 %vm244_vm0, %v5476_v34 }
  0x41   :  { %441 = vmatprep.mubr.f32.mxu0 %v9154_v0 }
  0x44   :  { %5493 = vmatmul.mubr.msk.f32.gmra.mxu0 %vm244_vm0, %v5477_v35 }
  0x45   :  { %447 = vmatprep.mubr.f32.mxu0 %v9154_v0 }
  0x48   :  { %5494 = vmatmul.mubr.msk.f32.gmra.mxu0 %vm244_vm0, %v5478_v36 }
  0x49   :  { %1141 = vmatprep.mubr.f32.mxu0 %v9154_v0 }
  0xcc   :  { %v6876_v37 = vpop.f32.mrf.mxu0 }
  0xce   :  { %v6878_v38 = vpop.f32.mrf.mxu0 }
  0xd0   :  { %v6880_v39 = vpop.f32.mrf.mxu0 }
  0xd2   :  { %v6882_v40 = vpop.f32.mrf.mxu0 }
  0xd4   :  { %v6884_v41 = vpop.f32.mrf.mxu0 }
  0xd6   :  { %v6886_v42 = vpop.f32.mrf.mxu0 }
  0xd8   :  { %v6888_v43 = vpop.f32.mrf.mxu0 }
  0xda   :  { %v6890_v44 = vpop.f32.mrf.mxu0 }
  0xdc   :  { %v383_v45 = vpop.f32.mrf.mxu0 }
  0xde   :  { %v385_v47 = vpop.f32.mrf.mxu0 }
  0xe0   :  { %v389_v48 = vpop.f32.mrf.mxu0 }
  0xe2   :  { %v391_v50 = vpop.f32.mrf.mxu0 }
  0xe4   :  { %v395_v52 = vpop.f32.mrf.mxu0 }
  0xe6   :  { %v397_v54 = vpop.f32.mrf.mxu0 }
  0xe8   :  { %v401_v58 = vpop.f32.mrf.mxu0 }
  0xea   :  { %v403_v61 = vpop.f32.mrf.mxu0 }
  0xec   :  { %v407_v1 = vpop.f32.mrf.mxu0 }
  0xed   :  { %v470_v4 = vsel %vm6899_vm1, %v395_v52, %v407_v1  ;;  %v474_v5 = vsel %vm6899_vm1, %v407_v1, %v395_v52 }
  0xee   :  { %v409_v9 = vpop.f32.mrf.mxu0  ;;  %v6918_v14 = vadd.f32 %v6904_v63, %v470_v4  ;;  %v6921_v19 = vadd.f32 %v6904_v63, %v474_v5 }
  0xef   :  { %v471_v24 = vsel %vm6906_vm2, %v397_v54, %v409_v9  ;;  %v475_v26 = vsel %vm6906_vm2, %v409_v9, %v397_v54 }
  0xf0   :  { %v413_v27 = vpop.f32.mrf.mxu0  ;;  %v6928_v28 = vadd.f32 %v6911_v3, %v471_v24  ;;  %v6931_v29 = vadd.f32 %v6911_v3, %v475_v26 }
  0xf1   :  { %v472_v30 = vsel %vm6899_vm1, %v401_v58, %v413_v27  ;;  %v476_v31 = vsel %vm6899_vm1, %v413_v27, %v401_v58 }
  0xf2   :  { %v415_v32 = vpop.f32.mrf.mxu0  ;;  %v6938_v33 = vadd.f32 %v6904_v63, %v472_v30  ;;  %v6941_v34 = vadd.f32 %v6904_v63, %v476_v31 }
  0xf3   :  { %v473_v35 = vsel %vm6906_vm2, %v403_v61, %v415_v32  ;;  %v477_v36 = vsel %vm6906_vm2, %v415_v32, %v403_v61 }
  0xf4   :  { %v419_v46 = vpop.f32.mrf.mxu0  ;;  %v6948_v49 = vadd.f32 %v6911_v3, %v473_v35  ;;  %v6951_v51 = vadd.f32 %v6911_v3, %v477_v36 }
  0xf5   :  { %v466_v52 = vsel %vm6899_vm1, %v383_v45, %v419_v46  ;;  %v478_v53 = vsel %vm6899_vm1, %v419_v46, %v383_v45 }
  0xf6   :  { %v421_v54 = vpop.f32.mrf.mxu0  ;;  %v6958_v55 = vadd.f32 %v6904_v63, %v466_v52  ;;  %v6961_v57 = vadd.f32 %v6904_v63, %v478_v53 }
  0xf7   :  { %v467_v58 = vsel %vm6906_vm2, %v385_v47, %v421_v54  ;;  %v479_v59 = vsel %vm6906_vm2, %v421_v54, %v385_v47 }
  0xf8   :  { %v425_v61 = vpop.f32.mrf.mxu0  ;;  %v6968_v1 = vadd.f32 %v6911_v3, %v467_v58  ;;  %v6971_v4 = vadd.f32 %v6911_v3, %v479_v59 }
  0xf9   :  { %v468_v45 = vsel %vm6899_vm1, %v389_v48, %v425_v61  ;;  %v480_v5 = vsel %vm6899_vm1, %v425_v61, %v389_v48 }
  0xfa   :  { %v427_v9 = vpop.f32.mrf.mxu0  ;;  %v6978_v24 = vadd.f32 %v6904_v63, %v468_v45  ;;  %v6981_v26 = vadd.f32 %v6904_v63, %v480_v5 }
  0xfb   :  { %v469_v47 = vsel %vm6906_vm2, %v391_v50, %v427_v9  ;;  %v481_v27 = vsel %vm6906_vm2, %v427_v9, %v391_v50 }
  0xfc   :  { %v431_v30 = vpop.f32.mrf.mxu0  ;;  %v6988_v31 = vadd.f32 %v6911_v3, %v469_v47  ;;  %v6991_v32 = vadd.f32 %v6911_v3, %v481_v27  ;;  %v603_v27 = vpop.f32.mrf.mxu1 }
  0xfd   :  { %v462_v48 = vsel %vm6899_vm1, %v6884_v41, %v431_v30  ;;  %v482_v35 = vsel %vm6899_vm1, %v431_v30, %v6884_v41 }
  0xfe   :  { %v433_v36 = vpop.f32.mrf.mxu0  ;;  %v7000_v46 = vadd.f32 %v6904_v63, %v462_v48  ;;  %v7003_v50 = vadd.f32 %v6904_v63, %v482_v35 }
  0xff   :  { %v463_v52 = vsel %vm6906_vm2, %v6886_v42, %v433_v36  ;;  %v483_v53 = vsel %vm6906_vm2, %v433_v36, %v6886_v42 }
 0x100   :  { %v437_v54 = vpop.f32.mrf.mxu0  ;;  %v7012_v58 = vadd.f32 %v6911_v3, %v463_v52  ;;  %v7015_v41 = vadd.f32 %v6911_v3, %v483_v53 }
 0x101   :  { %v464_v59 = vsel %vm6899_vm1, %v6888_v43, %v437_v54  ;;  %v484_v61 = vsel %vm6899_vm1, %v437_v54, %v6888_v43 }
 0x102   :  { %v439_v45 = vpop.f32.mrf.mxu0  ;;  %v7024_v5 = vadd.f32 %v6904_v63, %v464_v59  ;;  %v7027_v42 = vadd.f32 %v6904_v63, %v484_v61  ;;  %v605_v59 = vpop.f32.mrf.mxu1 }
 0x103   :  { %v465_v9 = vsel %vm6906_vm2, %v6890_v44, %v439_v45  ;;  %v485_v47 = vsel %vm6906_vm2, %v439_v45, %v6890_v44 }
 0x104   :  { %v443_v30 = vpop.f32.mrf.mxu0  ;;  %v7036_v48 = vadd.f32 %v6911_v3, %v465_v9  ;;  %v7039_v43 = vadd.f32 %v6911_v3, %v485_v47  ;;  %v609_v0 = vpop.f32.mrf.mxu1 }
 0x105   :  { %v458_v35 = vsel %vm6899_vm1, %v6876_v37, %v443_v30  ;;  %v486_v36 = vsel %vm6899_vm1, %v443_v30, %v6876_v37 }
 0x106   :  { %v501_v52 = vadd.f32 %v6904_v63, %v458_v35  ;;  %v445_v53 = vpop.f32.mrf.mxu0  ;;  %v7049_v44 = vadd.f32 %v6904_v63, %v486_v36 }
 0x107   :  { %v487_v54 = vsel %vm6906_vm2, %v445_v53, %v6878_v38 }
 0x108   :  { %v614_v61 = vadd.f32 %v603_v27, %v501_v52  ;;  %v449_v45 = vpop.f32.mrf.mxu0  ;;  %v7055_v9 = vadd.f32 %v6911_v3, %v487_v54  ;;  %v459_v54 = vsel %vm6906_vm2, %v6878_v38, %v445_v53 }
 0x109   :  { %v460_v37 = vsel %vm6899_vm1, %v6880_v39, %v449_v45  ;;  %v488_v47 = vsel %vm6899_vm1, %v449_v45, %v6880_v39  ;;  %v502_v62 = vadd.f32 %v6911_v3, %v459_v54 }
 0x10a   :  { %9187 = vst [vmem:[#allocation7_spill] sm:$0xff] %v7055_v9  ;;  %v5495_v30 = vmul.f32 -1.442695, %v614_v61  ;;  %v503_v35 = vadd.f32 %v6904_v63, %v460_v37  ;;  %v7065_v36 = vadd.f32 %v6904_v63, %v488_v47  ;;  %v7070_v60 = vpop.f32.mrf.mxu0  ;;  %v611_v37 = vpop.f32.mrf.mxu1 }
 0x10b   :  { %v461_v39 = vsel %vm6906_vm2, %v6882_v40, %v7070_v60  ;;  %v615_v63 = vadd.f32 %v605_v59, %v502_v62 }
 0x10c   :  { %6173 = vpow2.f32 %v5495_v30  ;;  %v616_v27 = vadd.f32 %v609_v0, %v503_v35  ;;  %v504_v61 = vadd.f32 %v6911_v3, %v461_v39 }
 0x10d   :  { %v5497_v54 = vmul.f32 -1.442695, %v615_v63 }
 0x10e   :  { %v5496_v52 = vmul.f32 -1.442695, %v616_v27  ;;  %v617_v47 = vadd.f32 %v611_v37, %v504_v61 }
 0x110   :  { %6175 = vpow2.f32 %v5496_v52  ;;  %v5498_v39 = vmul.f32 -1.442695, %v617_v47 }
 0x111   :  { %6177 = vtanh.f32 %v615_v63 }
 0x119   :  { %v6174_v45 = vpop.eup %6173 }
 0x11a   :  { %v624_v0 = vadd.f32 1.0, %v6174_v45 }
 0x11c   :  { %6179 = vrcp.f32 %v624_v0 }
 0x11d   :  { %v6176_v38 = vpop.eup %6175  ;;  %6181 = vtanh.f32 %v617_v47 }
 0x11e   :  { %v625_v53 = vadd.f32 1.0, %v6176_v38  ;;  %v6178_v30 = vpop.eup %6177 }
 0x120   :  { %6183 = vrcp.f32 %v625_v53 }
 0x121   :  { %6185 = vpow2.f32 %v5497_v54 }
 0x122   :  { %6187 = vpow2.f32 %v5498_v39 }
 0x129   :  { %v6180_v35 = vpop.eup %6179 }
 0x12a   :  { %v646_v27 = vmul.f32 %v6180_v35, %v6178_v30  ;;  %v6182_v52 = vpop.eup %6181  ;;  %v644_v37 = vmul.f32 0.0, %v6180_v35 }
 0x12c   :  { %650 = vrot.lane.b32.xlu0 %v646_v27, %s6668_s18 }
 0x12d   :  { %v6184_v62 = vpop.eup %6183 }
 0x12e   :  { %v647_v59 = vmul.f32 %v6184_v62, %v6182_v52  ;;  %v6186_v61 = vpop.eup %6185  ;;  %v645_v27 = vmul.f32 0.0, %v6184_v62 }
 0x12f   :  { %v638_v45 = vadd.f32 1.0, %v6186_v61  ;;  %v6188_v0 = vpop.eup %6187 }
 0x130   :  { %652 = vrot.lane.b32.xlu0 %v647_v59, %s6668_s18  ;;  %v639_v30 = vadd.f32 1.0, %v6188_v0 }
 0x131   :  { %6189 = vrcp.f32 %v638_v45 }
 0x13e   :  { %v6190_v63 = vpop.eup %6189 }
 0x19e   :  { %v651_v38 = vpop.permute.xlu0 %650 }
 0x19f   :  { %v7080_v53 = vadd.f32 %v651_v38, %v644_v37 }
 0x1a1   :  { %6191 = vtanh.f32 %v7080_v53 }
 0x1a2   :  { %v653_v56 = vpop.permute.xlu0 %652  ;;  %6193 = vrcp.f32 %v639_v30 }
 0x1a3   :  { %v7083_v52 = vadd.f32 %v653_v56, %v645_v27  ;;  %v9188_v56 = vmov 0.0  }
 0x1a5   :  { %6195 = vtanh.f32 %v7083_v52 }
 0x1ae   :  { %v6192_v47 = vpop.eup %6191 }
 0x1af   :  { %v660_v59 = vmul.f32 %v6192_v47, %v6190_v63  ;;  %v6194_v54 = vpop.eup %6193 }
 0x1b1   :  { %664 = vrot.lane.b32.xlu1 %v660_v59, %s6668_s18 }
 0x1b2   :  { %v6196_v35 = vpop.eup %6195 }
 0x1b3   :  { %v661_v39 = vmul.f32 %v6196_v35, %v6194_v54 }
 0x1b5   :  { %666 = vrot.lane.b32.xlu1 %v661_v39, %s6668_s18 }
 0x223   :  { %v7088_v61 = vpop.permute.xlu1 %664 }
 0x224   :  { %5499 = vmatmul.mubr.msk.f32.vlgmr.msra.gmra.mxu1 %vm533_vm3, %v7088_v61 }
 0x225   :  { %742 = vmatprep.mubr.f32.mxu1 %v9188_v56  ;;  %824 = vmatpush1.msra.mxu1 %v6732_v7 }
 0x226   :  { %825 = vmatprep.subr.mxu1 %v6735_v8 }
 0x227   :  { %v7095_v62 = vpop.permute.xlu1 %666  ;;  %826 = vmatpush1.msra.mxu1 %v6741_v10 }
 0x228   :  { %5500 = vmatmul.mubr.msk.f32.gmra.mxu1 %vm533_vm3, %v7095_v62  ;;  %827 = vmatprep.subr.mxu1 %v6745_v11 }
 0x229   :  { %828 = vmatpush1.msra.mxu1 %v6750_v12  ;;  %871 = vmatprep.mubr.f32.mxu1 %v9188_v56 }
 0x22a   :  { %829 = vmatprep.subr.mxu1 %v6756_v13 }
 0x22b   :  { %830 = vmatpush1.msra.mxu1 %v6762_v15 }
 0x22c   :  { %831 = vmatprep.subr.mxu1 %v6766_v16 }
 0x22d   :  { %832 = vmatpush1.msra.mxu1 %v6771_v17 }
 0x22e   :  { %833 = vmatprep.subr.mxu1 %v6777_v18 }
 0x22f   :  { %834 = vmatpush1.msra.mxu1 %v6783_v20 }
 0x230   :  { %835 = vmatprep.subr.mxu1 %v6787_v21 }
 0x231   :  { %836 = vmatpush1.msra.mxu1 %v6792_v22 }
 0x232   :  { %837 = vmatprep.subr.mxu1 %v6798_v23 }
 0x233   :  { %838 = vmatpush1.msra.mxu1 %v6804_v25 }
 0x234   :  { %958 = vmatprep.subr.mxu1 %v6729_v6 }
 0x2e4   :  { %v738_v45 = vpop.f32.mrf.mxu1 }
 0x2e5   :  { %v749_v0 = vadd.f32 %v738_v45, %v7000_v46 }
 0x2e6   :  { %v740_v37 = vpop.f32.mrf.mxu1 }
 0x2e7   :  { %v5501_v38 = vmul.f32 -1.442695, %v749_v0  ;;  %v750_v47 = vadd.f32 %v740_v37, %v7012_v58 }
 0x2e8   :  { %v744_v30 = vpop.f32.mrf.mxu1 }
 0x2e9   :  { %6197 = vpow2.f32 %v5501_v38  ;;  %v751_v27 = vadd.f32 %v744_v30, %v7024_v5  ;;  %v5503_v58 = vmul.f32 -1.442695, %v750_v47 }
 0x2ea   :  { %v746_v59 = vpop.f32.mrf.mxu1 }
 0x2eb   :  { %v5502_v63 = vmul.f32 -1.442695, %v751_v27  ;;  %v752_v39 = vadd.f32 %v746_v59, %v7036_v48 }
 0x2ed   :  { %6199 = vpow2.f32 %v5502_v63  ;;  %v5504_v37 = vmul.f32 -1.442695, %v752_v39 }
 0x2ee   :  { %6201 = vtanh.f32 %v750_v47 }
 0x2f6   :  { %v6198_v54 = vpop.eup %6197 }
 0x2f7   :  { %v759_v35 = vadd.f32 1.0, %v6198_v54 }
 0x2f9   :  { %6203 = vrcp.f32 %v759_v35 }
 0x2fa   :  { %v6200_v3 = vpop.eup %6199  ;;  %6205 = vtanh.f32 %v752_v39 }
 0x2fb   :  { %v760_v9 = vadd.f32 1.0, %v6200_v3  ;;  %v6202_v46 = vpop.eup %6201 }
 0x2fd   :  { %6207 = vrcp.f32 %v760_v9 }
 0x2fe   :  { %6209 = vpow2.f32 %v5503_v58 }
 0x2ff   :  { %6211 = vpow2.f32 %v5504_v37 }
 0x306   :  { %v6204_v45 = vpop.eup %6203 }
 0x307   :  { %v781_v0 = vmul.f32 %v6204_v45, %v6202_v46  ;;  %v6206_v38 = vpop.eup %6205  ;;  %v779_v3 = vmul.f32 %v6204_v45, %v7080_v53 }
 0x309   :  { %785 = vrot.lane.b32.xlu0 %v781_v0, %s6668_s18 }
 0x30a   :  { %v6208_v5 = vpop.eup %6207 }
 0x30b   :  { %v782_v30 = vmul.f32 %v6208_v5, %v6206_v38  ;;  %v6210_v48 = vpop.eup %6209  ;;  %v780_v35 = vmul.f32 %v6208_v5, %v7083_v52 }
 0x30c   :  { %v773_v27 = vadd.f32 1.0, %v6210_v48  ;;  %v6212_v63 = vpop.eup %6211 }
 0x30d   :  { %787 = vrot.lane.b32.xlu1 %v782_v30, %s6668_s18  ;;  %v774_v54 = vadd.f32 1.0, %v6212_v63 }
 0x30e   :  { %6213 = vrcp.f32 %v773_v27 }
 0x31b   :  { %v6214_v47 = vpop.eup %6213 }
 0x37b   :  { %v786_v9 = vpop.permute.xlu0 %785 }
 0x37c   :  { %v7121_v59 = vadd.f32 %v786_v9, %v779_v3 }
 0x37e   :  { %6215 = vtanh.f32 %v7121_v59 }
 0x37f   :  { %v788_v46 = vpop.permute.xlu1 %787  ;;  %6217 = vrcp.f32 %v774_v54 }
 0x380   :  { %v7125_v0 = vadd.f32 %v788_v46, %v780_v35 }
 0x382   :  { %6219 = vtanh.f32 %v7125_v0 }
 0x38b   :  { %v6216_v39 = vpop.eup %6215 }
 0x38c   :  { %v795_v38 = vmul.f32 %v6216_v39, %v6214_v47  ;;  %v6218_v30 = vpop.eup %6217 }
 0x38e   :  { %799 = vrot.lane.b32.xlu0 %v795_v38, %s6668_s18 }
 0x38f   :  { %v6220_v53 = vpop.eup %6219 }
 0x390   :  { %v796_v45 = vmul.f32 %v6220_v53, %v6218_v30 }
 0x392   :  { %801 = vrot.lane.b32.xlu1 %v796_v45, %s6668_s18 }
 0x400   :  { %v7130_v58 = vpop.permute.xlu0 %799 }
 0x401   :  { %5505 = vmatmul.mubr.msk.f32.vlgmr.msra.gmra.mxu1 %vm533_vm3, %v7130_v58 }
 0x402   :  { %877 = vmatprep.mubr.f32.mxu1 %v9188_v56  ;;  %959 = vmatpush1.msra.mxu1 %v6732_v7 }
 0x403   :  { %960 = vmatprep.subr.mxu1 %v6735_v8 }
 0x404   :  { %v7137_v52 = vpop.permute.xlu1 %801  ;;  %961 = vmatpush1.msra.mxu1 %v6741_v10 }
 0x405   :  { %5506 = vmatmul.mubr.msk.f32.gmra.mxu1 %vm533_vm3, %v7137_v52  ;;  %962 = vmatprep.subr.mxu1 %v6745_v11 }
 0x406   :  { %963 = vmatpush1.msra.mxu1 %v6750_v12  ;;  %1006 = vmatprep.mubr.f32.mxu1 %v9188_v56 }
 0x407   :  { %964 = vmatprep.subr.mxu1 %v6756_v13 }
 0x408   :  { %965 = vmatpush1.msra.mxu1 %v6762_v15 }
 0x409   :  { %966 = vmatprep.subr.mxu1 %v6766_v16 }
 0x40a   :  { %967 = vmatpush1.msra.mxu1 %v6771_v17 }
 0x40b   :  { %968 = vmatprep.subr.mxu1 %v6777_v18 }
 0x40c   :  { %969 = vmatpush1.msra.mxu1 %v6783_v20 }
 0x40d   :  { %970 = vmatprep.subr.mxu1 %v6787_v21 }
 0x40e   :  { %971 = vmatpush1.msra.mxu1 %v6792_v22 }
 0x40f   :  { %972 = vmatprep.subr.mxu1 %v6798_v23 }
 0x410   :  { %973 = vmatpush1.msra.mxu1 %v6804_v25 }
 0x411   :  { %1228 = vmatprep.subr.mxu1 %v6729_v6 }
 0x4c1   :  { %v873_v5 = vpop.f32.mrf.mxu1 }
 0x4c2   :  { %v884_v37 = vadd.f32 %v873_v5, %v6958_v55 }
 0x4c3   :  { %v875_v48 = vpop.f32.mrf.mxu1 }
 0x4c4   :  { %v5507_v27 = vmul.f32 -1.442695, %v884_v37  ;;  %v885_v54 = vadd.f32 %v875_v48, %v6968_v1 }
 0x4c5   :  { %v879_v63 = vpop.f32.mrf.mxu1 }
 0x4c6   :  { %6221 = vpow2.f32 %v5507_v27  ;;  %v886_v3 = vadd.f32 %v879_v63, %v6978_v24  ;;  %v5509_v1 = vmul.f32 -1.442695, %v885_v54 }
 0x4c7   :  { %v881_v35 = vpop.f32.mrf.mxu1 }
 0x4c8   :  { %v5508_v9 = vmul.f32 -1.442695, %v886_v3  ;;  %v887_v39 = vadd.f32 %v881_v35, %v6988_v31 }
 0x4ca   :  { %6223 = vpow2.f32 %v5508_v9  ;;  %v5510_v48 = vmul.f32 -1.442695, %v887_v39 }
 0x4cb   :  { %6225 = vtanh.f32 %v885_v54 }
 0x4d3   :  { %v6222_v46 = vpop.eup %6221 }
 0x4d4   :  { %v894_v47 = vadd.f32 1.0, %v6222_v46 }
 0x4d6   :  { %6227 = vrcp.f32 %v894_v47 }
 0x4d7   :  { %v6224_v38 = vpop.eup %6223  ;;  %6229 = vtanh.f32 %v887_v39 }
 0x4d8   :  { %v895_v30 = vadd.f32 1.0, %v6224_v38  ;;  %v6226_v55 = vpop.eup %6225 }
 0x4da   :  { %6231 = vrcp.f32 %v895_v30 }
 0x4db   :  { %6233 = vpow2.f32 %v5509_v1 }
 0x4dc   :  { %6235 = vpow2.f32 %v5510_v48 }
 0x4e3   :  { %v6228_v53 = vpop.eup %6227 }
 0x4e4   :  { %v916_v45 = vmul.f32 %v6228_v53, %v6226_v55  ;;  %v6230_v5 = vpop.eup %6229  ;;  %v914_v3 = vmul.f32 %v6228_v53, %v7121_v59 }
 0x4e6   :  { %920 = vrot.lane.b32.xlu0 %v916_v45, %s6668_s18 }
 0x4e7   :  { %v6232_v24 = vpop.eup %6231 }
 0x4e8   :  { %v917_v37 = vmul.f32 %v6232_v24, %v6230_v5  ;;  %v6234_v31 = vpop.eup %6233  ;;  %v915_v47 = vmul.f32 %v6232_v24, %v7125_v0 }
 0x4e9   :  { %v908_v27 = vadd.f32 1.0, %v6234_v31  ;;  %v6236_v63 = vpop.eup %6235 }
 0x4ea   :  { %922 = vrot.lane.b32.xlu1 %v917_v37, %s6668_s18  ;;  %v909_v46 = vadd.f32 1.0, %v6236_v63 }
 0x4eb   :  { %6237 = vrcp.f32 %v908_v27 }
 0x4f8   :  { %v6238_v54 = vpop.eup %6237 }
 0x558   :  { %v921_v9 = vpop.permute.xlu0 %920 }
 0x559   :  { %v7163_v35 = vadd.f32 %v921_v9, %v914_v3 }
 0x55b   :  { %6239 = vtanh.f32 %v7163_v35 }
 0x55c   :  { %v923_v38 = vpop.permute.xlu1 %922  ;;  %6241 = vrcp.f32 %v909_v46 }
 0x55d   :  { %v7167_v30 = vadd.f32 %v923_v38, %v915_v47 }
 0x55f   :  { %6243 = vtanh.f32 %v7167_v30 }
 0x568   :  { %v6240_v39 = vpop.eup %6239 }
 0x569   :  { %v930_v55 = vmul.f32 %v6240_v39, %v6238_v54  ;;  %v6242_v45 = vpop.eup %6241 }
 0x56b   :  { %934 = vrot.lane.b32.xlu0 %v930_v55, %s6668_s18 }
 0x56c   :  { %v6244_v59 = vpop.eup %6243 }
 0x56d   :  { %v931_v53 = vmul.f32 %v6244_v59, %v6242_v45 }
 0x56f   :  { %936 = vrot.lane.b32.xlu1 %v931_v53, %s6668_s18 }
 0x5dd   :  { %v7172_v5 = vpop.permute.xlu0 %934 }
 0x5de   :  { %5511 = vmatmul.mubr.msk.f32.vlgmr.msra.gmra.mxu1 %vm533_vm3, %v7172_v5 }
 0x5df   :  { %1012 = vmatprep.mubr.f32.mxu1 %v9188_v56  ;;  %1229 = vmatpush1.msra.mxu1 %v6732_v7 }
 0x5e0   :  { %1230 = vmatprep.subr.mxu1 %v6735_v8 }
 0x5e1   :  { %v7179_v0 = vpop.permute.xlu1 %936  ;;  %1231 = vmatpush1.msra.mxu1 %v6741_v10 }
 0x5e2   :  { %5512 = vmatmul.mubr.msk.f32.gmra.mxu1 %vm533_vm3, %v7179_v0  ;;  %1232 = vmatprep.subr.mxu1 %v6745_v11 }
 0x5e3   :  { %1233 = vmatpush1.msra.mxu1 %v6750_v12  ;;  %1276 = vmatprep.mubr.f32.mxu1 %v9188_v56 }
 0x5e4   :  { %1234 = vmatprep.subr.mxu1 %v6756_v13 }
 0x5e5   :  { %1235 = vmatpush1.msra.mxu1 %v6762_v15 }
 0x5e6   :  { %1236 = vmatprep.subr.mxu1 %v6766_v16 }
 0x5e7   :  { %1237 = vmatpush1.msra.mxu1 %v6771_v17 }
 0x5e8   :  { %1238 = vmatprep.subr.mxu1 %v6777_v18 }
 0x5e9   :  { %1239 = vmatpush1.msra.mxu1 %v6783_v20 }
 0x5ea   :  { %1240 = vmatprep.subr.mxu1 %v6787_v21 }
 0x5eb   :  { %1241 = vmatpush1.msra.mxu1 %v6792_v22 }
 0x5ec   :  { %1242 = vmatprep.subr.mxu1 %v6798_v23 }
 0x5ed   :  { %1243 = vmatpush1.msra.mxu1 %v6804_v25 }
 0x5ee   :  { %1498 = vmatprep.subr.mxu1 %v6729_v6 }
 0x69e   :  { %v1008_v24 = vpop.f32.mrf.mxu1 }
 0x69f   :  { %v1019_v37 = vadd.f32 %v1008_v24, %v6918_v14 }
 0x6a0   :  { %v1010_v1 = vpop.f32.mrf.mxu1 }
 0x6a1   :  { %v5513_v48 = vmul.f32 -1.442695, %v1019_v37  ;;  %v1020_v3 = vadd.f32 %v1010_v1, %v6928_v28 }
 0x6a2   :  { %v1014_v31 = vpop.f32.mrf.mxu1 }
 0x6a3   :  { %6245 = vpow2.f32 %v5513_v48  ;;  %v1021_v27 = vadd.f32 %v1014_v31, %v6938_v33  ;;  %v5515_v28 = vmul.f32 -1.442695, %v1020_v3 }
 0x6a4   :  { %v1016_v9 = vpop.f32.mrf.mxu1 }
 0x6a5   :  { %v5514_v63 = vmul.f32 -1.442695, %v1021_v27  ;;  %v1022_v38 = vadd.f32 %v1016_v9, %v6948_v49 }
 0x6a7   :  { %6247 = vpow2.f32 %v5514_v63  ;;  %v5516_v53 = vmul.f32 -1.442695, %v1022_v38 }
 0x6a8   :  { %6249 = vtanh.f32 %v1020_v3 }
 0x6b0   :  { %v6246_v46 = vpop.eup %6245 }
 0x6b1   :  { %v1029_v47 = vadd.f32 1.0, %v6246_v46 }
 0x6b3   :  { %6251 = vrcp.f32 %v1029_v47 }
 0x6b4   :  { %v6248_v6 = vpop.eup %6247  ;;  %6253 = vtanh.f32 %v1022_v38 }
 0x6b5   :  { %v1030_v54 = vadd.f32 1.0, %v6248_v6  ;;  %v6250_v14 = vpop.eup %6249 }
 0x6b7   :  { %6255 = vrcp.f32 %v1030_v54 }
 0x6b8   :  { %6257 = vpow2.f32 %v5515_v28 }
 0x6b9   :  { %6259 = vpow2.f32 %v5516_v53 }
 0x6c0   :  { %v6252_v39 = vpop.eup %6251 }
 0x6c1   :  { %v1051_v55 = vmul.f32 %v6252_v39, %v6250_v14  ;;  %v6254_v45 = vpop.eup %6253  ;;  %v1049_v1 = vmul.f32 %v6252_v39, %v7163_v35 }
 0x6c3   :  { %1055 = vrot.lane.b32.xlu0 %v1051_v55, %s6668_s18 }
 0x6c4   :  { %v6256_v33 = vpop.eup %6255 }
 0x6c5   :  { %v1052_v59 = vmul.f32 %v6256_v33, %v6254_v45  ;;  %v6258_v49 = vpop.eup %6257  ;;  %v1050_v63 = vmul.f32 %v6256_v33, %v7167_v30 }
 0x6c6   :  { %v1043_v24 = vadd.f32 1.0, %v6258_v49  ;;  %v6260_v37 = vpop.eup %6259 }
 0x6c7   :  { %1057 = vrot.lane.b32.xlu1 %v1052_v59, %s6668_s18  ;;  %v1044_v27 = vadd.f32 1.0, %v6260_v37 }
 0x6c8   :  { %6261 = vrcp.f32 %v1043_v24 }
 0x6d5   :  { %v6262_v3 = vpop.eup %6261 }
 0x735   :  { %v1056_v48 = vpop.permute.xlu0 %1055 }
 0x736   :  { %v7205_v31 = vadd.f32 %v1056_v48, %v1049_v1 }
 0x738   :  { %6263 = vtanh.f32 %v7205_v31 }
 0x739   :  { %v1058_v9 = vpop.permute.xlu1 %1057  ;;  %6265 = vrcp.f32 %v1044_v27 }
 0x73a   :  { %v7209_v46 = vadd.f32 %v1058_v9, %v1050_v63 }
 0x73c   :  { %6267 = vtanh.f32 %v7209_v46 }
 0x745   :  { %v6264_v47 = vpop.eup %6263 }
 0x746   :  { %v1065_v38 = vmul.f32 %v6264_v47, %v6262_v3  ;;  %v6266_v6 = vpop.eup %6265 }
 0x748   :  { %1069 = vrot.lane.b32.xlu0 %v1065_v38, %s6668_s18 }
 0x749   :  { %v6268_v35 = vpop.eup %6267 }
 0x74a   :  { %v1066_v54 = vmul.f32 %v6268_v35, %v6266_v6  ;;  %v6617_v6 = vld [vmem:[%s6724_s13 + $0x70] sm:$0xff]  ;;  %v6618_v35 = vld [vmem:[%s6724_s13 + $0x68] sm:$0xff] }
 0x74c   :  { %1071 = vrot.lane.b32.xlu1 %v1066_v54, %s6668_s18 }
 0x7ba   :  { %v7214_v14 = vpop.permute.xlu0 %1069 }
 0x7bb   :  { %5517 = vmatmul.mubr.msk.f32.vlgmr.msra.gmra.mxu0 %vm533_vm3, %v7214_v14 }
 0x7bc   :  { %1147 = vmatprep.mubr.f32.mxu0 %v9188_v56  ;;  %1364 = vmatpush1.msra.mxu0 %v6732_v7 }
 0x7bd   :  { %1365 = vmatprep.subr.mxu0 %v6735_v8 }
 0x7be   :  { %v7221_v30 = vpop.permute.xlu1 %1071  ;;  %1366 = vmatpush1.msra.mxu0 %v6741_v10 }
 0x7bf   :  { %5518 = vmatmul.mubr.msk.f32.gmra.mxu0 %vm533_vm3, %v7221_v30  ;;  %1367 = vmatprep.subr.mxu0 %v6745_v11 }
 0x7c0   :  { %1368 = vmatpush1.msra.mxu0 %v6750_v12  ;;  %1411 = vmatprep.mubr.f32.mxu0 %v9188_v56 }
 0x7c1   :  { %1369 = vmatprep.subr.mxu0 %v6756_v13 }
 0x7c2   :  { %1370 = vmatpush1.msra.mxu0 %v6762_v15 }
 0x7c3   :  { %1371 = vmatprep.subr.mxu0 %v6766_v16 }
 0x7c4   :  { %1372 = vmatpush1.msra.mxu0 %v6771_v17 }
 0x7c5   :  { %1373 = vmatprep.subr.mxu0 %v6777_v18 }
 0x7c6   :  { %1374 = vmatpush1.msra.mxu0 %v6783_v20 }
 0x7c7   :  { %1375 = vmatprep.subr.mxu0 %v6787_v21 }
 0x7c8   :  { %1376 = vmatpush1.msra.mxu0 %v6792_v22 }
 0x7c9   :  { %1377 = vmatprep.subr.mxu0 %v6798_v23 }
 0x7ca   :  { %1378 = vmatpush1.msra.mxu0 %v6804_v25 }
 0x87b   :  { %v1143_v7 = vpop.f32.mrf.mxu0 }
 0x87c   :  { %v1154_v8 = vadd.f32 %v1143_v7, %v6921_v19  ;;  %v6619_v7 = vld [vmem:[%s6724_s13 + $0x60] sm:$0xff] }
 0x87d   :  { %v1145_v10 = vpop.f32.mrf.mxu0 }
 0x87e   :  { %v5519_v11 = vmul.f32 -1.442695, %v1154_v8  ;;  %v1155_v16 = vadd.f32 %v1145_v10, %v6931_v29  ;;  %v6620_v8 = vld [vmem:[%s6724_s13 + $0x58] sm:$0xff]  ;;  %v6621_v10 = vld [vmem:[%s6724_s13 + $0x50] sm:$0xff] }
 0x87f   :  { %v1149_v12 = vpop.f32.mrf.mxu0 }
 0x880   :  { %6269 = vpow2.f32 %v5519_v11  ;;  %v1156_v13 = vadd.f32 %v1149_v12, %v6941_v34  ;;  %v5521_v29 = vmul.f32 -1.442695, %v1155_v16  ;;  %v6622_v11 = vld [vmem:[%s6724_s13 + $0x48] sm:$0xff]  ;;  %v6623_v12 = vld [vmem:[%s6724_s13 + $0x40] sm:$0xff] }
 0x881   :  { %v1151_v17 = vpop.f32.mrf.mxu0 }
 0x882   :  { %v5520_v15 = vmul.f32 -1.442695, %v1156_v13  ;;  %v1157_v21 = vadd.f32 %v1151_v17, %v6951_v51  ;;  %v6624_v13 = vld [vmem:[%s6724_s13 + $0x38] sm:$0xff]  ;;  %v6627_v17 = vld [vmem:[%s6724_s13 + $0x20] sm:$0xff] }
 0x884   :  { %6271 = vpow2.f32 %v5520_v15  ;;  %v5522_v33 = vmul.f32 -1.442695, %v1157_v21  ;;  %v6625_v15 = vld [vmem:[%s6724_s13 + $0x30] sm:$0xff] }
 0x885   :  { %6273 = vtanh.f32 %v1155_v16  ;;  %v6626_v16 = vld [vmem:[%s6724_s13 + $0x28] sm:$0xff] }
 0x88d   :  { %v6270_v18 = vpop.eup %6269 }
 0x88e   :  { %v1164_v20 = vadd.f32 1.0, %v6270_v18  ;;  %v6628_v18 = vld [vmem:[%s6724_s13 + $0x18] sm:$0xff] }
 0x890   :  { %6275 = vrcp.f32 %v1164_v20  ;;  %v6629_v20 = vld [vmem:[%s6724_s13 + $0x10] sm:$0xff] }
 0x891   :  { %v6272_v22 = vpop.eup %6271  ;;  %6277 = vtanh.f32 %v1157_v21  ;;  %v6630_v21 = vld [vmem:[%s6724_s13 + $0x8] sm:$0xff] }
 0x892   :  { %v1165_v23 = vadd.f32 1.0, %v6272_v22  ;;  %v6274_v25 = vpop.eup %6273  ;;  %v6631_v22 = vld [vmem:[%s6724_s13] sm:$0xff]  ;;  %s5447_s13 = sld [smem:[%s9153_s0 + %s6674_s10]]   ;;  %s6681_s10 = smov 23  }
 0x894   :  { %6279 = vrcp.f32 %v1165_v23 }
 0x895   :  { %6281 = vpow2.f32 %v5521_v29 }
 0x896   :  { %6283 = vpow2.f32 %v5522_v33 }
 0x89d   :  { %v6276_v19 = vpop.eup %6275 }
 0x89e   :  { %v1186_v39 = vmul.f32 %v6276_v19, %v6274_v25  ;;  %v6278_v55 = vpop.eup %6277  ;;  %v1184_v53 = vmul.f32 %v6276_v19, %v7205_v31 }
 0x8a0   :  { %1190 = vrot.lane.b32.xlu0 %v1186_v39, %s6668_s18 }
 0x8a1   :  { %v6280_v34 = vpop.eup %6279 }
 0x8a2   :  { %v1187_v45 = vmul.f32 %v6280_v34, %v6278_v55  ;;  %v6282_v51 = vpop.eup %6281  ;;  %v1185_v1 = vmul.f32 %v6280_v34, %v7209_v46 }
 0x8a3   :  { %v1178_v59 = vadd.f32 1.0, %v6282_v51  ;;  %v6284_v28 = vpop.eup %6283 }
 0x8a4   :  { %1192 = vrot.lane.b32.xlu1 %v1187_v45, %s6668_s18  ;;  %v1179_v37 = vadd.f32 1.0, %v6284_v28 }
 0x8a5   :  { %6285 = vrcp.f32 %v1178_v59 }
 0x8b2   :  { %v6286_v63 = vpop.eup %6285 }
 0x912   :  { %v1191_v49 = vpop.permute.xlu0 %1190 }
 0x913   :  { %v7246_v24 = vadd.f32 %v1191_v49, %v1184_v53 }
 0x915   :  { %6287 = vtanh.f32 %v7246_v24 }
 0x916   :  { %v1193_v48 = vpop.permute.xlu1 %1192  ;;  %6289 = vrcp.f32 %v1179_v37 }
 0x917   :  { %v7250_v27 = vadd.f32 %v1193_v48, %v1185_v1 }
 0x919   :  { %6291 = vtanh.f32 %v7250_v27 }
 0x922   :  { %v6288_v31 = vpop.eup %6287 }
 0x923   :  { %v1200_v9 = vmul.f32 %v6288_v31, %v6286_v63  ;;  %v6290_v3 = vpop.eup %6289 }
 0x925   :  { %1204 = vrot.lane.b32.xlu0 %v1200_v9, %s6668_s18 }
 0x926   :  { %v6292_v47 = vpop.eup %6291 }
 0x927   :  { %v1201_v38 = vmul.f32 %v6292_v47, %v6290_v3 }
 0x929   :  { %1206 = vrot.lane.b32.xlu1 %v1201_v38, %s6668_s18 }
 0x997   :  { %v7255_v46 = vpop.permute.xlu0 %1204 }
 0x998   :  { %5523 = vmatmul.mubr.msk.f32.vlgmr.msra.gmra.mxu1 %vm533_vm3, %v7255_v46 }
 0x999   :  { %1282 = vmatprep.mubr.f32.mxu1 %v9188_v56  ;;  %1499 = vmatpush1.msra.mxu1 %v6617_v6 }
 0x99a   :  { %1500 = vmatprep.subr.mxu1 %v6618_v35 }
 0x99b   :  { %v7262_v54 = vpop.permute.xlu1 %1206  ;;  %1501 = vmatpush1.msra.mxu1 %v6619_v7 }
 0x99c   :  { %5524 = vmatmul.mubr.msk.f32.gmra.mxu1 %vm533_vm3, %v7262_v54  ;;  %1502 = vmatprep.subr.mxu1 %v6620_v8 }
 0x99d   :  { %1503 = vmatpush1.msra.mxu1 %v6621_v10  ;;  %1546 = vmatprep.mubr.f32.mxu1 %v9188_v56 }
 0x99e   :  { %1504 = vmatprep.subr.mxu1 %v6622_v11 }
 0x99f   :  { %1505 = vmatpush1.msra.mxu1 %v6623_v12 }
 0x9a0   :  { %1506 = vmatprep.subr.mxu1 %v6624_v13 }
 0x9a1   :  { %1507 = vmatpush1.msra.mxu1 %v6625_v15 }
 0x9a2   :  { %1508 = vmatprep.subr.mxu1 %v6626_v16 }
 0x9a3   :  { %1509 = vmatpush1.msra.mxu1 %v6627_v17 }
 0x9a4   :  { %1510 = vmatprep.subr.mxu1 %v6628_v18 }
 0x9a5   :  { %1511 = vmatpush1.msra.mxu1 %v6629_v20 }
 0x9a6   :  { %1512 = vmatprep.subr.mxu1 %v6630_v21 }
 0x9a7   :  { %1513 = vmatpush1.msra.mxu1 %v6631_v22 }
 0xa58   :  { %v1278_v23 = vpop.f32.mrf.mxu1 }
 0xa59   :  { %v1289_v25 = vadd.f32 %v1278_v23, %v6961_v57 }
 0xa5a   :  { %v1280_v19 = vpop.f32.mrf.mxu1 }
 0xa5b   :  { %v5525_v39 = vmul.f32 -1.442695, %v1289_v25  ;;  %v1290_v29 = vadd.f32 %v1280_v19, %v6971_v4 }
 0xa5c   :  { %v1284_v55 = vpop.f32.mrf.mxu1 }
 0xa5d   :  { %6293 = vpow2.f32 %v5525_v39  ;;  %v1291_v34 = vadd.f32 %v1284_v55, %v6981_v26  ;;  %v5527_v4 = vmul.f32 -1.442695, %v1290_v29 }
 0xa5e   :  { %v1286_v33 = vpop.f32.mrf.mxu1 }
 0xa5f   :  { %v5526_v45 = vmul.f32 -1.442695, %v1291_v34  ;;  %v1292_v28 = vadd.f32 %v1286_v33, %v6991_v32 }
 0xa61   :  { %6295 = vpow2.f32 %v5526_v45  ;;  %v5528_v31 = vmul.f32 -1.442695, %v1292_v28 }
 0xa62   :  { %6297 = vtanh.f32 %v1290_v29 }
 0xa6a   :  { %v6294_v51 = vpop.eup %6293 }
 0xa6b   :  { %v1299_v59 = vadd.f32 1.0, %v6294_v51 }
 0xa6d   :  { %6299 = vrcp.f32 %v1299_v59 }
 0xa6e   :  { %v6296_v53 = vpop.eup %6295  ;;  %6301 = vtanh.f32 %v1292_v28 }
 0xa6f   :  { %v1300_v49 = vadd.f32 1.0, %v6296_v53  ;;  %v6298_v57 = vpop.eup %6297 }
 0xa71   :  { %6303 = vrcp.f32 %v1300_v49 }
 0xa72   :  { %6305 = vpow2.f32 %v5527_v4 }
 0xa73   :  { %6307 = vpow2.f32 %v5528_v31 }
 0xa7a   :  { %v6300_v37 = vpop.eup %6299 }
 0xa7b   :  { %v1321_v1 = vmul.f32 %v6300_v37, %v6298_v57  ;;  %v6302_v48 = vpop.eup %6301  ;;  %v1319_v47 = vmul.f32 %v6300_v37, %v7246_v24 }
 0xa7d   :  { %1325 = vrot.lane.b32.xlu0 %v1321_v1, %s6668_s18 }
 0xa7e   :  { %v6304_v26 = vpop.eup %6303 }
 0xa7f   :  { %v1322_v63 = vmul.f32 %v6304_v26, %v6302_v48  ;;  %v6306_v32 = vpop.eup %6305  ;;  %v1320_v7 = vmul.f32 %v6304_v26, %v7250_v27 }
 0xa80   :  { %v1313_v9 = vadd.f32 1.0, %v6306_v32  ;;  %v6308_v3 = vpop.eup %6307 }
 0xa81   :  { %1327 = vrot.lane.b32.xlu1 %v1322_v63, %s6668_s18  ;;  %v1314_v35 = vadd.f32 1.0, %v6308_v3 }
 0xa82   :  { %6309 = vrcp.f32 %v1313_v9 }
 0xa8f   :  { %v6310_v11 = vpop.eup %6309 }
 0xaef   :  { %v1326_v38 = vpop.permute.xlu0 %1325 }
 0xaf0   :  { %v1331_v6 = vadd.f32 %v1326_v38, %v1319_v47 }
 0xaf2   :  { %6311 = vtanh.f32 %v1331_v6 }
 0xaf3   :  { %v1328_v8 = vpop.permute.xlu1 %1327  ;;  %6313 = vrcp.f32 %v1314_v35 }
 0xaf4   :  { %v1332_v10 = vadd.f32 %v1328_v8, %v1320_v7 }
 0xaf6   :  { %6315 = vtanh.f32 %v1332_v10 }
 0xaff   :  { %v6312_v12 = vpop.eup %6311 }
 0xb00   :  { %v1335_v13 = vmul.f32 %v6312_v12, %v6310_v11  ;;  %v6314_v15 = vpop.eup %6313  ;;  %v231_v11 = vld [vmem:[%s7308_s22 + $0x30] sm:$0xff]  ;;  %v230_v12 = vld [vmem:[%s7308_s22 + $0x28] sm:$0xff] }
 0xb02   :  { %1339 = vrot.lane.b32.xlu0 %v1335_v13, %s6668_s18 }
 0xb03   :  { %v6316_v16 = vpop.eup %6315 }
 0xb04   :  { %v1336_v17 = vmul.f32 %v6316_v16, %v6314_v15  ;;  %v229_v15 = vld [vmem:[%s7308_s22 + $0x20] sm:$0xff]  ;;  %v228_v16 = vld [vmem:[%s7308_s22 + $0x18] sm:$0xff] }
 0xb06   :  { %1341 = vrot.lane.b32.xlu1 %v1336_v17, %s6668_s18  ;;  %v227_v17 = vld [vmem:[%s7308_s22 + $0x10] sm:$0xff] }
 0xb74   :  { %v7290_v24 = vpop.permute.xlu0 %1339 }
 0xb75   :  { %5529 = vmatmul.mubr.msk.f32.vlgmr.msra.gmra.mxu0 %vm533_vm3, %v7290_v24 }
 0xb76   :  { %1417 = vmatprep.mubr.f32.mxu0 %v9188_v56 }
 0xb78   :  { %v7295_v27 = vpop.permute.xlu1 %1341 }
 0xb79   :  { %5530 = vmatmul.mubr.msk.f32.gmra.mxu0 %vm533_vm3, %v7295_v27 }
 0xc35   :  { %v1413_v18 = vpop.f32.mrf.mxu0 }
 0xc36   :  { %v1424_v20 = vadd.f32 %v1413_v18, %v7003_v50  ;;  %v226_v18 = vld [vmem:[%s7308_s22 + $0x8] sm:$0xff] }
 0xc37   :  { %v1415_v21 = vpop.f32.mrf.mxu0 }
 0xc38   :  { %v5531_v22 = vmul.f32 -1.442695, %v1424_v20  ;;  %v1425_v39 = vadd.f32 %v1415_v21, %v7015_v41  ;;  %v232_v41 = vld [vmem:[%s7308_s22 + $0x38] sm:$0xff]  ;;  %v225_v20 = vld [vmem:[%s7308_s22] sm:$0xff]  ;;  %s7643_s22 = sld [smem:[%s9153_s0 + %s6676_s19]]   ;;  %s6683_s19 = smov 29  }
 0xc39   :  { %v1419_v23 = vpop.f32.mrf.mxu0  ;;  %5898 = vmatprep.subr.mxu1 %v232_v41 }
 0xc3a   :  { %6317 = vpow2.f32 %v5531_v22  ;;  %v1426_v25 = vadd.f32 %v1419_v23, %v7027_v42 }
 0xc3b   :  { %v1421_v55 = vpop.f32.mrf.mxu0 }
 0xc3c   :  { %v5532_v19 = vmul.f32 -1.442695, %v1426_v25  ;;  %v1427_v29 = vadd.f32 %v1421_v55, %v7039_v43  ;;  %v5533_v43 = vmul.f32 -1.442695, %v1425_v39 }
 0xc3e   :  { %6319 = vpow2.f32 %v5532_v19  ;;  %v5534_v57 = vmul.f32 -1.442695, %v1427_v29 }
 0xc3f   :  { %6321 = vtanh.f32 %v1425_v39 }
 0xc47   :  { %v6318_v34 = vpop.eup %6317 }
 0xc48   :  { %v1434_v45 = vadd.f32 1.0, %v6318_v34  ;;  %v489_v34 = vsel %vm6906_vm2, %v7070_v60, %v6882_v40 }
 0xc4a   :  { %6323 = vrcp.f32 %v1434_v45  ;;  %v9189_v45 = vld [vmem:[#allocation7_spill] sm:$0xff] }
 0xc4b   :  { %v6320_v33 = vpop.eup %6319  ;;  %6325 = vtanh.f32 %v1427_v29 }
 0xc4c   :  { %v1435_v51 = vadd.f32 1.0, %v6320_v33  ;;  %v6322_v50 = vpop.eup %6321 }
 0xc4e   :  { %6327 = vrcp.f32 %v1435_v51 }
 0xc4f   :  { %6329 = vpow2.f32 %v5533_v43 }
 0xc50   :  { %6331 = vpow2.f32 %v5534_v57  ;;  %v240_v57 = vld [vmem:[%s7376_s26 + $0x38] sm:$0xff] }
 0xc51   :  { %5858 = vmatprep.subr.mxu0 %v240_v57 }
 0xc52   :  { %5859 = vmatpush3.msra.mxu0 %v240_v57  ;;  %v2164_v57 = vld [vmem:[%s7397_s30 + $0x58] sm:$0xff] }
 0xc57   :  { %v6324_v59 = vpop.eup %6323 }
 0xc58   :  { %v1456_v28 = vmul.f32 %v6324_v59, %v6322_v50  ;;  %v6326_v53 = vpop.eup %6325  ;;  %v1454_v26 = vmul.f32 %v6324_v59, %v1331_v6  ;;  %v9190_v50 = vld [vmem:[#allocation6_spill] sm:$0xff] }
 0xc59   :  { %v532_v59 = vadd.f32 %v9190_v50, %v489_v34  ;;  %v7428_v34 = vld [vmem:[%s7403_s4 + $0x58] sm:$0xff]  ;;  %v7449_v50 = vld [vmem:[%s7403_s4 + $0x30] sm:$0xff] }
 0xc5a   :  { %1460 = vrot.lane.b32.xlu0 %v1456_v28, %s6668_s18 }
 0xc5b   :  { %v6328_v42 = vpop.eup %6327 }
 0xc5c   :  { %v1457_v49 = vmul.f32 %v6328_v42, %v6326_v53  ;;  %v6330_v37 = vpop.eup %6329  ;;  %v1455_v32 = vmul.f32 %v6328_v42, %v1332_v10 }
 0xc5d   :  { %v1448_v1 = vadd.f32 1.0, %v6330_v37  ;;  %v6332_v48 = vpop.eup %6331  ;;  %v239_v37 = vld [vmem:[%s7376_s26 + $0x30] sm:$0xff] }
 0xc5e   :  { %1462 = vrot.lane.b32.xlu1 %v1457_v49, %s6668_s18  ;;  %v1449_v31 = vadd.f32 1.0, %v6332_v48  ;;  %5860 = vmatprep.subr.mxu0 %v239_v37  ;;  %v237_v48 = vld [vmem:[%s7376_s26 + $0x20] sm:$0xff] }
 0xc5f   :  { %6333 = vrcp.f32 %v1448_v1  ;;  %v238_v1 = vld [vmem:[%s7376_s26 + $0x28] sm:$0xff]  ;;  %5861 = vmatpush3.msra.mxu0 %v239_v37  ;;  %v2163_v37 = vld [vmem:[%s7397_s30 + $0x50] sm:$0xff] }
 0xc60   :  { %5862 = vmatprep.subr.mxu0 %v238_v1 }
 0xc61   :  { %5863 = vmatpush3.msra.mxu0 %v238_v1  ;;  %v2162_v1 = vld [vmem:[%s7397_s30 + $0x48] sm:$0xff] }
 0xc62   :  { %5864 = vmatprep.subr.mxu0 %v237_v48 }
 0xc63   :  { %5865 = vmatpush3.msra.mxu0 %v237_v48  ;;  %v2161_v48 = vld [vmem:[%s7397_s30 + $0x40] sm:$0xff] }
 0xc6c   :  { %v6334_v47 = vpop.eup %6333 }
 0xccc   :  { %v1461_v63 = vpop.permute.xlu0 %1460 }
 0xccd   :  { %v7311_v4 = vadd.f32 %v1461_v63, %v1454_v26  ;;  %v236_v26 = vld [vmem:[%s7376_s26 + $0x18] sm:$0xff]  ;;  %v235_v63 = vld [vmem:[%s7376_s26 + $0x10] sm:$0xff] }
 0xcce   :  { %5866 = vmatprep.subr.mxu0 %v236_v26 }
 0xccf   :  { %6335 = vtanh.f32 %v7311_v4  ;;  %5867 = vmatpush3.msra.mxu0 %v236_v26  ;;  %v2159_v26 = vld [vmem:[%s7397_s30 + $0x30] sm:$0xff] }
 0xcd0   :  { %v1463_v9 = vpop.permute.xlu1 %1462  ;;  %6337 = vrcp.f32 %v1449_v31  ;;  %v234_v31 = vld [vmem:[%s7376_s26 + $0x8] sm:$0xff]  ;;  %5868 = vmatprep.subr.mxu0 %v235_v63 }
 0xcd1   :  { %v7314_v3 = vadd.f32 %v1463_v9, %v1455_v32  ;;  %5869 = vmatpush3.msra.mxu0 %v235_v63  ;;  %v2158_v63 = vld [vmem:[%s7397_s30 + $0x28] sm:$0xff] }
 0xcd2   :  { %5870 = vmatprep.subr.mxu0 %v234_v31 }
 0xcd3   :  { %6339 = vtanh.f32 %v7314_v3  ;;  %5871 = vmatpush3.msra.mxu0 %v234_v31  ;;  %v2155_v31 = vld [vmem:[%s7397_s30 + $0x10] sm:$0xff] }
 0xcdc   :  { %v6336_v38 = vpop.eup %6335 }
 0xcdd   :  { %v1470_v6 = vmul.f32 %v6336_v38, %v6334_v47  ;;  %v6338_v35 = vpop.eup %6337 }
 0xcdf   :  { %1474 = vrot.lane.b32.xlu0 %v1470_v6, %s6668_s18 }
 0xce0   :  { %v6340_v7 = vpop.eup %6339 }
 0xce1   :  { %v1471_v8 = vmul.f32 %v6340_v7, %v6338_v35 }
 0xce3   :  { %1476 = vrot.lane.b32.xlu1 %v1471_v8, %s6668_s18 }
 0xd51   :  { %v7319_v10 = vpop.permute.xlu0 %1474 }
 0xd52   :  { %5535 = vmatmul.mubr.msk.f32.vlgmr.msra.gmra.mxu1 %vm533_vm3, %v7319_v10 }
 0xd53   :  { %5899 = vmatpush3.msra.mxu1 %v232_v41  ;;  %1552 = vmatprep.mubr.f32.mxu1 %v9188_v56 }
 0xd54   :  { %5900 = vmatprep.subr.mxu1 %v231_v11 }
 0xd55   :  { %5901 = vmatpush3.msra.mxu1 %v231_v11  ;;  %v7326_v13 = vpop.permute.xlu1 %1476 }
 0xd56   :  { %5902 = vmatprep.subr.mxu1 %v230_v12  ;;  %5536 = vmatmul.mubr.msk.f32.gmra.mxu1 %vm533_vm3, %v7326_v13 }
 0xd57   :  { %5903 = vmatpush3.msra.mxu1 %v230_v12  ;;  %5914 = vmatprep.mubr.msk.f32.mxu1 %vm533_vm3, %v7088_v61 }
 0xd58   :  { %5904 = vmatprep.subr.mxu1 %v229_v15 }
 0xd59   :  { %5905 = vmatpush3.msra.mxu1 %v229_v15 }
 0xd5a   :  { %5906 = vmatprep.subr.mxu1 %v228_v16 }
 0xd5b   :  { %5907 = vmatpush3.msra.mxu1 %v228_v16 }
 0xd5c   :  { %5908 = vmatprep.subr.mxu1 %v227_v17 }
 0xd5d   :  { %5909 = vmatpush3.msra.mxu1 %v227_v17  ;;  %v233_v17 = vld [vmem:[%s7376_s26] sm:$0xff]  ;;  %s7665_s26 = sld [smem:[%s9153_s0 + %s6677_s23]]   ;;  %s6684_s23 = smov 9  }
 0xd5e   :  { %5910 = vmatprep.subr.mxu1 %v226_v18  ;;  %5872 = vmatprep.subr.mxu0 %v233_v17 }
 0xd5f   :  { %5911 = vmatpush3.msra.mxu1 %v226_v18  ;;  %5873 = vmatpush3.msra.mxu0 %v233_v17  ;;  %v7578_v17 = vld [vmem:[%s5434_s8] ss:$0 sm:$0xff]  ;;  %s5450_s8 = sld [smem:[%s9153_s0 + %s6680_s5]]   ;;  %s6687_s5 = smov 7  }
 0xd60   :  { %5912 = vmatprep.subr.mxu1 %v225_v20 }
 0xd61   :  { %5913 = vmatpush3.msra.mxu1 %v225_v20 }
 0xd62   :  { %5915 = vmatmul.mubr.msk.f32.vlgmr.msra.gmra.mxu1 %vm533_vm3, %v7095_v62 }
 0xd63   :  { %5917 = vmatprep.mubr.msk.f32.mxu1 %vm533_vm3, %v7130_v58 }
 0xd66   :  { %5918 = vmatmul.mubr.msk.f32.gmra.mxu1 %vm533_vm3, %v7137_v52 }
 0xd67   :  { %5920 = vmatprep.mubr.msk.f32.mxu1 %vm533_vm3, %v7172_v5 }
 0xd6a   :  { %5921 = vmatmul.mubr.msk.f32.gmra.mxu1 %vm533_vm3, %v7179_v0 }
 0xd6b   :  { %5923 = vmatprep.mubr.msk.f32.mxu1 %vm533_vm3, %v7214_v14 }
 0xd6e   :  { %5924 = vmatmul.mubr.msk.f32.gmra.mxu1 %vm533_vm3, %v7221_v30 }
 0xd6f   :  { %5926 = vmatprep.mubr.msk.f32.mxu1 %vm533_vm3, %v7255_v46 }
 0xd72   :  { %5927 = vmatmul.mubr.msk.f32.gmra.mxu1 %vm533_vm3, %v7262_v54 }
 0xd73   :  { %5929 = vmatprep.mubr.msk.f32.mxu1 %vm533_vm3, %v7290_v24 }
 0xd76   :  { %5930 = vmatmul.mubr.msk.f32.gmra.mxu1 %vm533_vm3, %v7295_v27 }
 0xd77   :  { %5932 = vmatprep.mubr.msk.f32.mxu1 %vm533_vm3, %v7319_v10 }
 0xd7a   :  { %5933 = vmatmul.mubr.msk.f32.gmra.mxu1 %vm533_vm3, %v7326_v13 }
 0xe12   :  { %v1548_v21 = vpop.f32.mrf.mxu1 }
 0xe13   :  { %v1559_v22 = vadd.f32 %v1548_v21, %v7049_v44 }
 0xe14   :  { %v1550_v23 = vpop.f32.mrf.mxu1 }
 0xe15   :  { %v5537_v25 = vmul.f32 -1.442695, %v1559_v22  ;;  %v1560_v29 = vadd.f32 %v1550_v23, %v9189_v45  ;;  %v7432_v45 = vld [vmem:[%s7403_s4 + $0x50] sm:$0xff] }
 0xe16   :  { %v1554_v19 = vpop.f32.mrf.mxu1 }
 0xe17   :  { %6341 = vpow2.f32 %v5537_v25  ;;  %v1561_v39 = vadd.f32 %v1554_v19, %v7065_v36  ;;  %v5539_v32 = vmul.f32 -1.442695, %v1560_v29  ;;  %v7412_v25 = vld [vmem:[%s7403_s4 + $0x78] sm:$0xff]  ;;  %v7415_v19 = vld [vmem:[%s7403_s4 + $0x70] sm:$0xff] }
 0xe18   :  { %v1556_v33 = vpop.f32.mrf.mxu1  ;;  %2317 = vmatprep.subr.mxu1 %v7412_v25 }
 0xe19   :  { %v5538_v55 = vmul.f32 -1.442695, %v1561_v39  ;;  %v1562_v28 = vadd.f32 %v1556_v33, %v532_v59  ;;  %v7418_v39 = vld [vmem:[%s7403_s4 + $0x68] sm:$0xff]  ;;  %2318 = vmatpush1.msra.mxu1 %v7415_v19  ;;  %v7440_v33 = vld [vmem:[%s7403_s4 + $0x40] sm:$0xff] }
 0xe1a   :  { %2319 = vmatprep.subr.mxu1 %v7418_v39  ;;  %v7454_v59 = vld [vmem:[%s7403_s4 + $0x28] sm:$0xff] }
 0xe1b   :  { %6343 = vpow2.f32 %v5538_v55  ;;  %v5540_v9 = vmul.f32 -1.442695, %v1562_v28  ;;  %v7424_v55 = vld [vmem:[%s7403_s4 + $0x60] sm:$0xff] }
 0xe1c   :  { %6345 = vtanh.f32 %v1560_v29  ;;  %2320 = vmatpush1.msra.mxu1 %v7424_v55  ;;  %v7437_v29 = vld [vmem:[%s7403_s4 + $0x48] sm:$0xff] }
 0xe1d   :  { %2321 = vmatprep.subr.mxu1 %v7428_v34 }
 0xe1e   :  { %2322 = vmatpush1.msra.mxu1 %v7432_v45 }
 0xe1f   :  { %2323 = vmatprep.subr.mxu1 %v7437_v29 }
 0xe20   :  { %2324 = vmatpush1.msra.mxu1 %v7440_v33 }
 0xe24   :  { %v6342_v51 = vpop.eup %6341 }
 0xe25   :  { %v1569_v44 = vadd.f32 1.0, %v6342_v51  ;;  %v7446_v51 = vld [vmem:[%s7403_s4 + $0x38] sm:$0xff] }
 0xe26   :  { %2325 = vmatprep.subr.mxu1 %v7446_v51 }
 0xe27   :  { %6347 = vrcp.f32 %v1569_v44  ;;  %2326 = vmatpush1.msra.mxu1 %v7449_v50  ;;  %v7457_v44 = vld [vmem:[%s7403_s4 + $0x20] sm:$0xff] }
 0xe28   :  { %v6344_v53 = vpop.eup %6343  ;;  %6349 = vtanh.f32 %v1562_v28  ;;  %2327 = vmatprep.subr.mxu1 %v7454_v59  ;;  %v7462_v28 = vld [vmem:[%s7403_s4 + $0x18] sm:$0xff] }
 0xe29   :  { %v1570_v42 = vadd.f32 1.0, %v6344_v53  ;;  %v6346_v36 = vpop.eup %6345  ;;  %2328 = vmatpush1.msra.mxu1 %v7457_v44  ;;  %v7466_v53 = vld [vmem:[%s7403_s4 + $0x10] sm:$0xff] }
 0xe2a   :  { %2329 = vmatprep.subr.mxu1 %v7462_v28 }
 0xe2b   :  { %6351 = vrcp.f32 %v1570_v42  ;;  %2330 = vmatpush1.msra.mxu1 %v7466_v53  ;;  %v7470_v42 = vld [vmem:[%s7403_s4 + $0x8] sm:$0xff] }
 0xe2c   :  { %6353 = vpow2.f32 %v5539_v32  ;;  %2331 = vmatprep.subr.mxu1 %v7470_v42  ;;  %v2154_v32 = vld [vmem:[%s7397_s30 + $0x8] sm:$0xff] }
 0xe2d   :  { %6355 = vpow2.f32 %v5540_v9  ;;  %v2153_v9 = vld [vmem:[%s7397_s30] sm:$0xff] }
 0xe34   :  { %v6348_v49 = vpop.eup %6347 }
 0xe35   :  { %v1591_v41 = vmul.f32 %v6348_v49, %v6346_v36  ;;  %v6350_v43 = vpop.eup %6349  ;;  %v1589_v35 = vmul.f32 %v6348_v49, %v7311_v4  ;;  %v2168_v4 = vld [vmem:[%s7397_s30 + $0x78] sm:$0xff]  ;;  %v7474_v36 = vld [vmem:[%s7403_s4] sm:$0xff]  ;;  %s5455_s4 = sld [smem:[%s9153_s0 + %s6679_s1]]   ;;  %s6686_s1 = smov 10  }
 0xe36   :  { %2221 = vmatprep.subr.mxu0 %v2168_v4  ;;  %2332 = vmatpush1.msra.mxu1 %v7474_v36 }
 0xe37   :  { %1595 = vrot.lane.b32.xlu0 %v1591_v41, %s6668_s18  ;;  %v2167_v41 = vld [vmem:[%s7397_s30 + $0x70] sm:$0xff] }
 0xe38   :  { %v6352_v40 = vpop.eup %6351 }
 0xe39   :  { %v1592_v60 = vmul.f32 %v6352_v40, %v6350_v43  ;;  %v6354_v47 = vpop.eup %6353  ;;  %v1590_v12 = vmul.f32 %v6352_v40, %v7314_v3  ;;  %v2166_v40 = vld [vmem:[%s7397_s30 + $0x68] sm:$0xff] }
 0xe3a   :  { %v1583_v38 = vadd.f32 1.0, %v6354_v47  ;;  %v6356_v6 = vpop.eup %6355 }
 0xe3b   :  { %1597 = vrot.lane.b32.xlu1 %v1592_v60, %s6668_s18  ;;  %v1584_v11 = vadd.f32 1.0, %v6356_v6  ;;  %v2165_v60 = vld [vmem:[%s7397_s30 + $0x60] sm:$0xff] }
 0xe3c   :  { %6357 = vrcp.f32 %v1583_v38 }
 0xe49   :  { %v6358_v18 = vpop.eup %6357 }
 0xea9   :  { %v1596_v7 = vpop.permute.xlu0 %1595 }
 0xeaa   :  { %v7386_v8 = vadd.f32 %v1596_v7, %v1589_v35 }
 0xeac   :  { %6359 = vtanh.f32 %v7386_v8 }
 0xead   :  { %v1598_v15 = vpop.permute.xlu1 %1597  ;;  %6361 = vrcp.f32 %v1584_v11 }
 0xeae   :  { %v7390_v16 = vadd.f32 %v1598_v15, %v1590_v12 }
 0xeb0   :  { %6363 = vtanh.f32 %v7390_v16 }
 0xeb9   :  { %v6360_v3 = vpop.eup %6359 }
 0xeba   :  { %v7405_v20 = vmul.f32 %v6360_v3, %v6358_v18  ;;  %v6362_v21 = vpop.eup %6361 }
 0xebc   :  { %1609 = vrot.lane.b32.xlu0 %v7405_v20, %s6668_s18 }
 0xebd   :  { %v6364_v22 = vpop.eup %6363 }
 0xebe   :  { %v7409_v23 = vmul.f32 %v6364_v22, %v6362_v21 }
 0xec0   :  { %1611 = vrot.lane.b32.xlu1 %v7409_v23, %s6668_s18 }
 0xf2e   :  { %v1610_v49 = vpop.permute.xlu0 %1609 }
 0xf2f   :  { %5874 = vmatprep.mubr.msk.f32.mxu0 %vm533_vm3, %v1610_v49  ;;  %5935 = vmatprep.mubr.msk.f32.mxu1 %vm533_vm3, %v1610_v49 }
 0xf32   :  { %v1612_v43 = vpop.permute.xlu1 %1611 }
 0xf33   :  { %5875 = vmatmul.mubr.msk.f32.vlgmr.msra.gmra.mxu0 %vm533_vm3, %v1612_v43  ;;  %5936 = vmatmul.mubr.msk.f32.gmra.mxu1 %vm533_vm3, %v1612_v43 }
 0xf34   :  { %2222 = vmatpush1.msra.mxu0 %v2167_v41  ;;  %5877 = vmatprep.mubr.msk.f32.mxu0 %vm533_vm3, %v7319_v10  ;;  %v2160_v10 = vld [vmem:[%s7397_s30 + $0x38] sm:$0xff] }
 0xf35   :  { %2223 = vmatprep.subr.mxu0 %v2166_v40  ;;  %2365 = vmatprep.mubr.f32.mxu1 %v9188_v56 }
 0xf36   :  { %2224 = vmatpush1.msra.mxu0 %v2165_v60  ;;  %v2185_v60 = vld [vmem:[%s5447_s13] sm:$0x3]  ;;  %s5451_s13 = sld [smem:[%s9153_s0 + %s6681_s10]]   ;;  %s6688_s10 = smov 8  }
 0xf37   :  { %5878 = vmatmul.mubr.msk.f32.gmra.mxu0 %vm533_vm3, %v7326_v13  ;;  %2225 = vmatprep.subr.mxu0 %v2164_v57  ;;  %v2157_v13 = vld [vmem:[%s7397_s30 + $0x20] sm:$0xff] }
 0xf38   :  { %5880 = vmatprep.mubr.msk.f32.mxu0 %vm533_vm3, %v7290_v24  ;;  %2226 = vmatpush1.msra.mxu0 %v2163_v37  ;;  %v2156_v24 = vld [vmem:[%s7397_s30 + $0x18] sm:$0xff]  ;;  %s7670_s30 = sld [smem:[%s9153_s0 + %s6678_s27]]   ;;  %s6685_s27 = smov 24  }
 0xf39   :  { %2227 = vmatprep.subr.mxu0 %v2162_v1  ;;  %2366 = vmatmul.mubr.f32.vlgmr.msra.gmra.mxu1 %v9188_v56 }
 0xf3a   :  { %2228 = vmatpush1.msra.mxu0 %v2161_v48  ;;  %v9191_v48 = vld [vmem:[#allocation3_spill] sm:$0xff] }
 0xf3b   :  { %5881 = vmatmul.mubr.msk.f32.gmra.mxu0 %vm533_vm3, %v7295_v27  ;;  %2229 = vmatprep.subr.mxu0 %v2160_v10  ;;  %v2290_v10 = vrot.slane %v2185_v60, %v9191_v48 }
 0xf3c   :  { %5883 = vmatprep.mubr.msk.f32.mxu0 %vm533_vm3, %v7255_v46  ;;  %2230 = vmatpush1.msra.mxu0 %v2159_v26 }
 0xf3d   :  { %2231 = vmatprep.subr.mxu0 %v2158_v63  ;;  %v9192_v63 = vld [vmem:[#allocation4_spill] sm:$0xff] }
 0xf3e   :  { %2232 = vmatpush1.msra.mxu0 %v2157_v13  ;;  %v2294_v13 = vrot.slane %v2185_v60, %v9192_v63 }
 0xf3f   :  { %5884 = vmatmul.mubr.msk.f32.gmra.mxu0 %vm533_vm3, %v7262_v54  ;;  %2233 = vmatprep.subr.mxu0 %v2156_v24 }
 0xf40   :  { %5886 = vmatprep.mubr.msk.f32.mxu0 %vm533_vm3, %v7214_v14  ;;  %2234 = vmatpush1.msra.mxu0 %v2155_v31 }
 0xf41   :  { %2235 = vmatprep.subr.mxu0 %v2154_v32 }
 0xf42   :  { %2236 = vmatpush1.msra.mxu0 %v2153_v9 }
 0xf43   :  { %5887 = vmatmul.mubr.msk.f32.gmra.mxu0 %vm533_vm3, %v7221_v30  ;;  %2417 = vmatprep.subr.mxu0 %v7412_v25 }
 0xf44   :  { %5889 = vmatprep.mubr.msk.f32.mxu0 %vm533_vm3, %v7172_v5 }
 0xf47   :  { %5890 = vmatmul.mubr.msk.f32.gmra.mxu0 %vm533_vm3, %v7179_v0 }
 0xf48   :  { %5892 = vmatprep.mubr.msk.f32.mxu0 %vm533_vm3, %v7130_v58 }
 0xf4b   :  { %5893 = vmatmul.mubr.msk.f32.gmra.mxu0 %vm533_vm3, %v7137_v52 }
 0xf4c   :  { %5895 = vmatprep.mubr.msk.f32.mxu0 %vm533_vm3, %v7088_v61  ;;  %v7547_v61 = vpop.f32.mrf.mxu1 }
 0xf4f   :  { %5896 = vmatmul.mubr.msk.f32.gmra.mxu0 %vm533_vm3, %v7095_v62  ;;  %v7549_v62 = vpop.f32.mrf.mxu1 }
 0xf50   :  { %2269 = vmatprep.mubr.f32.mxu0 %v9188_v56 }
 0xf51   :  { %v7551_v58 = vpop.f32.mrf.mxu1 }
 0xf53   :  { %5576 = vmatmul.mubr.msk.f32.vlgmr.msra.gmra.mxu0 %vm533_vm3, %v1610_v49  ;;  %v7553_v52 = vpop.f32.mrf.mxu1 }
 0xf54   :  { %2275 = vmatprep.mubr.f32.mxu0 %v9188_v56  ;;  %2418 = vmatpush1.msra.mxu0 %v7415_v19 }
 0xf55   :  { %2419 = vmatprep.subr.mxu0 %v7418_v39  ;;  %v7555_v5 = vpop.f32.mrf.mxu1 }
 0xf56   :  { %2420 = vmatpush1.msra.mxu0 %v7424_v55 }
 0xf57   :  { %5577 = vmatmul.mubr.msk.f32.gmra.mxu0 %vm533_vm3, %v1612_v43  ;;  %2421 = vmatprep.subr.mxu0 %v7428_v34  ;;  %v7557_v0 = vpop.f32.mrf.mxu1 }
 0xf58   :  { %2422 = vmatpush1.msra.mxu0 %v7432_v45  ;;  %2465 = vmatprep.mubr.f32.mxu0 %v9188_v56 }
 0xf59   :  { %2423 = vmatprep.subr.mxu0 %v7437_v29  ;;  %v5925_v14 = vpop.f32.mrf.mxu1 }
 0xf5a   :  { %2424 = vmatpush1.msra.mxu0 %v7440_v33 }
 0xf5b   :  { %2425 = vmatprep.subr.mxu0 %v7446_v51  ;;  %v7559_v30 = vpop.f32.mrf.mxu1 }
 0xf5c   :  { %2426 = vmatpush1.msra.mxu0 %v7449_v50 }
 0xf5d   :  { %2427 = vmatprep.subr.mxu0 %v7454_v59  ;;  %v5928_v27 = vpop.f32.mrf.mxu1 }
 0xf5e   :  { %2428 = vmatpush1.msra.mxu0 %v7457_v44 }
 0xf5f   :  { %2429 = vmatprep.subr.mxu0 %v7462_v28  ;;  %v7572_v6 = vpop.f32.mrf.mxu1 }
 0xf60   :  { %2430 = vmatpush1.msra.mxu0 %v7466_v53 }
 0xf61   :  { %2431 = vmatprep.subr.mxu0 %v7470_v42  ;;  %v5931_v11 = vpop.f32.mrf.mxu1 }
 0xf62   :  { %2432 = vmatpush1.msra.mxu0 %v7474_v36 }
 0xf63   :  { %v7585_v3 = vpop.f32.mrf.mxu1 }
 0xf65   :  { %v5934_v39 = vpop.f32.mrf.mxu1 }
 0xf67   :  { %v1888_v33 = vpop.f32.mrf.mxu1 }
 0xff3   :  { %v7561_v46 = vpop.f32.mrf.mxu0  ;;  %v5937_v59 = vpop.f32.mrf.mxu1 }
 0xff5   :  { %v7563_v54 = vpop.f32.mrf.mxu0  ;;  %v1898_v49 = vpop.f32.mrf.mxu1 }
 0xff7   :  { %v7565_v47 = vpop.f32.mrf.mxu0 }
 0xff9   :  { %v7570_v38 = vpop.f32.mrf.mxu0 }
 0xffb   :  { %v7574_v35 = vpop.f32.mrf.mxu0 }
 0xffd   :  { %v7576_v7 = vpop.f32.mrf.mxu0 }
 0xfff   :  { %v5885_v12 = vpop.f32.mrf.mxu0 }
0x1000   :  { %v1864_v15 = vadd.f32 %v5925_v14, %v5885_v12 }
0x1001   :  { %v7580_v4 = vpop.f32.mrf.mxu0 }
0x1002   :  { %v7583_v18 = vadd.f32 %v7578_v17, %v1864_v15 }
0x1003   :  { %v5888_v21 = vpop.f32.mrf.mxu0 }
0x1004   :  { %v1874_v22 = vadd.f32 %v5928_v27, %v5888_v21 }
0x1005   :  { %v7587_v25 = vpop.f32.mrf.mxu0 }
0x1006   :  { %v7590_v19 = vadd.f32 %v7578_v17, %v1874_v22 }
0x1007   :  { %v5891_v55 = vpop.f32.mrf.mxu0 }
0x1008   :  { %v1884_v34 = vadd.f32 %v5931_v11, %v5891_v55  ;;  %v2367_v11 = vpop.f32.mrf.mxu1 }
0x1009   :  { %v7592_v45 = vpop.f32.mrf.mxu0 }
0x100a   :  { %v7595_v29 = vadd.f32 %v7578_v17, %v1884_v34  ;;  %v2369_v34 = vpop.f32.mrf.mxu1 }
0x100b   :  { %v5894_v51 = vpop.f32.mrf.mxu0 }
0x100c   :  { %v1894_v50 = vadd.f32 %v5934_v39, %v5894_v51 }
0x100d   :  { %v1743_v44 = vpop.f32.mrf.mxu0 }
0x100e   :  { %v7601_v28 = vadd.f32 %v7578_v17, %v1894_v50  ;;  %v7603_v53 = vadd.f32 %v1888_v33, %v1743_v44 }
0x100f   :  { %v5897_v42 = vpop.f32.mrf.mxu0 }
0x1010   :  { %v1904_v36 = vadd.f32 %v5937_v59, %v5897_v42 }
0x1011   :  { %v1753_v41 = vpop.f32.mrf.mxu0 }
0x1012   :  { %v7606_v43 = vadd.f32 %v7578_v17, %v1904_v36  ;;  %v1899_v40 = vadd.f32 %v1898_v49, %v1753_v41 }
0x1013   :  { %v2271_v57 = vpop.f32.mrf.mxu0 }
0x1014   :  { %v7609_v37 = vadd.f32 %v7578_v17, %v1899_v40 }
0x1015   :  { %v2273_v1 = vpop.f32.mrf.mxu0 }
0x1017   :  { %v2277_v26 = vpop.f32.mrf.mxu0 }
0x1018   :  { %v2282_v31 = vsel %vm6899_vm1, %v2271_v57, %v2277_v26  ;;  %v2284_v32 = vsel %vm6899_vm1, %v2277_v26, %v2271_v57 }
0x1019   :  { %v2297_v9 = vadd.f32 %v2290_v10, %v2282_v31  ;;  %v2279_v14 = vpop.f32.mrf.mxu0  ;;  %v2299_v27 = vadd.f32 %v2290_v10, %v2284_v32 }
0x101a   :  { %v2285_v12 = vsel %vm6906_vm2, %v2279_v14, %v2273_v1  ;;  %v2283_v39 = vsel %vm6906_vm2, %v2273_v1, %v2279_v14 }
0x101b   :  { %v2372_v15 = vadd.f32 %v2367_v11, %v2297_v9  ;;  %v2300_v21 = vadd.f32 %v2294_v13, %v2285_v12  ;;  %v2298_v55 = vadd.f32 %v2294_v13, %v2283_v39 }
0x101d   :  { %v5578_v22 = vmul.f32 -1.442695, %v2372_v15  ;;  %v2373_v33 = vadd.f32 %v2369_v34, %v2298_v55  ;;  %v2193_v34 = vld [vmem:[%s7643_s22 + $0x38] sm:$0xff] }
0x101e   :  { %5957 = vmatprep.subr.mxu0 %v2193_v34 }
0x101f   :  { %6365 = vpow2.f32 %v5578_v22  ;;  %v5579_v36 = vmul.f32 -1.442695, %v2373_v33 }
0x1020   :  { %6367 = vtanh.f32 %v2373_v33  ;;  %v2192_v33 = vld [vmem:[%s7643_s22 + $0x30] sm:$0xff] }
0x102c   :  { %v6366_v51 = vpop.eup %6365 }
0x102d   :  { %v2377_v50 = vadd.f32 1.0, %v6366_v51  ;;  %v6368_v59 = vpop.eup %6367  ;;  %v2199_v51 = vld [vmem:[%s7638_s17 + $0x28] sm:$0xff] }
0x102f   :  { %6369 = vrcp.f32 %v2377_v50  ;;  %v2191_v50 = vld [vmem:[%s7643_s22 + $0x28] sm:$0xff] }
0x1030   :  { %6371 = vpow2.f32 %v5579_v36  ;;  %v2189_v36 = vld [vmem:[%s7643_s22 + $0x18] sm:$0xff] }
0x103c   :  { %v6370_v44 = vpop.eup %6369 }
0x103d   :  { %v2388_v42 = vmul.f32 %v6370_v44, %v6368_v59  ;;  %v6372_v49 = vpop.eup %6371  ;;  %v2387_v40 = vmul.f32 0.0, %v6370_v44  ;;  %v2198_v59 = vld [vmem:[%s7638_s17 + $0x20] sm:$0xff] }
0x103e   :  { %v2384_v41 = vadd.f32 1.0, %v6372_v49  ;;  %v2190_v44 = vld [vmem:[%s7643_s22 + $0x20] sm:$0xff]  ;;  %v2196_v49 = vld [vmem:[%s7638_s17 + $0x10] sm:$0xff] }
0x103f   :  { %2390 = vrot.lane.b32.xlu0 %v2388_v42, %s6668_s18  ;;  %v2197_v42 = vld [vmem:[%s7638_s17 + $0x18] sm:$0xff] }
0x1040   :  { %6373 = vrcp.f32 %v2384_v41  ;;  %v2188_v41 = vld [vmem:[%s7643_s22 + $0x10] sm:$0xff] }
0x104d   :  { %v6374_v1 = vpop.eup %6373 }
0x10b1   :  { %v2391_v60 = vpop.permute.xlu0 %2390 }
0x10b2   :  { %v7622_v57 = vadd.f32 %v2391_v60, %v2387_v40  ;;  %v2195_v40 = vld [vmem:[%s7638_s17 + $0x8] sm:$0xff] }
0x10b3   :  { %v2187_v60 = vld [vmem:[%s7643_s22 + $0x8] sm:$0xff] }
0x10b4   :  { %6375 = vtanh.f32 %v7622_v57 }
0x10c1   :  { %v6376_v10 = vpop.eup %6375 }
0x10c2   :  { %v2395_v26 = vmul.f32 %v6376_v10, %v6374_v1  ;;  %v2194_v1 = vld [vmem:[%s7638_s17] sm:$0xff] }
0x10c3   :  { %v2186_v10 = vld [vmem:[%s7643_s22] sm:$0xff]  ;;  %s7955_s22 = sld [smem:[%s9153_s0 + %s6683_s19]]  }
0x10c4   :  { %2397 = vrot.lane.b32.xlu1 %v2395_v26, %s6668_s18 }
0x1136   :  { %v7626_v13 = vpop.permute.xlu1 %2397 }
0x1137   :  { %5580 = vmatmul.mubr.msk.f32.vlgmr.msra.gmra.mxu0 %vm533_vm3, %v7626_v13 }
0x1138   :  { %5973 = vmatprep.mubr.msk.f32.mxu0 %vm533_vm3, %v7626_v13  ;;  %5958 = vmatpush3.msra.mxu0 %v2193_v34  ;;  %v7685_v34 = vld [vmem:[%s7670_s30 + $0x68] sm:$0xff] }
0x1139   :  { %5959 = vmatprep.subr.mxu0 %v2192_v33 }
0x113a   :  { %5960 = vmatpush3.msra.mxu0 %v2192_v33  ;;  %v2730_v33 = vld [vmem:[%s7665_s26 + $0x68] sm:$0xff] }
0x113b   :  { %5961 = vmatprep.subr.mxu0 %v2191_v50 }
0x113c   :  { %5962 = vmatpush3.msra.mxu0 %v2191_v50  ;;  %v2729_v50 = vld [vmem:[%s7665_s26 + $0x60] sm:$0xff] }
0x113d   :  { %5963 = vmatprep.subr.mxu0 %v2190_v44 }
0x113e   :  { %5964 = vmatpush3.msra.mxu0 %v2190_v44  ;;  %v2728_v44 = vld [vmem:[%s7665_s26 + $0x58] sm:$0xff] }
0x113f   :  { %5965 = vmatprep.subr.mxu0 %v2189_v36 }
0x1140   :  { %5966 = vmatpush3.msra.mxu0 %v2189_v36  ;;  %v2727_v36 = vld [vmem:[%s7665_s26 + $0x50] sm:$0xff] }
0x1141   :  { %5967 = vmatprep.subr.mxu0 %v2188_v41 }
0x1142   :  { %5968 = vmatpush3.msra.mxu0 %v2188_v41  ;;  %v2741_v41 = vld [vmem:[%s7670_s30 + $0x40] sm:$0xff] }
0x1143   :  { %5969 = vmatprep.subr.mxu0 %v2187_v60 }
0x1144   :  { %5970 = vmatpush3.msra.mxu0 %v2187_v60  ;;  %v2740_v60 = vld [vmem:[%s7670_s30 + $0x38] sm:$0xff] }
0x1145   :  { %5971 = vmatprep.subr.mxu0 %v2186_v10 }
0x1146   :  { %5972 = vmatpush3.msra.mxu0 %v2186_v10  ;;  %v2739_v10 = vld [vmem:[%s7670_s30 + $0x30] sm:$0xff] }
0x11f7   :  { %v2467_v31 = vpop.f32.mrf.mxu0 }
0x11f8   :  { %v2472_v32 = vadd.f32 %v2467_v31, %v2299_v27  ;;  %v2201_v27 = vld [vmem:[%s7638_s17 + $0x38] sm:$0xff] }
0x11f9   :  { %v2469_v14 = vpop.f32.mrf.mxu0  ;;  %5938 = vmatprep.subr.mxu1 %v2201_v27 }
0x11fa   :  { %v5581_v9 = vmul.f32 -1.442695, %v2472_v32  ;;  %v2473_v11 = vadd.f32 %v2469_v14, %v2300_v21  ;;  %v2200_v21 = vld [vmem:[%s7638_s17 + $0x30] sm:$0xff]  ;;  %5939 = vmatpush3.msra.mxu1 %v2201_v27  ;;  %s7946_s17 = sld [smem:[%s9153_s0 + %s6682_s14]]  }
0x11fb   :  { %5940 = vmatprep.subr.mxu1 %v2200_v21 }
0x11fc   :  { %6377 = vpow2.f32 %v5581_v9  ;;  %5941 = vmatpush3.msra.mxu1 %v2200_v21  ;;  %v5582_v26 = vmul.f32 -1.442695, %v2473_v11  ;;  %v2731_v21 = vld [vmem:[%s7665_s26 + $0x70] sm:$0xff] }
0x11fd   :  { %6379 = vtanh.f32 %v2473_v11  ;;  %5942 = vmatprep.subr.mxu1 %v2199_v51  ;;  %v7674_v11 = vld [vmem:[%s7670_s30 + $0x78] sm:$0xff] }
0x11fe   :  { %5943 = vmatpush3.msra.mxu1 %v2199_v51  ;;  %2891 = vmatprep.subr.mxu0 %v7674_v11  ;;  %v7691_v51 = vld [vmem:[%s7670_s30 + $0x60] sm:$0xff] }
0x11ff   :  { %5944 = vmatprep.subr.mxu1 %v2198_v59 }
0x1200   :  { %5945 = vmatpush3.msra.mxu1 %v2198_v59  ;;  %v7698_v59 = vld [vmem:[%s7670_s30 + $0x58] sm:$0xff] }
0x1201   :  { %5946 = vmatprep.subr.mxu1 %v2197_v42 }
0x1202   :  { %5947 = vmatpush3.msra.mxu1 %v2197_v42  ;;  %v2743_v42 = vld [vmem:[%s7670_s30 + $0x50] sm:$0xff] }
0x1203   :  { %5948 = vmatprep.subr.mxu1 %v2196_v49 }
0x1204   :  { %5949 = vmatpush3.msra.mxu1 %v2196_v49  ;;  %v2726_v49 = vld [vmem:[%s7665_s26 + $0x48] sm:$0xff] }
0x1205   :  { %5950 = vmatprep.subr.mxu1 %v2195_v40 }
0x1206   :  { %5951 = vmatpush3.msra.mxu1 %v2195_v40  ;;  %v2725_v40 = vld [vmem:[%s7665_s26 + $0x40] sm:$0xff] }
0x1207   :  { %5952 = vmatprep.subr.mxu1 %v2194_v1 }
0x1208   :  { %5953 = vmatpush3.msra.mxu1 %v2194_v1  ;;  %v2724_v1 = vld [vmem:[%s7665_s26 + $0x38] sm:$0xff] }
0x1209   :  { %v6378_v12 = vpop.eup %6377 }
0x120a   :  { %v2477_v15 = vadd.f32 1.0, %v6378_v12  ;;  %v6380_v22 = vpop.eup %6379 }
0x120c   :  { %6381 = vrcp.f32 %v2477_v15 }
0x120d   :  { %6383 = vpow2.f32 %v5582_v26  ;;  %v2723_v26 = vld [vmem:[%s7665_s26 + $0x30] sm:$0xff] }
0x1219   :  { %v6382_v39 = vpop.eup %6381 }
0x121a   :  { %v2488_v55 = vmul.f32 %v6382_v39, %v6380_v22  ;;  %v6384_v31 = vpop.eup %6383  ;;  %v2487_v9 = vmul.f32 %v6382_v39, %v7622_v57  ;;  %v2732_v57 = vld [vmem:[%s7665_s26 + $0x78] sm:$0xff] }
0x121b   :  { %v2484_v32 = vadd.f32 1.0, %v6384_v31  ;;  %2795 = vmatprep.subr.mxu1 %v2732_v57  ;;  %v2722_v31 = vld [vmem:[%s7665_s26 + $0x28] sm:$0xff]  ;;  %v2736_v57 = vld [vmem:[%s7670_s30 + $0x18] sm:$0xff] }
0x121c   :  { %2490 = vrot.lane.b32.xlu0 %v2488_v55, %s6668_s18  ;;  %v7681_v55 = vld [vmem:[%s7670_s30 + $0x70] sm:$0xff] }
0x121d   :  { %6385 = vrcp.f32 %v2484_v32  ;;  %v2738_v32 = vld [vmem:[%s7670_s30 + $0x28] sm:$0xff] }
0x1220   :  { %2771 = vrot.lane.b32.xlu0 %v7386_v8, %s6668_s18 }
0x122a   :  { %v6386_v15 = vpop.eup %6385 }
0x128e   :  { %v2491_v14 = vpop.permute.xlu0 %2490 }
0x128f   :  { %v2493_v12 = vadd.f32 %v2491_v14, %v2487_v9  ;;  %v2721_v9 = vld [vmem:[%s7665_s26 + $0x20] sm:$0xff] }
0x1290   :  { %v2737_v14 = vld [vmem:[%s7670_s30 + $0x20] sm:$0xff] }
0x1291   :  { %6387 = vtanh.f32 %v2493_v12  ;;  %v2720_v12 = vld [vmem:[%s7665_s26 + $0x18] sm:$0xff] }
0x129e   :  { %v6388_v22 = vpop.eup %6387 }
0x129f   :  { %v2495_v39 = vmul.f32 %v6388_v22, %v6386_v15  ;;  %v2719_v15 = vld [vmem:[%s7665_s26 + $0x10] sm:$0xff] }
0x12a0   :  { %v2735_v22 = vld [vmem:[%s7670_s30 + $0x10] sm:$0xff] }
0x12a1   :  { %2497 = vrot.lane.b32.xlu1 %v2495_v39, %s6668_s18  ;;  %v2718_v39 = vld [vmem:[%s7665_s26 + $0x8] sm:$0xff] }
0x12a5   :  { %2773 = vrot.lane.b32.xlu1 %v7390_v16, %s6668_s18 }
0x1313   :  { %v2498_v27 = vpop.permute.xlu1 %2497 }
0x1314   :  { %5954 = vmatprep.mubr.msk.f32.mxu1 %vm533_vm3, %v2498_v27  ;;  %5974 = vmatmul.mubr.msk.f32.vlgmr.msra.gmra.mxu0 %vm533_vm3, %v2498_v27  ;;  %v2734_v27 = vld [vmem:[%s7670_s30 + $0x8] sm:$0xff] }
0x1315   :  { %5955 = vmatmul.mubr.msk.f32.vlgmr.msra.gmra.mxu1 %vm533_vm3, %v7626_v13  ;;  %2892 = vmatpush1.msra.mxu0 %v7681_v55  ;;  %v2742_v13 = vld [vmem:[%s7670_s30 + $0x48] sm:$0xff] }
0x1316   :  { %2796 = vmatpush1.msra.mxu1 %v2731_v21  ;;  %2893 = vmatprep.subr.mxu0 %v7685_v34  ;;  %v2717_v21 = vld [vmem:[%s7665_s26] sm:$0xff]  ;;  %s7985_s26 = sld [smem:[%s9153_s0 + %s6684_s23]]  }
0x1317   :  { %2797 = vmatprep.subr.mxu1 %v2730_v33  ;;  %2894 = vmatpush1.msra.mxu0 %v7691_v51  ;;  %v2733_v33 = vld [vmem:[%s7670_s30] sm:$0xff]  ;;  %s5452_s30 = sld [smem:[%s9153_s0 + %s6685_s27]]  }
0x1318   :  { %2798 = vmatpush1.msra.mxu1 %v2729_v50  ;;  %2895 = vmatprep.subr.mxu0 %v7698_v59  ;;  %v2772_v50 = vpop.permute.xlu0 %2771 }
0x1319   :  { %2799 = vmatprep.subr.mxu1 %v2728_v44  ;;  %2896 = vmatpush1.msra.mxu0 %v2743_v42  ;;  %v2774_v44 = vpop.permute.xlu1 %2773 }
0x131a   :  { %2800 = vmatpush1.msra.mxu1 %v2727_v36  ;;  %2897 = vmatprep.subr.mxu0 %v2742_v13 }
0x131b   :  { %2801 = vmatprep.subr.mxu1 %v2726_v49  ;;  %2898 = vmatpush1.msra.mxu0 %v2741_v41 }
0x131c   :  { %2802 = vmatpush1.msra.mxu1 %v2725_v40  ;;  %2899 = vmatprep.subr.mxu0 %v2740_v60 }
0x131d   :  { %2803 = vmatprep.subr.mxu1 %v2724_v1  ;;  %2900 = vmatpush1.msra.mxu0 %v2739_v10 }
0x131e   :  { %2804 = vmatpush1.msra.mxu1 %v2723_v26  ;;  %2843 = vmatprep.mubr.f32.mxu1 %v9188_v56 }
0x131f   :  { %2805 = vmatprep.subr.mxu1 %v2722_v31  ;;  %2901 = vmatprep.subr.mxu0 %v2738_v32 }
0x1320   :  { %2806 = vmatpush1.msra.mxu1 %v2721_v9  ;;  %2902 = vmatpush1.msra.mxu0 %v2737_v14 }
0x1321   :  { %2807 = vmatprep.subr.mxu1 %v2720_v12  ;;  %2903 = vmatprep.subr.mxu0 %v2736_v57 }
0x1322   :  { %2808 = vmatpush1.msra.mxu1 %v2719_v15  ;;  %2904 = vmatpush1.msra.mxu0 %v2735_v22 }
0x1323   :  { %2809 = vmatprep.subr.mxu1 %v2718_v39  ;;  %2905 = vmatprep.subr.mxu0 %v2734_v27 }
0x1324   :  { %2810 = vmatpush1.msra.mxu1 %v2717_v21  ;;  %2906 = vmatpush1.msra.mxu0 %v2733_v33 }
0x1325   :  { %5590 = vmatmul.mubr.msk.f32.vlgmr.msra.gmra.mxu1 %vm533_vm3, %v2772_v50  ;;  %2939 = vmatprep.mubr.f32.mxu0 %v9188_v56 }
0x1326   :  { %2849 = vmatprep.mubr.f32.mxu1 %v9188_v56  ;;  %2940 = vmatmul.mubr.f32.vlgmr.msra.gmra.mxu0 %v9188_v56 }
0x1327   :  { %2991 = vmatprep.subr.mxu1 %v7674_v11 }
0x1328   :  { %2992 = vmatpush1.msra.mxu1 %v7681_v55 }
0x1329   :  { %5591 = vmatmul.mubr.msk.f32.gmra.mxu1 %vm533_vm3, %v2774_v44  ;;  %2993 = vmatprep.subr.mxu1 %v7685_v34 }
0x132a   :  { %2994 = vmatpush1.msra.mxu1 %v7691_v51  ;;  %3039 = vmatprep.mubr.f32.mxu1 %v9188_v56 }
0x132b   :  { %2995 = vmatprep.subr.mxu1 %v7698_v59  ;;  %v2749_v59 = vld [vmem:[%s5455_s4] sm:$0x3]  ;;  %s8003_s4 = sld [smem:[%s9153_s0 + %s6686_s1]]   ;;  %s6703_s1 = smov 112  }
0x132c   :  { %2996 = vmatpush1.msra.mxu1 %v2743_v42 }
0x132d   :  { %2997 = vmatprep.subr.mxu1 %v2742_v13 }
0x132e   :  { %2998 = vmatpush1.msra.mxu1 %v2741_v41  ;;  %v2864_v41 = vrot.slane %v2749_v59, %v9191_v48 }
0x132f   :  { %2999 = vmatprep.subr.mxu1 %v2740_v60  ;;  %v2868_v60 = vrot.slane %v2749_v59, %v9192_v63 }
0x1330   :  { %3000 = vmatpush1.msra.mxu1 %v2739_v10 }
0x1331   :  { %3001 = vmatprep.subr.mxu1 %v2738_v32 }
0x1332   :  { %3002 = vmatpush1.msra.mxu1 %v2737_v14 }
0x1333   :  { %3003 = vmatprep.subr.mxu1 %v2736_v57 }
0x1334   :  { %3004 = vmatpush1.msra.mxu1 %v2735_v22 }
0x1335   :  { %3005 = vmatprep.subr.mxu1 %v2734_v27 }
0x1336   :  { %3006 = vmatpush1.msra.mxu1 %v2733_v33 }
0x13d4   :  { %v5975_v11 = vpop.f32.mrf.mxu0 }
0x13d5   :  { %v5956_v55 = vpop.f32.mrf.mxu1 }
0x13d6   :  { %v2648_v34 = vadd.f32 %v5975_v11, %v5956_v55  ;;  %v2642_v36 = vpop.f32.mrf.mxu0 }
0x13d7   :  { %v2567_v51 = vpop.f32.mrf.mxu1 }
0x13d8   :  { %v2643_v49 = vadd.f32 %v2642_v36, %v2567_v51  ;;  %v5587_v36 = vld [vmem:[%s5450_s8] ss:$0 sm:$0xff]  ;;  %s5435_s8 = sld [smem:[%s9153_s0 + %s6687_s5]]  }
0x13d9   :  { %v7767_v59 = vadd.f32 %v5587_v36, %v2648_v34  ;;  %v1839_v34 = vadd.f32 %v7553_v52, %v7570_v38  ;;  %v1834_v52 = vadd.f32 %v7547_v61, %v7561_v46  ;;  %v1859_v61 = vadd.f32 %v7559_v30, %v7580_v4 }
0x13da   :  { %v7765_v51 = vadd.f32 %v5587_v36, %v2643_v49 }
0x13e5   :  { %v2845_v42 = vpop.f32.mrf.mxu1 }
0x13e6   :  { %v2941_v9 = vpop.f32.mrf.mxu0 }
0x13e7   :  { %v2847_v13 = vpop.f32.mrf.mxu1 }
0x13e8   :  { %v2943_v27 = vpop.f32.mrf.mxu0 }
0x13e9   :  { %v2851_v40 = vpop.f32.mrf.mxu1 }
0x13ea   :  { %v2856_v1 = vsel %vm6899_vm1, %v2845_v42, %v2851_v40  ;;  %v2858_v10 = vsel %vm6899_vm1, %v2851_v40, %v2845_v42  ;;  %v2659_v42 = vsel %vm533_vm3, %v7765_v51, 0.0 }
0x13eb   :  { %v2871_v26 = vadd.f32 %v2864_v41, %v2856_v1  ;;  %v2853_v31 = vpop.f32.mrf.mxu1  ;;  %v7747_v32 = vadd.f32 %v2864_v41, %v2858_v10  ;;  %v1829_v41 = vadd.f32 %v7549_v62, %v7563_v54  ;;  %v7785_v10 = vadd.f32 %v7578_v17, %v1839_v34 }
0x13ec   :  { %v2859_v14 = vsel %vm6906_vm2, %v2853_v31, %v2847_v13  ;;  %v2857_v22 = vsel %vm6906_vm2, %v2847_v13, %v2853_v31  ;;  %v2665_v13 = vmul.f32 %v7765_v51, %v7765_v51  ;;  %v1849_v62 = vadd.f32 %v7557_v0, %v7576_v7 }
0x13ed   :  { %v2946_v12 = vadd.f32 %v2941_v9, %v2871_v26  ;;  %v7751_v57 = vadd.f32 %v2868_v60, %v2859_v14  ;;  %v2872_v39 = vadd.f32 %v2868_v60, %v2857_v22  ;;  %v2666_v60 = vmul.f32 %v7767_v59, %v7767_v59 }
0x13ee   :  { %v2667_v40 = vsel %vm533_vm3, %v2665_v13, 0.0  ;;  %v7779_v49 = vadd.f32 %v7578_v17, %v1829_v41  ;;  %v7792_v26 = vadd.f32 %v7578_v17, %v1849_v62  ;;  %v1935_v31 = vsel %vm244_vm0, %v7785_v10, 0.0 }
0x13ef   :  { %v5592_v15 = vmul.f32 -1.442695, %v2946_v12  ;;  %v7755_v21 = vadd.f32 %v2943_v27, %v2872_v39  ;;  %v2670_v1 = vsel %vm533_vm3, %v2666_v60, 0.0  ;;  %v7803_v7 = vadd.f32 %v7578_v17, %v1834_v52 }
0x13f0   :  { %v1929_v54 = vsel %vm244_vm0, %v7779_v49, 0.0  ;;  %v1941_v38 = vsel %vm244_vm0, %v7792_v26, 0.0  ;;  %v1977_v0 = vmul.f32 %v7779_v49, %v7779_v49  ;;  %v1844_v9 = vadd.f32 %v7551_v58, %v7565_v47 }
0x13f1   :  { %6389 = vpow2.f32 %v5592_v15  ;;  %v1932_v46 = vsel %vm244_vm0, %v7803_v7, 0.0  ;;  %v7816_v15 = vadd.f32 %v7578_v17, %v1859_v61  ;;  %v1854_v58 = vadd.f32 %v7555_v5, %v7574_v35 }
0x13f2   :  { %6391 = vtanh.f32 %v7755_v21  ;;  %v1993_v14 = vsel %vm244_vm0, %v1977_v0, 0.0  ;;  %v7809_v12 = vadd.f32 %v7578_v17, %v1844_v9  ;;  %v1981_v30 = vmul.f32 %v7792_v26, %v7792_v26 }
0x13f3   :  { %v1947_v47 = vsel %vm244_vm0, %v7816_v15, 0.0  ;;  %v7827_v4 = vadd.f32 %v7578_v17, %v1854_v58  ;;  %v1869_v39 = vadd.f32 %v7572_v6, %v7587_v25  ;;  %v1879_v25 = vadd.f32 %v7585_v3, %v7592_v45 }
0x13f4   :  { %v1938_v22 = vsel %vm244_vm0, %v7809_v12, 0.0  ;;  %v2005_v27 = vsel %vm244_vm0, %v1981_v30, 0.0  ;;  %v1980_v6 = vmul.f32 %v7809_v12, %v7809_v12  ;;  %v1983_v36 = vmul.f32 %v7816_v15, %v7816_v15 }
0x13f5   :  { %v1944_v5 = vsel %vm244_vm0, %v7827_v4, 0.0  ;;  %v5593_v41 = vmul.f32 -1.442695, %v7755_v21  ;;  %v7860_v45 = vadd.f32 %v7578_v17, %v7603_v53  ;;  %v1988_v0 = vmul.f32 %v7595_v29, %v7595_v29 }
0x13f6   :  { %v2011_v13 = vsel %vm244_vm0, %v1983_v36, 0.0  ;;  %v1974_v61 = vsel %vm244_vm0, %v7606_v43, 0.0  ;;  %v2662_v30 = vsel %vm533_vm3, %v7767_v59, 0.0 }
0x13f7   :  { %v1965_v34 = vsel %vm244_vm0, %v7860_v45, 0.0 }
0x13fe   :  { %v6390_v33 = vpop.eup %6389 }
0x13ff   :  { %v2951_v50 = vadd.f32 1.0, %v6390_v33  ;;  %v6392_v44 = vpop.eup %6391  ;;  %v7833_v33 = vadd.f32 %v7578_v17, %v1869_v39  ;;  %v1979_v39 = vmul.f32 %v7785_v10, %v7785_v10 }
0x1401   :  { %6393 = vrcp.f32 %v2951_v50  ;;  %v1953_v35 = vsel %vm244_vm0, %v7833_v33, 0.0  ;;  %v1978_v50 = vmul.f32 %v7803_v7, %v7803_v7  ;;  %v1985_v3 = vmul.f32 %v7833_v33, %v7833_v33 }
0x1402   :  { %6395 = vpow2.f32 %v5593_v41 }
0x1403   :  { %v2017_v60 = vsel %vm244_vm0, %v1985_v3, 0.0 }
0x140e   :  { %v7758_v11 = vpop.eup %6393 }
0x140f   :  { %v2962_v55 = vmul.f32 %v7758_v11, %v6392_v44  ;;  %v1996_v44 = vsel %vm244_vm0, %v1978_v50, 0.0  ;;  %v6396_v62 = vpop.eup %6395 }
0x1410   :  { %v2958_v53 = vadd.f32 1.0, %v6396_v62  ;;  %v5588_v62 = vld [vmem:[%s5451_s13] ss:$0 sm:$0xff]  ;;  %s5436_s13 = sld [smem:[%s9153_s0 + %s6688_s10]]  }
0x1411   :  { %2964 = vrot.lane.b32.xlu0 %v2962_v55, %s6668_s18  ;;  %v2002_v55 = vsel %vm244_vm0, %v1980_v6, 0.0 }
0x1412   :  { %6397 = vrcp.f32 %v2958_v53 }
0x1430   :  { %2660 = vadd.xlane.f32.xlu0 %v2659_v42  ;;  %v7850_v42 = vadd.f32 %v7578_v17, %v1879_v25  ;;  %v1989_v17 = vmul.f32 %v7860_v45, %v7860_v45 }
0x1432   :  { %v1987_v21 = vmul.f32 %v7850_v42, %v7850_v42 }
0x1434   :  { %2668 = vadd.xlane.f32.xlu0 %v2667_v40  ;;  %v1959_v40 = vsel %vm244_vm0, %v7850_v42, 0.0 }
0x1438   :  { %2671 = vadd.xlane.f32.xlu0 %v2670_v1  ;;  %v2023_v1 = vsel %vm244_vm0, %v1987_v21, 0.0 }
0x143c   :  { %1930 = vadd.xlane.f32.xlu0 %v1929_v54  ;;  %v1971_v54 = vsel %vm244_vm0, %v7609_v37, 0.0 }
0x1440   :  { %1936 = vadd.xlane.f32.xlu0 %v1935_v31  ;;  %v2961_v31 = vmul.f32 0.0, %v7758_v11  ;;  %v1992_v11 = vmul.f32 %v7606_v43, %v7606_v43 }
0x1444   :  { %1942 = vadd.xlane.f32.xlu0 %v1941_v38  ;;  %v2029_v38 = vsel %vm244_vm0, %v1989_v17, 0.0 }
0x1448   :  { %1994 = vadd.xlane.f32.xlu0 %v1993_v14  ;;  %v2026_v14 = vsel %vm244_vm0, %v1988_v0, 0.0 }
0x144c   :  { %1933 = vadd.xlane.f32.xlu0 %v1932_v46  ;;  %v2038_v46 = vsel %vm244_vm0, %v1992_v11, 0.0 }
0x1450   :  { %1939 = vadd.xlane.f32.xlu0 %v1938_v22  ;;  %v6398_v22 = vpop.eup %6397 }
0x1454   :  { %1948 = vadd.xlane.f32.xlu0 %v1947_v47 }
0x1458   :  { %2006 = vadd.xlane.f32.xlu0 %v2005_v27  ;;  %v1999_v27 = vsel %vm244_vm0, %v1979_v39, 0.0  ;;  %v1986_v39 = vmul.f32 %v7590_v19, %v7590_v19 }
0x145c   :  { %1945 = vadd.xlane.f32.xlu0 %v1944_v5  ;;  %v1950_v5 = vsel %vm244_vm0, %v7583_v18, 0.0 }
0x1460   :  { %1954 = vadd.xlane.f32.xlu0 %v1953_v35  ;;  %v1982_v35 = vmul.f32 %v7827_v4, %v7827_v4 }
0x1462   :  { %v2008_v50 = vsel %vm244_vm0, %v1982_v35, 0.0  ;;  %v1991_v35 = vmul.f32 %v7609_v37, %v7609_v37 }
0x1464   :  { %1997 = vadd.xlane.f32.xlu0 %v1996_v44 }
0x1468   :  { %2003 = vadd.xlane.f32.xlu0 %v2002_v55 }
0x146c   :  { %2012 = vadd.xlane.f32.xlu0 %v2011_v13 }
0x1470   :  { %1960 = vadd.xlane.f32.xlu0 %v1959_v40 }
0x1474   :  { %2018 = vadd.xlane.f32.xlu0 %v2017_v60 }
0x1478   :  { %1966 = vadd.xlane.f32.xlu0 %v1965_v34 }
0x147c   :  { %2024 = vadd.xlane.f32.xlu0 %v2023_v1 }
0x1480   :  { %1972 = vadd.xlane.f32.xlu0 %v1971_v54 }
0x1483   :  { %v2965_v52 = vpop.permute.xlu0 %2964 }
0x1484   :  { %v7876_v9 = vadd.f32 %v2965_v52, %v2961_v31  ;;  %2030 = vadd.xlane.f32.xlu0 %v2029_v38 }
0x1486   :  { %6399 = vtanh.f32 %v7876_v9 }
0x1488   :  { %2027 = vadd.xlane.f32.xlu0 %v2026_v14 }
0x148c   :  { %1975 = vadd.xlane.f32.xlu0 %v1974_v61 }
0x1490   :  { %2039 = vadd.xlane.f32.xlu0 %v2038_v46 }
0x1493   :  { %v6400_v58 = vpop.eup %6399 }
0x1494   :  { %v2969_v47 = vmul.f32 %v6400_v58, %v6398_v22 }
0x1496   :  { %2971 = vrot.lane.b32.xlu1 %v2969_v47, %s6668_s18 }
0x14b9   :  { %v2661_v6 = vpop.xlane.xlu0 %2660 }
0x14ba   :  { %2663 = vadd.xlane.f32.xlu1 %v2662_v30  ;;  %v1962_v30 = vsel %vm244_vm0, %v7595_v29, 0.0 }
0x14bd   :  { %v2669_v25 = vpop.xlane.xlu0 %2668 }
0x14be   :  { %2000 = vadd.xlane.f32.xlu1 %v1999_v27  ;;  %v2020_v27 = vsel %vm244_vm0, %v1986_v39, 0.0 }
0x14c1   :  { %v2672_v55 = vpop.xlane.xlu0 %2671 }
0x14c2   :  { %1951 = vadd.xlane.f32.xlu1 %v1950_v5  ;;  %v2677_v13 = vadd.f32 %v2672_v55, %v2669_v25  ;;  %v1968_v5 = vsel %vm244_vm0, %v7601_v28, 0.0 }
0x14c4   :  { %v2678_v3 = vmul.f32 0.0078125, %v2677_v13 }
0x14c5   :  { %v7937_v55 = vpop.xlane.xlu0 %1930 }
0x14c6   :  { %2009 = vadd.xlane.f32.xlu1 %v2008_v50  ;;  %v2035_v50 = vsel %vm244_vm0, %v1991_v35, 0.0  ;;  %v2750_v35 = vld [vmem:[%s7946_s17] sm:$0xff] }
0x1508   :  { %v7896_v44 = vpop.permute.xlu1 %2971 }
0x1509   :  { %5594 = vmatmul.mubr.msk.f32.vlgmr.msra.gmra.mxu1 %vm533_vm3, %v7896_v44 }
0x150a   :  { %6011 = vmatprep.mubr.msk.f32.mxu1 %vm533_vm3, %v7896_v44 }
0x1543   :  { %v2664_v36 = vpop.xlane.xlu1 %2663 }
0x1544   :  { %v2674_v41 = vadd.f32 %v2664_v36, %v2661_v6  ;;  %v1990_v6 = vmul.f32 %v7601_v28, %v7601_v28  ;;  %v7939_v36 = vpop.xlane.xlu0 %1936 }
0x1546   :  { %v2675_v40 = vmul.f32 0.0078125, %v2674_v41  ;;  %v2032_v25 = vsel %vm244_vm0, %v1990_v6, 0.0 }
0x1548   :  { %v2679_v60 = vmul.f32 %v2675_v40, %v2675_v40  ;;  %v7941_v13 = vpop.xlane.xlu0 %1942 }
0x154a   :  { %v2680_v34 = vsub.f32 %v2678_v3, %v2679_v60  ;;  %v7950_v3 = vpop.xlane.xlu1 %2000  ;;  %v2757_v60 = vld [vmem:[%s7946_s17 + $0x38] sm:$0xff] }
0x154b   :  { %5995 = vmatprep.subr.mxu1 %v2757_v60 }
0x154c   :  { %v2681_v21 = vmax.f32 %v2680_v34, 0.0  ;;  %v2756_v34 = vld [vmem:[%s7946_s17 + $0x30] sm:$0xff]  ;;  %5996 = vmatpush3.msra.mxu1 %v2757_v60 }
0x154d   :  { %5997 = vmatprep.subr.mxu1 %v2756_v34 }
0x154e   :  { %v2682_v1 = vadd.f32 1e-08, %v2681_v21  ;;  %5998 = vmatpush3.msra.mxu1 %v2756_v34 }
0x1550   :  { %6401 = vrsqrt.f32 %v2682_v1  ;;  %v7961_v1 = vpop.xlane.xlu1 %1951 }
0x155d   :  { %v6402_v54 = vpop.eup %6401 }
0x155e   :  { %v7905_v17 = vmul.f32 %v6402_v54, %v5588_v62  ;;  %v2765_v62 = vld [vmem:[%s7955_s22 + $0x38] sm:$0xff]  ;;  %v2764_v54 = vld [vmem:[%s7955_s22 + $0x30] sm:$0xff] }
0x155f   :  { %5976 = vmatprep.subr.mxu0 %v2765_v62 }
0x1560   :  { %v7908_v53 = vmul.f32 %v7905_v17, %v2675_v40  ;;  %v2699_v31 = vmul.f32 %v7905_v17, %v7765_v51  ;;  %v1956_v51 = vsel %vm244_vm0, %v7590_v19, 0.0  ;;  %v7948_v40 = vpop.xlane.xlu0 %1994  ;;  %5977 = vmatpush3.msra.mxu0 %v2765_v62  ;;  %v5589_v62 = vld [vmem:[%s5452_s30] ss:$0 sm:$0xff]  ;;  %s6693_s30 = smov 12  }
0x1561   :  { %5978 = vmatprep.subr.mxu0 %v2764_v54  ;;  %s8789_s3 = sld [smem:[%s9153_s0 + %s6693_s30]]   ;;  %s6700_s30 = smov 48  }
0x1562   :  { %2701 = vrot.lane.b32.xlu0 %v2699_v31, %s6668_s18  ;;  %v2755_v31 = vld [vmem:[%s7946_s17 + $0x28] sm:$0xff]  ;;  %5979 = vmatpush3.msra.mxu0 %v2764_v54 }
0x1563   :  { %5999 = vmatprep.subr.mxu1 %v2755_v31 }
0x1564   :  { %v7959_v21 = vpop.xlane.xlu0 %1933  ;;  %6000 = vmatpush3.msra.mxu1 %v2755_v31  ;;  %v2698_v31 = vsub.f32 %v5589_v62, %v7908_v53 }
0x15c9   :  { %v3041_v52 = vpop.f32.mrf.mxu1 }
0x15ca   :  { %v3046_v38 = vadd.f32 %v3041_v52, %v7747_v32  ;;  %v1984_v32 = vmul.f32 %v7583_v18, %v7583_v18  ;;  %v2763_v52 = vld [vmem:[%s7955_s22 + $0x28] sm:$0xff] }
0x15cb   :  { %v3043_v14 = vpop.f32.mrf.mxu1  ;;  %5980 = vmatprep.subr.mxu0 %v2763_v52 }
0x15cc   :  { %v5595_v0 = vmul.f32 -1.442695, %v3046_v38  ;;  %v3047_v61 = vadd.f32 %v3043_v14, %v7751_v57  ;;  %v2014_v57 = vsel %vm244_vm0, %v1984_v32, 0.0  ;;  %v2754_v38 = vld [vmem:[%s7946_s17 + $0x20] sm:$0xff]  ;;  %5981 = vmatpush3.msra.mxu0 %v2763_v52  ;;  %v2760_v32 = vld [vmem:[%s7955_s22 + $0x10] sm:$0xff]  ;;  %v2710_v52 = vmul.f32 %v7905_v17, %v7767_v59 }
0x15cd   :  { %6001 = vmatprep.subr.mxu1 %v2754_v38  ;;  %v2043_v17 = vadd.f32 %v7939_v36, %v7937_v55 }
0x15ce   :  { %6403 = vpow2.f32 %v5595_v0  ;;  %v5596_v41 = vmul.f32 -1.442695, %v3047_v61  ;;  %v2762_v0 = vld [vmem:[%s7955_s22 + $0x20] sm:$0xff]  ;;  %6002 = vmatpush3.msra.mxu1 %v2754_v38 }
0x15cf   :  { %6405 = vtanh.f32 %v3047_v61  ;;  %v2753_v61 = vld [vmem:[%s7946_s17 + $0x18] sm:$0xff]  ;;  %5982 = vmatprep.subr.mxu0 %v2762_v0 }
0x15d0   :  { %5983 = vmatpush3.msra.mxu0 %v2762_v0  ;;  %6003 = vmatprep.subr.mxu1 %v2753_v61 }
0x15d1   :  { %6004 = vmatpush3.msra.mxu1 %v2753_v61 }
0x15db   :  { %v6404_v11 = vpop.eup %6403 }
0x15dc   :  { %v3051_v46 = vadd.f32 1.0, %v6404_v11  ;;  %v6406_v22 = vpop.eup %6405  ;;  %v7970_v11 = vpop.xlane.xlu0 %1939 }
0x15de   :  { %6407 = vrcp.f32 %v3051_v46  ;;  %v7972_v46 = vpop.xlane.xlu1 %2009 }
0x15df   :  { %6409 = vpow2.f32 %v5596_v41 }
0x15eb   :  { %v7915_v58 = vpop.eup %6407 }
0x15ec   :  { %v3062_v47 = vmul.f32 %v7915_v58, %v6406_v22  ;;  %v6410_v14 = vpop.eup %6409  ;;  %v2761_v22 = vld [vmem:[%s7955_s22 + $0x18] sm:$0xff] }
0x15ed   :  { %5984 = vmatprep.subr.mxu0 %v2761_v22 }
0x15ee   :  { %3064 = vrot.lane.b32.xlu1 %v3062_v47, %s6668_s18  ;;  %v2752_v47 = vld [vmem:[%s7946_s17 + $0x10] sm:$0xff]  ;;  %5985 = vmatpush3.msra.mxu0 %v2761_v22 }
0x15ef   :  { %6005 = vmatprep.subr.mxu1 %v2752_v47  ;;  %5986 = vmatprep.subr.mxu0 %v2760_v32 }
0x15f0   :  { %6006 = vmatpush3.msra.mxu1 %v2752_v47  ;;  %5987 = vmatpush3.msra.mxu0 %v2760_v32 }
0x1612   :  { %1957 = vadd.xlane.f32.xlu1 %v1956_v51  ;;  %v3058_v51 = vadd.f32 1.0, %v6410_v14 }
0x1614   :  { %6411 = vrcp.f32 %v3058_v51 }
0x1616   :  { %2015 = vadd.xlane.f32.xlu1 %v2014_v57  ;;  %v3061_v57 = vmul.f32 %v7915_v58, %v7876_v9  ;;  %v1949_v9 = vpop.xlane.xlu0 %1948  ;;  %v2758_v58 = vld [vmem:[%s7955_s22] sm:$0xff] }
0x161a   :  { %1963 = vadd.xlane.f32.xlu1 %v1962_v30  ;;  %v2751_v30 = vld [vmem:[%s7946_s17 + $0x8] sm:$0xff]  ;;  %v2007_v6 = vpop.xlane.xlu0 %2006  ;;  %s6690_s17 = smov 11  }
0x161b   :  { %6007 = vmatprep.subr.mxu1 %v2751_v30  ;;  %s5439_s21 = sld [smem:[%s9153_s0 + %s6690_s17]]  }
0x161c   :  { %6008 = vmatpush3.msra.mxu1 %v2751_v30  ;;  %v2061_v30 = vadd.f32 %v7950_v3, %v7948_v40  ;;  %v2044_v40 = vadd.f32 %v7970_v11, %v7959_v21 }
0x161d   :  { %6009 = vmatprep.subr.mxu1 %v2750_v35 }
0x161e   :  { %2021 = vadd.xlane.f32.xlu1 %v2020_v27  ;;  %v2759_v27 = vld [vmem:[%s7955_s22 + $0x8] sm:$0xff]  ;;  %6010 = vmatpush3.msra.mxu1 %v2750_v35  ;;  %s6691_s22 = smov 31  }
0x161f   :  { %5988 = vmatprep.subr.mxu0 %v2759_v27  ;;  %s5459_s25 = sld [smem:[%s9153_s0 + %s6691_s22]]  }
0x1620   :  { %5989 = vmatpush3.msra.mxu0 %v2759_v27  ;;  %v2063_v27 = vadd.f32 %v2061_v30, %v2007_v6  ;;  %v8011_v6 = vld [vmem:[%s8003_s4 + $0x78] sm:$0xff] }
0x1621   :  { %5990 = vmatprep.subr.mxu0 %v2758_v58  ;;  %v6412_v41 = vpop.eup %6411  ;;  %3641 = vmatprep.subr.mxu1 %v8011_v6 }
0x1622   :  { %1969 = vadd.xlane.f32.xlu1 %v1968_v5  ;;  %5991 = vmatpush3.msra.mxu0 %v2758_v58 }
0x1625   :  { %v5602_v2 = vld [vmem:[%s5459_s25] ss:$0 sm:$0xff]  ;;  %s6699_s25 = smov 16  }
0x1626   :  { %2036 = vadd.xlane.f32.xlu1 %v2035_v50  ;;  %v3294_v50 = vld [vmem:[%s7985_s26 + $0x18] sm:$0xff] }
0x1627   :  { %3407 = vmatprep.subr.mxu0 %v3294_v50  ;;  %v2045_v50 = vadd.f32 %v2043_v17, %v7941_v13 }
0x162a   :  { %2033 = vadd.xlane.f32.xlu1 %v2032_v25  ;;  %v1946_v25 = vpop.xlane.xlu0 %1945 }
0x162e   :  { %v1955_v54 = vpop.xlane.xlu0 %1954 }
0x1632   :  { %v1998_v38 = vpop.xlane.xlu0 %1997 }
0x1636   :  { %v2004_v0 = vpop.xlane.xlu0 %2003 }
0x1637   :  { %v2062_v3 = vadd.f32 %v2004_v0, %v1998_v38 }
0x163a   :  { %v2013_v14 = vpop.xlane.xlu0 %2012 }
0x163b   :  { %v2065_v35 = vadd.f32 %v2063_v27, %v2013_v14 }
0x163e   :  { %v1961_v61 = vpop.xlane.xlu0 %1960 }
0x1642   :  { %v2019_v22 = vpop.xlane.xlu0 %2018 }
0x1643   :  { %v2067_v62 = vadd.f32 %v2065_v35, %v2019_v22 }
0x1646   :  { %v1967_v47 = vpop.xlane.xlu0 %1966 }
0x164a   :  { %v2025_v32 = vpop.xlane.xlu0 %2024 }
0x164b   :  { %v2069_v21 = vadd.f32 %v2067_v62, %v2025_v32 }
0x1660   :  { %v3065_v39 = vpop.permute.xlu1 %3064 }
0x1661   :  { %v3067_v5 = vadd.f32 %v3065_v39, %v3061_v57  ;;  %v1973_v39 = vpop.xlane.xlu0 %1972 }
0x1663   :  { %6413 = vtanh.f32 %v3067_v5 }
0x1665   :  { %v2031_v59 = vpop.xlane.xlu0 %2030 }
0x1670   :  { %v6414_v60 = vpop.eup %6413 }
0x1671   :  { %v3069_v34 = vmul.f32 %v6414_v60, %v6412_v41  ;;  %v2047_v41 = vadd.f32 %v2045_v50, %v1949_v9  ;;  %v2046_v60 = vadd.f32 %v2044_v40, %v1946_v25 }
0x1673   :  { %3071 = vrot.lane.b32.xlu1 %v3069_v34, %s6668_s18  ;;  %v2064_v34 = vadd.f32 %v2062_v3, %v7972_v46  ;;  %v2049_v55 = vadd.f32 %v2047_v41, %v1955_v54  ;;  %v2048_v36 = vadd.f32 %v2046_v60, %v7961_v1  ;;  %v2071_v46 = vadd.f32 %v2069_v21, %v2031_v59  ;;  %v3293_v21 = vld [vmem:[%s7985_s26 + $0x10] sm:$0xff] }
0x1675   :  { %v2051_v13 = vadd.f32 %v2049_v55, %v1961_v61 }
0x1677   :  { %2706 = vrot.lane.b32.xlu1 %v2698_v31, %s6668_s18  ;;  %v2028_v31 = vpop.xlane.xlu0 %2027  ;;  %v2053_v11 = vadd.f32 %v2051_v13, %v1967_v47  ;;  %v8030_v13 = vld [vmem:[%s8003_s4 + $0x70] sm:$0xff] }
0x1679   :  { %v2055_v25 = vadd.f32 %v2053_v11, %v1973_v39 }
0x167b   :  { %2712 = vrot.lane.b32.xlu1 %v2710_v52, %s6668_s18  ;;  %v1976_v0 = vpop.xlane.xlu0 %1975  ;;  %v2057_v40 = vmul.f32 0.0078125, %v2055_v25 }
0x167f   :  { %v2040_v54 = vpop.xlane.xlu0 %2039 }
0x169b   :  { %v1958_v51 = vpop.xlane.xlu1 %1957 }
0x169c   :  { %v2050_v30 = vadd.f32 %v2048_v36, %v1958_v51 }
0x169f   :  { %v2016_v57 = vpop.xlane.xlu1 %2015 }
0x16a0   :  { %v2066_v14 = vadd.f32 %v2064_v34, %v2016_v57  ;;  %v2077_v57 = vmul.f32 %v2057_v40, %v2057_v40 }
0x16a3   :  { %v1964_v53 = vpop.xlane.xlu1 %1963 }
0x16a4   :  { %v2052_v38 = vadd.f32 %v2050_v30, %v1964_v53  ;;  %v2702_v30 = vpop.permute.xlu0 %2701 }
0x16a7   :  { %v2022_v5 = vpop.xlane.xlu1 %2021 }
0x16a8   :  { %v2068_v27 = vadd.f32 %v2066_v14, %v2022_v5  ;;  %v5575_v14 = vld [vmem:[%s5436_s13] ss:$0 sm:$0xff]  ;;  %s6696_s13 = smov 33  }
0x16a9   :  { %s5461_s15 = sld [smem:[%s9153_s0 + %s6696_s13]]  }
0x16aa   :  { %v2070_v22 = vadd.f32 %v2068_v27, %v2028_v31 }
0x16ab   :  { %v1970_v58 = vpop.xlane.xlu1 %1969 }
0x16ac   :  { %v2054_v17 = vadd.f32 %v2052_v38, %v1970_v58  ;;  %v5574_v58 = vld [vmem:[%s5435_s8] ss:$0 sm:$0xff]  ;;  %s6695_s8 = smov 14  }
0x16ad   :  { %v6632_v38 = vld [vmem:[%s6719_s9] sm:$0xff]  ;;  %s5442_s12 = sld [smem:[%s9153_s0 + %s6695_s8]]  }
0x16ae   :  { %v2056_v3 = vadd.f32 %v2054_v17, %v1976_v0  ;;  %v8043_v17 = vld [vmem:[%s8003_s4 + $0x68] sm:$0xff] }
0x16af   :  { %v2037_v52 = vpop.xlane.xlu1 %2036 }
0x16b0   :  { %v2073_v35 = vadd.f32 %v2071_v46, %v2037_v52  ;;  %v2058_v61 = vmul.f32 0.0078125, %v2056_v3  ;;  %v3291_v46 = vld [vmem:[%s7985_s26] sm:$0xff] }
0x16b2   :  { %v2075_v41 = vmul.f32 0.0078125, %v2073_v35  ;;  %v2078_v32 = vmul.f32 %v2058_v61, %v2058_v61  ;;  %v2704_v35 = vadd.f32 %v2702_v30, %v7405_v20  ;;  %v8129_v30 = vld [vmem:[%s8003_s4 + $0x8] sm:$0xff] }
0x16b3   :  { %v2034_v9 = vpop.xlane.xlu1 %2033 }
0x16b4   :  { %v2072_v50 = vadd.f32 %v2070_v22, %v2034_v9  ;;  %v2079_v51 = vsub.f32 %v2075_v41, %v2077_v57  ;;  %v8050_v22 = vld [vmem:[%s8003_s4 + $0x60] sm:$0xff] }
0x16b5   :  { %v8079_v57 = vld [vmem:[%s8003_s4 + $0x40] sm:$0xff] }
0x16b6   :  { %v2074_v1 = vadd.f32 %v2072_v50, %v2040_v54  ;;  %v2081_v47 = vmax.f32 %v2079_v51, 0.0  ;;  %v8057_v50 = vld [vmem:[%s8003_s4 + $0x58] sm:$0xff]  ;;  %v6633_v54 = vld [vmem:[%s6719_s9 + $0x8] sm:$0xff] }
0x16b8   :  { %v2076_v5 = vmul.f32 0.0078125, %v2074_v1  ;;  %v2083_v60 = vadd.f32 1e-08, %v2081_v47  ;;  %v8074_v1 = vld [vmem:[%s8003_s4 + $0x48] sm:$0xff] }
0x16ba   :  { %v2080_v53 = vsub.f32 %v2076_v5, %v2078_v32  ;;  %6415 = vrsqrt.f32 %v2083_v60  ;;  %v6634_v5 = vld [vmem:[%s6719_s9 + $0x10] sm:$0xff] }
0x16bc   :  { %v2082_v34 = vmax.f32 %v2080_v53, 0.0  ;;  %v8089_v53 = vld [vmem:[%s8003_s4 + $0x38] sm:$0xff] }
0x16be   :  { %v2084_v39 = vadd.f32 1e-08, %v2082_v34  ;;  %v8095_v34 = vld [vmem:[%s8003_s4 + $0x30] sm:$0xff] }
0x16c0   :  { %6417 = vrsqrt.f32 %v2084_v39 }
0x16c7   :  { %v6416_v59 = vpop.eup %6415 }
0x16c8   :  { %v8022_v62 = vmul.f32 %v6416_v59, %v5574_v58 }
0x16ca   :  { %v2095_v55 = vmul.f32 %v8022_v62, %v2057_v40  ;;  %v2105_v36 = vmul.f32 %v8022_v62, %v7779_v49  ;;  %v3292_v49 = vld [vmem:[%s7985_s26 + $0x8] sm:$0xff]  ;;  %s6692_s26 = smov 32  }
0x16cb   :  { %s5460_s29 = sld [smem:[%s9153_s0 + %s6692_s26]]  }
0x16cc   :  { %v8033_v11 = vsub.f32 %v5575_v14, %v2095_v55  ;;  %v2107_v0 = vadd.f32 %v6632_v38, %v2105_v36  ;;  %v2117_v55 = vmul.f32 %v8022_v62, %v7792_v26  ;;  %v8117_v36 = vld [vmem:[%s8003_s4 + $0x18] sm:$0xff]  ;;  %v8134_v26 = vld [vmem:[%s8003_s4] sm:$0xff] }
0x16cd   :  { %v6418_v31 = vpop.eup %6417 }
0x16ce   :  { %v8024_v52 = vmul.f32 %v6418_v31, %v5574_v58  ;;  %v8060_v40 = vadd.f32 %v2107_v0, %v8033_v11  ;;  %v6635_v58 = vld [vmem:[%s6719_s9 + $0x18] sm:$0xff] }
0x16d0   :  { %v2096_v9 = vmul.f32 %v8024_v52, %v2058_v61  ;;  %v2106_v25 = vmul.f32 %v8024_v52, %v7803_v7  ;;  %v2111_v7 = vmul.f32 %v8022_v62, %v7785_v10  ;;  %9194 = vst [vmem:[#allocation7_spill] sm:$0xff] %v8060_v40  ;;  %v8068_v10 = vld [vmem:[%s8003_s4 + $0x50] sm:$0xff]  ;;  %v2112_v47 = vmul.f32 %v8024_v52, %v7809_v12  ;;  %v8102_v12 = vld [vmem:[%s8003_s4 + $0x28] sm:$0xff] }
0x16d1   :  { %v2118_v0 = vmul.f32 %v8024_v52, %v7827_v4 }
0x16d2   :  { %v8062_v3 = vsub.f32 %v5575_v14, %v2096_v9  ;;  %v2108_v20 = vadd.f32 %v6633_v54, %v2106_v25  ;;  %v2113_v32 = vadd.f32 %v6634_v5, %v2111_v7  ;;  %v2114_v31 = vadd.f32 %v6635_v58, %v2112_v47  ;;  %v8123_v14 = vld [vmem:[%s8003_s4 + $0x10] sm:$0xff]  ;;  %v6637_v9 = vld [vmem:[%s6719_s9 + $0x28] sm:$0xff]  ;;  %v6639_v54 = vld [vmem:[%s6719_s9 + $0x38] sm:$0xff] }
0x16d3   :  { %v2120_v25 = vadd.f32 %v6637_v9, %v2118_v0  ;;  %v6641_v47 = vld [vmem:[%s6719_s9 + $0x48] sm:$0xff]  ;;  %v6642_v58 = vld [vmem:[%s6719_s9 + $0x50] sm:$0xff]  ;;  %v2141_v0 = vmul.f32 %v8022_v62, %v7860_v45  ;;  %v6644_v9 = vld [vmem:[%s6719_s9 + $0x60] sm:$0xff] }
0x16d4   :  { %v8082_v51 = vadd.f32 %v2108_v20, %v8062_v3  ;;  %v8110_v59 = vadd.f32 %v2113_v32, %v8033_v11 }
0x16d6   :  { %9195 = vst [vmem:[#allocation6_spill] sm:$0xff] %v8082_v51  ;;  %9196 = vst [vmem:[#allocation3_spill] sm:$0xff] %v8110_v59 }
0x16e5   :  { %v3072_v27 = vpop.permute.xlu1 %3071 }
0x16e6   :  { %5992 = vmatprep.mubr.msk.f32.mxu0 %vm533_vm3, %v3072_v27  ;;  %6012 = vmatmul.mubr.msk.f32.vlgmr.msra.gmra.mxu1 %vm533_vm3, %v3072_v27  ;;  %v8137_v27 = vadd.f32 %v2114_v31, %v8062_v3 }
0x16e7   :  { %5993 = vmatmul.mubr.msk.f32.vlgmr.msra.gmra.mxu0 %vm533_vm3, %v7896_v44  ;;  %3642 = vmatpush1.msra.mxu1 %v8030_v13 }
0x16e8   :  { %3408 = vmatpush1.msra.mxu0 %v3293_v21  ;;  %3443 = vmatprep.mubr.f32.mxu0 %v9188_v56  ;;  %9197 = vst [vmem:[#allocation4_spill] sm:$0xff] %v8137_v27  ;;  %v6636_v21 = vld [vmem:[%s6719_s9 + $0x20] sm:$0xff] }
0x16e9   :  { %3409 = vmatprep.subr.mxu0 %v3292_v49  ;;  %v2707_v44 = vpop.permute.xlu1 %2706  ;;  %3643 = vmatprep.subr.mxu1 %v8043_v17  ;;  %v2119_v38 = vadd.f32 %v6636_v21, %v2117_v55  ;;  %v2123_v49 = vmul.f32 %v8022_v62, %v7816_v15  ;;  %v2124_v15 = vmul.f32 %v8024_v52, %v7583_v18  ;;  %v6643_v21 = vld [vmem:[%s6719_s9 + $0x58] sm:$0xff] }
0x16ea   :  { %v2709_v41 = vadd.f32 %v2707_v44, %v2704_v35  ;;  %3410 = vmatpush1.msra.mxu0 %v3291_v46  ;;  %3644 = vmatpush1.msra.mxu1 %v8050_v22  ;;  %v8165_v46 = vadd.f32 %v2120_v25, %v8062_v3  ;;  %v6638_v35 = vld [vmem:[%s6719_s9 + $0x30] sm:$0xff]  ;;  %v2129_v18 = vmul.f32 %v8022_v62, %v7833_v33 }
0x16eb   :  { %5604 = vmatmul.mubr.msk.f32.vlgmr.msra.gmra.mxu0 %vm244_vm0, %v8060_v40  ;;  %3645 = vmatprep.subr.mxu1 %v8057_v50  ;;  %v8152_v4 = vadd.f32 %v2119_v38, %v8033_v11  ;;  %v2125_v7 = vadd.f32 %v6638_v35, %v2123_v49  ;;  %v2126_v20 = vadd.f32 %v6639_v54, %v2124_v15  ;;  %v6645_v35 = vld [vmem:[%s6719_s9 + $0x68] sm:$0xff]  ;;  %v6646_v54 = vld [vmem:[%s6719_s9 + $0x70] sm:$0xff] }
0x16ec   :  { %3617 = vrot.lane.b32.xlu0 %v2709_v41, %s6668_s18  ;;  %3449 = vmatprep.mubr.f32.mxu0 %v9188_v56  ;;  %9199 = vst [vmem:[#allocation8_spill] sm:$0xff] %v8165_v46  ;;  %v2130_v33 = vmul.f32 %v8024_v52, %v7590_v19  ;;  %v2136_v55 = vmul.f32 %v8024_v52, %v7595_v29 }
0x16ed   :  { %v2713_v61 = vpop.permute.xlu1 %2712  ;;  %3646 = vmatpush1.msra.mxu1 %v8068_v10  ;;  %3689 = vmatprep.mubr.f32.mxu1 %v9188_v56  ;;  %9198 = vst [vmem:[#allocation5_spill] sm:$0xff] %v8152_v4  ;;  %v8191_v41 = vadd.f32 %v2126_v20, %v8062_v3  ;;  %v2143_v25 = vadd.f32 %v6644_v9, %v2141_v0 }
0x16ee   :  { %v2715_v60 = vadd.f32 %v2713_v61, %v7409_v23  ;;  %3647 = vmatprep.subr.mxu1 %v8074_v1  ;;  %4046 = vmatprep.subr.mxu0 %v8011_v6  ;;  %v8107_v23 = vld [vmem:[%s8003_s4 + $0x20] sm:$0xff]  ;;  %v2138_v38 = vadd.f32 %v6643_v21, %v2136_v55  ;;  %v2142_v49 = vmul.f32 %v8024_v52, %v7601_v28 }
0x16ef   :  { %5605 = vmatmul.mubr.msk.f32.gmra.mxu0 %vm244_vm0, %v8082_v51  ;;  %3648 = vmatpush1.msra.mxu1 %v8079_v57  ;;  %9201 = vst [vmem:[#allocation10_spill] sm:$0xff] %v8191_v41  ;;  %v6640_v61 = vld [vmem:[%s6719_s9 + $0x40] sm:$0xff]  ;;  %v8237_v45 = vadd.f32 %v2143_v25, %v8033_v11  ;;  %v2147_v15 = vmul.f32 %v8022_v62, %v7609_v37 }
0x16f0   :  { %v2716_v39 = vadd.f32 %v2715_v60, %v2707_v44  ;;  %3455 = vmatprep.mubr.f32.mxu0 %v9188_v56  ;;  %3649 = vmatprep.subr.mxu1 %v8089_v53  ;;  %v8178_v44 = vadd.f32 %v2125_v7, %v8033_v11  ;;  %v2131_v5 = vadd.f32 %v6640_v61, %v2129_v18 }
0x16f1   :  { %3650 = vmatpush1.msra.mxu1 %v8095_v34  ;;  %4047 = vmatpush1.msra.mxu0 %v8030_v13  ;;  %v2132_v60 = vadd.f32 %v6641_v47, %v2130_v33  ;;  %v8228_v29 = vadd.f32 %v2138_v38, %v8062_v3  ;;  %9206 = vst [vmem:[#allocation15_spill] sm:$0xff] %v8237_v45 }
0x16f2   :  { %3619 = vrot.lane.b32.xlu1 %v2716_v39, %s6668_s18  ;;  %3651 = vmatprep.subr.mxu1 %v8102_v12  ;;  %9200 = vst [vmem:[#allocation9_spill] sm:$0xff] %v8178_v44  ;;  %v8201_v32 = vadd.f32 %v2131_v5, %v8033_v11  ;;  %v2135_v39 = vmul.f32 %v8022_v62, %v7850_v42  ;;  %v6647_v62 = vld [vmem:[%s6719_s9 + $0x78] sm:$0xff]  ;;  %s6689_s9 = smov 30  }
0x16f3   :  { %5606 = vmatmul.mubr.msk.f32.gmra.mxu0 %vm244_vm0, %v8110_v59  ;;  %3652 = vmatpush1.msra.mxu1 %v8107_v23  ;;  %v8210_v19 = vadd.f32 %v2132_v60, %v8062_v3  ;;  %9205 = vst [vmem:[#allocation14_spill] sm:$0xff] %v8228_v29  ;;  %v2144_v7 = vadd.f32 %v6645_v35, %v2142_v49  ;;  %s5458_s16 = sld [smem:[%s9153_s0 + %s6689_s9]]  }
0x16f4   :  { %3461 = vmatprep.mubr.f32.mxu0 %v9188_v56  ;;  %3653 = vmatprep.subr.mxu1 %v8117_v36  ;;  %9202 = vst [vmem:[#allocation11_spill] sm:$0xff] %v8201_v32  ;;  %v2137_v31 = vadd.f32 %v6642_v58, %v2135_v39  ;;  %v2149_v20 = vadd.f32 %v6646_v54, %v2147_v15 }
0x16f5   :  { %3654 = vmatpush1.msra.mxu1 %v8123_v14  ;;  %4048 = vmatprep.subr.mxu0 %v8043_v17  ;;  %9203 = vst [vmem:[#allocation12_spill] sm:$0xff] %v8210_v19  ;;  %v8246_v28 = vadd.f32 %v2144_v7, %v8062_v3  ;;  %v2148_v18 = vmul.f32 %v8024_v52, %v7606_v43 }
0x16f6   :  { %3655 = vmatprep.subr.mxu1 %v8129_v30  ;;  %4049 = vmatpush1.msra.mxu0 %v8050_v22  ;;  %v8219_v42 = vadd.f32 %v2137_v31, %v8033_v11  ;;  %v8255_v37 = vadd.f32 %v2149_v20, %v8033_v11 }
0x16f7   :  { %5607 = vmatmul.mubr.msk.f32.gmra.mxu0 %vm244_vm0, %v8137_v27  ;;  %3656 = vmatpush1.msra.mxu1 %v8134_v26  ;;  %9207 = vst [vmem:[#allocation16_spill] sm:$0xff] %v8246_v28  ;;  %v2150_v61 = vadd.f32 %v6647_v62, %v2148_v18 }
0x16f8   :  { %3467 = vmatprep.mubr.f32.mxu0 %v9188_v56  ;;  %3776 = vmatprep.subr.mxu1 %v8011_v6  ;;  %9204 = vst [vmem:[#allocation13_spill] sm:$0xff] %v8219_v42  ;;  %9208 = vst [vmem:[#allocation17_spill] sm:$0xff] %v8255_v37 }
0x16f9   :  { %4050 = vmatprep.subr.mxu0 %v8057_v50  ;;  %v8262_v5 = vadd.f32 %v2150_v61, %v8062_v3  ;;  %v5601_v3 = vld [vmem:[%s5458_s16] ss:$0 sm:$0xff]  ;;  %s6697_s16 = smov 34  }
0x16fa   :  { %4051 = vmatpush1.msra.mxu0 %v8068_v10  ;;  %s9038_s20 = sld [smem:[%s9153_s0 + %s6697_s16]]  }
0x16fb   :  { %5608 = vmatmul.mubr.msk.f32.gmra.mxu0 %vm244_vm0, %v8152_v4  ;;  %4052 = vmatprep.subr.mxu0 %v8074_v1  ;;  %9209 = vst [vmem:[#allocation18_spill] sm:$0xff] %v8262_v5 }
0x16fc   :  { %3473 = vmatprep.mubr.f32.mxu0 %v9188_v56  ;;  %4053 = vmatpush1.msra.mxu0 %v8079_v57 }
0x16fd   :  { %4054 = vmatprep.subr.mxu0 %v8089_v53 }
0x16fe   :  { %4055 = vmatpush1.msra.mxu0 %v8095_v34 }
0x16ff   :  { %5609 = vmatmul.mubr.msk.f32.gmra.mxu0 %vm244_vm0, %v8165_v46  ;;  %4056 = vmatprep.subr.mxu0 %v8102_v12 }
0x1700   :  { %3479 = vmatprep.mubr.f32.mxu0 %v9188_v56  ;;  %4057 = vmatpush1.msra.mxu0 %v8107_v23 }
0x1701   :  { %4058 = vmatprep.subr.mxu0 %v8117_v36 }
0x1702   :  { %4059 = vmatpush1.msra.mxu0 %v8123_v14 }
0x1703   :  { %5610 = vmatmul.mubr.msk.f32.gmra.mxu0 %vm244_vm0, %v8178_v44  ;;  %4060 = vmatprep.subr.mxu0 %v8129_v30 }
0x1704   :  { %3485 = vmatprep.mubr.f32.mxu0 %v9188_v56  ;;  %4061 = vmatpush1.msra.mxu0 %v8134_v26 }
0x1705   :  { %4316 = vmatprep.subr.mxu0 %v8011_v6 }
0x1707   :  { %5611 = vmatmul.mubr.msk.f32.gmra.mxu0 %vm244_vm0, %v8191_v41 }
0x1708   :  { %3491 = vmatprep.mubr.f32.mxu0 %v9188_v56 }
0x170b   :  { %5612 = vmatmul.mubr.msk.f32.gmra.mxu0 %vm244_vm0, %v8201_v32 }
0x170c   :  { %3497 = vmatprep.mubr.f32.mxu0 %v9188_v56 }
0x170f   :  { %5613 = vmatmul.mubr.msk.f32.gmra.mxu0 %vm244_vm0, %v8210_v19 }
0x1710   :  { %3503 = vmatprep.mubr.f32.mxu0 %v9188_v56 }
0x1713   :  { %5614 = vmatmul.mubr.msk.f32.gmra.mxu0 %vm244_vm0, %v8219_v42 }
0x1714   :  { %3509 = vmatprep.mubr.f32.mxu0 %v9188_v56 }
0x1717   :  { %5615 = vmatmul.mubr.msk.f32.gmra.mxu0 %vm244_vm0, %v8228_v29 }
0x1718   :  { %3515 = vmatprep.mubr.f32.mxu0 %v9188_v56 }
0x171b   :  { %5616 = vmatmul.mubr.msk.f32.gmra.mxu0 %vm244_vm0, %v8237_v45 }
0x171c   :  { %3521 = vmatprep.mubr.f32.mxu0 %v9188_v56 }
0x171f   :  { %5617 = vmatmul.mubr.msk.f32.gmra.mxu0 %vm244_vm0, %v8246_v28 }
0x1720   :  { %3527 = vmatprep.mubr.f32.mxu0 %v9188_v56 }
0x1723   :  { %5618 = vmatmul.mubr.msk.f32.gmra.mxu0 %vm244_vm0, %v8255_v37 }
0x1724   :  { %3533 = vmatprep.mubr.f32.mxu0 %v9188_v56 }
0x1727   :  { %5619 = vmatmul.mubr.msk.f32.gmra.mxu0 %vm244_vm0, %v8262_v5 }
0x1728   :  { %4094 = vmatprep.mubr.f32.mxu0 %v9188_v56 }
0x175e   :  { %v3618_v43 = vpop.permute.xlu0 %3617 }
0x175f   :  { %5620 = vmatmul.mubr.msk.f32.vlgmr.msra.gmra.mxu1 %vm533_vm3, %v3618_v43 }
0x1760   :  { %3695 = vmatprep.mubr.f32.mxu1 %v9188_v56  ;;  %3777 = vmatpush1.msra.mxu1 %v8030_v13 }
0x1761   :  { %3778 = vmatprep.subr.mxu1 %v8043_v17 }
0x1762   :  { %3779 = vmatpush1.msra.mxu1 %v8050_v22 }
0x1763   :  { %3780 = vmatprep.subr.mxu1 %v8057_v50 }
0x1764   :  { %v3620_v52 = vpop.permute.xlu1 %3619  ;;  %3781 = vmatpush1.msra.mxu1 %v8068_v10 }
0x1765   :  { %5621 = vmatmul.mubr.msk.f32.gmra.mxu1 %vm533_vm3, %v3620_v52  ;;  %3782 = vmatprep.subr.mxu1 %v8074_v1 }
0x1766   :  { %3783 = vmatpush1.msra.mxu1 %v8079_v57  ;;  %3824 = vmatprep.mubr.f32.mxu1 %v9188_v56 }
0x1767   :  { %3784 = vmatprep.subr.mxu1 %v8089_v53 }
0x1768   :  { %3785 = vmatpush1.msra.mxu1 %v8095_v34 }
0x1769   :  { %3786 = vmatprep.subr.mxu1 %v8102_v12 }
0x176a   :  { %3787 = vmatpush1.msra.mxu1 %v8107_v23 }
0x176b   :  { %3788 = vmatprep.subr.mxu1 %v8117_v36 }
0x176c   :  { %3789 = vmatpush1.msra.mxu1 %v8123_v14 }
0x176d   :  { %3790 = vmatprep.subr.mxu1 %v8129_v30 }
0x176e   :  { %3791 = vmatpush1.msra.mxu1 %v8134_v26 }
0x176f   :  { %3911 = vmatprep.subr.mxu1 %v8011_v6 }
0x17a6   :  { %v6013_v11 = vpop.f32.mrf.mxu1 }
0x17a7   :  { %v5994_v33 = vpop.f32.mrf.mxu0 }
0x17a8   :  { %v3222_v47 = vadd.f32 %v6013_v11, %v5994_v33  ;;  %v3216_v60 = vpop.f32.mrf.mxu1 }
0x17a9   :  { %v3141_v39 = vpop.f32.mrf.mxu0 }
0x17aa   :  { %v8290_v58 = vadd.f32 %v5601_v3, %v3222_v47  ;;  %v3217_v31 = vadd.f32 %v3216_v60, %v3141_v39  ;;  %v3311_v60 = vld [vmem:[%s5439_s21] sm:$0x3]  ;;  %s6698_s21 = smov 15  }
0x17ab   :  { %v8292_v55 = vpop.f32.mrf.mxu0  ;;  %s5443_s24 = sld [smem:[%s9153_s0 + %s6698_s21]]  }
0x17ac   :  { %v8294_v21 = vadd.f32 %v5601_v3, %v3217_v31  ;;  %v3236_v38 = vsel %vm533_vm3, %v8290_v58, 0.0  ;;  %v3240_v15 = vmul.f32 %v8290_v58, %v8290_v58 }
0x17ad   :  { %3237 = vadd.xlane.f32.xlu1 %v3236_v38  ;;  %v8298_v0 = vpop.f32.mrf.mxu0  ;;  %v8324_v38 = vrot.slane %v3311_v60, %v9191_v48 }
0x17ae   :  { %v3233_v9 = vsel %vm533_vm3, %v8294_v21, 0.0  ;;  %v3239_v25 = vmul.f32 %v8294_v21, %v8294_v21  ;;  %v3244_v18 = vsel %vm533_vm3, %v3240_v15, 0.0 }
0x17af   :  { %v8304_v49 = vpop.f32.mrf.mxu0  ;;  %3234 = vadd.xlane.f32.xlu0 %v3233_v9 }
0x17b0   :  { %v3241_v7 = vsel %vm533_vm3, %v3239_v25, 0.0  ;;  %v8327_v25 = vrot.slane %v3311_v60, %v9192_v63 }
0x17b1   :  { %v8306_v35 = vpop.f32.mrf.mxu0 }
0x17b3   :  { %v8311_v54 = vpop.f32.mrf.mxu0  ;;  %3242 = vadd.xlane.f32.xlu0 %v3241_v7 }
0x17b5   :  { %v8313_v20 = vpop.f32.mrf.mxu0 }
0x17b7   :  { %v8316_v62 = vpop.f32.mrf.mxu0  ;;  %3245 = vadd.xlane.f32.xlu0 %v3244_v18 }
0x17b9   :  { %v8318_v61 = vpop.f32.mrf.mxu0 }
0x17bb   :  { %v3469_v43 = vpop.f32.mrf.mxu0 }
0x17bd   :  { %v3471_v52 = vpop.f32.mrf.mxu0 }
0x17bf   :  { %v3475_v11 = vpop.f32.mrf.mxu0 }
0x17c1   :  { %v3477_v3 = vpop.f32.mrf.mxu0 }
0x17c3   :  { %v3481_v33 = vpop.f32.mrf.mxu0 }
0x17c5   :  { %v3483_v47 = vpop.f32.mrf.mxu0 }
0x17c7   :  { %v3487_v39 = vpop.f32.mrf.mxu0 }
0x17c9   :  { %v3489_v31 = vpop.f32.mrf.mxu0 }
0x17cb   :  { %v3493_v9 = vpop.f32.mrf.mxu0 }
0x17cc   :  { %v3552_v7 = vsel %vm6899_vm1, %v3481_v33, %v3493_v9  ;;  %v3556_v15 = vsel %vm6899_vm1, %v3493_v9, %v3481_v33 }
0x17cd   :  { %v3495_v18 = vpop.f32.mrf.mxu0  ;;  %v8334_v5 = vadd.f32 %v8324_v38, %v3552_v7  ;;  %v8337_v37 = vadd.f32 %v8324_v38, %v3556_v15 }
0x17ce   :  { %v3553_v48 = vsel %vm6906_vm2, %v3483_v47, %v3495_v18  ;;  %v3557_v63 = vsel %vm6906_vm2, %v3495_v18, %v3483_v47 }
0x17cf   :  { %v3499_v60 = vpop.f32.mrf.mxu0  ;;  %v8344_v28 = vadd.f32 %v8327_v25, %v3553_v48  ;;  %v8347_v45 = vadd.f32 %v8327_v25, %v3557_v63 }
0x17d0   :  { %v3554_v33 = vsel %vm6899_vm1, %v3487_v39, %v3499_v60  ;;  %v3558_v9 = vsel %vm6899_vm1, %v3499_v60, %v3487_v39 }
0x17d1   :  { %9210 = vst [vmem:[#allocation19_spill] sm:$0xff] %v8347_v45  ;;  %v3501_v7 = vpop.f32.mrf.mxu0  ;;  %v8354_v15 = vadd.f32 %v8324_v38, %v3554_v33  ;;  %v8357_v59 = vadd.f32 %v8324_v38, %v3558_v9 }
0x17d2   :  { %v3555_v47 = vsel %vm6906_vm2, %v3489_v31, %v3501_v7  ;;  %v3559_v18 = vsel %vm6906_vm2, %v3501_v7, %v3489_v31 }
0x17d3   :  { %v3505_v48 = vpop.f32.mrf.mxu0  ;;  %v8364_v63 = vadd.f32 %v8327_v25, %v3555_v47  ;;  %v8367_v42 = vadd.f32 %v8327_v25, %v3559_v18 }
0x17d4   :  { %v3548_v39 = vsel %vm6899_vm1, %v3469_v43, %v3505_v48  ;;  %v3560_v60 = vsel %vm6899_vm1, %v3505_v48, %v3469_v43 }
0x17d5   :  { %9211 = vst [vmem:[#allocation20_spill] sm:$0xff] %v8367_v42  ;;  %v3507_v33 = vpop.f32.mrf.mxu0  ;;  %v8374_v9 = vadd.f32 %v8324_v38, %v3548_v39  ;;  %v8377_v32 = vadd.f32 %v8324_v38, %v3560_v60 }
0x17d6   :  { %v3549_v31 = vsel %vm6906_vm2, %v3471_v52, %v3507_v33  ;;  %v3561_v7 = vsel %vm6906_vm2, %v3507_v33, %v3471_v52 }
0x17d7   :  { %9212 = vst [vmem:[#allocation21_spill] sm:$0xff] %v8377_v32  ;;  %v3511_v47 = vpop.f32.mrf.mxu0  ;;  %v8384_v18 = vadd.f32 %v8327_v25, %v3549_v31  ;;  %v8387_v29 = vadd.f32 %v8327_v25, %v3561_v7 }
0x17d8   :  { %v3550_v43 = vsel %vm6899_vm1, %v3475_v11, %v3511_v47  ;;  %v3562_v48 = vsel %vm6899_vm1, %v3511_v47, %v3475_v11 }
0x17d9   :  { %9213 = vst [vmem:[#allocation22_spill] sm:$0xff] %v8387_v29  ;;  %v3513_v39 = vpop.f32.mrf.mxu0  ;;  %v8394_v60 = vadd.f32 %v8324_v38, %v3550_v43  ;;  %v8397_v40 = vadd.f32 %v8324_v38, %v3562_v48 }
0x17da   :  { %v3551_v52 = vsel %vm6906_vm2, %v3477_v3, %v3513_v39  ;;  %v3563_v33 = vsel %vm6906_vm2, %v3513_v39, %v3477_v3 }
0x17db   :  { %9214 = vst [vmem:[#allocation23_spill] sm:$0xff] %v8397_v40  ;;  %v3517_v31 = vpop.f32.mrf.mxu0  ;;  %v8404_v7 = vadd.f32 %v8327_v25, %v3551_v52  ;;  %v8407_v51 = vadd.f32 %v8327_v25, %v3563_v33 }
0x17dc   :  { %v3544_v11 = vsel %vm6899_vm1, %v8311_v54, %v3517_v31  ;;  %v3564_v47 = vsel %vm6899_vm1, %v3517_v31, %v8311_v54 }
0x17dd   :  { %9215 = vst [vmem:[#allocation24_spill] sm:$0xff] %v8407_v51  ;;  %v3519_v43 = vpop.f32.mrf.mxu0  ;;  %v8416_v48 = vadd.f32 %v8324_v38, %v3544_v11  ;;  %v8419_v3 = vadd.f32 %v8324_v38, %v3564_v47 }
0x17de   :  { %v3545_v39 = vsel %vm6906_vm2, %v8313_v20, %v3519_v43  ;;  %v3565_v52 = vsel %vm6906_vm2, %v3519_v43, %v8313_v20 }
0x17df   :  { %9216 = vst [vmem:[#allocation25_spill] sm:$0xff] %v8419_v3  ;;  %v3523_v33 = vpop.f32.mrf.mxu0  ;;  %v8428_v19 = vadd.f32 %v8327_v25, %v3545_v39  ;;  %v8431_v54 = vadd.f32 %v8327_v25, %v3565_v52 }
0x17e0   :  { %v3546_v31 = vsel %vm6899_vm1, %v8316_v62, %v3523_v33  ;;  %v3566_v11 = vsel %vm6899_vm1, %v3523_v33, %v8316_v62 }
0x17e1   :  { %9217 = vst [vmem:[#allocation26_spill] sm:$0xff] %v8431_v54  ;;  %v3525_v47 = vpop.f32.mrf.mxu0  ;;  %v8440_v44 = vadd.f32 %v8324_v38, %v3546_v31  ;;  %v8443_v20 = vadd.f32 %v8324_v38, %v3566_v11 }
0x17e2   :  { %v3547_v43 = vsel %vm6906_vm2, %v8318_v61, %v3525_v47  ;;  %v3567_v39 = vsel %vm6906_vm2, %v3525_v47, %v8318_v61 }
0x17e3   :  { %9218 = vst [vmem:[#allocation27_spill] sm:$0xff] %v8443_v20  ;;  %v3529_v52 = vpop.f32.mrf.mxu0  ;;  %v8452_v41 = vadd.f32 %v8327_v25, %v3547_v43  ;;  %v8455_v62 = vadd.f32 %v8327_v25, %v3567_v39 }
0x17e4   :  { %v3568_v33 = vsel %vm6899_vm1, %v3529_v52, %v8292_v55 }
0x17e5   :  { %9219 = vst [vmem:[#allocation28_spill] sm:$0xff] %v8455_v62  ;;  %v3531_v31 = vpop.f32.mrf.mxu0  ;;  %v8461_v11 = vadd.f32 %v8324_v38, %v3568_v33  ;;  %v3540_v62 = vsel %vm6899_vm1, %v8292_v55, %v3529_v52 }
0x17e6   :  { %v3569_v4 = vsel %vm6906_vm2, %v3531_v31, %v8298_v0 }
0x17e7   :  { %9220 = vst [vmem:[#allocation29_spill] sm:$0xff] %v8461_v11  ;;  %v3535_v61 = vpop.f32.mrf.mxu0  ;;  %v8467_v47 = vadd.f32 %v8327_v25, %v3569_v4 }
0x17e8   :  { %v3570_v43 = vsel %vm6899_vm1, %v3535_v61, %v8304_v49  ;;  %v3542_v4 = vsel %vm6899_vm1, %v8304_v49, %v3535_v61 }
0x17e9   :  { %9221 = vst [vmem:[#allocation30_spill] sm:$0xff] %v8467_v47  ;;  %v3537_v39 = vpop.f32.mrf.mxu0  ;;  %v8473_v46 = vadd.f32 %v8324_v38, %v3570_v43  ;;  %v3585_v43 = vadd.f32 %v8324_v38, %v3542_v4 }
0x17ea   :  { %v3571_v33 = vsel %vm6906_vm2, %v3537_v39, %v8306_v35 }
0x17eb   :  { %9222 = vst [vmem:[#allocation31_spill] sm:$0xff] %v8473_v46  ;;  %v8479_v27 = vadd.f32 %v8327_v25, %v3571_v33  ;;  %v3583_v46 = vadd.f32 %v8324_v38, %v3540_v62  ;;  %v3543_v38 = vsel %vm6906_vm2, %v8306_v35, %v3537_v39  ;;  %v5603_v62 = vld [vmem:[%s5460_s29] ss:$0 sm:$0xff]  ;;  %s5444_s29 = sld [smem:[%s9153_s0 + %s6699_s25]]  }
0x17ed   :  { %9223 = vst [vmem:[#allocation32_spill] sm:$0xff] %v8479_v27 }
0x181f   :  { %v3691_v11 = vpop.f32.mrf.mxu1 }
0x1820   :  { %v3702_v3 = vadd.f32 %v3691_v11, %v3583_v46 }
0x1821   :  { %v3693_v47 = vpop.f32.mrf.mxu1 }
0x1822   :  { %v5622_v29 = vmul.f32 -1.442695, %v3702_v3 }
0x1825   :  { %v3697_v54 = vpop.f32.mrf.mxu1 }
0x1826   :  { %v3704_v20 = vadd.f32 %v3697_v54, %v3585_v43 }
0x1828   :  { %v5623_v33 = vmul.f32 -1.442695, %v3704_v20  ;;  %v3699_v20 = vpop.f32.mrf.mxu1 }
0x182a   :  { %6419 = vpow2.f32 %v5623_v33 }
0x182b   :  { %6421 = vpow2.f32 %v5622_v29 }
0x1836   :  { %v3238_v27 = vpop.xlane.xlu1 %3237 }
0x1837   :  { %v6420_v54 = vpop.eup %6419 }
0x1838   :  { %v3235_v51 = vpop.xlane.xlu0 %3234  ;;  %v6422_v3 = vpop.eup %6421 }
0x1839   :  { %v3248_v40 = vadd.f32 %v3238_v27, %v3235_v51  ;;  %v3541_v51 = vsel %vm6906_vm2, %v8298_v0, %v3531_v31  ;;  %v3713_v27 = vadd.f32 1.0, %v6420_v54 }
0x183a   :  { %v3584_v29 = vadd.f32 %v8327_v25, %v3541_v51 }
0x183b   :  { %v3249_v49 = vmul.f32 0.0078125, %v3248_v40  ;;  %v3586_v40 = vadd.f32 %v8327_v25, %v3543_v38 }
0x183c   :  { %v3243_v32 = vpop.xlane.xlu0 %3242 }
0x183d   :  { %v3253_v24 = vmul.f32 %v3249_v49, %v3249_v49 }
0x1840   :  { %v3246_v61 = vpop.xlane.xlu0 %3245 }
0x1841   :  { %v3251_v42 = vadd.f32 %v3246_v61, %v3243_v32  ;;  %v3705_v32 = vadd.f32 %v3699_v20, %v3586_v40 }
0x1843   :  { %v3252_v55 = vmul.f32 0.0078125, %v3251_v42  ;;  %v3712_v42 = vadd.f32 1.0, %v6422_v3 }
0x1845   :  { %v3254_v52 = vsub.f32 %v3252_v55, %v3253_v24 }
0x1847   :  { %v3255_v45 = vmax.f32 %v3254_v52, 0.0 }
0x1849   :  { %v3256_v46 = vadd.f32 1e-08, %v3255_v45  ;;  %v3703_v45 = vadd.f32 %v3693_v47, %v3584_v29 }
0x184b   :  { %6423 = vrsqrt.f32 %v3256_v46 }
0x184c   :  { %6425 = vrcp.f32 %v3713_v27 }
0x184d   :  { %6427 = vtanh.f32 %v3705_v32 }
0x184e   :  { %6429 = vrcp.f32 %v3712_v42 }
0x184f   :  { %6431 = vtanh.f32 %v3703_v45 }
0x1858   :  { %v6424_v0 = vpop.eup %6423 }
0x1859   :  { %v3264_v35 = vmul.f32 %v6424_v0, %v5602_v2  ;;  %v6426_v47 = vpop.eup %6425 }
0x185a   :  { %v6428_v39 = vpop.eup %6427 }
0x185b   :  { %v3273_v31 = vmul.f32 %v3264_v35, %v8294_v21  ;;  %v3265_v11 = vmul.f32 %v3264_v35, %v3249_v49  ;;  %v3284_v4 = vmul.f32 %v3264_v35, %v8290_v58  ;;  %v6430_v43 = vpop.eup %6429  ;;  %v3735_v33 = vmul.f32 %v6428_v39, %v6426_v47 }
0x185c   :  { %v6432_v61 = vpop.eup %6431  ;;  %v5624_v21 = vmul.f32 -1.442695, %v3703_v45  ;;  %v5625_v49 = vmul.f32 -1.442695, %v3705_v32 }
0x185d   :  { %3275 = vrot.lane.b32.xlu1 %v3273_v31, %s6668_s18  ;;  %v3272_v25 = vsub.f32 %v5603_v62, %v3265_v11  ;;  %v3734_v24 = vmul.f32 %v6432_v61, %v6430_v43 }
0x185e   :  { %6433 = vpow2.f32 %v5624_v21 }
0x185f   :  { %3280 = vrot.lane.b32.xlu0 %v3272_v25, %s6668_s18  ;;  %6435 = vpow2.f32 %v5625_v49 }
0x1861   :  { %3286 = vrot.lane.b32.xlu1 %v3284_v4, %s6668_s18 }
0x1863   :  { %3740 = vrot.lane.b32.xlu0 %v3735_v33, %s6668_s18 }
0x1865   :  { %3738 = vrot.lane.b32.xlu1 %v3734_v24, %s6668_s18 }
0x186b   :  { %v6434_v46 = vpop.eup %6433 }
0x186c   :  { %v6436_v20 = vpop.eup %6435  ;;  %v3726_v51 = vadd.f32 1.0, %v6434_v46 }
0x186d   :  { %v3727_v42 = vadd.f32 1.0, %v6436_v20 }
0x186e   :  { %6437 = vrcp.f32 %v3726_v51 }
0x18cf   :  { %v3276_v55 = vpop.permute.xlu1 %3275 }
0x18d0   :  { %v3278_v52 = vadd.f32 %v3276_v55, %v7386_v8  ;;  %v6438_v8 = vpop.eup %6437 }
0x18d1   :  { %v3281_v38 = vpop.permute.xlu0 %3280 }
0x18d2   :  { %v3283_v58 = vadd.f32 %v3281_v38, %v3278_v52 }
0x18d3   :  { %v3287_v54 = vpop.permute.xlu1 %3286 }
0x18d4   :  { %v3289_v3 = vadd.f32 %v3287_v54, %v7390_v16  ;;  %v3732_v27 = vmul.f32 %v6430_v43, %v3283_v58 }
0x18d5   :  { %v3741_v32 = vpop.permute.xlu0 %3740 }
0x18d6   :  { %v3290_v40 = vadd.f32 %v3289_v3, %v3281_v38 }
0x18d7   :  { %v3739_v29 = vpop.permute.xlu1 %3738 }
0x18d8   :  { %v3733_v2 = vmul.f32 %v6426_v47, %v3290_v40  ;;  %v8513_v45 = vadd.f32 %v3739_v29, %v3732_v27 }
0x18da   :  { %v8515_v0 = vadd.f32 %v3741_v32, %v3733_v2  ;;  %6439 = vtanh.f32 %v8513_v45 }
0x18db   :  { %6441 = vrcp.f32 %v3727_v42 }
0x18dc   :  { %6443 = vtanh.f32 %v8515_v0 }
0x18e7   :  { %v6440_v35 = vpop.eup %6439 }
0x18e8   :  { %v6442_v16 = vpop.eup %6441  ;;  %v3748_v62 = vmul.f32 %v6440_v35, %v6438_v8 }
0x18e9   :  { %v6444_v31 = vpop.eup %6443 }
0x18ea   :  { %3752 = vrot.lane.b32.xlu1 %v3748_v62, %s6668_s18  ;;  %v3749_v11 = vmul.f32 %v6444_v31, %v6442_v16 }
0x18ec   :  { %3754 = vrot.lane.b32.xlu0 %v3749_v11, %s6668_s18 }
0x195c   :  { %v8521_v25 = vpop.permute.xlu1 %3752 }
0x195d   :  { %5626 = vmatmul.mubr.msk.f32.vlgmr.msra.gmra.mxu1 %vm533_vm3, %v8521_v25 }
0x195e   :  { %3830 = vmatprep.mubr.f32.mxu1 %v9188_v56  ;;  %3912 = vmatpush1.msra.mxu1 %v8030_v13  ;;  %v8528_v47 = vpop.permute.xlu0 %3754 }
0x195f   :  { %3913 = vmatprep.subr.mxu1 %v8043_v17 }
0x1960   :  { %3914 = vmatpush1.msra.mxu1 %v8050_v22 }
0x1961   :  { %5627 = vmatmul.mubr.msk.f32.gmra.mxu1 %vm533_vm3, %v8528_v47  ;;  %3915 = vmatprep.subr.mxu1 %v8057_v50 }
0x1962   :  { %3916 = vmatpush1.msra.mxu1 %v8068_v10  ;;  %3959 = vmatprep.mubr.f32.mxu1 %v9188_v56 }
0x1963   :  { %3917 = vmatprep.subr.mxu1 %v8074_v1 }
0x1964   :  { %3918 = vmatpush1.msra.mxu1 %v8079_v57 }
0x1965   :  { %3919 = vmatprep.subr.mxu1 %v8089_v53 }
0x1966   :  { %3920 = vmatpush1.msra.mxu1 %v8095_v34 }
0x1967   :  { %3921 = vmatprep.subr.mxu1 %v8102_v12 }
0x1968   :  { %3922 = vmatpush1.msra.mxu1 %v8107_v23 }
0x1969   :  { %3923 = vmatprep.subr.mxu1 %v8117_v36 }
0x196a   :  { %3924 = vmatpush1.msra.mxu1 %v8123_v14 }
0x196b   :  { %3925 = vmatprep.subr.mxu1 %v8129_v30 }
0x196c   :  { %3926 = vmatpush1.msra.mxu1 %v8134_v26 }
0x196d   :  { %4181 = vmatprep.subr.mxu1 %v8011_v6 }
0x1a1d   :  { %v3826_v39 = vpop.f32.mrf.mxu1 }
0x1a1e   :  { %v3837_v4 = vadd.f32 %v3826_v39, %v8416_v48 }
0x1a1f   :  { %v3828_v43 = vpop.f32.mrf.mxu1 }
0x1a20   :  { %v5628_v33 = vmul.f32 -1.442695, %v3837_v4  ;;  %v3838_v49 = vadd.f32 %v3828_v43, %v8428_v19 }
0x1a21   :  { %v3832_v61 = vpop.f32.mrf.mxu1 }
0x1a22   :  { %6445 = vpow2.f32 %v5628_v33  ;;  %v3839_v24 = vadd.f32 %v3832_v61, %v8440_v44  ;;  %v5630_v19 = vmul.f32 -1.442695, %v3838_v49 }
0x1a23   :  { %v3834_v55 = vpop.f32.mrf.mxu1 }
0x1a24   :  { %v5629_v21 = vmul.f32 -1.442695, %v3839_v24  ;;  %v3840_v46 = vadd.f32 %v3834_v55, %v8452_v41 }
0x1a26   :  { %6447 = vpow2.f32 %v5629_v21  ;;  %v5631_v40 = vmul.f32 -1.442695, %v3840_v46 }
0x1a27   :  { %6449 = vtanh.f32 %v3838_v49 }
0x1a2f   :  { %v6446_v52 = vpop.eup %6445 }
0x1a30   :  { %v3847_v38 = vadd.f32 1.0, %v6446_v52 }
0x1a32   :  { %6451 = vrcp.f32 %v3847_v38 }
0x1a33   :  { %v6448_v6 = vpop.eup %6447  ;;  %6453 = vtanh.f32 %v3840_v46 }
0x1a34   :  { %v3848_v58 = vadd.f32 1.0, %v6448_v6  ;;  %v6450_v48 = vpop.eup %6449 }
0x1a36   :  { %6455 = vrcp.f32 %v3848_v58 }
0x1a37   :  { %6457 = vpow2.f32 %v5630_v19 }
0x1a38   :  { %6459 = vpow2.f32 %v5631_v40 }
0x1a3f   :  { %v6452_v54 = vpop.eup %6451 }
0x1a40   :  { %v3869_v20 = vmul.f32 %v6452_v54, %v6450_v48  ;;  %v6454_v3 = vpop.eup %6453  ;;  %v3867_v29 = vmul.f32 %v6452_v54, %v8513_v45 }
0x1a42   :  { %3873 = vrot.lane.b32.xlu1 %v3869_v20, %s6668_s18 }
0x1a43   :  { %v6456_v44 = vpop.eup %6455 }
0x1a44   :  { %v3870_v51 = vmul.f32 %v6456_v44, %v6454_v3  ;;  %v6458_v41 = vpop.eup %6457  ;;  %v3868_v35 = vmul.f32 %v6456_v44, %v8515_v0 }
0x1a45   :  { %v3861_v27 = vadd.f32 1.0, %v6458_v41  ;;  %v6460_v42 = vpop.eup %6459 }
0x1a46   :  { %3875 = vrot.lane.b32.xlu0 %v3870_v51, %s6668_s18  ;;  %v3862_v8 = vadd.f32 1.0, %v6460_v42 }
0x1a47   :  { %6461 = vrcp.f32 %v3861_v27 }
0x1a54   :  { %v6462_v31 = vpop.eup %6461 }
0x1ab4   :  { %v3874_v2 = vpop.permute.xlu1 %3873 }
0x1ab5   :  { %v8554_v32 = vadd.f32 %v3874_v2, %v3867_v29 }
0x1ab7   :  { %6463 = vtanh.f32 %v8554_v32 }
0x1ab8   :  { %v3876_v16 = vpop.permute.xlu0 %3875  ;;  %6465 = vrcp.f32 %v3862_v8 }
0x1ab9   :  { %v8558_v62 = vadd.f32 %v3876_v16, %v3868_v35 }
0x1abb   :  { %6467 = vtanh.f32 %v8558_v62 }
0x1ac4   :  { %v6464_v11 = vpop.eup %6463 }
0x1ac5   :  { %v3883_v39 = vmul.f32 %v6464_v11, %v6462_v31  ;;  %v6466_v4 = vpop.eup %6465  ;;  %v8614_v11 = vld [vmem:[%s8003_s4 + $0x70] sm:$0xff] }
0x1ac7   :  { %3887 = vrot.lane.b32.xlu1 %v3883_v39, %s6668_s18  ;;  %v8618_v39 = vld [vmem:[%s8003_s4 + $0x68] sm:$0xff] }
0x1ac8   :  { %v6468_v45 = vpop.eup %6467 }
0x1ac9   :  { %v3884_v43 = vmul.f32 %v6468_v45, %v6466_v4  ;;  %v8624_v45 = vld [vmem:[%s8003_s4 + $0x60] sm:$0xff] }
0x1acb   :  { %3889 = vrot.lane.b32.xlu0 %v3884_v43, %s6668_s18  ;;  %v8630_v43 = vld [vmem:[%s8003_s4 + $0x58] sm:$0xff] }
0x1b39   :  { %v8563_v33 = vpop.permute.xlu1 %3887 }
0x1b3a   :  { %5632 = vmatmul.mubr.msk.f32.vlgmr.msra.gmra.mxu1 %vm533_vm3, %v8563_v33 }
0x1b3b   :  { %3965 = vmatprep.mubr.f32.mxu1 %v9188_v56  ;;  %4182 = vmatpush1.msra.mxu1 %v8030_v13  ;;  %v8589_v13 = vld [vmem:[%s8003_s4 + $0x78] sm:$0xff] }
0x1b3c   :  { %4183 = vmatprep.subr.mxu1 %v8043_v17 }
0x1b3d   :  { %v8570_v0 = vpop.permute.xlu0 %3889  ;;  %4184 = vmatpush1.msra.mxu1 %v8050_v22 }
0x1b3e   :  { %5633 = vmatmul.mubr.msk.f32.gmra.mxu1 %vm533_vm3, %v8570_v0  ;;  %4185 = vmatprep.subr.mxu1 %v8057_v50 }
0x1b3f   :  { %4186 = vmatpush1.msra.mxu1 %v8068_v10  ;;  %4229 = vmatprep.mubr.f32.mxu1 %v9188_v56 }
0x1b40   :  { %4187 = vmatprep.subr.mxu1 %v8074_v1 }
0x1b41   :  { %4188 = vmatpush1.msra.mxu1 %v8079_v57 }
0x1b42   :  { %4189 = vmatprep.subr.mxu1 %v8089_v53 }
0x1b43   :  { %4190 = vmatpush1.msra.mxu1 %v8095_v34 }
0x1b44   :  { %4191 = vmatprep.subr.mxu1 %v8102_v12 }
0x1b45   :  { %4192 = vmatpush1.msra.mxu1 %v8107_v23 }
0x1b46   :  { %4193 = vmatprep.subr.mxu1 %v8117_v36 }
0x1b47   :  { %4194 = vmatpush1.msra.mxu1 %v8123_v14 }
0x1b48   :  { %4195 = vmatprep.subr.mxu1 %v8129_v30 }
0x1b49   :  { %4196 = vmatpush1.msra.mxu1 %v8134_v26 }
0x1b4a   :  { %4451 = vmatprep.subr.mxu1 %v8589_v13 }
0x1bfa   :  { %v3961_v17 = vpop.f32.mrf.mxu1 }
0x1bfb   :  { %v3972_v22 = vadd.f32 %v3961_v17, %v8374_v9  ;;  %v8634_v17 = vld [vmem:[%s8003_s4 + $0x50] sm:$0xff] }
0x1bfc   :  { %v3963_v50 = vpop.f32.mrf.mxu1 }
0x1bfd   :  { %v5634_v10 = vmul.f32 -1.442695, %v3972_v22  ;;  %v3973_v24 = vadd.f32 %v3963_v50, %v8384_v18  ;;  %v8639_v22 = vld [vmem:[%s8003_s4 + $0x48] sm:$0xff]  ;;  %v8643_v50 = vld [vmem:[%s8003_s4 + $0x40] sm:$0xff] }
0x1bfe   :  { %v3967_v1 = vpop.f32.mrf.mxu1 }
0x1bff   :  { %6469 = vpow2.f32 %v5634_v10  ;;  %v3974_v57 = vadd.f32 %v3967_v1, %v8394_v60  ;;  %v5636_v18 = vmul.f32 -1.442695, %v3973_v24 }
0x1c00   :  { %v3969_v21 = vpop.f32.mrf.mxu1 }
0x1c01   :  { %v5635_v61 = vmul.f32 -1.442695, %v3974_v57  ;;  %v3975_v52 = vadd.f32 %v3969_v21, %v8404_v7 }
0x1c03   :  { %6471 = vpow2.f32 %v5635_v61  ;;  %v5637_v20 = vmul.f32 -1.442695, %v3975_v52 }
0x1c04   :  { %6473 = vtanh.f32 %v3973_v24 }
0x1c0c   :  { %v6470_v49 = vpop.eup %6469 }
0x1c0d   :  { %v3982_v55 = vadd.f32 1.0, %v6470_v49 }
0x1c0f   :  { %6475 = vrcp.f32 %v3982_v55 }
0x1c10   :  { %v6472_v38 = vpop.eup %6471  ;;  %6477 = vtanh.f32 %v3975_v52 }
0x1c11   :  { %v3983_v46 = vadd.f32 1.0, %v6472_v38  ;;  %v6474_v9 = vpop.eup %6473 }
0x1c13   :  { %6479 = vrcp.f32 %v3983_v46 }
0x1c14   :  { %6481 = vpow2.f32 %v5636_v18 }
0x1c15   :  { %6483 = vpow2.f32 %v5637_v20 }
0x1c1c   :  { %v6476_v6 = vpop.eup %6475 }
0x1c1d   :  { %v4004_v58 = vmul.f32 %v6476_v6, %v6474_v9  ;;  %v6478_v48 = vpop.eup %6477  ;;  %v4002_v51 = vmul.f32 %v6476_v6, %v8554_v32 }
0x1c1f   :  { %4008 = vrot.lane.b32.xlu1 %v4004_v58, %s6668_s18 }
0x1c20   :  { %v6480_v60 = vpop.eup %6479 }
0x1c21   :  { %v4005_v54 = vmul.f32 %v6480_v60, %v6478_v48  ;;  %v6482_v7 = vpop.eup %6481  ;;  %v4003_v27 = vmul.f32 %v6480_v60, %v8558_v62 }
0x1c22   :  { %v3996_v3 = vadd.f32 1.0, %v6482_v7  ;;  %v6484_v44 = vpop.eup %6483 }
0x1c23   :  { %4010 = vrot.lane.b32.xlu0 %v4005_v54, %s6668_s18  ;;  %v3997_v41 = vadd.f32 1.0, %v6484_v44 }
0x1c24   :  { %6485 = vrcp.f32 %v3996_v3 }
0x1c31   :  { %v6486_v2 = vpop.eup %6485 }
0x1c91   :  { %v4009_v19 = vpop.permute.xlu1 %4008 }
0x1c92   :  { %v8599_v40 = vadd.f32 %v4009_v19, %v4002_v51 }
0x1c94   :  { %6487 = vtanh.f32 %v8599_v40 }
0x1c95   :  { %v4011_v42 = vpop.permute.xlu0 %4010  ;;  %6489 = vrcp.f32 %v3997_v41 }
0x1c96   :  { %v8603_v29 = vadd.f32 %v4011_v42, %v4003_v27  ;;  %v8689_v42 = vld [vmem:[%s8003_s4 + $0x38] sm:$0xff] }
0x1c98   :  { %6491 = vtanh.f32 %v8603_v29 }
0x1ca1   :  { %v6488_v32 = vpop.eup %6487 }
0x1ca2   :  { %v4018_v8 = vmul.f32 %v6488_v32, %v6486_v2  ;;  %v6490_v35 = vpop.eup %6489  ;;  %v8697_v2 = vld [vmem:[%s8003_s4 + $0x28] sm:$0xff]  ;;  %v8701_v32 = vld [vmem:[%s8003_s4 + $0x20] sm:$0xff] }
0x1ca4   :  { %4022 = vrot.lane.b32.xlu1 %v4018_v8, %s6668_s18  ;;  %v8705_v8 = vld [vmem:[%s8003_s4 + $0x18] sm:$0xff] }
0x1ca5   :  { %v6492_v16 = vpop.eup %6491 }
0x1ca6   :  { %v4019_v31 = vmul.f32 %v6492_v16, %v6490_v35  ;;  %v8709_v35 = vld [vmem:[%s8003_s4 + $0x10] sm:$0xff]  ;;  %v8713_v16 = vld [vmem:[%s8003_s4 + $0x8] sm:$0xff] }
0x1ca8   :  { %4024 = vrot.lane.b32.xlu0 %v4019_v31, %s6668_s18  ;;  %v8717_v31 = vld [vmem:[%s8003_s4] sm:$0xff] }
0x1d16   :  { %v8608_v62 = vpop.permute.xlu1 %4022 }
0x1d17   :  { %5638 = vmatmul.mubr.msk.f32.vlgmr.msra.gmra.mxu0 %vm533_vm3, %v8608_v62 }
0x1d18   :  { %4100 = vmatprep.mubr.f32.mxu0 %v9188_v56  ;;  %4317 = vmatpush1.msra.mxu0 %v8614_v11 }
0x1d19   :  { %4318 = vmatprep.subr.mxu0 %v8618_v39 }
0x1d1a   :  { %v8621_v4 = vpop.permute.xlu0 %4024  ;;  %4319 = vmatpush1.msra.mxu0 %v8624_v45 }
0x1d1b   :  { %5639 = vmatmul.mubr.msk.f32.gmra.mxu0 %vm533_vm3, %v8621_v4  ;;  %4320 = vmatprep.subr.mxu0 %v8630_v43 }
0x1d1c   :  { %4321 = vmatpush1.msra.mxu0 %v8634_v17  ;;  %4364 = vmatprep.mubr.f32.mxu0 %v9188_v56 }
0x1d1d   :  { %4322 = vmatprep.subr.mxu0 %v8639_v22 }
0x1d1e   :  { %4323 = vmatpush1.msra.mxu0 %v8643_v50 }
0x1d1f   :  { %4324 = vmatprep.subr.mxu0 %v8089_v53 }
0x1d20   :  { %4325 = vmatpush1.msra.mxu0 %v8095_v34 }
0x1d21   :  { %4326 = vmatprep.subr.mxu0 %v8102_v12 }
0x1d22   :  { %4327 = vmatpush1.msra.mxu0 %v8107_v23 }
0x1d23   :  { %4328 = vmatprep.subr.mxu0 %v8117_v36 }
0x1d24   :  { %4329 = vmatpush1.msra.mxu0 %v8123_v14 }
0x1d25   :  { %4330 = vmatprep.subr.mxu0 %v8129_v30 }
0x1d26   :  { %4331 = vmatpush1.msra.mxu0 %v8134_v26 }
0x1d27   :  { %4586 = vmatprep.subr.mxu0 %v8589_v13 }
0x1dd7   :  { %v4096_v10 = vpop.f32.mrf.mxu0 }
0x1dd8   :  { %v4107_v1 = vadd.f32 %v4096_v10, %v8334_v5 }
0x1dd9   :  { %v4098_v53 = vpop.f32.mrf.mxu0 }
0x1dda   :  { %v5640_v57 = vmul.f32 -1.442695, %v4107_v1  ;;  %v4108_v36 = vadd.f32 %v4098_v53, %v8344_v28 }
0x1ddb   :  { %v4102_v34 = vpop.f32.mrf.mxu0 }
0x1ddc   :  { %6493 = vpow2.f32 %v5640_v57  ;;  %v4109_v12 = vadd.f32 %v4102_v34, %v8354_v15  ;;  %v5642_v28 = vmul.f32 -1.442695, %v4108_v36 }
0x1ddd   :  { %v4104_v14 = vpop.f32.mrf.mxu0 }
0x1dde   :  { %v5641_v23 = vmul.f32 -1.442695, %v4109_v12  ;;  %v4110_v26 = vadd.f32 %v4104_v14, %v8364_v63 }
0x1de0   :  { %6495 = vpow2.f32 %v5641_v23  ;;  %v5643_v38 = vmul.f32 -1.442695, %v4110_v26 }
0x1de1   :  { %6497 = vtanh.f32 %v4108_v36  ;;  %v9224_v36 = vld [vmem:[#allocation19_spill] sm:$0xff] }
0x1de9   :  { %v6494_v61 = vpop.eup %6493 }
0x1dea   :  { %v4117_v30 = vadd.f32 1.0, %v6494_v61 }
0x1dec   :  { %6499 = vrcp.f32 %v4117_v30 }
0x1ded   :  { %v6496_v13 = vpop.eup %6495  ;;  %6501 = vtanh.f32 %v4110_v26 }
0x1dee   :  { %v4118_v24 = vadd.f32 1.0, %v6496_v13  ;;  %v6498_v5 = vpop.eup %6497  ;;  %v9225_v13 = vld [vmem:[#allocation20_spill] sm:$0xff] }
0x1df0   :  { %6503 = vrcp.f32 %v4118_v24 }
0x1df1   :  { %6505 = vpow2.f32 %v5642_v28 }
0x1df2   :  { %6507 = vpow2.f32 %v5643_v38 }
0x1df9   :  { %v6500_v21 = vpop.eup %6499 }
0x1dfa   :  { %v4139_v49 = vmul.f32 %v6500_v21, %v6498_v5  ;;  %v6502_v55 = vpop.eup %6501  ;;  %v4137_v6 = vmul.f32 %v6500_v21, %v8599_v40 }
0x1dfc   :  { %4143 = vrot.lane.b32.xlu1 %v4139_v49, %s6668_s18 }
0x1dfd   :  { %v6504_v15 = vpop.eup %6503 }
0x1dfe   :  { %v4140_v52 = vmul.f32 %v6504_v15, %v6502_v55  ;;  %v6506_v63 = vpop.eup %6505  ;;  %v4138_v54 = vmul.f32 %v6504_v15, %v8603_v29  ;;  %v8693_v29 = vld [vmem:[%s8003_s4 + $0x30] sm:$0xff]  ;;  %s6694_s4 = smov 13  }
0x1dff   :  { %v4131_v46 = vadd.f32 1.0, %v6506_v63  ;;  %v6508_v9 = vpop.eup %6507  ;;  %s8853_s7 = sld [smem:[%s9153_s0 + %s6694_s4]]  }
0x1e00   :  { %4145 = vrot.lane.b32.xlu0 %v4140_v52, %s6668_s18  ;;  %v4132_v60 = vadd.f32 1.0, %v6508_v9 }
0x1e01   :  { %6509 = vrcp.f32 %v4131_v46 }
0x1e0e   :  { %v6510_v7 = vpop.eup %6509 }
0x1e6e   :  { %v4144_v58 = vpop.permute.xlu1 %4143 }
0x1e6f   :  { %v8662_v48 = vadd.f32 %v4144_v58, %v4137_v6 }
0x1e71   :  { %6511 = vtanh.f32 %v8662_v48 }
0x1e72   :  { %v4146_v18 = vpop.permute.xlu0 %4145  ;;  %6513 = vrcp.f32 %v4132_v60 }
0x1e73   :  { %v8666_v20 = vadd.f32 %v4146_v18, %v4138_v54 }
0x1e75   :  { %6515 = vtanh.f32 %v8666_v20 }
0x1e7e   :  { %v6512_v3 = vpop.eup %6511 }
0x1e7f   :  { %v4153_v44 = vmul.f32 %v6512_v3, %v6510_v7  ;;  %v6514_v51 = vpop.eup %6513 }
0x1e81   :  { %4157 = vrot.lane.b32.xlu1 %v4153_v44, %s6668_s18 }
0x1e82   :  { %v6516_v19 = vpop.eup %6515 }
0x1e83   :  { %v4154_v40 = vmul.f32 %v6516_v19, %v6514_v51 }
0x1e85   :  { %4159 = vrot.lane.b32.xlu0 %v4154_v40, %s6668_s18 }
0x1ef3   :  { %v8671_v41 = vpop.permute.xlu1 %4157 }
0x1ef4   :  { %5644 = vmatmul.mubr.msk.f32.vlgmr.msra.gmra.mxu1 %vm533_vm3, %v8671_v41 }
0x1ef5   :  { %4235 = vmatprep.mubr.f32.mxu1 %v9188_v56  ;;  %4452 = vmatpush1.msra.mxu1 %v8614_v11 }
0x1ef6   :  { %4453 = vmatprep.subr.mxu1 %v8618_v39 }
0x1ef7   :  { %v8678_v27 = vpop.permute.xlu0 %4159  ;;  %4454 = vmatpush1.msra.mxu1 %v8624_v45 }
0x1ef8   :  { %5645 = vmatmul.mubr.msk.f32.gmra.mxu1 %vm533_vm3, %v8678_v27  ;;  %4455 = vmatprep.subr.mxu1 %v8630_v43 }
0x1ef9   :  { %4456 = vmatpush1.msra.mxu1 %v8634_v17  ;;  %4499 = vmatprep.mubr.f32.mxu1 %v9188_v56 }
0x1efa   :  { %4457 = vmatprep.subr.mxu1 %v8639_v22 }
0x1efb   :  { %4458 = vmatpush1.msra.mxu1 %v8643_v50 }
0x1efc   :  { %4459 = vmatprep.subr.mxu1 %v8689_v42 }
0x1efd   :  { %4460 = vmatpush1.msra.mxu1 %v8693_v29 }
0x1efe   :  { %4461 = vmatprep.subr.mxu1 %v8697_v2 }
0x1eff   :  { %4462 = vmatpush1.msra.mxu1 %v8701_v32 }
0x1f00   :  { %4463 = vmatprep.subr.mxu1 %v8705_v8 }
0x1f01   :  { %4464 = vmatpush1.msra.mxu1 %v8709_v35 }
0x1f02   :  { %4465 = vmatprep.subr.mxu1 %v8713_v16 }
0x1f03   :  { %4466 = vmatpush1.msra.mxu1 %v8717_v31 }
0x1fb4   :  { %v4231_v10 = vpop.f32.mrf.mxu1 }
0x1fb5   :  { %v4242_v1 = vadd.f32 %v4231_v10, %v8337_v37 }
0x1fb6   :  { %v4233_v53 = vpop.f32.mrf.mxu1 }
0x1fb7   :  { %v5646_v57 = vmul.f32 -1.442695, %v4242_v1  ;;  %v4243_v14 = vadd.f32 %v4233_v53, %v9224_v36 }
0x1fb8   :  { %v4237_v34 = vpop.f32.mrf.mxu1 }
0x1fb9   :  { %6517 = vpow2.f32 %v5646_v57  ;;  %v4244_v12 = vadd.f32 %v4237_v34, %v8357_v59  ;;  %v5648_v28 = vmul.f32 -1.442695, %v4243_v14 }
0x1fba   :  { %v4239_v61 = vpop.f32.mrf.mxu1 }
0x1fbb   :  { %v5647_v23 = vmul.f32 -1.442695, %v4244_v12  ;;  %v4245_v24 = vadd.f32 %v4239_v61, %v9225_v13 }
0x1fbd   :  { %6519 = vpow2.f32 %v5647_v23  ;;  %v5649_v38 = vmul.f32 -1.442695, %v4245_v24 }
0x1fbe   :  { %6521 = vtanh.f32 %v4243_v14 }
0x1fc6   :  { %v6518_v30 = vpop.eup %6517 }
0x1fc7   :  { %v4252_v26 = vadd.f32 1.0, %v6518_v30 }
0x1fc9   :  { %6523 = vrcp.f32 %v4252_v26 }
0x1fca   :  { %v6520_v5 = vpop.eup %6519  ;;  %6525 = vtanh.f32 %v4245_v24 }
0x1fcb   :  { %v4253_v21 = vadd.f32 1.0, %v6520_v5  ;;  %v6522_v37 = vpop.eup %6521 }
0x1fcd   :  { %6527 = vrcp.f32 %v4253_v21 }
0x1fce   :  { %6529 = vpow2.f32 %v5648_v28 }
0x1fcf   :  { %6531 = vpow2.f32 %v5649_v38 }
0x1fd6   :  { %v6524_v49 = vpop.eup %6523 }
0x1fd7   :  { %v4274_v55 = vmul.f32 %v6524_v49, %v6522_v37  ;;  %v6526_v15 = vpop.eup %6525  ;;  %v4272_v6 = vmul.f32 %v6524_v49, %v8662_v48 }
0x1fd9   :  { %4278 = vrot.lane.b32.xlu1 %v4274_v55, %s6668_s18 }
0x1fda   :  { %v6528_v59 = vpop.eup %6527 }
0x1fdb   :  { %v4275_v52 = vmul.f32 %v6528_v59, %v6526_v15  ;;  %v6530_v63 = vpop.eup %6529  ;;  %v4273_v18 = vmul.f32 %v6528_v59, %v8666_v20 }
0x1fdc   :  { %v4266_v46 = vadd.f32 1.0, %v6530_v63  ;;  %v6532_v9 = vpop.eup %6531 }
0x1fdd   :  { %4280 = vrot.lane.b32.xlu0 %v4275_v52, %s6668_s18  ;;  %v4267_v54 = vadd.f32 1.0, %v6532_v9 }
0x1fde   :  { %6533 = vrcp.f32 %v4266_v46 }
0x1feb   :  { %v6534_v44 = vpop.eup %6533 }
0x204b   :  { %v4279_v58 = vpop.permute.xlu1 %4278 }
0x204c   :  { %v8727_v60 = vadd.f32 %v4279_v58, %v4272_v6 }
0x204e   :  { %6535 = vtanh.f32 %v8727_v60 }
0x204f   :  { %v4281_v7 = vpop.permute.xlu0 %4280  ;;  %6537 = vrcp.f32 %v4267_v54 }
0x2050   :  { %v8731_v3 = vadd.f32 %v4281_v7, %v4273_v18  ;;  %v9230_v7 = vld [vmem:[#allocation25_spill] sm:$0xff] }
0x2052   :  { %6539 = vtanh.f32 %v8731_v3 }
0x205b   :  { %v6536_v51 = vpop.eup %6535 }
0x205c   :  { %v4288_v19 = vmul.f32 %v6536_v51, %v6534_v44  ;;  %v6538_v40 = vpop.eup %6537 }
0x205e   :  { %4292 = vrot.lane.b32.xlu1 %v4288_v19, %s6668_s18 }
0x205f   :  { %v6540_v48 = vpop.eup %6539 }
0x2060   :  { %v4289_v10 = vmul.f32 %v6540_v48, %v6538_v40  ;;  %v9231_v40 = vld [vmem:[#allocation27_spill] sm:$0xff] }
0x2062   :  { %4294 = vrot.lane.b32.xlu0 %v4289_v10, %s6668_s18 }
0x20d0   :  { %v8736_v1 = vpop.permute.xlu1 %4292 }
0x20d1   :  { %5650 = vmatmul.mubr.msk.f32.vlgmr.msra.gmra.mxu0 %vm533_vm3, %v8736_v1 }
0x20d2   :  { %4370 = vmatprep.mubr.f32.mxu0 %v9188_v56  ;;  %4587 = vmatpush1.msra.mxu0 %v8614_v11 }
0x20d3   :  { %4588 = vmatprep.subr.mxu0 %v8618_v39  ;;  %v9226_v39 = vld [vmem:[#allocation21_spill] sm:$0xff] }
0x20d4   :  { %v8743_v20 = vpop.permute.xlu0 %4294  ;;  %4589 = vmatpush1.msra.mxu0 %v8624_v45 }
0x20d5   :  { %5651 = vmatmul.mubr.msk.f32.gmra.mxu0 %vm533_vm3, %v8743_v20  ;;  %4590 = vmatprep.subr.mxu0 %v8630_v43 }
0x20d6   :  { %4591 = vmatpush1.msra.mxu0 %v8634_v17  ;;  %4634 = vmatprep.mubr.f32.mxu0 %v9188_v56 }
0x20d7   :  { %4592 = vmatprep.subr.mxu0 %v8639_v22 }
0x20d8   :  { %4593 = vmatpush1.msra.mxu0 %v8643_v50  ;;  %v9227_v50 = vld [vmem:[#allocation23_spill] sm:$0xff] }
0x20d9   :  { %4594 = vmatprep.subr.mxu0 %v8689_v42 }
0x20da   :  { %4595 = vmatpush1.msra.mxu0 %v8693_v29 }
0x20db   :  { %4596 = vmatprep.subr.mxu0 %v8697_v2  ;;  %v9228_v2 = vld [vmem:[#allocation22_spill] sm:$0xff] }
0x20dc   :  { %4597 = vmatpush1.msra.mxu0 %v8701_v32 }
0x20dd   :  { %4598 = vmatprep.subr.mxu0 %v8705_v8 }
0x20de   :  { %4599 = vmatpush1.msra.mxu0 %v8709_v35 }
0x20df   :  { %4600 = vmatprep.subr.mxu0 %v8713_v16  ;;  %v9229_v16 = vld [vmem:[#allocation24_spill] sm:$0xff] }
0x20e0   :  { %4601 = vmatpush1.msra.mxu0 %v8717_v31 }
0x2191   :  { %v4366_v11 = vpop.f32.mrf.mxu0 }
0x2192   :  { %v4377_v45 = vadd.f32 %v4366_v11, %v9226_v39  ;;  %v9232_v11 = vld [vmem:[#allocation26_spill] sm:$0xff] }
0x2193   :  { %v4368_v43 = vpop.f32.mrf.mxu0 }
0x2194   :  { %v5652_v17 = vmul.f32 -1.442695, %v4377_v45  ;;  %v4378_v32 = vadd.f32 %v4368_v43, %v9228_v2 }
0x2195   :  { %v4372_v22 = vpop.f32.mrf.mxu0 }
0x2196   :  { %6541 = vpow2.f32 %v5652_v17  ;;  %v4379_v42 = vadd.f32 %v4372_v22, %v9227_v50  ;;  %v5654_v26 = vmul.f32 -1.442695, %v4378_v32  ;;  %v9233_v22 = vld [vmem:[#allocation28_spill] sm:$0xff] }
0x2197   :  { %v4374_v8 = vpop.f32.mrf.mxu0 }
0x2198   :  { %v5653_v29 = vmul.f32 -1.442695, %v4379_v42  ;;  %v4380_v57 = vadd.f32 %v4374_v8, %v9229_v16 }
0x219a   :  { %6543 = vpow2.f32 %v5653_v29  ;;  %v5655_v13 = vmul.f32 -1.442695, %v4380_v57 }
0x219b   :  { %6545 = vtanh.f32 %v4378_v32 }
0x21a3   :  { %v6542_v53 = vpop.eup %6541 }
0x21a4   :  { %v4387_v35 = vadd.f32 1.0, %v6542_v53 }
0x21a6   :  { %6547 = vrcp.f32 %v4387_v35 }
0x21a7   :  { %v6544_v31 = vpop.eup %6543  ;;  %6549 = vtanh.f32 %v4380_v57  ;;  %v3319_v57 = vld [vmem:[%s8789_s3 + $0x38] sm:$0xff] }
0x21a8   :  { %v4388_v34 = vadd.f32 1.0, %v6544_v31  ;;  %v6546_v12 = vpop.eup %6545  ;;  %6054 = vmatprep.subr.mxu0 %v3319_v57 }
0x21aa   :  { %6551 = vrcp.f32 %v4388_v34 }
0x21ab   :  { %6553 = vpow2.f32 %v5654_v26 }
0x21ac   :  { %6555 = vpow2.f32 %v5655_v13 }
0x21b3   :  { %v6548_v23 = vpop.eup %6547 }
0x21b4   :  { %v4409_v36 = vmul.f32 %v6548_v23, %v6546_v12  ;;  %v6550_v14 = vpop.eup %6549  ;;  %v4407_v37 = vmul.f32 %v6548_v23, %v8727_v60 }
0x21b6   :  { %4413 = vrot.lane.b32.xlu1 %v4409_v36, %s6668_s18 }
0x21b7   :  { %v6552_v61 = vpop.eup %6551 }
0x21b8   :  { %v4410_v30 = vmul.f32 %v6552_v61, %v6550_v14  ;;  %v6554_v24 = vpop.eup %6553  ;;  %v4408_v59 = vmul.f32 %v6552_v61, %v8731_v3 }
0x21b9   :  { %v4401_v5 = vadd.f32 1.0, %v6554_v24  ;;  %v6556_v21 = vpop.eup %6555 }
0x21ba   :  { %4415 = vrot.lane.b32.xlu0 %v4410_v30, %s6668_s18  ;;  %v4402_v15 = vadd.f32 1.0, %v6556_v21 }
0x21bb   :  { %6557 = vrcp.f32 %v4401_v5 }
0x21c8   :  { %v6558_v38 = vpop.eup %6557 }
0x2228   :  { %v4414_v49 = vpop.permute.xlu1 %4413 }
0x2229   :  { %v4419_v55 = vadd.f32 %v4414_v49, %v4407_v37 }
0x222b   :  { %6559 = vtanh.f32 %v4419_v55 }
0x222c   :  { %v4416_v52 = vpop.permute.xlu0 %4415  ;;  %6561 = vrcp.f32 %v4402_v15 }
0x222d   :  { %v4420_v28 = vadd.f32 %v4416_v52, %v4408_v59 }
0x222f   :  { %6563 = vtanh.f32 %v4420_v28 }
0x2238   :  { %v6560_v63 = vpop.eup %6559 }
0x2239   :  { %v4423_v46 = vmul.f32 %v6560_v63, %v6558_v38  ;;  %v6562_v9 = vpop.eup %6561  ;;  %v3317_v38 = vld [vmem:[%s8789_s3 + $0x28] sm:$0xff] }
0x223b   :  { %4427 = vrot.lane.b32.xlu1 %v4423_v46, %s6668_s18  ;;  %v3316_v46 = vld [vmem:[%s8789_s3 + $0x20] sm:$0xff] }
0x223c   :  { %v6564_v6 = vpop.eup %6563 }
0x223d   :  { %v4424_v58 = vmul.f32 %v6564_v6, %v6562_v9  ;;  %v3315_v9 = vld [vmem:[%s8789_s3 + $0x18] sm:$0xff]  ;;  %v3313_v6 = vld [vmem:[%s8789_s3 + $0x8] sm:$0xff] }
0x223f   :  { %4429 = vrot.lane.b32.xlu0 %v4424_v58, %s6668_s18  ;;  %v3312_v58 = vld [vmem:[%s8789_s3] sm:$0xff] }
0x22ad   :  { %v8771_v60 = vpop.permute.xlu1 %4427 }
0x22ae   :  { %5656 = vmatmul.mubr.msk.f32.vlgmr.msra.gmra.mxu1 %vm533_vm3, %v8771_v60 }
0x22af   :  { %4505 = vmatprep.mubr.f32.mxu1 %v9188_v56 }
0x22b1   :  { %v8776_v54 = vpop.permute.xlu0 %4429 }
0x22b2   :  { %5657 = vmatmul.mubr.msk.f32.gmra.mxu1 %vm533_vm3, %v8776_v54 }
0x236e   :  { %v4501_v18 = vpop.f32.mrf.mxu1 }
0x236f   :  { %v4512_v3 = vadd.f32 %v4501_v18, %v9230_v7  ;;  %v9234_v7 = vld [vmem:[#allocation29_spill] sm:$0xff] }
0x2370   :  { %v4503_v44 = vpop.f32.mrf.mxu1 }
0x2371   :  { %v5658_v51 = vmul.f32 -1.442695, %v4512_v3  ;;  %v4513_v39 = vadd.f32 %v4503_v44, %v9232_v11  ;;  %v9236_v11 = vld [vmem:[#allocation30_spill] sm:$0xff] }
0x2372   :  { %v4507_v19 = vpop.f32.mrf.mxu1 }
0x2373   :  { %6565 = vpow2.f32 %v5658_v51  ;;  %v4514_v48 = vadd.f32 %v4507_v19, %v9231_v40  ;;  %v5660_v31 = vmul.f32 -1.442695, %v4513_v39  ;;  %v9235_v40 = vld [vmem:[#allocation31_spill] sm:$0xff] }
0x2374   :  { %v4509_v45 = vpop.f32.mrf.mxu1 }
0x2375   :  { %v5659_v10 = vmul.f32 -1.442695, %v4514_v48  ;;  %v4515_v50 = vadd.f32 %v4509_v45, %v9233_v22  ;;  %v9237_v22 = vld [vmem:[#allocation32_spill] sm:$0xff] }
0x2377   :  { %6567 = vpow2.f32 %v5659_v10  ;;  %v5661_v34 = vmul.f32 -1.442695, %v4515_v50 }
0x2378   :  { %6569 = vtanh.f32 %v4513_v39 }
0x2380   :  { %v6566_v43 = vpop.eup %6565 }
0x2381   :  { %v4522_v17 = vadd.f32 1.0, %v6566_v43 }
0x2383   :  { %6571 = vrcp.f32 %v4522_v17 }
0x2384   :  { %v6568_v42 = vpop.eup %6567  ;;  %6573 = vtanh.f32 %v4515_v50 }
0x2385   :  { %v4523_v29 = vadd.f32 1.0, %v6568_v42  ;;  %v6570_v2 = vpop.eup %6569 }
0x2387   :  { %6575 = vrcp.f32 %v4523_v29 }
0x2388   :  { %6577 = vpow2.f32 %v5660_v31  ;;  %v3326_v31 = vld [vmem:[%s8853_s7 + $0x30] sm:$0xff] }
0x2389   :  { %6579 = vpow2.f32 %v5661_v34  ;;  %v3325_v34 = vld [vmem:[%s8853_s7 + $0x28] sm:$0xff] }
0x2390   :  { %v6572_v32 = vpop.eup %6571 }
0x2391   :  { %v4544_v8 = vmul.f32 %v6572_v32, %v6570_v2  ;;  %v6574_v53 = vpop.eup %6573  ;;  %v4542_v14 = vmul.f32 %v6572_v32, %v4419_v55 }
0x2393   :  { %4548 = vrot.lane.b32.xlu1 %v4544_v8, %s6668_s18 }
0x2394   :  { %v6576_v35 = vpop.eup %6575 }
0x2395   :  { %v4545_v16 = vmul.f32 %v6576_v35, %v6574_v53  ;;  %v6578_v12 = vpop.eup %6577  ;;  %v4543_v13 = vmul.f32 %v6576_v35, %v4420_v28  ;;  %v3318_v28 = vld [vmem:[%s8789_s3 + $0x30] sm:$0xff] }
0x2396   :  { %v4536_v23 = vadd.f32 1.0, %v6578_v12  ;;  %v6580_v36 = vpop.eup %6579  ;;  %v3324_v12 = vld [vmem:[%s8853_s7 + $0x20] sm:$0xff] }
0x2397   :  { %4550 = vrot.lane.b32.xlu0 %v4545_v16, %s6668_s18  ;;  %v4537_v26 = vadd.f32 1.0, %v6580_v36  ;;  %v3322_v36 = vld [vmem:[%s8853_s7 + $0x10] sm:$0xff] }
0x2398   :  { %6581 = vrcp.f32 %v4536_v23  ;;  %v3323_v23 = vld [vmem:[%s8853_s7 + $0x18] sm:$0xff] }
0x23a5   :  { %v6582_v21 = vpop.eup %6581 }
0x2405   :  { %v4549_v61 = vpop.permute.xlu1 %4548 }
0x2406   :  { %v8792_v30 = vadd.f32 %v4549_v61, %v4542_v14 }
0x2408   :  { %6583 = vtanh.f32 %v8792_v30 }
0x2409   :  { %v4551_v24 = vpop.permute.xlu0 %4550  ;;  %6585 = vrcp.f32 %v4537_v26 }
0x240a   :  { %v8795_v5 = vadd.f32 %v4551_v24, %v4543_v13 }
0x240c   :  { %6587 = vtanh.f32 %v8795_v5 }
0x2415   :  { %v6584_v37 = vpop.eup %6583 }
0x2416   :  { %v4558_v49 = vmul.f32 %v6584_v37, %v6582_v21  ;;  %v6586_v55 = vpop.eup %6585 }
0x2418   :  { %4562 = vrot.lane.b32.xlu1 %v4558_v49, %s6668_s18 }
0x2419   :  { %v6588_v15 = vpop.eup %6587 }
0x241a   :  { %v4559_v59 = vmul.f32 %v6588_v15, %v6586_v55 }
0x241c   :  { %4564 = vrot.lane.b32.xlu0 %v4559_v59, %s6668_s18 }
0x248a   :  { %v8800_v52 = vpop.permute.xlu1 %4562 }
0x248b   :  { %5662 = vmatmul.mubr.msk.f32.vlgmr.msra.gmra.mxu0 %vm533_vm3, %v8800_v52 }
0x248c   :  { %6055 = vmatpush3.msra.mxu0 %v3319_v57  ;;  %4640 = vmatprep.mubr.f32.mxu0 %v9188_v56  ;;  %v3314_v56 = vld [vmem:[%s8789_s3 + $0x10] sm:$0xff]  ;;  %v3327_v57 = vld [vmem:[%s8853_s7 + $0x38] sm:$0xff]  ;;  %s6704_s3 = smov 35  }
0x248d   :  { %6056 = vmatprep.subr.mxu0 %v3318_v28  ;;  %6014 = vmatprep.subr.mxu1 %v3327_v57  ;;  %s5463_s6 = sld [smem:[%s9153_s0 + %s6704_s3]]  }
0x248e   :  { %6057 = vmatpush3.msra.mxu0 %v3318_v28  ;;  %v8807_v63 = vpop.permute.xlu0 %4564  ;;  %6015 = vmatpush3.msra.mxu1 %v3327_v57 }
0x248f   :  { %6058 = vmatprep.subr.mxu0 %v3317_v38  ;;  %5663 = vmatmul.mubr.msk.f32.gmra.mxu0 %vm533_vm3, %v8807_v63 }
0x2490   :  { %6059 = vmatpush3.msra.mxu0 %v3317_v38  ;;  %6070 = vmatprep.mubr.msk.f32.mxu0 %vm533_vm3, %v8521_v25  ;;  %v3321_v38 = vld [vmem:[%s8853_s7 + $0x8] sm:$0xff] }
0x2491   :  { %6060 = vmatprep.subr.mxu0 %v3316_v46  ;;  %6016 = vmatprep.subr.mxu1 %v3326_v31 }
0x2492   :  { %6061 = vmatpush3.msra.mxu0 %v3316_v46  ;;  %6017 = vmatpush3.msra.mxu1 %v3326_v31  ;;  %v3320_v46 = vld [vmem:[%s8853_s7] sm:$0xff]  ;;  %s6705_s7 = smov 36  }
0x2493   :  { %6062 = vmatprep.subr.mxu0 %v3315_v9  ;;  %6018 = vmatprep.subr.mxu1 %v3325_v34  ;;  %s5464_s11 = sld [smem:[%s9153_s0 + %s6705_s7]]  }
0x2494   :  { %6063 = vmatpush3.msra.mxu0 %v3315_v9  ;;  %6019 = vmatpush3.msra.mxu1 %v3325_v34 }
0x2495   :  { %6064 = vmatprep.subr.mxu0 %v3314_v56  ;;  %6020 = vmatprep.subr.mxu1 %v3324_v12 }
0x2496   :  { %6065 = vmatpush3.msra.mxu0 %v3314_v56  ;;  %6021 = vmatpush3.msra.mxu1 %v3324_v12 }
0x2497   :  { %6066 = vmatprep.subr.mxu0 %v3313_v6  ;;  %6022 = vmatprep.subr.mxu1 %v3323_v23 }
0x2498   :  { %6067 = vmatpush3.msra.mxu0 %v3313_v6  ;;  %6023 = vmatpush3.msra.mxu1 %v3323_v23 }
0x2499   :  { %6068 = vmatprep.subr.mxu0 %v3312_v58  ;;  %6024 = vmatprep.subr.mxu1 %v3322_v36 }
0x249a   :  { %6069 = vmatpush3.msra.mxu0 %v3312_v58  ;;  %6025 = vmatpush3.msra.mxu1 %v3322_v36 }
0x249b   :  { %6071 = vmatmul.mubr.msk.f32.vlgmr.msra.gmra.mxu0 %vm533_vm3, %v8528_v47  ;;  %6026 = vmatprep.subr.mxu1 %v3321_v38 }
0x249c   :  { %6073 = vmatprep.mubr.msk.f32.mxu0 %vm533_vm3, %v8563_v33  ;;  %6027 = vmatpush3.msra.mxu1 %v3321_v38 }
0x249d   :  { %6028 = vmatprep.subr.mxu1 %v3320_v46 }
0x249e   :  { %6029 = vmatpush3.msra.mxu1 %v3320_v46 }
0x249f   :  { %6074 = vmatmul.mubr.msk.f32.gmra.mxu0 %vm533_vm3, %v8570_v0 }
0x24a0   :  { %6076 = vmatprep.mubr.msk.f32.mxu0 %vm533_vm3, %v8608_v62 }
0x24a3   :  { %6077 = vmatmul.mubr.msk.f32.gmra.mxu0 %vm533_vm3, %v8621_v4 }
0x24a4   :  { %6079 = vmatprep.mubr.msk.f32.mxu0 %vm533_vm3, %v8671_v41 }
0x24a7   :  { %6080 = vmatmul.mubr.msk.f32.gmra.mxu0 %vm533_vm3, %v8678_v27 }
0x24a8   :  { %6082 = vmatprep.mubr.msk.f32.mxu0 %vm533_vm3, %v8736_v1 }
0x24ab   :  { %6083 = vmatmul.mubr.msk.f32.gmra.mxu0 %vm533_vm3, %v8743_v20 }
0x24ac   :  { %6085 = vmatprep.mubr.msk.f32.mxu0 %vm533_vm3, %v8771_v60 }
0x24af   :  { %6086 = vmatmul.mubr.msk.f32.gmra.mxu0 %vm533_vm3, %v8776_v54 }
0x24b0   :  { %6088 = vmatprep.mubr.msk.f32.mxu0 %vm533_vm3, %v8800_v52 }
0x24b3   :  { %6089 = vmatmul.mubr.msk.f32.gmra.mxu0 %vm533_vm3, %v8807_v63 }
0x254b   :  { %v4636_v18 = vpop.f32.mrf.mxu0 }
0x254c   :  { %v4647_v3 = vadd.f32 %v4636_v18, %v9234_v7 }
0x254d   :  { %v4638_v44 = vpop.f32.mrf.mxu0 }
0x254e   :  { %v5664_v51 = vmul.f32 -1.442695, %v4647_v3  ;;  %v4648_v39 = vadd.f32 %v4638_v44, %v9236_v11 }
0x254f   :  { %v4642_v19 = vpop.f32.mrf.mxu0 }
0x2550   :  { %6589 = vpow2.f32 %v5664_v51  ;;  %v4649_v48 = vadd.f32 %v4642_v19, %v9235_v40  ;;  %v5666_v14 = vmul.f32 -1.442695, %v4648_v39 }
0x2551   :  { %v4644_v45 = vpop.f32.mrf.mxu0 }
0x2552   :  { %v5665_v10 = vmul.f32 -1.442695, %v4649_v48  ;;  %v4650_v50 = vadd.f32 %v4644_v45, %v9237_v22 }
0x2554   :  { %6591 = vpow2.f32 %v5665_v10  ;;  %v5667_v61 = vmul.f32 -1.442695, %v4650_v50 }
0x2555   :  { %6593 = vtanh.f32 %v4648_v39 }
0x255d   :  { %v6590_v43 = vpop.eup %6589 }
0x255e   :  { %v4657_v17 = vadd.f32 1.0, %v6590_v43 }
0x2560   :  { %6595 = vrcp.f32 %v4657_v17 }
0x2561   :  { %v6592_v42 = vpop.eup %6591  ;;  %6597 = vtanh.f32 %v4650_v50 }
0x2562   :  { %v4658_v29 = vadd.f32 1.0, %v6592_v42  ;;  %v6594_v2 = vpop.eup %6593 }
0x2564   :  { %6599 = vrcp.f32 %v4658_v29 }
0x2565   :  { %6601 = vpow2.f32 %v5666_v14 }
0x2566   :  { %6603 = vpow2.f32 %v5667_v61 }
0x256d   :  { %v6596_v32 = vpop.eup %6595 }
0x256e   :  { %v4679_v8 = vmul.f32 %v6596_v32, %v6594_v2  ;;  %v6598_v53 = vpop.eup %6597  ;;  %v4677_v21 = vmul.f32 %v6596_v32, %v8792_v30 }
0x2570   :  { %4683 = vrot.lane.b32.xlu1 %v4679_v8, %s6668_s18 }
0x2571   :  { %v6600_v35 = vpop.eup %6599 }
0x2572   :  { %v4680_v16 = vmul.f32 %v6600_v35, %v6598_v53  ;;  %v6602_v26 = vpop.eup %6601  ;;  %v4678_v15 = vmul.f32 %v6600_v35, %v8795_v5 }
0x2573   :  { %v4671_v13 = vadd.f32 1.0, %v6602_v26  ;;  %v6604_v24 = vpop.eup %6603 }
0x2574   :  { %4685 = vrot.lane.b32.xlu0 %v4680_v16, %s6668_s18  ;;  %v4672_v55 = vadd.f32 1.0, %v6604_v24 }
0x2575   :  { %6605 = vrcp.f32 %v4671_v13 }
0x2582   :  { %v6606_v9 = vpop.eup %6605 }
0x25e2   :  { %v4684_v37 = vpop.permute.xlu1 %4683 }
0x25e3   :  { %v4689_v49 = vadd.f32 %v4684_v37, %v4677_v21 }
0x25e5   :  { %6607 = vtanh.f32 %v4689_v49 }
0x25e6   :  { %v4686_v59 = vpop.permute.xlu0 %4685  ;;  %6609 = vrcp.f32 %v4672_v55 }
0x25e7   :  { %v4690_v28 = vadd.f32 %v4686_v59, %v4678_v15 }
0x25e9   :  { %6611 = vtanh.f32 %v4690_v28 }
0x25f2   :  { %v6608_v56 = vpop.eup %6607 }
0x25f3   :  { %v4693_v30 = vmul.f32 %v6608_v56, %v6606_v9  ;;  %v6610_v6 = vpop.eup %6609 }
0x25f5   :  { %4697 = vrot.lane.b32.xlu1 %v4693_v30, %s6668_s18 }
0x25f6   :  { %v6612_v58 = vpop.eup %6611 }
0x25f7   :  { %v4694_v18 = vmul.f32 %v6612_v58, %v6610_v6 }
0x25f9   :  { %4699 = vrot.lane.b32.xlu0 %v4694_v18, %s6668_s18 }
0x2667   :  { %v4698_v5 = vpop.permute.xlu1 %4697 }
0x2668   :  { %6030 = vmatprep.mubr.msk.f32.mxu1 %vm533_vm3, %v4698_v5  ;;  %6091 = vmatprep.mubr.msk.f32.mxu0 %vm533_vm3, %v4698_v5 }
0x266b   :  { %v4700_v7 = vpop.permute.xlu0 %4699 }
0x266c   :  { %6031 = vmatmul.mubr.msk.f32.vlgmr.msra.gmra.mxu1 %vm533_vm3, %v4700_v7  ;;  %6092 = vmatmul.mubr.msk.f32.gmra.mxu0 %vm533_vm3, %v4700_v7 }
0x266d   :  { %6033 = vmatprep.mubr.msk.f32.mxu1 %vm533_vm3, %v8800_v52 }
0x2670   :  { %6034 = vmatmul.mubr.msk.f32.gmra.mxu1 %vm533_vm3, %v8807_v63 }
0x2671   :  { %6036 = vmatprep.mubr.msk.f32.mxu1 %vm533_vm3, %v8771_v60 }
0x2674   :  { %6037 = vmatmul.mubr.msk.f32.gmra.mxu1 %vm533_vm3, %v8776_v54 }
0x2675   :  { %6039 = vmatprep.mubr.msk.f32.mxu1 %vm533_vm3, %v8736_v1 }
0x2678   :  { %6040 = vmatmul.mubr.msk.f32.gmra.mxu1 %vm533_vm3, %v8743_v20 }
0x2679   :  { %6042 = vmatprep.mubr.msk.f32.mxu1 %vm533_vm3, %v8671_v41  ;;  %v6072_v41 = vpop.f32.mrf.mxu0 }
0x267c   :  { %6043 = vmatmul.mubr.msk.f32.gmra.mxu1 %vm533_vm3, %v8678_v27  ;;  %v8902_v27 = vld [vmem:[%s5442_s12] ss:$0 sm:$0xff] }
0x267d   :  { %6045 = vmatprep.mubr.msk.f32.mxu1 %vm533_vm3, %v8608_v62  ;;  %v4916_v62 = vpop.f32.mrf.mxu0 }
0x2680   :  { %6046 = vmatmul.mubr.msk.f32.gmra.mxu1 %vm533_vm3, %v8621_v4  ;;  %v6075_v4 = vpop.f32.mrf.mxu0 }
0x2681   :  { %6048 = vmatprep.mubr.msk.f32.mxu1 %vm533_vm3, %v8563_v33 }
0x2682   :  { %v4926_v60 = vpop.f32.mrf.mxu0 }
0x2684   :  { %6049 = vmatmul.mubr.msk.f32.gmra.mxu1 %vm533_vm3, %v8570_v0  ;;  %v6078_v48 = vpop.f32.mrf.mxu0 }
0x2685   :  { %6051 = vmatprep.mubr.msk.f32.mxu1 %vm533_vm3, %v8521_v25 }
0x2686   :  { %v4936_v22 = vpop.f32.mrf.mxu0 }
0x2688   :  { %6052 = vmatmul.mubr.msk.f32.gmra.mxu1 %vm533_vm3, %v8528_v47  ;;  %v6081_v35 = vpop.f32.mrf.mxu0 }
0x268a   :  { %v4946_v36 = vpop.f32.mrf.mxu0 }
0x268c   :  { %v6084_v37 = vpop.f32.mrf.mxu0 }
0x268e   :  { %v4956_v46 = vpop.f32.mrf.mxu0 }
0x2690   :  { %v6087_v5 = vpop.f32.mrf.mxu0 }
0x272c   :  { %v6032_v33 = vpop.f32.mrf.mxu1 }
0x272d   :  { %v4922_v1 = vadd.f32 %v6072_v41, %v6032_v33 }
0x272e   :  { %v4771_v20 = vpop.f32.mrf.mxu1 }
0x272f   :  { %v8905_v0 = vadd.f32 %v8902_v27, %v4922_v1  ;;  %v4917_v25 = vadd.f32 %v4916_v62, %v4771_v20  ;;  %v4966_v20 = vpop.f32.mrf.mxu0 }
0x2730   :  { %v6035_v54 = vpop.f32.mrf.mxu1 }
0x2731   :  { %v8908_v47 = vadd.f32 %v8902_v27, %v4917_v25  ;;  %v4932_v52 = vadd.f32 %v6075_v4, %v6035_v54  ;;  %v5020_v63 = vsel %vm244_vm0, %v8905_v0, 0.0  ;;  %v5066_v3 = vmul.f32 %v8905_v0, %v8905_v0 }
0x2732   :  { %5021 = vadd.xlane.f32.xlu0 %v5020_v63  ;;  %v4781_v44 = vpop.f32.mrf.mxu1 }
0x2733   :  { %v8915_v51 = vadd.f32 %v8902_v27, %v4932_v52  ;;  %v4927_v19 = vadd.f32 %v4926_v60, %v4781_v44  ;;  %v5017_v40 = vsel %vm244_vm0, %v8908_v47, 0.0  ;;  %v5084_v39 = vsel %vm244_vm0, %v5066_v3, 0.0  ;;  %v6090_v44 = vpop.f32.mrf.mxu0 }
0x2734   :  { %5018 = vadd.xlane.f32.xlu1 %v5017_v40  ;;  %v6038_v10 = vpop.f32.mrf.mxu1  ;;  %v5065_v17 = vmul.f32 %v8908_v47, %v8908_v47 }
0x2735   :  { %v8920_v11 = vadd.f32 %v8902_v27, %v4927_v19  ;;  %v5026_v43 = vsel %vm244_vm0, %v8915_v51, 0.0  ;;  %v4942_v32 = vadd.f32 %v6078_v48, %v6038_v10  ;;  %v5068_v53 = vmul.f32 %v8915_v51, %v8915_v51 }
0x2736   :  { %5085 = vadd.xlane.f32.xlu0 %v5084_v39  ;;  %v4791_v45 = vpop.f32.mrf.mxu1  ;;  %v5081_v8 = vsel %vm244_vm0, %v5065_v17, 0.0 }
0x2737   :  { %v4937_v50 = vadd.f32 %v4936_v22, %v4791_v45  ;;  %v5023_v42 = vsel %vm244_vm0, %v8920_v11, 0.0  ;;  %v5067_v29 = vmul.f32 %v8920_v11, %v8920_v11  ;;  %v8939_v12 = vadd.f32 %v8902_v27, %v4942_v32 }
0x2738   :  { %5027 = vadd.xlane.f32.xlu1 %v5026_v43  ;;  %v6041_v2 = vpop.f32.mrf.mxu1  ;;  %v5090_v23 = vsel %vm244_vm0, %v5068_v53, 0.0  ;;  %v4976_v43 = vpop.f32.mrf.mxu0 }
0x2739   :  { %v8935_v16 = vadd.f32 %v8902_v27, %v4937_v50  ;;  %v4952_v57 = vadd.f32 %v6081_v35, %v6041_v2  ;;  %v5087_v31 = vsel %vm244_vm0, %v5067_v29, 0.0  ;;  %v5032_v24 = vsel %vm244_vm0, %v8939_v12, 0.0 }
0x273a   :  { %5024 = vadd.xlane.f32.xlu0 %v5023_v42  ;;  %v4801_v34 = vpop.f32.mrf.mxu1  ;;  %v5070_v21 = vmul.f32 %v8939_v12, %v8939_v12  ;;  %v6093_v32 = vpop.f32.mrf.mxu0 }
0x273b   :  { %v8943_v14 = vadd.f32 %v8902_v27, %v4952_v57  ;;  %v4947_v61 = vadd.f32 %v4946_v36, %v4801_v34  ;;  %v5029_v26 = vsel %vm244_vm0, %v8935_v16, 0.0  ;;  %v5069_v38 = vmul.f32 %v8935_v16, %v8935_v16 }
0x273c   :  { %5082 = vadd.xlane.f32.xlu1 %v5081_v8  ;;  %v6044_v13 = vpop.f32.mrf.mxu1  ;;  %v5096_v28 = vsel %vm244_vm0, %v5070_v21, 0.0 }
0x273d   :  { %v8952_v49 = vadd.f32 %v8902_v27, %v4947_v61  ;;  %v4962_v55 = vadd.f32 %v6084_v37, %v6044_v13  ;;  %v5038_v15 = vsel %vm244_vm0, %v8943_v14, 0.0  ;;  %v5093_v58 = vsel %vm244_vm0, %v5069_v38, 0.0 }
0x273e   :  { %5088 = vadd.xlane.f32.xlu0 %v5087_v31  ;;  %v4811_v59 = vpop.f32.mrf.mxu1  ;;  %v5072_v18 = vmul.f32 %v8943_v14, %v8943_v14 }
0x273f   :  { %v8960_v9 = vadd.f32 %v8902_v27, %v4962_v55  ;;  %v4957_v56 = vadd.f32 %v4956_v46, %v4811_v59  ;;  %v5035_v30 = vsel %vm244_vm0, %v8952_v49, 0.0  ;;  %v5071_v1 = vmul.f32 %v8952_v49, %v8952_v49 }
0x2740   :  { %5091 = vadd.xlane.f32.xlu1 %v5090_v23  ;;  %v6047_v6 = vpop.f32.mrf.mxu1  ;;  %v5102_v33 = vsel %vm244_vm0, %v5072_v18, 0.0  ;;  %v4986_v23 = vpop.f32.mrf.mxu0 }
0x2741   :  { %v8968_v7 = vadd.f32 %v8902_v27, %v4957_v56  ;;  %v4972_v41 = vadd.f32 %v6087_v5, %v6047_v6  ;;  %v5044_v62 = vsel %vm244_vm0, %v8960_v9, 0.0  ;;  %v5099_v63 = vsel %vm244_vm0, %v5071_v1, 0.0  ;;  %v5340_v6 = vld [vmem:[%s9038_s20 + $0x78] sm:$0xff] }
0x2742   :  { %5030 = vadd.xlane.f32.xlu0 %v5029_v26  ;;  %v4821_v4 = vpop.f32.mrf.mxu1  ;;  %v5074_v3 = vmul.f32 %v8960_v9, %v8960_v9  ;;  %6094 = vmatprep.subr.mxu1 %v5340_v6 }
0x2743   :  { %v8976_v25 = vadd.f32 %v8902_v27, %v4972_v41  ;;  %v4967_v60 = vadd.f32 %v4966_v20, %v4821_v4  ;;  %v5041_v54 = vsel %vm244_vm0, %v8968_v7, 0.0  ;;  %v5073_v45 = vmul.f32 %v8968_v7, %v8968_v7  ;;  %6095 = vmatpush3.msra.mxu1 %v5340_v6 }
0x2744   :  { %5033 = vadd.xlane.f32.xlu1 %v5032_v24  ;;  %v6050_v52 = vpop.f32.mrf.mxu1  ;;  %v5108_v39 = vsel %vm244_vm0, %v5074_v3, 0.0 }
0x2745   :  { %v8984_v19 = vadd.f32 %v8902_v27, %v4967_v60  ;;  %v4982_v40 = vadd.f32 %v6090_v44, %v6050_v52  ;;  %v5050_v48 = vsel %vm244_vm0, %v8976_v25, 0.0  ;;  %v5105_v29 = vsel %vm244_vm0, %v5073_v45, 0.0 }
0x2746   :  { %5039 = vadd.xlane.f32.xlu0 %v5038_v15  ;;  %v4831_v10 = vpop.f32.mrf.mxu1  ;;  %v5076_v2 = vmul.f32 %v8976_v25, %v8976_v25 }
0x2747   :  { %v8992_v17 = vadd.f32 %v8902_v27, %v4982_v40  ;;  %v4977_v22 = vadd.f32 %v4976_v43, %v4831_v10  ;;  %v5047_v50 = vsel %vm244_vm0, %v8984_v19, 0.0  ;;  %v5075_v34 = vmul.f32 %v8984_v19, %v8984_v19 }
0x2748   :  { %5097 = vadd.xlane.f32.xlu1 %v5096_v28  ;;  %v6053_v42 = vpop.f32.mrf.mxu1  ;;  %v5114_v31 = vsel %vm244_vm0, %v5076_v2, 0.0 }
0x2749   :  { %v9000_v8 = vadd.f32 %v8902_v27, %v4977_v22  ;;  %v4992_v53 = vadd.f32 %v6093_v32, %v6053_v42  ;;  %v5056_v35 = vsel %vm244_vm0, %v8992_v17, 0.0  ;;  %v5111_v13 = vsel %vm244_vm0, %v5075_v34, 0.0 }
0x274a   :  { %5036 = vadd.xlane.f32.xlu0 %v5035_v30  ;;  %v4841_v57 = vpop.f32.mrf.mxu1  ;;  %v5078_v24 = vmul.f32 %v8992_v17, %v8992_v17  ;;  %v78_v30 = vstv %s5461_s15 }
0x274b   :  { %v9008_v36 = vadd.f32 %v8902_v27, %v4992_v53  ;;  %v4987_v61 = vadd.f32 %v4986_v23, %v4841_v57  ;;  %v5053_v26 = vsel %vm244_vm0, %v9000_v8, 0.0  ;;  %v5077_v15 = vmul.f32 %v9000_v8, %v9000_v8  ;;  %79 = vst [vmem:[#allocation2] sm:$0x1] %v78_v30 }
0x274c   :  { %5094 = vadd.xlane.f32.xlu1 %v5093_v58  ;;  %v5120_v55 = vsel %vm244_vm0, %v5078_v24, 0.0  ;;  %v5339_v58 = vld [vmem:[%s9038_s20 + $0x70] sm:$0xff] }
0x274d   :  { %v9016_v21 = vadd.f32 %v8902_v27, %v4987_v61  ;;  %v5062_v37 = vsel %vm244_vm0, %v9008_v36, 0.0  ;;  %v5117_v27 = vsel %vm244_vm0, %v5077_v15, 0.0  ;;  %v5080_v38 = vmul.f32 %v9008_v36, %v9008_v36  ;;  %6096 = vmatprep.subr.mxu1 %v5339_v58 }
0x274e   :  { %5045 = vadd.xlane.f32.xlu0 %v5044_v62  ;;  %6097 = vmatpush3.msra.mxu1 %v5339_v58 }
0x274f   :  { %v5059_v59 = vsel %vm244_vm0, %v9016_v21, 0.0  ;;  %v5079_v28 = vmul.f32 %v9016_v21, %v9016_v21  ;;  %v5126_v56 = vsel %vm244_vm0, %v5080_v38, 0.0 }
0x2750   :  { %5103 = vadd.xlane.f32.xlu1 %v5102_v33 }
0x2751   :  { %v5123_v46 = vsel %vm244_vm0, %v5079_v28, 0.0 }
0x2752   :  { %5042 = vadd.xlane.f32.xlu0 %v5041_v54  ;;  %v5316_v4 = vld [vmem:[#allocation2] sm:$0x1] }
0x2753   :  { %6129 = vpush %v5316_v4 }
0x2754   :  { %5100 = vadd.xlane.f32.xlu1 %v5099_v63 }
0x2756   :  { %5051 = vadd.xlane.f32.xlu0 %v5050_v48 }
0x2758   :  { %5109 = vadd.xlane.f32.xlu1 %v5108_v39 }
0x275a   :  { %5048 = vadd.xlane.f32.xlu0 %v5047_v50 }
0x275c   :  { %5106 = vadd.xlane.f32.xlu1 %v5105_v29 }
0x275e   :  { %5057 = vadd.xlane.f32.xlu0 %v5056_v35 }
0x2760   :  { %5115 = vadd.xlane.f32.xlu1 %v5114_v31 }
0x2762   :  { %5054 = vadd.xlane.f32.xlu0 %v5053_v26 }
0x2764   :  { %5112 = vadd.xlane.f32.xlu1 %v5111_v13 }
0x2766   :  { %5063 = vadd.xlane.f32.xlu0 %v5062_v37 }
0x2768   :  { %5121 = vadd.xlane.f32.xlu1 %v5120_v55 }
0x276a   :  { %5060 = vadd.xlane.f32.xlu0 %v5059_v59 }
0x276c   :  { %5118 = vadd.xlane.f32.xlu1 %v5117_v27 }
0x276e   :  { %5124 = vadd.xlane.f32.xlu0 %v5123_v46 }
0x2770   :  { %5127 = vadd.xlane.f32.xlu1 %v5126_v56 }
0x2784   :  { %s6130_s2 = spop %6129 }
0x27bb   :  { %v5022_v18 = vpop.xlane.xlu0 %5021 }
0x27bd   :  { %v5019_v5 = vpop.xlane.xlu1 %5018 }
0x27bf   :  { %v5086_v41 = vpop.xlane.xlu0 %5085 }
0x27c1   :  { %v5028_v62 = vpop.xlane.xlu1 %5027 }
0x27c2   :  { %v5132_v29 = vadd.f32 %v5028_v62, %v5022_v18 }
0x27c3   :  { %v5025_v33 = vpop.xlane.xlu0 %5024 }
0x27c4   :  { %v5131_v32 = vadd.f32 %v5025_v33, %v5019_v5 }
0x27c5   :  { %v5083_v1 = vpop.xlane.xlu1 %5082 }
0x27c7   :  { %v5089_v20 = vpop.xlane.xlu0 %5088 }
0x27c8   :  { %v5149_v34 = vadd.f32 %v5089_v20, %v5083_v1 }
0x27c9   :  { %v5092_v60 = vpop.xlane.xlu1 %5091 }
0x27ca   :  { %v5150_v13 = vadd.f32 %v5092_v60, %v5086_v41 }
0x27cb   :  { %v5031_v54 = vpop.xlane.xlu0 %5030 }
0x27cc   :  { %v5133_v57 = vadd.f32 %v5131_v32, %v5031_v54  ;;  %v5701_v32 = vld [vmem:[%s5443_s24] ss:$0 sm:$0xff] }
0x27cd   :  { %v5034_v52 = vpop.xlane.xlu1 %5033 }
0x27ce   :  { %v5134_v53 = vadd.f32 %v5132_v29, %v5034_v52 }
0x27cf   :  { %v5040_v63 = vpop.xlane.xlu0 %5039 }
0x27d0   :  { %v5136_v23 = vadd.f32 %v5134_v53, %v5040_v63  ;;  %v5338_v53 = vld [vmem:[%s9038_s20 + $0x68] sm:$0xff] }
0x27d1   :  { %v5098_v3 = vpop.xlane.xlu1 %5097  ;;  %6098 = vmatprep.subr.mxu1 %v5338_v53 }
0x27d2   :  { %v5152_v59 = vadd.f32 %v5150_v13, %v5098_v3  ;;  %6099 = vmatpush3.msra.mxu1 %v5338_v53  ;;  %v5329_v53 = vld [vmem:[%s9038_s20 + $0x20] sm:$0xff] }
0x27d3   :  { %v5037_v44 = vpop.xlane.xlu0 %5036 }
0x27d4   :  { %v5135_v61 = vadd.f32 %v5133_v57, %v5037_v44 }
0x27d5   :  { %v5095_v40 = vpop.xlane.xlu1 %5094 }
0x27d6   :  { %v5151_v24 = vadd.f32 %v5149_v34, %v5095_v40 }
0x27d7   :  { %v5046_v48 = vpop.xlane.xlu0 %5045 }
0x27d8   :  { %v5138_v37 = vadd.f32 %v5136_v23, %v5046_v48  ;;  %v5336_v23 = vld [vmem:[%s9038_s20 + $0x58] sm:$0xff] }
0x27d9   :  { %v5104_v10 = vpop.xlane.xlu1 %5103 }
0x27da   :  { %v5154_v56 = vadd.f32 %v5152_v59, %v5104_v10 }
0x27db   :  { %v5043_v39 = vpop.xlane.xlu0 %5042 }
0x27dc   :  { %v5137_v55 = vadd.f32 %v5135_v61, %v5043_v39 }
0x27dd   :  { %v5101_v45 = vpop.xlane.xlu1 %5100 }
0x27de   :  { %v5153_v28 = vadd.f32 %v5151_v24, %v5101_v45 }
0x27df   :  { %v5052_v43 = vpop.xlane.xlu0 %5051 }
0x27e0   :  { %v5140_v27 = vadd.f32 %v5138_v37, %v5052_v43  ;;  %v5702_v37 = vld [vmem:[%s5444_s29] ss:$0 sm:$0xff] }
0x27e1   :  { %v5110_v22 = vpop.xlane.xlu1 %5109 }
0x27e2   :  { %v5156_v5 = vadd.f32 %v5154_v56, %v5110_v22  ;;  %v9239_v56 = vld [vmem:[#allocation8_spill] sm:$0xff] }
0x27e3   :  { %v5049_v50 = vpop.xlane.xlu0 %5048 }
0x27e4   :  { %v5139_v38 = vadd.f32 %v5137_v55, %v5049_v50 }
0x27e5   :  { %v5107_v42 = vpop.xlane.xlu1 %5106 }
0x27e6   :  { %v5155_v30 = vadd.f32 %v5153_v28, %v5107_v42 }
0x27e7   :  { %v5058_v2 = vpop.xlane.xlu0 %5057 }
0x27e8   :  { %v5142_v6 = vadd.f32 %v5140_v27, %v5058_v2  ;;  %v5334_v27 = vld [vmem:[%s9038_s20 + $0x48] sm:$0xff] }
0x27e9   :  { %v5116_v35 = vpop.xlane.xlu1 %5115 }
0x27ea   :  { %v5158_v41 = vadd.f32 %v5156_v5, %v5116_v35  ;;  %v5337_v35 = vld [vmem:[%s9038_s20 + $0x60] sm:$0xff] }
0x27eb   :  { %v5055_v31 = vpop.xlane.xlu0 %5054  ;;  %6100 = vmatprep.subr.mxu1 %v5337_v35 }
0x27ec   :  { %v5141_v58 = vadd.f32 %v5139_v38, %v5055_v31  ;;  %6101 = vmatpush3.msra.mxu1 %v5337_v35 }
0x27ed   :  { %v5113_v26 = vpop.xlane.xlu1 %5112  ;;  %6102 = vmatprep.subr.mxu1 %v5336_v23 }
0x27ee   :  { %v5157_v62 = vadd.f32 %v5155_v30, %v5113_v26  ;;  %v5335_v26 = vld [vmem:[%s9038_s20 + $0x50] sm:$0xff]  ;;  %6103 = vmatpush3.msra.mxu1 %v5336_v23  ;;  %v9249_v23 = vld [vmem:[#allocation3_spill] sm:$0xff] }
0x27ef   :  { %v5064_v15 = vpop.xlane.xlu0 %5063  ;;  %6104 = vmatprep.subr.mxu1 %v5335_v26 }
0x27f0   :  { %v5144_v4 = vadd.f32 %v5142_v6, %v5064_v15  ;;  %6105 = vmatpush3.msra.mxu1 %v5335_v26  ;;  %v5333_v6 = vld [vmem:[%s9038_s20 + $0x40] sm:$0xff] }
0x27f1   :  { %v5122_v46 = vpop.xlane.xlu1 %5121  ;;  %6106 = vmatprep.subr.mxu1 %v5334_v27 }
0x27f2   :  { %v5146_v52 = vmul.f32 0.0078125, %v5144_v4  ;;  %v5160_v63 = vadd.f32 %v5158_v41, %v5122_v46  ;;  %6107 = vmatpush3.msra.mxu1 %v5334_v27  ;;  %v9242_v41 = vld [vmem:[#allocation9_spill] sm:$0xff] }
0x27f3   :  { %v5061_v18 = vpop.xlane.xlu0 %5060  ;;  %6108 = vmatprep.subr.mxu1 %v5333_v6 }
0x27f4   :  { %v5143_v33 = vadd.f32 %v5141_v58, %v5061_v18  ;;  %v5166_v39 = vmul.f32 %v5146_v52, %v5146_v52  ;;  %6109 = vmatpush3.msra.mxu1 %v5333_v6  ;;  %v9252_v6 = vld [vmem:[#allocation17_spill] sm:$0xff] }
0x27f5   :  { %v5119_v1 = vpop.xlane.xlu1 %5118 }
0x27f6   :  { %v5145_v20 = vmul.f32 0.0078125, %v5143_v33  ;;  %v5159_v60 = vadd.f32 %v5157_v62, %v5119_v1  ;;  %v9241_v62 = vld [vmem:[#allocation10_spill] sm:$0xff] }
0x27f7   :  { %v5125_v54 = vpop.xlane.xlu0 %5124  ;;  %v5332_v1 = vld [vmem:[%s9038_s20 + $0x38] sm:$0xff] }
0x27f8   :  { %v5161_v3 = vadd.f32 %v5159_v60, %v5125_v54  ;;  %v5165_v40 = vmul.f32 %v5145_v20, %v5145_v20  ;;  %6110 = vmatprep.subr.mxu1 %v5332_v1 }
0x27f9   :  { %v5128_v44 = vpop.xlane.xlu1 %5127  ;;  %6111 = vmatpush3.msra.mxu1 %v5332_v1 }
0x27fa   :  { %v5163_v48 = vmul.f32 0.0078125, %v5161_v3  ;;  %v5162_v10 = vadd.f32 %v5160_v63, %v5128_v44  ;;  %v5331_v44 = vld [vmem:[%s9038_s20 + $0x30] sm:$0xff] }
0x27fb   :  { %6112 = vmatprep.subr.mxu1 %v5331_v44 }
0x27fc   :  { %v5167_v45 = vsub.f32 %v5163_v48, %v5165_v40  ;;  %v5164_v43 = vmul.f32 0.0078125, %v5162_v10  ;;  %v9245_v48 = vld [vmem:[#allocation7_spill] sm:$0xff]  ;;  %6113 = vmatpush3.msra.mxu1 %v5331_v44 }
0x27fe   :  { %v5169_v22 = vmax.f32 %v5167_v45, 0.0  ;;  %v5168_v50 = vsub.f32 %v5164_v43, %v5166_v39  ;;  %v9246_v45 = vld [vmem:[#allocation14_spill] sm:$0xff] }
0x2800   :  { %v5171_v42 = vadd.f32 1e-08, %v5169_v22  ;;  %v5170_v29 = vmax.f32 %v5168_v50, 0.0  ;;  %v5330_v22 = vld [vmem:[%s9038_s20 + $0x28] sm:$0xff] }
0x2801   :  { %6114 = vmatprep.subr.mxu1 %v5330_v22 }
0x2802   :  { %6613 = vrsqrt.f32 %v5171_v42  ;;  %v5172_v2 = vadd.f32 1e-08, %v5170_v29  ;;  %v9247_v42 = vld [vmem:[#allocation11_spill] sm:$0xff]  ;;  %6115 = vmatpush3.msra.mxu1 %v5330_v22 }
0x2803   :  { %6116 = vmatprep.subr.mxu1 %v5329_v53 }
0x2804   :  { %6615 = vrsqrt.f32 %v5172_v2  ;;  %6117 = vmatpush3.msra.mxu1 %v5329_v53 }
0x280f   :  { %v6614_v57 = vpop.eup %6613 }
0x2810   :  { %v9051_v31 = vmul.f32 %v6614_v57, %v5701_v32 }
0x2811   :  { %v6616_v34 = vpop.eup %6615 }
0x2812   :  { %v9054_v61 = vmul.f32 %v6616_v34, %v5701_v32  ;;  %v5183_v13 = vmul.f32 %v9051_v31, %v5145_v20  ;;  %v5205_v24 = vmul.f32 %v9051_v31, %v8935_v16  ;;  %v9238_v16 = vld [vmem:[#allocation4_spill] sm:$0xff]  ;;  %v5217_v54 = vmul.f32 %v9051_v31, %v8968_v7  ;;  %v9244_v7 = vld [vmem:[#allocation6_spill] sm:$0xff] }
0x2813   :  { %v5193_v40 = vmul.f32 %v9051_v31, %v8908_v47  ;;  %v5199_v47 = vmul.f32 %v9051_v31, %v8920_v11  ;;  %v5229_v35 = vmul.f32 %v9051_v31, %v9000_v8 }
0x2814   :  { %v5184_v55 = vmul.f32 %v9054_v61, %v5146_v52  ;;  %v5200_v15 = vmul.f32 %v9054_v61, %v8915_v51  ;;  %v5206_v59 = vmul.f32 %v9054_v61, %v8939_v12  ;;  %v5212_v28 = vmul.f32 %v9054_v61, %v8943_v14  ;;  %v9240_v51 = vld [vmem:[#allocation5_spill] sm:$0xff]  ;;  %v9243_v52 = vld [vmem:[#allocation12_spill] sm:$0xff] }
0x2815   :  { %v9073_v58 = vsub.f32 %v5702_v37, %v5183_v13  ;;  %v5207_v18 = vadd.f32 %v5205_v24, %v9240_v51  ;;  %v5211_v12 = vmul.f32 %v9051_v31, %v8952_v49  ;;  %v5218_v33 = vmul.f32 %v9054_v61, %v8960_v9  ;;  %v5328_v24 = vld [vmem:[%s9038_s20 + $0x18] sm:$0xff] }
0x2816   :  { %v9068_v38 = vsub.f32 %v5702_v37, %v5184_v55  ;;  %v5202_v46 = vadd.f32 %v5200_v15, %v9238_v16  ;;  %v5208_v30 = vadd.f32 %v5206_v59, %v9239_v56  ;;  %v5214_v4 = vadd.f32 %v5212_v28, %v9241_v62  ;;  %v5327_v37 = vld [vmem:[%s9038_s20 + $0x10] sm:$0xff]  ;;  %v9250_v55 = vld [vmem:[#allocation15_spill] sm:$0xff]  ;;  %6118 = vmatprep.subr.mxu1 %v5328_v24 }
0x2817   :  { %v5209_v49 = vadd.f32 %v5207_v18, %v9073_v58  ;;  %v5213_v20 = vadd.f32 %v5211_v12, %v9242_v41  ;;  %v5224_v60 = vmul.f32 %v9054_v61, %v8976_v25  ;;  %v5220_v63 = vadd.f32 %v5218_v33, %v9243_v52  ;;  %v9251_v28 = vld [vmem:[#allocation16_spill] sm:$0xff]  ;;  %6119 = vmatpush3.msra.mxu1 %v5328_v24  ;;  %v9253_v18 = vld [vmem:[#allocation18_spill] sm:$0xff] }
0x2818   :  { %v5204_v14 = vadd.f32 %v5202_v46, %v9068_v38  ;;  %v5210_v5 = vadd.f32 %v5208_v30, %v9068_v38  ;;  %v5216_v9 = vadd.f32 %v5214_v4, %v9068_v38  ;;  %v5194_v3 = vmul.f32 %v9054_v61, %v8905_v0  ;;  %6120 = vmatprep.subr.mxu1 %v5327_v37  ;;  %v5326_v46 = vld [vmem:[%s9038_s20 + $0x8] sm:$0xff] }
0x2819   :  { %v5195_v10 = vadd.f32 %v5193_v40, %v9245_v48  ;;  %v5215_v39 = vadd.f32 %v5213_v20, %v9073_v58  ;;  %v5226_v43 = vadd.f32 %v5224_v60, %v9246_v45  ;;  %v5223_v0 = vmul.f32 %v9051_v31, %v8984_v19  ;;  %v9248_v19 = vld [vmem:[#allocation13_spill] sm:$0xff]  ;;  %6121 = vmatpush3.msra.mxu1 %v5327_v37 }
0x281a   :  { %5245 = vrot.lane.b32.xlu1 %v5204_v14, %s6699_s25  ;;  %5253 = vrot.lane.b32.xlu0 %v5210_v5, %s6692_s26  ;;  %v5196_v25 = vadd.f32 %v5194_v3, %v9244_v7  ;;  %v5222_v50 = vadd.f32 %v5220_v63, %v9068_v38  ;;  %v5219_v29 = vadd.f32 %v5217_v54, %v9247_v42  ;;  %v5320_v48 = vstv %s6130_s2 }
0x281b   :  { %v5197_v32 = vadd.f32 %v5195_v10, %v9073_v58  ;;  %v5225_v11 = vadd.f32 %v5223_v0, %v9248_v19  ;;  %v5228_v57 = vadd.f32 %v5226_v43, %v9068_v38  ;;  %v5201_v26 = vadd.f32 %v5199_v47, %v9249_v23  ;;  %6122 = vmatprep.subr.mxu1 %v5326_v46 }
0x281c   :  { %v5198_v2 = vadd.f32 %v5196_v25, %v9068_v38  ;;  %v5221_v34 = vadd.f32 %v5219_v29, %v9073_v58  ;;  %v5230_v13 = vmul.f32 %v9054_v61, %v8992_v17  ;;  %v5231_v15 = vadd.f32 %v5229_v35, %v9250_v55  ;;  %6123 = vmatpush3.msra.mxu1 %v5326_v46 }
0x281d   :  { %v5227_v8 = vadd.f32 %v5225_v11, %v9073_v58  ;;  %v5203_v59 = vadd.f32 %v5201_v26, %v9073_v58  ;;  %v5235_v17 = vmul.f32 %v9051_v31, %v9016_v21  ;;  %v5236_v16 = vmul.f32 %v9054_v61, %v9008_v36  ;;  %v5325_v21 = vld [vmem:[%s9038_s20] sm:$0xff] }
0x281e   :  { %5261 = vrot.lane.b32.xlu0 %v5216_v9, %s6700_s30  ;;  %5251 = vrot.lane.b32.xlu1 %v5209_v49, %s6692_s26  ;;  %s6701_s26 = smov 80   ;;  %v5232_v27 = vadd.f32 %v5230_v13, %v9251_v28  ;;  %v5233_v56 = vadd.f32 %v5231_v15, %v9073_v58 }
0x281f   :  { %v5237_v51 = vadd.f32 %v5235_v17, %v9252_v6  ;;  %v5238_v12 = vadd.f32 %v5236_v16, %v9253_v18  ;;  %6124 = vmatprep.subr.mxu1 %v5325_v21 }
0x2820   :  { %v5234_v30 = vadd.f32 %v5232_v27, %v9068_v38  ;;  %6125 = vmatpush3.msra.mxu1 %v5325_v21 }
0x2821   :  { %v5239_v36 = vadd.f32 %v5237_v51, %v9073_v58  ;;  %v5240_v31 = vadd.f32 %v5238_v12, %v9068_v38 }
0x2822   :  { %5269 = vrot.lane.b32.xlu0 %v5222_v50, %s6668_s18  ;;  %5259 = vrot.lane.b32.xlu1 %v5215_v39, %s6700_s30 }
0x2826   :  { %5277 = vrot.lane.b32.xlu0 %v5228_v57, %s6701_s26  ;;  %5267 = vrot.lane.b32.xlu1 %v5221_v34, %s6668_s18  ;;  %s6702_s18 = smov 96  }
0x282a   :  { %5275 = vrot.lane.b32.xlu1 %v5227_v8, %s6701_s26  ;;  %5243 = vrot.lane.b32.xlu0 %v5203_v59, %s6699_s25 }
0x282e   :  { %5283 = vrot.lane.b32.xlu1 %v5233_v56, %s6702_s18  ;;  %5285 = vrot.lane.b32.xlu0 %v5234_v30, %s6702_s18 }
0x2832   :  { %5291 = vrot.lane.b32.xlu1 %v5239_v36, %s6703_s1  ;;  %5293 = vrot.lane.b32.xlu0 %v5240_v31, %s6703_s1 }
0x288c   :  { %v5246_v61 = vpop.permute.xlu1 %5245  ;;  %v5254_v14 = vpop.permute.xlu0 %5253 }
0x288d   :  { %v5298_v60 = vsel %vm244_vm0, %v5198_v2, %v5246_v61  ;;  %v5703_v2 = vld [vmem:[%s5463_s6] ss:$0 sm:$0xff] }
0x288e   :  { %v5301_v9 = vsel %vm5299_vm4, %v5298_v60, %v5254_v14 }
0x2890   :  { %v5252_v5 = vpop.permute.xlu1 %5251  ;;  %v5262_v62 = vpop.permute.xlu0 %5261 }
0x2891   :  { %v5304_v44 = vsel %vm5302_vm5, %v5301_v9, %v5262_v62 }
0x2894   :  { %v5260_v4 = vpop.permute.xlu1 %5259  ;;  %v5270_v33 = vpop.permute.xlu0 %5269 }
0x2895   :  { %v5306_v7 = vsel %vm533_vm3, %v5304_v44, %v5270_v33 }
0x2898   :  { %v5268_v1 = vpop.permute.xlu1 %5267  ;;  %v5278_v49 = vpop.permute.xlu0 %5277 }
0x2899   :  { %v5309_v25 = vsel %vm5307_vm6, %v5306_v7, %v5278_v49 }
0x289c   :  { %v5276_v41 = vpop.permute.xlu1 %5275  ;;  %v5244_v20 = vpop.permute.xlu0 %5243 }
0x289d   :  { %v5297_v58 = vsel %vm244_vm0, %v5197_v32, %v5244_v20 }
0x289e   :  { %v5300_v38 = vsel %vm5299_vm4, %v5297_v58, %v5252_v5 }
0x289f   :  { %v5303_v54 = vsel %vm5302_vm5, %v5300_v38, %v5260_v4 }
0x28a0   :  { %v5284_v52 = vpop.permute.xlu1 %5283  ;;  %v5305_v63 = vsel %vm533_vm3, %v5303_v54, %v5268_v1  ;;  %v5286_v3 = vpop.permute.xlu0 %5285 }
0x28a1   :  { %v5308_v40 = vsel %vm5307_vm6, %v5305_v63, %v5276_v41  ;;  %v5312_v39 = vsel %vm5310_vm7, %v5309_v25, %v5286_v3 }
0x28a2   :  { %v5311_v10 = vsel %vm5310_vm7, %v5308_v40, %v5284_v52 }
0x28a4   :  { %v5292_v45 = vpop.permute.xlu1 %5291  ;;  %v5294_v43 = vpop.permute.xlu0 %5293 }
0x28a5   :  { %v5314_v0 = vsel %vm5313_vm8, %v5311_v10, %v5292_v45  ;;  %v5315_v47 = vsel %vm5313_vm8, %v5312_v39, %v5294_v43 }
0x28a6   :  { %v5321_v22 = vmul.f32 %v5320_v48, %v5314_v0  ;;  %vm5319_vm9 = vcmp.ge.f32.partialorder %v5315_v47, 0.0  ;;  %v5322_v50 = vmul.f32 %v5320_v48, %v5315_v47  ;;  %vm5318_vm10 = vcmp.ge.f32.partialorder %v5314_v0, 0.0 }
0x28a8   :  { %v5324_v42 = vsel %vm5319_vm9, %v5315_v47, %v5322_v50  ;;  %v5323_v29 = vsel %vm5318_vm10, %v5314_v0, %v5321_v22 }
0x28a9   :  { %6126 = vmatprep.mubr.f32.mxu1 %v5323_v29 }
0x28aa   :  { %6127 = vmatmul.mubr.f32.vlgmr.msra.gmra.mxu1 %v5324_v42 }
0x296a   :  { %v6128_v32 = vpop.f32.mrf.mxu1 }
0x296b   :  { %v5420_v53 = vadd.f32 %v6128_v32, %v5703_v2 }
0x296c   :  { %v5414_v19 = vpop.f32.mrf.mxu1 }
0x296d   :  { %5424 = vst [vmem:[%s5464_s11 + $0x8] sm:$0xff] %v5420_v53  ;;  %v5415_v11 = vadd.f32 %v5703_v2, %v5414_v19 }
0x296f   :  { %5423 = vst [vmem:[%s5464_s11] sm:$0xff] %v5415_v11 }

</bundles_post_ra>
